<compile_context>
chip_gen: v7x
topology: tpu7x:2x2x1
jax: 0.10.0
libtpu: 0.0.40
codegen_flags: <defaults>
</compile_context>

<pallas_src>
import functools
import math

import numpy as np

import jax
import jax.numpy as jnp
from jax.experimental import pallas as pl
from jax.experimental.pallas import tpu as pltpu

# MXU input dtype (accumulation always f32).  Set to jnp.float32 to disable the bf16 path.
_MXU_DTYPE = jnp.bfloat16
# Explicit scoped-VMEM budget; tile sizes below are chosen so the double-buffered footprint
# stays well under this even on v7x (64 MiB physical per TensorCore).
_VMEM_LIMIT = 32 * 1024 * 1024


def _round_up(x, m):
    return (x + m - 1) // m * m


def _gelu(x):
    # tanh-approximate GELU computed in-kernel (tanh lowers to the EUP slot).
    # TODO(synk): switch to exact erf-GELU once math.erf lowering is guaranteed in Mosaic.
    c = math.sqrt(2.0 / math.pi)
    return 0.5 * x * (1.0 + jnp.tanh(c * (x + 0.044715 * x * x * x)))


# ----------------------------------------------------------------------------
# Kernel 1: tiled matmul + bias (+GELU, +residual) with K-accumulator grid
# ----------------------------------------------------------------------------

def _mm_kernel(*refs, activation, has_residual):
    if has_residual:
        x_ref, w_ref, b_ref, r_ref, o_ref, acc_ref = refs
    else:
        x_ref, w_ref, b_ref, o_ref, acc_ref = refs
        r_ref = None
    k = pl.program_id(2)

    @pl.when(k == 0)
    def _():
        acc_ref[...] = jnp.zeros_like(acc_ref)

    acc_ref[...] += jnp.dot(
        x_ref[...].astype(_MXU_DTYPE),
        w_ref[...].astype(_MXU_DTYPE),
        preferred_element_type=jnp.float32,
    )

    @pl.when(k == pl.num_programs(2) - 1)
    def _():
        y = acc_ref[...] + b_ref[...]
        if activation == "gelu":
            y = _gelu(y)
        if has_residual:
            y = y + r_ref[...]
        o_ref[...] = y


def matmul_bias(x, w, b, *, activation=None, residual=None,
                tm_max=512, tk_max=512, tn_max=512):
    """(M, K) @ (K, N) + b with fused epilogue; M (and K, N if large) tiled and zero-padded."""
    M, K = x.shape
    N = w.shape[1]

    tm = min(tm_max, _round_up(M, 8))
    Mp = _round_up(M, tm)
    if K > tk_max:
        tk, Kp = tk_max, _round_up(K, tk_max)
    else:
        tk, Kp = K, K
    if N > tn_max:
        tn, Np = tn_max, _round_up(N, tn_max)
    else:
        # NOTE: for small channel widths (demo C2=8) the output last dim stays < 128 lanes;
        # padding channels to 128 everywhere would add more HBM traffic than it saves here.
        tn, Np = N, N

    xp = x if (Mp, Kp) == (M, K) else jnp.pad(x, ((0, Mp - M), (0, Kp - K)))
    wp = w if (Kp, Np) == (K, N) else jnp.pad(w, ((0, Kp - K), (0, Np - N)))
    bp = b.reshape(1, N)
    if Np != N:
        bp = jnp.pad(bp, ((0, 0), (0, Np - N)))

    has_residual = residual is not None
    ins = [xp, wp, bp]
    in_specs = [
        pl.BlockSpec((tm, tk), lambda i, j, kk: (i, kk)),
        pl.BlockSpec((tk, tn), lambda i, j, kk: (kk, j)),
        pl.BlockSpec((1, tn), lambda i, j, kk: (0, j)),
    ]
    if has_residual:
        rp = residual
        if (Mp, Np) != residual.shape:
            rp = jnp.pad(residual, ((0, Mp - M), (0, Np - N)))
        ins.append(rp)
        in_specs.append(pl.BlockSpec((tm, tn), lambda i, j, kk: (i, j)))

    out = pl.pallas_call(
        functools.partial(_mm_kernel, activation=activation, has_residual=has_residual),
        out_shape=jax.ShapeDtypeStruct((Mp, Np), jnp.float32),
        grid=(Mp // tm, Np // tn, Kp // tk),
        in_specs=in_specs,
        out_specs=pl.BlockSpec((tm, tn), lambda i, j, kk: (i, j)),
        scratch_shapes=[pltpu.VMEM((tm, tn), jnp.float32)],
        compiler_params=pltpu.CompilerParams(
            dimension_semantics=("parallel", "parallel", "arbitrary"),
            vmem_limit_bytes=_VMEM_LIMIT,
        ),
    )(*ins)
    if (Mp, Np) != (M, N):
        out = out[:M, :N]
    return out


# ----------------------------------------------------------------------------
# Kernel 2: grouped conv matmul — single pallas_call, group index as grid axis
# ----------------------------------------------------------------------------

def _grouped_mm_kernel(x_ref, w_ref, b_ref, o_ref):
    o_ref[...] = (
        jnp.dot(x_ref[...].astype(_MXU_DTYPE), w_ref[...].astype(_MXU_DTYPE),
                preferred_element_type=jnp.float32)
        + b_ref[...]
    )


# ----------------------------------------------------------------------------
# Kernel 3: WindowMSA — fused qkv/proj, batched windows, optional PE / LayerNorm epilogue
# ----------------------------------------------------------------------------

def _wmsa_kernel(*refs, num_heads, scale, use_pe, use_ln):
    idx = 0
    x_ref = refs[idx]; idx += 1
    wqkv_ref = refs[idx]; idx += 1
    bqkv_ref = refs[idx]; idx += 1
    wp_ref = refs[idx]; idx += 1
    bp_ref = refs[idx]; idx += 1
    pe_ref = None
    if use_pe:
        pe_ref = refs[idx]; idx += 1
    lnw_ref = lnb_ref = None
    if use_ln:
        lnw_ref = refs[idx]; idx += 1
        lnb_ref = refs[idx]; idx += 1
    o_ref = refs[idx]

    x = x_ref[...]                              # (Wb, N, C)  — Wb windows per grid step
    Wb, N, C = x.shape
    hd = C // num_heads
    xf = x.reshape(Wb * N, C)                   # leading-dim merge, lane dim unchanged (cheap)

    # Single full-width qkv matmul: (Wb*N, C) @ (C, 3C)
    qkv = jnp.dot(xf.astype(_MXU_DTYPE), wqkv_ref[...].astype(_MXU_DTYPE),
                  preferred_element_type=jnp.float32) + bqkv_ref[...]

    ctx_heads = []
    for h in range(num_heads):                  # only the tiny score/context contractions per head
        q = (qkv[:, h * hd:(h + 1) * hd] * scale).reshape(Wb, N, hd)
        k = qkv[:, C + h * hd:C + (h + 1) * hd].reshape(Wb, N, hd)
        v = qkv[:, 2 * C + h * hd:2 * C + (h + 1) * hd].reshape(Wb, N, hd)
        attn = jnp.einsum('wnd,wmd->wnm', q.astype(_MXU_DTYPE), k.astype(_MXU_DTYPE),
                          preferred_element_type=jnp.float32)            # (Wb, N, N)
        if use_pe:
            attn = attn + pe_ref[h]
        attn = attn - jnp.max(attn, axis=-1, keepdims=True)
        p = jnp.exp(attn)
        # softmax normalize as a single multiply with an EUP-approx reciprocal
        p = p * pl.reciprocal(jnp.sum(p, axis=-1, keepdims=True), approx=True)
        ctx = jnp.einsum('wnm,wmd->wnd', p.astype(_MXU_DTYPE), v.astype(_MXU_DTYPE),
                         preferred_element_type=jnp.float32)             # (Wb, N, hd)
        ctx_heads.append(ctx.reshape(Wb * N, hd))
    ctx = jnp.concatenate(ctx_heads, axis=-1)                            # (Wb*N, C)

    # Single full-width output projection: (Wb*N, C) @ (C, C)
    out = jnp.dot(ctx.astype(_MXU_DTYPE), wp_ref[...].astype(_MXU_DTYPE),
                  preferred_element_type=jnp.float32) + bp_ref[...]

    if use_ln:  # fused LayerNorm epilogue (per-token; commutes with window_reverse/unpad)
        mu = jnp.mean(out, axis=-1, keepdims=True)
        var = jnp.mean(jnp.square(out - mu), axis=-1, keepdims=True)
        out = (out - mu) * jax.lax.rsqrt(var + 1e-5) * lnw_ref[...] + lnb_ref[...]

    o_ref[...] = out.reshape(Wb, N, C)


def window_msa(x, w_qkv, b_qkv, w_proj, b_proj, num_heads, *, pe=None, ln=None,
               target_rows=512):
    """x: (Bw, N, C).  pe: (heads, N, N) or None.  ln: (gamma, beta) or None."""
    Bw, N, C = x.shape
    hd = C // num_heads
    scale = float(hd) ** (-0.5)

    # Batch enough windows per grid step to reach ~512 rows for the fused matmuls.
    Wb = max(1, min(Bw, max(1, target_rows // N)))
    Bwp = _round_up(Bw, Wb)
    xp = x if Bwp == Bw else jnp.pad(x, ((0, Bwp - Bw), (0, 0), (0, 0)))

    use_pe = pe is not None
    use_ln = ln is not None

    def const_spec(arr):
        nd = arr.ndim
        return pl.BlockSpec(arr.shape, lambda i, _n=nd: (0,) * _n)

    ins = [xp, w_qkv, b_qkv.reshape(1, 3 * C), w_proj, b_proj.reshape(1, C)]
    in_specs = [pl.BlockSpec((Wb, N, C), lambda i: (i, 0, 0))]
    in_specs += [const_spec(a) for a in ins[1:]]
    if use_pe:
        ins.append(pe)
        in_specs.append(const_spec(pe))
    if use_ln:
        lw, lb = ln
        for a in (lw.reshape(1, C), lb.reshape(1, C)):
            ins.append(a)
            in_specs.append(const_spec(a))

    kernel = functools.partial(_wmsa_kernel, num_heads=num_heads, scale=scale,
                               use_pe=use_pe, use_ln=use_ln)
    out = pl.pallas_call(
        kernel,
        out_shape=jax.ShapeDtypeStruct((Bwp, N, C), jnp.float32),
        grid=(Bwp // Wb,),
        in_specs=in_specs,
        out_specs=pl.BlockSpec((Wb, N, C), lambda i: (i, 0, 0)),
        compiler_params=pltpu.CompilerParams(
            dimension_semantics=("parallel",),
            vmem_limit_bytes=_VMEM_LIMIT,
        ),
    )(*ins)
    return out[:Bw] if Bwp != Bw else out


# ----------------------------------------------------------------------------
# JAX glue (layout / patch extraction / interpolation) around the kernels
# ----------------------------------------------------------------------------

def extract_patches(x, kh, kw, stride, pad):
    """NHWC im2col: returns (B, Ho, Wo, kh*kw*C) ordered (kh, kw, c)."""
    if pad > 0:
        x = jnp.pad(x, ((0, 0), (pad, pad), (pad, pad), (0, 0)))
    B, H, W, C = x.shape
    Ho = (H - kh) // stride + 1
    Wo = (W - kw) // stride + 1
    cols = []
    for i in range(kh):
        for j in range(kw):
            cols.append(x[:, i:i + (Ho - 1) * stride + 1:stride,
                          j:j + (Wo - 1) * stride + 1:stride, :])
    return jnp.concatenate(cols, axis=-1), Ho, Wo


def conv2d(x, w, b, stride, pad, activation=None, residual=None):
    """NHWC conv, weight (kh, kw, cin, cout); matmul (+epilogue) runs in the Pallas kernel."""
    kh, kw, cin, cout = w.shape
    patches, Ho, Wo = extract_patches(x, kh, kw, stride, pad)
    Bn = x.shape[0]
    r2d = None if residual is None else residual.reshape(Bn * Ho * Wo, cout)
    y = matmul_bias(patches.reshape(Bn * Ho * Wo, kh * kw * cin),
                    w.reshape(kh * kw * cin, cout), b,
                    activation=activation, residual=r2d)
    return y.reshape(Bn, Ho, Wo, cout)


def grouped_conv2d(x, w, b, stride, pad, groups):
    """Grouped conv: weight (kh, kw, cin_per_group, cout_total), group-major cout ordering.
    One pallas_call; grid = (group, M tiles)."""
    kh, kw, cin_g, cout = w.shape
    cout_g = cout // groups
    B = x.shape[0]
    patches, Ho, Wo = extract_patches(x, kh, kw, stride, pad)   # (B, Ho, Wo, kh*kw*C)
    M = B * Ho * Wo
    Kg = kh * kw * cin_g

    # regroup patch columns:  (kk, G, cin_g) -> (G, M, kk*cin_g)
    p = patches.reshape(M, kh * kw, groups, cin_g)
    p = jnp.transpose(p, (2, 0, 1, 3)).reshape(groups, M, Kg)
    # weight: (kk, cin_g, G, cout_g) -> (G, kk*cin_g, cout_g)
    wg = jnp.transpose(w.reshape(kh * kw, cin_g, groups, cout_g), (2, 0, 1, 3))
    wg = wg.reshape(groups, Kg, cout_g)
    bg = b.reshape(groups, 1, cout_g)

    tm = min(512, _round_up(M, 8))
    Mp = _round_up(M, tm)
    if Mp != M:
        p = jnp.pad(p, ((0, 0), (0, Mp - M), (0, 0)))

    out = pl.pallas_call(
        _grouped_mm_kernel,
        out_shape=jax.ShapeDtypeStruct((groups, Mp, cout_g), jnp.float32),
        grid=(groups, Mp // tm),
        in_specs=[
            pl.BlockSpec((None, tm, Kg), lambda g, i: (g, i, 0)),
            pl.BlockSpec((None, Kg, cout_g), lambda g, i: (g, 0, 0)),
            pl.BlockSpec((None, 1, cout_g), lambda g, i: (g, 0, 0)),
        ],
        out_specs=pl.BlockSpec((None, tm, cout_g), lambda g, i: (g, i, 0)),
        compiler_params=pltpu.CompilerParams(
            dimension_semantics=("parallel", "parallel"),
            vmem_limit_bytes=_VMEM_LIMIT,
        ),
    )(p, wg, bg)
    out = out[:, :M, :]                                          # (G, M, cout_g)
    out = jnp.transpose(out, (1, 0, 2)).reshape(B, Ho, Wo, cout)  # group-major cout = PyTorch
    return out


def window_partition(x, wh, ww):
    B, H, W, C = x.shape
    x = x.reshape(B, H // wh, wh, W // ww, ww, C)
    x = jnp.transpose(x, (0, 1, 3, 2, 4, 5))
    return x.reshape(-1, wh * ww, C)


def window_reverse(win, wh, ww, H, W):
    C = win.shape[-1]
    B = win.shape[0] // ((H // wh) * (W // ww))
    x = win.reshape(B, H // wh, W // ww, wh, ww, C)
    x = jnp.transpose(x, (0, 1, 3, 2, 4, 5))
    return x.reshape(B, H, W, C)


def get_index(real_h):
    index = []
    windows = real_h // 4
    for i in range(windows):
        if i == 0:
            index.append(3)
        elif i == windows - 1:
            index.append(real_h - 4)
        else:
            index.append(i * 4)
            index.append(i * 4 + 3)
    return index


def relative_position_index(wh, ww):
    ch, cw = np.arange(wh), np.arange(ww)
    coords = np.stack(np.meshgrid(ch, cw, indexing='ij'))           # (2, wh, ww)
    flat = coords.reshape(2, -1)
    rel = (flat[:, :, None] - flat[:, None, :]).transpose(1, 2, 0).astype(np.int64)
    rel[:, :, 0] += wh - 1
    rel[:, :, 1] += ww - 1
    rel[:, :, 0] *= 2 * ww - 1
    return np.asarray(rel.sum(-1), dtype=np.int32)                  # (N, N)


def interp_mat(n_in, n_out):
    """1-D bilinear, align_corners=True (matches F.interpolate)."""
    if n_in == 1:
        return jnp.ones((n_out, 1), jnp.float32)
    src = np.arange(n_out, dtype=np.float64) * (n_in - 1) / (n_out - 1)
    lo = np.clip(np.floor(src).astype(np.int64), 0, n_in - 2)
    frac = src - lo
    m = np.zeros((n_out, n_in), dtype=np.float64)
    m[np.arange(n_out), lo] += 1.0 - frac
    m[np.arange(n_out), lo + 1] += frac
    return jnp.asarray(m, dtype=jnp.float32)


def bilinear_up2(x):
    """NHWC bilinear x2 upsample with align_corners=True (data-movement glue)."""
    B, H, W, C = x.shape
    return jnp.einsum('ip,jq,bpqc->bijc', interp_mat(H, 2 * H), interp_mat(W, 2 * W), x)


def multiscale_conv_mlp(x, p, residual=None):
    """MultiScaleConvMlp (eval-mode dropout = identity).  GELU + residual are fused into
    the matmul epilogues of fc1 / fc2 (no separate HBM round trips)."""
    x1 = conv2d(x, p['mlp_w1'], p['mlp_b1'], stride=1, pad=0)
    x2 = conv2d(x, p['mlp_w2'], p['mlp_b2'], stride=1, pad=1)
    x3 = conv2d(x, p['mlp_w3'], p['mlp_b3'], stride=1, pad=3)
    xc = jnp.concatenate([x1, x2, x3], axis=-1)
    y = conv2d(xc, p['mlp_fc1_w'], p['mlp_fc1_b'], stride=1, pad=0, activation='gelu')
    y = conv2d(y, p['mlp_fc2_w'], p['mlp_fc2_b'], stride=1, pad=0,
               activation='gelu', residual=residual)
    return y


# ----------------------------------------------------------------------------
# LSRFormer forward
# ----------------------------------------------------------------------------

def lsrformer_forward(params, x_nchw, *, dim, heads):
    B = x_nchw.shape[0]
    G = dim // 8
    x = jnp.transpose(x_nchw, (0, 2, 3, 1)).astype(jnp.float32)        # NHWC

    # conv_reduce (2x2 / s2, grouped) with eval-BatchNorm folded into the weights.
    xr = grouped_conv2d(x, params['reduce_w'], params['reduce_b'], stride=2, pad=0, groups=G)
    H, W = xr.shape[1], xr.shape[2]
    pad_r = int((4 - W % 4) % 4 / 2)
    pad_b = pad_l = pad_t = pad_r
    if pad_r > 0:
        xr = jnp.pad(xr, ((0, 0), (pad_t, pad_b), (pad_l, pad_r), (0, 0)), mode='reflect')

    border_np = np.asarray(get_index(xr.shape[2]), dtype=np.int32)
    border = jnp.asarray(border_np)

    # ---- horizontal border strip branch
    xh = jnp.take(xr, border, axis=1)                                  # (B, L, Wp, C2)
    xh = conv2d(xh, params['h_conv_w'], params['h_conv_b'], stride=2, pad=0)
    b_, h_, w_, c_ = xh.shape
    xh_seq = xh.reshape(b_ * h_, w_, c_)

    # ---- vertical border strip branch (mirrors the PyTorch code, which assumes H == W
    #      after reduction when reusing w_ from the horizontal branch)
    xw = jnp.take(xr, border, axis=2)                                  # (B, Hp, L, C2)
    xw = jnp.transpose(xw, (0, 2, 1, 3))                               # (B, L, Hp, C2)
    xw = conv2d(xw, params['w_conv_w'], params['w_conv_b'], stride=2, pad=0)
    xw_seq = xw.reshape(-1, w_, c_)

    # ---- global attention over concatenated strips (no PE, no zero-PE DMA)
    x_total = jnp.concatenate([xh_seq, xw_seq], axis=0)                # (2*B*h_, w_, C2)
    attn = window_msa(x_total, params['g_qkv_w'], params['g_qkv_b'],
                      params['g_proj_w'], params['g_proj_b'], heads)
    xh_a, xw_a = jnp.split(attn, 2, axis=0)
    xh_a = xh_a.reshape(B, h_, w_, c_)
    xw_a = xw_a.reshape(B, h_, w_, c_)

    xh_up = bilinear_up2(xh_a)                                         # (B, L, Wp, C2)
    xw_up = bilinear_up2(jnp.transpose(xw_a, (0, 2, 1, 3)))            # (B, Hp, L, C2)

    xr = xr.at[:, border, :, :].add(xh_up)                             # index_add_ dim 1
    xr = xr.at[:, :, border, :].add(xw_up)                             # index_add_ dim 2

    # ---- local 4x4 window attention (relative PE) with fused LayerNorm epilogue
    Hp, Wp = xr.shape[1], xr.shape[2]
    lw = window_partition(xr, 4, 4)                                    # (B*nw, 16, C2)
    rel_idx = relative_position_index(4, 4)
    pe = params['rel_table'][rel_idx.reshape(-1)].reshape(16, 16, heads)
    pe = jnp.transpose(pe, (2, 0, 1))                                  # (heads, 16, 16)
    lw = window_msa(lw, params['l_qkv_w'], params['l_qkv_b'],
                    params['l_proj_w'], params['l_proj_b'], heads,
                    pe=pe, ln=(params['ln_w'], params['ln_b']))
    lw = window_reverse(lw, 4, 4, Hp, Wp)                              # (B, Hp, Wp, C2), normed

    if pad_r > 0:
        xr = xr[:, pad_t:H + pad_t, pad_l:W + pad_t, :]
        lw = lw[:, pad_t:H + pad_t, pad_l:W + pad_t, :]

    # ---- MultiScaleConvMlp (GELU + residual add of xr fused into the fc2 epilogue)
    lw = multiscale_conv_mlp(lw, params, residual=xr)

    # ---- upsample x2 + grouped 3x3 conv_out (single pallas_call over the group grid)
    up = bilinear_up2(lw)                                              # (B, 2H, 2W, C2)
    out = grouped_conv2d(up, params['out_w'], params['out_b'], stride=1, pad=1, groups=G)
    return jnp.transpose(out, (0, 3, 1, 2))                            # NCHW


# ----------------------------------------------------------------------------
# Deterministic synthetic parameters (shapes follow the PyTorch __init__)
# ----------------------------------------------------------------------------

def init_params(key, dim, heads):
    C2 = dim // 2
    G = dim // 8
    it = iter(jax.random.split(key, 40))

    def rn(shape, std=0.1):
        return std * jax.random.normal(next(it), shape, dtype=jnp.float32)

    p = {}
    # TODO(synk): BatchNorm folded with synthetic stats (gamma=1, beta=0, mean=0, var=1);
    # real checkpoints must fold the actual running statistics.
    bn_s = 1.0 / np.sqrt(1.0 + 1e-5)
    p['reduce_w'] = rn((2, 2, dim // G, C2)) * bn_s
    p['reduce_b'] = rn((C2,), 0.02) * bn_s
    p['h_conv_w'] = rn((2, 2, C2, C2)); p['h_conv_b'] = rn((C2,), 0.02)
    p['w_conv_w'] = rn((2, 2, C2, C2)); p['w_conv_b'] = rn((C2,), 0.02)
    p['g_qkv_w'] = rn((C2, 3 * C2), 0.02); p['g_qkv_b'] = rn((3 * C2,), 0.02)
    p['g_proj_w'] = rn((C2, C2), 0.02);    p['g_proj_b'] = rn((C2,), 0.02)
    p['l_qkv_w'] = rn((C2, 3 * C2), 0.02); p['l_qkv_b'] = rn((3 * C2,), 0.02)
    p['l_proj_w'] = rn((C2, C2), 0.02);    p['l_proj_b'] = rn((C2,), 0.02)
    p['rel_table'] = rn(((2 * 4 - 1) * (2 * 4 - 1), heads), 0.02)
    p['out_w'] = rn((3, 3, C2 // G, dim)); p['out_b'] = rn((dim,), 0.02)
    p['mlp_w1'] = rn((1, 1, C2, C2 // 2)); p['mlp_b1'] = rn((C2 // 2,), 0.02)
    p['mlp_w2'] = rn((3, 3, C2, C2 // 4)); p['mlp_b2'] = rn((C2 // 4,), 0.02)
    p['mlp_w3'] = rn((7, 7, C2, C2 // 4)); p['mlp_b3'] = rn((C2 // 4,), 0.02)
    p['mlp_fc1_w'] = rn((1, 1, C2, 4 * C2)); p['mlp_fc1_b'] = rn((4 * C2,), 0.02)
    p['mlp_fc2_w'] = rn((1, 1, 4 * C2, C2)); p['mlp_fc2_b'] = rn((C2,), 0.02)
    p['ln_w'] = jnp.ones((C2,), jnp.float32)
    p['ln_b'] = jnp.zeros((C2,), jnp.float32)
    return p


if __name__ == "__main__":
    dim, heads = 16, 2
    B, H0, W0 = 2, 16, 16

    key = jax.random.PRNGKey(0)
    pkey, xkey = jax.random.split(key)
    params = init_params(pkey, dim, heads)
    x = jax.random.normal(xkey, (B, dim, H0, W0), dtype=jnp.float32)   # NCHW like PyTorch

    fwd = jax.jit(functools.partial(lsrformer_forward, dim=dim, heads=heads))
    out = jax.block_until_ready(fwd(params, x))

    assert out.shape == (B, dim, H0, W0), out.shape
    assert bool(jnp.all(jnp.isfinite(out)))
    print("KERNEL_OK")
</pallas_src>

<mosaic_0001>
module attributes {stable_mosaic.version = 11 : i64} {
  func.func @_grouped_mm_kernel(%arg0: i32, %arg1: i32, %arg2: memref<1x128x32xf32, #tpu.memory_space<vmem>>, %arg3: memref<1x32x4xf32, #tpu.memory_space<vmem>>, %arg4: memref<1x1x4xf32, #tpu.memory_space<vmem>>, %arg5: memref<1x128x4xf32, #tpu.memory_space<vmem>>) attributes {dimension_semantics = [#tpu.dimension_semantics<parallel>, #tpu.dimension_semantics<parallel>], iteration_bounds = array<i64: 2, 1>, scalar_prefetch = 0 : i64, scratch_operands = 0 : i64, tpu.core_type = #tpu.core_type<tc>, window_params = [{transform_indices = @transform_0, window_bounds = array<i64: 1, 128, 32>}, {transform_indices = @transform_1, window_bounds = array<i64: 1, 32, 4>}, {transform_indices = @transform_2, window_bounds = array<i64: 1, 1, 4>}, {transform_indices = @transform_3, window_bounds = array<i64: 1, 128, 4>}]} {
    %c0 = arith.constant 0 : index
    %c0_0 = arith.constant 0 : index
    %c0_1 = arith.constant 0 : index
    %0 = vector.load %arg2[%c0, %c0_0, %c0_1] : memref<1x128x32xf32, #tpu.memory_space<vmem>>, vector<1x128x32xf32>
    %1 = vector.shape_cast %0 : vector<1x128x32xf32> to vector<128x32xf32>
    %2 = arith.truncf %1 : vector<128x32xf32> to vector<128x32xbf16>
    %c0_2 = arith.constant 0 : index
    %c0_3 = arith.constant 0 : index
    %c0_4 = arith.constant 0 : index
    %3 = vector.load %arg3[%c0_2, %c0_3, %c0_4] : memref<1x32x4xf32, #tpu.memory_space<vmem>>, vector<1x32x4xf32>
    %4 = vector.shape_cast %3 : vector<1x32x4xf32> to vector<32x4xf32>
    %5 = arith.truncf %4 : vector<32x4xf32> to vector<32x4xbf16>
    %cst = arith.constant dense<0.000000e+00> : vector<128x4xf32>
    %6 = tpu.matmul %2, %5, %cst {dimension_numbers = #tpu.dot_dimension_numbers<[1], [0], [0], [1], [0, 0, 1, 1], [], []>} : vector<128x32xbf16>, vector<32x4xbf16>, vector<128x4xf32> -> vector<128x4xf32>
    %c0_5 = arith.constant 0 : index
    %c0_6 = arith.constant 0 : index
    %c0_7 = arith.constant 0 : index
    %7 = vector.load %arg4[%c0_5, %c0_6, %c0_7] : memref<1x1x4xf32, #tpu.memory_space<vmem>>, vector<1x1x4xf32>
    %8 = vector.shape_cast %7 : vector<1x1x4xf32> to vector<1x4xf32>
    %9 = vector.broadcast %8 : vector<1x4xf32> to vector<128x4xf32>
    %10 = arith.addf %6, %9 : vector<128x4xf32>
    %c0_8 = arith.constant 0 : index
    %c0_9 = arith.constant 0 : index
    %c0_10 = arith.constant 0 : index
    %11 = vector.load %arg5[%c0_8, %c0_9, %c0_10] : memref<1x128x4xf32, #tpu.memory_space<vmem>>, vector<1x128x4xf32>
    %12 = vector.shape_cast %11 : vector<1x128x4xf32> to vector<128x4xf32>
    %13 = vector.shape_cast %10 : vector<128x4xf32> to vector<1x128x4xf32>
    tpu.vector_store %arg5[%c0_8, %c0_9, %c0_10], %13 {strides = array<i32>} : memref<1x128x4xf32, #tpu.memory_space<vmem>>, vector<1x128x4xf32>,
    return
  }
  func.func @transform_0(%arg0: i32, %arg1: i32) -> (i32, i32, i32) {
    %c0_i32 = arith.constant 0 : i32
    %c0_i32_0 = arith.constant 0 : i32
    return %arg0, %arg1, %c0_i32 : i32, i32, i32
  }
  func.func @transform_1(%arg0: i32, %arg1: i32) -> (i32, i32, i32) {
    %c0_i32 = arith.constant 0 : i32
    %c0_i32_0 = arith.constant 0 : i32
    %c0_i32_1 = arith.constant 0 : i32
    return %arg0, %c0_i32, %c0_i32_0 : i32, i32, i32
  }
  func.func @transform_2(%arg0: i32, %arg1: i32) -> (i32, i32, i32) {
    %c0_i32 = arith.constant 0 : i32
    %c0_i32_0 = arith.constant 0 : i32
    %c0_i32_1 = arith.constant 0 : i32
    return %arg0, %c0_i32, %c0_i32_0 : i32, i32, i32
  }
  func.func @transform_3(%arg0: i32, %arg1: i32) -> (i32, i32, i32) {
    %c0_i32 = arith.constant 0 : i32
    %c0_i32_0 = arith.constant 0 : i32
    return %arg0, %arg1, %c0_i32 : i32, i32, i32
  }
}

module attributes {stable_mosaic.version = 11 : i64} {
  func.func @_mm_kernel(%arg0: i32, %arg1: i32, %arg2: i32, %arg3: memref<8x32xf32, #tpu.memory_space<vmem>>, %arg4: memref<32x8xf32, #tpu.memory_space<vmem>>, %arg5: memref<1x8xf32, #tpu.memory_space<vmem>>, %arg6: memref<8x8xf32, #tpu.memory_space<vmem>>, %arg7: memref<8x8xf32, #tpu.memory_space<vmem>>) attributes {dimension_semantics = [#tpu.dimension_semantics<parallel>, #tpu.dimension_semantics<parallel>, #tpu.dimension_semantics<arbitrary>], iteration_bounds = array<i64: 1, 1, 1>, scalar_prefetch = 0 : i64, scratch_operands = 1 : i64, tpu.core_type = #tpu.core_type<tc>, window_params = [{transform_indices = @transform_0, window_bounds = array<i64: 8, 32>}, {transform_indices = @transform_1, window_bounds = array<i64: 32, 8>}, {transform_indices = @transform_2, window_bounds = array<i64: 1, 8>}, {transform_indices = @transform_3, window_bounds = array<i64: 8, 8>}]} {
    %c0_i32 = arith.constant 0 : i32
    %0 = arith.cmpi eq, %arg2, %c0_i32 : i32
    %1 = arith.extui %0 : i1 to i32
    %c0_i32_0 = arith.constant 0 : i32
    %2 = arith.cmpi ne, %1, %c0_i32_0 : i32
    scf.if %2 {
      %cst_10 = arith.constant 0.000000e+00 : f32
      %14 = vector.broadcast %cst_10 : f32 to vector<8x8xf32>
      %c0_11 = arith.constant 0 : index
      %c0_12 = arith.constant 0 : index
      %15 = vector.load %arg7[%c0_11, %c0_12] : memref<8x8xf32, #tpu.memory_space<vmem>>, vector<8x8xf32>
      tpu.vector_store %arg7[%c0_11, %c0_12], %14 {strides = array<i32>} : memref<8x8xf32, #tpu.memory_space<vmem>>, vector<8x8xf32>,
    } else {
    }
    %c0 = arith.constant 0 : index
    %c0_1 = arith.constant 0 : index
    %3 = vector.load %arg7[%c0, %c0_1] : memref<8x8xf32, #tpu.memory_space<vmem>>, vector<8x8xf32>
    %c0_2 = arith.constant 0 : index
    %c0_3 = arith.constant 0 : index
    %4 = vector.load %arg3[%c0_2, %c0_3] : memref<8x32xf32, #tpu.memory_space<vmem>>, vector<8x32xf32>
    %5 = arith.truncf %4 : vector<8x32xf32> to vector<8x32xbf16>
    %c0_4 = arith.constant 0 : index
    %c0_5 = arith.constant 0 : index
    %6 = vector.load %arg4[%c0_4, %c0_5] : memref<32x8xf32, #tpu.memory_space<vmem>>, vector<32x8xf32>
    %7 = arith.truncf %6 : vector<32x8xf32> to vector<32x8xbf16>
    %cst = arith.constant dense<0.000000e+00> : vector<8x8xf32>
    %8 = tpu.matmul %5, %7, %cst {dimension_numbers = #tpu.dot_dimension_numbers<[1], [0], [0], [1], [0, 0, 1, 1], [], []>} : vector<8x32xbf16>, vector<32x8xbf16>, vector<8x8xf32> -> vector<8x8xf32>
    %9 = arith.addf %3, %8 : vector<8x8xf32>
    %c0_6 = arith.constant 0 : index
    %c0_7 = arith.constant 0 : index
    %10 = vector.load %arg7[%c0_6, %c0_7] : memref<8x8xf32, #tpu.memory_space<vmem>>, vector<8x8xf32>
    tpu.vector_store %arg7[%c0_6, %c0_7], %9 {strides = array<i32>} : memref<8x8xf32, #tpu.memory_space<vmem>>, vector<8x8xf32>,
    %c0_i32_8 = arith.constant 0 : i32
    %11 = arith.cmpi eq, %arg2, %c0_i32_8 : i32
    %12 = arith.extui %11 : i1 to i32
    %c0_i32_9 = arith.constant 0 : i32
    %13 = arith.cmpi ne, %12, %c0_i32_9 : i32
    scf.if %13 {
      %c0_10 = arith.constant 0 : index
      %c0_11 = arith.constant 0 : index
      %14 = vector.load %arg7[%c0_10, %c0_11] : memref<8x8xf32, #tpu.memory_space<vmem>>, vector<8x8xf32>
      %c0_12 = arith.constant 0 : index
      %c0_13 = arith.constant 0 : index
      %15 = vector.load %arg5[%c0_12, %c0_13] : memref<1x8xf32, #tpu.memory_space<vmem>>, vector<1x8xf32>
      %16 = vector.broadcast %15 : vector<1x8xf32> to vector<8x8xf32>
      %17 = arith.addf %14, %16 : vector<8x8xf32>
      %c0_14 = arith.constant 0 : index
      %c0_15 = arith.constant 0 : index
      %18 = vector.load %arg6[%c0_14, %c0_15] : memref<8x8xf32, #tpu.memory_space<vmem>>, vector<8x8xf32>
      tpu.vector_store %arg6[%c0_14, %c0_15], %17 {strides = array<i32>} : memref<8x8xf32, #tpu.memory_space<vmem>>, vector<8x8xf32>,
    } else {
    }
    return
  }
  func.func @transform_0(%arg0: i32, %arg1: i32, %arg2: i32) -> (i32, i32) {
    %c0_i32 = arith.constant 0 : i32
    return %arg0, %arg2 : i32, i32
  }
  func.func @transform_1(%arg0: i32, %arg1: i32, %arg2: i32) -> (i32, i32) {
    %c0_i32 = arith.constant 0 : i32
    return %arg2, %arg1 : i32, i32
  }
  func.func @transform_2(%arg0: i32, %arg1: i32, %arg2: i32) -> (i32, i32) {
    %c0_i32 = arith.constant 0 : i32
    %c0_i32_0 = arith.constant 0 : i32
    return %c0_i32, %arg1 : i32, i32
  }
  func.func @transform_3(%arg0: i32, %arg1: i32, %arg2: i32) -> (i32, i32) {
    %c0_i32 = arith.constant 0 : i32
    return %arg0, %arg1 : i32, i32
  }
}

module attributes {stable_mosaic.version = 11 : i64} {
  func.func @_wmsa_kernel(%arg0: i32, %arg1: memref<4x4x8xf32, #tpu.memory_space<vmem>>, %arg2: memref<8x24xf32, #tpu.memory_space<vmem>>, %arg3: memref<1x24xf32, #tpu.memory_space<vmem>>, %arg4: memref<8x8xf32, #tpu.memory_space<vmem>>, %arg5: memref<1x8xf32, #tpu.memory_space<vmem>>, %arg6: memref<4x4x8xf32, #tpu.memory_space<vmem>>) attributes {dimension_semantics = [#tpu.dimension_semantics<parallel>], iteration_bounds = array<i64: 1>, scalar_prefetch = 0 : i64, scratch_operands = 0 : i64, tpu.core_type = #tpu.core_type<tc>, window_params = [{transform_indices = @transform_0, window_bounds = array<i64: 4, 4, 8>}, {pipeline_mode = #tpu.pipeline_mode<synchronous>, transform_indices = @transform_1, window_bounds = array<i64: 8, 24>}, {pipeline_mode = #tpu.pipeline_mode<synchronous>, transform_indices = @transform_2, window_bounds = array<i64: 1, 24>}, {pipeline_mode = #tpu.pipeline_mode<synchronous>, transform_indices = @transform_3, window_bounds = array<i64: 8, 8>}, {pipeline_mode = #tpu.pipeline_mode<synchronous>, transform_indices = @transform_4, window_bounds = array<i64: 1, 8>}, {transform_indices = @transform_5, window_bounds = array<i64: 4, 4, 8>}]} {
    %c0 = arith.constant 0 : index
    %c0_0 = arith.constant 0 : index
    %c0_1 = arith.constant 0 : index
    %0 = vector.load %arg1[%c0, %c0_0, %c0_1] : memref<4x4x8xf32, #tpu.memory_space<vmem>>, vector<4x4x8xf32>
    %1 = vector.shape_cast %0 : vector<4x4x8xf32> to vector<16x8xf32>
    %2 = arith.truncf %1 : vector<16x8xf32> to vector<16x8xbf16>
    %c0_2 = arith.constant 0 : index
    %c0_3 = arith.constant 0 : index
    %3 = vector.load %arg2[%c0_2, %c0_3] : memref<8x24xf32, #tpu.memory_space<vmem>>, vector<8x24xf32>
    %4 = arith.truncf %3 : vector<8x24xf32> to vector<8x24xbf16>
    %cst = arith.constant dense<0.000000e+00> : vector<16x24xf32>
    %5 = tpu.matmul %2, %4, %cst {dimension_numbers = #tpu.dot_dimension_numbers<[1], [0], [0], [1], [0, 0, 1, 1], [], []>} : vector<16x8xbf16>, vector<8x24xbf16>, vector<16x24xf32> -> vector<16x24xf32>
    %c0_4 = arith.constant 0 : index
    %c0_5 = arith.constant 0 : index
    %6 = vector.load %arg3[%c0_4, %c0_5] : memref<1x24xf32, #tpu.memory_space<vmem>>, vector<1x24xf32>
    %7 = vector.broadcast %6 : vector<1x24xf32> to vector<16x24xf32>
    %8 = arith.addf %5, %7 : vector<16x24xf32>
    %9 = vector.extract_strided_slice %8 {offsets = [0, 0], sizes = [16, 4], strides = [1, 1]} : vector<16x24xf32> to vector<16x4xf32>
    %cst_6 = arith.constant 5.000000e-01 : f32
    %10 = vector.broadcast %cst_6 : f32 to vector<16x4xf32>
    %11 = arith.mulf %9, %10 : vector<16x4xf32>
    %12 = vector.shape_cast %11 : vector<16x4xf32> to vector<4x4x4xf32>
    %13 = vector.extract_strided_slice %8 {offsets = [0, 8], sizes = [16, 4], strides = [1, 1]} : vector<16x24xf32> to vector<16x4xf32>
    %14 = vector.shape_cast %13 : vector<16x4xf32> to vector<4x4x4xf32>
    %15 = vector.extract_strided_slice %8 {offsets = [0, 16], sizes = [16, 4], strides = [1, 1]} : vector<16x24xf32> to vector<16x4xf32>
    %16 = vector.shape_cast %15 : vector<16x4xf32> to vector<4x4x4xf32>
    %17 = arith.truncf %12 : vector<4x4x4xf32> to vector<4x4x4xbf16>
    %18 = arith.truncf %14 : vector<4x4x4xf32> to vector<4x4x4xbf16>
    "tpu.trace_start"() <{level = 10 : i32, message = "wnd,wmd->wnm"}> : () -> ()
    %cst_7 = arith.constant dense<0.000000e+00> : vector<4x4x4xf32>
    %19 = tpu.matmul %17, %18, %cst_7 {dimension_numbers = #tpu.dot_dimension_numbers<[2], [2], [1], [1], [0, 0, 0, 1, 1, 1], [0], [0]>} : vector<4x4x4xbf16>, vector<4x4x4xbf16>, vector<4x4x4xf32> -> vector<4x4x4xf32>
    "tpu.trace_stop"() : () -> ()
    %cst_8 = arith.constant dense<0xFF800000> : vector<4x4xf32>
    %20 = vector.multi_reduction <maximumf>, %19, %cst_8 [2] : vector<4x4x4xf32> to vector<4x4xf32>
    %21 = vector.shape_cast %20 : vector<4x4xf32> to vector<4x4x1xf32>
    %22 = vector.broadcast %21 : vector<4x4x1xf32> to vector<4x4x4xf32>
    %23 = arith.subf %19, %22 : vector<4x4x4xf32>
    %24 = math.exp %23 : vector<4x4x4xf32>
    %cst_9 = arith.constant dense<0.000000e+00> : vector<4x4xf32>
    %25 = vector.multi_reduction <add>, %24, %cst_9 [2] : vector<4x4x4xf32> to vector<4x4xf32>
    %26 = vector.shape_cast %25 : vector<4x4xf32> to vector<4x4x1xf32>
    %27 = tpu.reciprocal %26 {approx = true} : vector<4x4x1xf32> -> vector<4x4x1xf32>
    %28 = vector.broadcast %27 : vector<4x4x1xf32> to vector<4x4x4xf32>
    %29 = arith.mulf %24, %28 : vector<4x4x4xf32>
    %30 = arith.truncf %29 : vector<4x4x4xf32> to vector<4x4x4xbf16>
    %31 = arith.truncf %16 : vector<4x4x4xf32> to vector<4x4x4xbf16>
    "tpu.trace_start"() <{level = 10 : i32, message = "wnm,wmd->wnd"}> : () -> ()
    %cst_10 = arith.constant dense<0.000000e+00> : vector<4x4x4xf32>
    %32 = tpu.matmul %30, %31, %cst_10 {dimension_numbers = #tpu.dot_dimension_numbers<[2], [1], [1], [2], [0, 0, 0, 1, 1, 2], [0], [0]>} : vector<4x4x4xbf16>, vector<4x4x4xbf16>, vector<4x4x4xf32> -> vector<4x4x4xf32>
    "tpu.trace_stop"() : () -> ()
    %33 = vector.shape_cast %32 : vector<4x4x4xf32> to vector<16x4xf32>
    %34 = vector.extract_strided_slice %8 {offsets = [0, 4], sizes = [16, 4], strides = [1, 1]} : vector<16x24xf32> to vector<16x4xf32>
    %cst_11 = arith.constant 5.000000e-01 : f32
    %35 = vector.broadcast %cst_11 : f32 to vector<16x4xf32>
    %36 = arith.mulf %34, %35 : vector<16x4xf32>
    %37 = vector.shape_cast %36 : vector<16x4xf32> to vector<4x4x4xf32>
    %38 = vector.extract_strided_slice %8 {offsets = [0, 12], sizes = [16, 4], strides = [1, 1]} : vector<16x24xf32> to vector<16x4xf32>
    %39 = vector.shape_cast %38 : vector<16x4xf32> to vector<4x4x4xf32>
    %40 = vector.extract_strided_slice %8 {offsets = [0, 20], sizes = [16, 4], strides = [1, 1]} : vector<16x24xf32> to vector<16x4xf32>
    %41 = vector.shape_cast %40 : vector<16x4xf32> to vector<4x4x4xf32>
    %42 = arith.truncf %37 : vector<4x4x4xf32> to vector<4x4x4xbf16>
    %43 = arith.truncf %39 : vector<4x4x4xf32> to vector<4x4x4xbf16>
    "tpu.trace_start"() <{level = 10 : i32, message = "wnd,wmd->wnm"}> : () -> ()
    %cst_12 = arith.constant dense<0.000000e+00> : vector<4x4x4xf32>
    %44 = tpu.matmul %42, %43, %cst_12 {dimension_numbers = #tpu.dot_dimension_numbers<[2], [2], [1], [1], [0, 0, 0, 1, 1, 1], [0], [0]>} : vector<4x4x4xbf16>, vector<4x4x4xbf16>, vector<4x4x4xf32> -> vector<4x4x4xf32>
    "tpu.trace_stop"() : () -> ()
    %cst_13 = arith.constant dense<0xFF800000> : vector<4x4xf32>
    %45 = vector.multi_reduction <maximumf>, %44, %cst_13 [2] : vector<4x4x4xf32> to vector<4x4xf32>
    %46 = vector.shape_cast %45 : vector<4x4xf32> to vector<4x4x1xf32>
    %47 = vector.broadcast %46 : vector<4x4x1xf32> to vector<4x4x4xf32>
    %48 = arith.subf %44, %47 : vector<4x4x4xf32>
    %49 = math.exp %48 : vector<4x4x4xf32>
    %cst_14 = arith.constant dense<0.000000e+00> : vector<4x4xf32>
    %50 = vector.multi_reduction <add>, %49, %cst_14 [2] : vector<4x4x4xf32> to vector<4x4xf32>
    %51 = vector.shape_cast %50 : vector<4x4xf32> to vector<4x4x1xf32>
    %52 = tpu.reciprocal %51 {approx = true} : vector<4x4x1xf32> -> vector<4x4x1xf32>
    %53 = vector.broadcast %52 : vector<4x4x1xf32> to vector<4x4x4xf32>
    %54 = arith.mulf %49, %53 : vector<4x4x4xf32>
    %55 = arith.truncf %54 : vector<4x4x4xf32> to vector<4x4x4xbf16>
    %56 = arith.truncf %41 : vector<4x4x4xf32> to vector<4x4x4xbf16>
    "tpu.trace_start"() <{level = 10 : i32, message = "wnm,wmd->wnd"}> : () -> ()
    %cst_15 = arith.constant dense<0.000000e+00> : vector<4x4x4xf32>
    %57 = tpu.matmul %55, %56, %cst_15 {dimension_numbers = #tpu.dot_dimension_numbers<[2], [1], [1], [2], [0, 0, 0, 1, 1, 2], [0], [0]>} : vector<4x4x4xbf16>, vector<4x4x4xbf16>, vector<4x4x4xf32> -> vector<4x4x4xf32>
    "tpu.trace_stop"() : () -> ()
    %58 = vector.shape_cast %57 : vector<4x4x4xf32> to vector<16x4xf32>
    %59 = tpu.concatenate %33, %58 in 1 : vector<16x4xf32>, vector<16x4xf32> -> vector<16x8xf32>
    %60 = arith.truncf %59 : vector<16x8xf32> to vector<16x8xbf16>
    %c0_16 = arith.constant 0 : index
    %c0_17 = arith.constant 0 : index
    %61 = vector.load %arg4[%c0_16, %c0_17] : memref<8x8xf32, #tpu.memory_space<vmem>>, vector<8x8xf32>
    %62 = arith.truncf %61 : vector<8x8xf32> to vector<8x8xbf16>
    %cst_18 = arith.constant dense<0.000000e+00> : vector<16x8xf32>
    %63 = tpu.matmul %60, %62, %cst_18 {dimension_numbers = #tpu.dot_dimension_numbers<[1], [0], [0], [1], [0, 0, 1, 1], [], []>} : vector<16x8xbf16>, vector<8x8xbf16>, vector<16x8xf32> -> vector<16x8xf32>
    %c0_19 = arith.constant 0 : index
    %c0_20 = arith.constant 0 : index
    %64 = vector.load %arg5[%c0_19, %c0_20] : memref<1x8xf32, #tpu.memory_space<vmem>>, vector<1x8xf32>
    %65 = vector.broadcast %64 : vector<1x8xf32> to vector<16x8xf32>
    %66 = arith.addf %63, %65 : vector<16x8xf32>
    %67 = vector.shape_cast %66 : vector<16x8xf32> to vector<4x4x8xf32>
    %c0_21 = arith.constant 0 : index
    %c0_22 = arith.constant 0 : index
    %c0_23 = arith.constant 0 : index
    %68 = vector.load %arg6[%c0_21, %c0_22, %c0_23] : memref<4x4x8xf32, #tpu.memory_space<vmem>>, vector<4x4x8xf32>
    tpu.vector_store %arg6[%c0_21, %c0_22, %c0_23], %67 {strides = array<i32>} : memref<4x4x8xf32, #tpu.memory_space<vmem>>, vector<4x4x8xf32>,
    return
  }
  func.func @transform_0(%arg0: i32) -> (i32, i32, i32) {
    %c0_i32 = arith.constant 0 : i32
    %c0_i32_0 = arith.constant 0 : i32
    %c0_i32_1 = arith.constant 0 : i32
    return %arg0, %c0_i32, %c0_i32_0 : i32, i32, i32
  }
  func.func @transform_1(%arg0: i32) -> (i32, i32) {
    %c0_i32 = arith.constant 0 : i32
    %c0_i32_0 = arith.constant 0 : i32
    %c0_i32_1 = arith.constant 0 : i32
    return %c0_i32, %c0_i32_0 : i32, i32
  }
  func.func @transform_2(%arg0: i32) -> (i32, i32) {
    %c0_i32 = arith.constant 0 : i32
    %c0_i32_0 = arith.constant 0 : i32
    %c0_i32_1 = arith.constant 0 : i32
    return %c0_i32, %c0_i32_0 : i32, i32
  }
  func.func @transform_3(%arg0: i32) -> (i32, i32) {
    %c0_i32 = arith.constant 0 : i32
    %c0_i32_0 = arith.constant 0 : i32
    %c0_i32_1 = arith.constant 0 : i32
    return %c0_i32, %c0_i32_0 : i32, i32
  }
  func.func @transform_4(%arg0: i32) -> (i32, i32) {
    %c0_i32 = arith.constant 0 : i32
    %c0_i32_0 = arith.constant 0 : i32
    %c0_i32_1 = arith.constant 0 : i32
    return %c0_i32, %c0_i32_0 : i32, i32
  }
  func.func @transform_5(%arg0: i32) -> (i32, i32, i32) {
    %c0_i32 = arith.constant 0 : i32
    %c0_i32_0 = arith.constant 0 : i32
    %c0_i32_1 = arith.constant 0 : i32
    return %arg0, %c0_i32, %c0_i32_0 : i32, i32, i32
  }
}

module attributes {stable_mosaic.version = 11 : i64} {
  func.func @_wmsa_kernel(%arg0: i32, %arg1: memref<8x16x8xf32, #tpu.memory_space<vmem>>, %arg2: memref<8x24xf32, #tpu.memory_space<vmem>>, %arg3: memref<1x24xf32, #tpu.memory_space<vmem>>, %arg4: memref<8x8xf32, #tpu.memory_space<vmem>>, %arg5: memref<1x8xf32, #tpu.memory_space<vmem>>, %arg6: memref<2x16x16xf32, #tpu.memory_space<vmem>>, %arg7: memref<1x8xf32, #tpu.memory_space<vmem>>, %arg8: memref<1x8xf32, #tpu.memory_space<vmem>>, %arg9: memref<8x16x8xf32, #tpu.memory_space<vmem>>) attributes {dimension_semantics = [#tpu.dimension_semantics<parallel>], iteration_bounds = array<i64: 1>, scalar_prefetch = 0 : i64, scratch_operands = 0 : i64, tpu.core_type = #tpu.core_type<tc>, window_params = [{transform_indices = @transform_0, window_bounds = array<i64: 8, 16, 8>}, {pipeline_mode = #tpu.pipeline_mode<synchronous>, transform_indices = @transform_1, window_bounds = array<i64: 8, 24>}, {pipeline_mode = #tpu.pipeline_mode<synchronous>, transform_indices = @transform_2, window_bounds = array<i64: 1, 24>}, {pipeline_mode = #tpu.pipeline_mode<synchronous>, transform_indices = @transform_3, window_bounds = array<i64: 8, 8>}, {pipeline_mode = #tpu.pipeline_mode<synchronous>, transform_indices = @transform_4, window_bounds = array<i64: 1, 8>}, {pipeline_mode = #tpu.pipeline_mode<synchronous>, transform_indices = @transform_5, window_bounds = array<i64: 2, 16, 16>}, {pipeline_mode = #tpu.pipeline_mode<synchronous>, transform_indices = @transform_6, window_bounds = array<i64: 1, 8>}, {pipeline_mode = #tpu.pipeline_mode<synchronous>, transform_indices = @transform_7, window_bounds = array<i64: 1, 8>}, {transform_indices = @transform_8, window_bounds = array<i64: 8, 16, 8>}]} {
    %c0 = arith.constant 0 : index
    %c0_0 = arith.constant 0 : index
    %c0_1 = arith.constant 0 : index
    %0 = vector.load %arg1[%c0, %c0_0, %c0_1] : memref<8x16x8xf32, #tpu.memory_space<vmem>>, vector<8x16x8xf32>
    %1 = vector.shape_cast %0 : vector<8x16x8xf32> to vector<128x8xf32>
    %2 = arith.truncf %1 : vector<128x8xf32> to vector<128x8xbf16>
    %c0_2 = arith.constant 0 : index
    %c0_3 = arith.constant 0 : index
    %3 = vector.load %arg2[%c0_2, %c0_3] : memref<8x24xf32, #tpu.memory_space<vmem>>, vector<8x24xf32>
    %4 = arith.truncf %3 : vector<8x24xf32> to vector<8x24xbf16>
    %cst = arith.constant dense<0.000000e+00> : vector<128x24xf32>
    %5 = tpu.matmul %2, %4, %cst {dimension_numbers = #tpu.dot_dimension_numbers<[1], [0], [0], [1], [0, 0, 1, 1], [], []>} : vector<128x8xbf16>, vector<8x24xbf16>, vector<128x24xf32> -> vector<128x24xf32>
    %c0_4 = arith.constant 0 : index
    %c0_5 = arith.constant 0 : index
    %6 = vector.load %arg3[%c0_4, %c0_5] : memref<1x24xf32, #tpu.memory_space<vmem>>, vector<1x24xf32>
    %7 = vector.broadcast %6 : vector<1x24xf32> to vector<128x24xf32>
    %8 = arith.addf %5, %7 : vector<128x24xf32>
    %9 = vector.extract_strided_slice %8 {offsets = [0, 0], sizes = [128, 4], strides = [1, 1]} : vector<128x24xf32> to vector<128x4xf32>
    %cst_6 = arith.constant 5.000000e-01 : f32
    %10 = vector.broadcast %cst_6 : f32 to vector<128x4xf32>
    %11 = arith.mulf %9, %10 : vector<128x4xf32>
    %12 = vector.shape_cast %11 : vector<128x4xf32> to vector<8x16x4xf32>
    %13 = vector.extract_strided_slice %8 {offsets = [0, 8], sizes = [128, 4], strides = [1, 1]} : vector<128x24xf32> to vector<128x4xf32>
    %14 = vector.shape_cast %13 : vector<128x4xf32> to vector<8x16x4xf32>
    %15 = vector.extract_strided_slice %8 {offsets = [0, 16], sizes = [128, 4], strides = [1, 1]} : vector<128x24xf32> to vector<128x4xf32>
    %16 = vector.shape_cast %15 : vector<128x4xf32> to vector<8x16x4xf32>
    %17 = arith.truncf %12 : vector<8x16x4xf32> to vector<8x16x4xbf16>
    %18 = arith.truncf %14 : vector<8x16x4xf32> to vector<8x16x4xbf16>
    "tpu.trace_start"() <{level = 10 : i32, message = "wnd,wmd->wnm"}> : () -> ()
    %cst_7 = arith.constant dense<0.000000e+00> : vector<8x16x16xf32>
    %19 = tpu.matmul %17, %18, %cst_7 {dimension_numbers = #tpu.dot_dimension_numbers<[2], [2], [1], [1], [0, 0, 0, 1, 1, 1], [0], [0]>} : vector<8x16x4xbf16>, vector<8x16x4xbf16>, vector<8x16x16xf32> -> vector<8x16x16xf32>
    "tpu.trace_stop"() : () -> ()
    %c0_8 = arith.constant 0 : index
    %c0_9 = arith.constant 0 : index
    %c0_10 = arith.constant 0 : index
    %20 = vector.load %arg6[%c0_8, %c0_9, %c0_10] : memref<2x16x16xf32, #tpu.memory_space<vmem>>, vector<1x16x16xf32>
    %21 = vector.shape_cast %20 : vector<1x16x16xf32> to vector<16x16xf32>
    %22 = vector.shape_cast %21 : vector<16x16xf32> to vector<1x16x16xf32>
    %23 = vector.broadcast %22 : vector<1x16x16xf32> to vector<8x16x16xf32>
    %24 = arith.addf %19, %23 : vector<8x16x16xf32>
    %cst_11 = arith.constant dense<0xFF800000> : vector<8x16xf32>
    %25 = vector.multi_reduction <maximumf>, %24, %cst_11 [2] : vector<8x16x16xf32> to vector<8x16xf32>
    %26 = vector.shape_cast %25 : vector<8x16xf32> to vector<8x16x1xf32>
    %27 = vector.broadcast %26 : vector<8x16x1xf32> to vector<8x16x16xf32>
    %28 = arith.subf %24, %27 : vector<8x16x16xf32>
    %29 = math.exp %28 : vector<8x16x16xf32>
    %cst_12 = arith.constant dense<0.000000e+00> : vector<8x16xf32>
    %30 = vector.multi_reduction <add>, %29, %cst_12 [2] : vector<8x16x16xf32> to vector<8x16xf32>
    %31 = vector.shape_cast %30 : vector<8x16xf32> to vector<8x16x1xf32>
    %32 = tpu.reciprocal %31 {approx = true} : vector<8x16x1xf32> -> vector<8x16x1xf32>
    %33 = vector.broadcast %32 : vector<8x16x1xf32> to vector<8x16x16xf32>
    %34 = arith.mulf %29, %33 : vector<8x16x16xf32>
    %35 = arith.truncf %34 : vector<8x16x16xf32> to vector<8x16x16xbf16>
    %36 = arith.truncf %16 : vector<8x16x4xf32> to vector<8x16x4xbf16>
    "tpu.trace_start"() <{level = 10 : i32, message = "wnm,wmd->wnd"}> : () -> ()
    %cst_13 = arith.constant dense<0.000000e+00> : vector<8x16x4xf32>
    %37 = tpu.matmul %35, %36, %cst_13 {dimension_numbers = #tpu.dot_dimension_numbers<[2], [1], [1], [2], [0, 0, 0, 1, 1, 2], [0], [0]>} : vector<8x16x16xbf16>, vector<8x16x4xbf16>, vector<8x16x4xf32> -> vector<8x16x4xf32>
    "tpu.trace_stop"() : () -> ()
    %38 = vector.shape_cast %37 : vector<8x16x4xf32> to vector<128x4xf32>
    %39 = vector.extract_strided_slice %8 {offsets = [0, 4], sizes = [128, 4], strides = [1, 1]} : vector<128x24xf32> to vector<128x4xf32>
    %cst_14 = arith.constant 5.000000e-01 : f32
    %40 = vector.broadcast %cst_14 : f32 to vector<128x4xf32>
    %41 = arith.mulf %39, %40 : vector<128x4xf32>
    %42 = vector.shape_cast %41 : vector<128x4xf32> to vector<8x16x4xf32>
    %43 = vector.extract_strided_slice %8 {offsets = [0, 12], sizes = [128, 4], strides = [1, 1]} : vector<128x24xf32> to vector<128x4xf32>
    %44 = vector.shape_cast %43 : vector<128x4xf32> to vector<8x16x4xf32>
    %45 = vector.extract_strided_slice %8 {offsets = [0, 20], sizes = [128, 4], strides = [1, 1]} : vector<128x24xf32> to vector<128x4xf32>
    %46 = vector.shape_cast %45 : vector<128x4xf32> to vector<8x16x4xf32>
    %47 = arith.truncf %42 : vector<8x16x4xf32> to vector<8x16x4xbf16>
    %48 = arith.truncf %44 : vector<8x16x4xf32> to vector<8x16x4xbf16>
    "tpu.trace_start"() <{level = 10 : i32, message = "wnd,wmd->wnm"}> : () -> ()
    %cst_15 = arith.constant dense<0.000000e+00> : vector<8x16x16xf32>
    %49 = tpu.matmul %47, %48, %cst_15 {dimension_numbers = #tpu.dot_dimension_numbers<[2], [2], [1], [1], [0, 0, 0, 1, 1, 1], [0], [0]>} : vector<8x16x4xbf16>, vector<8x16x4xbf16>, vector<8x16x16xf32> -> vector<8x16x16xf32>
    "tpu.trace_stop"() : () -> ()
    %c1 = arith.constant 1 : index
    %c0_16 = arith.constant 0 : index
    %c0_17 = arith.constant 0 : index
    %50 = vector.load %arg6[%c1, %c0_16, %c0_17] : memref<2x16x16xf32, #tpu.memory_space<vmem>>, vector<1x16x16xf32>
    %51 = vector.shape_cast %50 : vector<1x16x16xf32> to vector<16x16xf32>
    %52 = vector.shape_cast %51 : vector<16x16xf32> to vector<1x16x16xf32>
    %53 = vector.broadcast %52 : vector<1x16x16xf32> to vector<8x16x16xf32>
    %54 = arith.addf %49, %53 : vector<8x16x16xf32>
    %cst_18 = arith.constant dense<0xFF800000> : vector<8x16xf32>
    %55 = vector.multi_reduction <maximumf>, %54, %cst_18 [2] : vector<8x16x16xf32> to vector<8x16xf32>
    %56 = vector.shape_cast %55 : vector<8x16xf32> to vector<8x16x1xf32>
    %57 = vector.broadcast %56 : vector<8x16x1xf32> to vector<8x16x16xf32>
    %58 = arith.subf %54, %57 : vector<8x16x16xf32>
    %59 = math.exp %58 : vector<8x16x16xf32>
    %cst_19 = arith.constant dense<0.000000e+00> : vector<8x16xf32>
    %60 = vector.multi_reduction <add>, %59, %cst_19 [2] : vector<8x16x16xf32> to vector<8x16xf32>
    %61 = vector.shape_cast %60 : vector<8x16xf32> to vector<8x16x1xf32>
    %62 = tpu.reciprocal %61 {approx = true} : vector<8x16x1xf32> -> vector<8x16x1xf32>
    %63 = vector.broadcast %62 : vector<8x16x1xf32> to vector<8x16x16xf32>
    %64 = arith.mulf %59, %63 : vector<8x16x16xf32>
    %65 = arith.truncf %64 : vector<8x16x16xf32> to vector<8x16x16xbf16>
    %66 = arith.truncf %46 : vector<8x16x4xf32> to vector<8x16x4xbf16>
    "tpu.trace_start"() <{level = 10 : i32, message = "wnm,wmd->wnd"}> : () -> ()
    %cst_20 = arith.constant dense<0.000000e+00> : vector<8x16x4xf32>
    %67 = tpu.matmul %65, %66, %cst_20 {dimension_numbers = #tpu.dot_dimension_numbers<[2], [1], [1], [2], [0, 0, 0, 1, 1, 2], [0], [0]>} : vector<8x16x16xbf16>, vector<8x16x4xbf16>, vector<8x16x4xf32> -> vector<8x16x4xf32>
    "tpu.trace_stop"() : () -> ()
    %68 = vector.shape_cast %67 : vector<8x16x4xf32> to vector<128x4xf32>
    %69 = tpu.concatenate %38, %68 in 1 : vector<128x4xf32>, vector<128x4xf32> -> vector<128x8xf32>
    %70 = arith.truncf %69 : vector<128x8xf32> to vector<128x8xbf16>
    %c0_21 = arith.constant 0 : index
    %c0_22 = arith.constant 0 : index
    %71 = vector.load %arg4[%c0_21, %c0_22] : memref<8x8xf32, #tpu.memory_space<vmem>>, vector<8x8xf32>
    %72 = arith.truncf %71 : vector<8x8xf32> to vector<8x8xbf16>
    %cst_23 = arith.constant dense<0.000000e+00> : vector<128x8xf32>
    %73 = tpu.matmul %70, %72, %cst_23 {dimension_numbers = #tpu.dot_dimension_numbers<[1], [0], [0], [1], [0, 0, 1, 1], [], []>} : vector<128x8xbf16>, vector<8x8xbf16>, vector<128x8xf32> -> vector<128x8xf32>
    %c0_24 = arith.constant 0 : index
    %c0_25 = arith.constant 0 : index
    %74 = vector.load %arg5[%c0_24, %c0_25] : memref<1x8xf32, #tpu.memory_space<vmem>>, vector<1x8xf32>
    %75 = vector.broadcast %74 : vector<1x8xf32> to vector<128x8xf32>
    %76 = arith.addf %73, %75 : vector<128x8xf32>
    %cst_26 = arith.constant dense<0.000000e+00> : vector<128xf32>
    %77 = vector.multi_reduction <add>, %76, %cst_26 [1] : vector<128x8xf32> to vector<128xf32>
    %78 = vector.shape_cast %77 : vector<128xf32> to vector<128x1xf32>
    %cst_27 = arith.constant 8.000000e+00 : f32
    %79 = vector.broadcast %cst_27 : f32 to vector<128x1xf32>
    %80 = arith.divf %78, %79 : vector<128x1xf32>
    %81 = vector.broadcast %80 : vector<128x1xf32> to vector<128x8xf32>
    %82 = arith.subf %76, %81 : vector<128x8xf32>
    %83 = arith.mulf %82, %82 : vector<128x8xf32>
    %cst_28 = arith.constant dense<0.000000e+00> : vector<128xf32>
    %84 = vector.multi_reduction <add>, %83, %cst_28 [1] : vector<128x8xf32> to vector<128xf32>
    %85 = vector.shape_cast %84 : vector<128xf32> to vector<128x1xf32>
    %cst_29 = arith.constant 8.000000e+00 : f32
    %86 = vector.broadcast %cst_29 : f32 to vector<128x1xf32>
    %87 = arith.divf %85, %86 : vector<128x1xf32>
    %88 = vector.broadcast %80 : vector<128x1xf32> to vector<128x8xf32>
    %89 = arith.subf %76, %88 : vector<128x8xf32>
    %cst_30 = arith.constant 9.99999974E-6 : f32
    %90 = vector.broadcast %cst_30 : f32 to vector<128x1xf32>
    %91 = arith.addf %87, %90 : vector<128x1xf32>
    %92 = math.rsqrt %91 : vector<128x1xf32>
    %93 = vector.broadcast %92 : vector<128x1xf32> to vector<128x8xf32>
    %94 = arith.mulf %89, %93 : vector<128x8xf32>
    %c0_31 = arith.constant 0 : index
    %c0_32 = arith.constant 0 : index
    %95 = vector.load %arg7[%c0_31, %c0_32] : memref<1x8xf32, #tpu.memory_space<vmem>>, vector<1x8xf32>
    %96 = vector.broadcast %95 : vector<1x8xf32> to vector<128x8xf32>
    %97 = arith.mulf %94, %96 : vector<128x8xf32>
    %c0_33 = arith.constant 0 : index
    %c0_34 = arith.constant 0 : index
    %98 = vector.load %arg8[%c0_33, %c0_34] : memref<1x8xf32, #tpu.memory_space<vmem>>, vector<1x8xf32>
    %99 = vector.broadcast %98 : vector<1x8xf32> to vector<128x8xf32>
    %100 = arith.addf %97, %99 : vector<128x8xf32>
    %101 = vector.shape_cast %100 : vector<128x8xf32> to vector<8x16x8xf32>
    %c0_35 = arith.constant 0 : index
    %c0_36 = arith.constant 0 : index
    %c0_37 = arith.constant 0 : index
    %102 = vector.load %arg9[%c0_35, %c0_36, %c0_37] : memref<8x16x8xf32, #tpu.memory_space<vmem>>, vector<8x16x8xf32>
    tpu.vector_store %arg9[%c0_35, %c0_36, %c0_37], %101 {strides = array<i32>} : memref<8x16x8xf32, #tpu.memory_space<vmem>>, vector<8x16x8xf32>,
    return
  }
  func.func @transform_0(%arg0: i32) -> (i32, i32, i32) {
    %c0_i32 = arith.constant 0 : i32
    %c0_i32_0 = arith.constant 0 : i32
    %c0_i32_1 = arith.constant 0 : i32
    return %arg0, %c0_i32, %c0_i32_0 : i32, i32, i32
  }
  func.func @transform_1(%arg0: i32) -> (i32, i32) {
    %c0_i32 = arith.constant 0 : i32
    %c0_i32_0 = arith.constant 0 : i32
    %c0_i32_1 = arith.constant 0 : i32
    return %c0_i32, %c0_i32_0 : i32, i32
  }
  func.func @transform_2(%arg0: i32) -> (i32, i32) {
    %c0_i32 = arith.constant 0 : i32
    %c0_i32_0 = arith.constant 0 : i32
    %c0_i32_1 = arith.constant 0 : i32
    return %c0_i32, %c0_i32_0 : i32, i32
  }
  func.func @transform_3(%arg0: i32) -> (i32, i32) {
    %c0_i32 = arith.constant 0 : i32
    %c0_i32_0 = arith.constant 0 : i32
    %c0_i32_1 = arith.constant 0 : i32
    return %c0_i32, %c0_i32_0 : i32, i32
  }
  func.func @transform_4(%arg0: i32) -> (i32, i32) {
    %c0_i32 = arith.constant 0 : i32
    %c0_i32_0 = arith.constant 0 : i32
    %c0_i32_1 = arith.constant 0 : i32
    return %c0_i32, %c0_i32_0 : i32, i32
  }
  func.func @transform_5(%arg0: i32) -> (i32, i32, i32) {
    %c0_i32 = arith.constant 0 : i32
    %c0_i32_0 = arith.constant 0 : i32
    %c0_i32_1 = arith.constant 0 : i32
    %c0_i32_2 = arith.constant 0 : i32
    return %c0_i32, %c0_i32_0, %c0_i32_1 : i32, i32, i32
  }
  func.func @transform_6(%arg0: i32) -> (i32, i32) {
    %c0_i32 = arith.constant 0 : i32
    %c0_i32_0 = arith.constant 0 : i32
    %c0_i32_1 = arith.constant 0 : i32
    return %c0_i32, %c0_i32_0 : i32, i32
  }
  func.func @transform_7(%arg0: i32) -> (i32, i32) {
    %c0_i32 = arith.constant 0 : i32
    %c0_i32_0 = arith.constant 0 : i32
    %c0_i32_1 = arith.constant 0 : i32
    return %c0_i32, %c0_i32_0 : i32, i32
  }
  func.func @transform_8(%arg0: i32) -> (i32, i32, i32) {
    %c0_i32 = arith.constant 0 : i32
    %c0_i32_0 = arith.constant 0 : i32
    %c0_i32_1 = arith.constant 0 : i32
    return %arg0, %c0_i32, %c0_i32_0 : i32, i32, i32
  }
}

module attributes {stable_mosaic.version = 11 : i64} {
  func.func @_mm_kernel(%arg0: i32, %arg1: i32, %arg2: i32, %arg3: memref<128x72xf32, #tpu.memory_space<vmem>>, %arg4: memref<72x2xf32, #tpu.memory_space<vmem>>, %arg5: memref<1x2xf32, #tpu.memory_space<vmem>>, %arg6: memref<128x2xf32, #tpu.memory_space<vmem>>, %arg7: memref<128x2xf32, #tpu.memory_space<vmem>>) attributes {dimension_semantics = [#tpu.dimension_semantics<parallel>, #tpu.dimension_semantics<parallel>, #tpu.dimension_semantics<arbitrary>], iteration_bounds = array<i64: 1, 1, 1>, scalar_prefetch = 0 : i64, scratch_operands = 1 : i64, tpu.core_type = #tpu.core_type<tc>, window_params = [{transform_indices = @transform_0, window_bounds = array<i64: 128, 72>}, {transform_indices = @transform_1, window_bounds = array<i64: 72, 2>}, {transform_indices = @transform_2, window_bounds = array<i64: 1, 2>}, {transform_indices = @transform_3, window_bounds = array<i64: 128, 2>}]} {
    %c0_i32 = arith.constant 0 : i32
    %0 = arith.cmpi eq, %arg2, %c0_i32 : i32
    %1 = arith.extui %0 : i1 to i32
    %c0_i32_0 = arith.constant 0 : i32
    %2 = arith.cmpi ne, %1, %c0_i32_0 : i32
    scf.if %2 {
      %cst_10 = arith.constant 0.000000e+00 : f32
      %14 = vector.broadcast %cst_10 : f32 to vector<128x2xf32>
      %c0_11 = arith.constant 0 : index
      %c0_12 = arith.constant 0 : index
      %15 = vector.load %arg7[%c0_11, %c0_12] : memref<128x2xf32, #tpu.memory_space<vmem>>, vector<128x2xf32>
      tpu.vector_store %arg7[%c0_11, %c0_12], %14 {strides = array<i32>} : memref<128x2xf32, #tpu.memory_space<vmem>>, vector<128x2xf32>,
    } else {
    }
    %c0 = arith.constant 0 : index
    %c0_1 = arith.constant 0 : index
    %3 = vector.load %arg7[%c0, %c0_1] : memref<128x2xf32, #tpu.memory_space<vmem>>, vector<128x2xf32>
    %c0_2 = arith.constant 0 : index
    %c0_3 = arith.constant 0 : index
    %4 = vector.load %arg3[%c0_2, %c0_3] : memref<128x72xf32, #tpu.memory_space<vmem>>, vector<128x72xf32>
    %5 = arith.truncf %4 : vector<128x72xf32> to vector<128x72xbf16>
    %c0_4 = arith.constant 0 : index
    %c0_5 = arith.constant 0 : index
    %6 = vector.load %arg4[%c0_4, %c0_5] : memref<72x2xf32, #tpu.memory_space<vmem>>, vector<72x2xf32>
    %7 = arith.truncf %6 : vector<72x2xf32> to vector<72x2xbf16>
    %cst = arith.constant dense<0.000000e+00> : vector<128x2xf32>
    %8 = tpu.matmul %5, %7, %cst {dimension_numbers = #tpu.dot_dimension_numbers<[1], [0], [0], [1], [0, 0, 1, 1], [], []>} : vector<128x72xbf16>, vector<72x2xbf16>, vector<128x2xf32> -> vector<128x2xf32>
    %9 = arith.addf %3, %8 : vector<128x2xf32>
    %c0_6 = arith.constant 0 : index
    %c0_7 = arith.constant 0 : index
    %10 = vector.load %arg7[%c0_6, %c0_7] : memref<128x2xf32, #tpu.memory_space<vmem>>, vector<128x2xf32>
    tpu.vector_store %arg7[%c0_6, %c0_7], %9 {strides = array<i32>} : memref<128x2xf32, #tpu.memory_space<vmem>>, vector<128x2xf32>,
    %c0_i32_8 = arith.constant 0 : i32
    %11 = arith.cmpi eq, %arg2, %c0_i32_8 : i32
    %12 = arith.extui %11 : i1 to i32
    %c0_i32_9 = arith.constant 0 : i32
    %13 = arith.cmpi ne, %12, %c0_i32_9 : i32
    scf.if %13 {
      %c0_10 = arith.constant 0 : index
      %c0_11 = arith.constant 0 : index
      %14 = vector.load %arg7[%c0_10, %c0_11] : memref<128x2xf32, #tpu.memory_space<vmem>>, vector<128x2xf32>
      %c0_12 = arith.constant 0 : index
      %c0_13 = arith.constant 0 : index
      %15 = vector.load %arg5[%c0_12, %c0_13] : memref<1x2xf32, #tpu.memory_space<vmem>>, vector<1x2xf32>
      %16 = vector.broadcast %15 : vector<1x2xf32> to vector<128x2xf32>
      %17 = arith.addf %14, %16 : vector<128x2xf32>
      %c0_14 = arith.constant 0 : index
      %c0_15 = arith.constant 0 : index
      %18 = vector.load %arg6[%c0_14, %c0_15] : memref<128x2xf32, #tpu.memory_space<vmem>>, vector<128x2xf32>
      tpu.vector_store %arg6[%c0_14, %c0_15], %17 {strides = array<i32>} : memref<128x2xf32, #tpu.memory_space<vmem>>, vector<128x2xf32>,
    } else {
    }
    return
  }
  func.func @transform_0(%arg0: i32, %arg1: i32, %arg2: i32) -> (i32, i32) {
    %c0_i32 = arith.constant 0 : i32
    return %arg0, %arg2 : i32, i32
  }
  func.func @transform_1(%arg0: i32, %arg1: i32, %arg2: i32) -> (i32, i32) {
    %c0_i32 = arith.constant 0 : i32
    return %arg2, %arg1 : i32, i32
  }
  func.func @transform_2(%arg0: i32, %arg1: i32, %arg2: i32) -> (i32, i32) {
    %c0_i32 = arith.constant 0 : i32
    %c0_i32_0 = arith.constant 0 : i32
    return %c0_i32, %arg1 : i32, i32
  }
  func.func @transform_3(%arg0: i32, %arg1: i32, %arg2: i32) -> (i32, i32) {
    %c0_i32 = arith.constant 0 : i32
    return %arg0, %arg1 : i32, i32
  }
}

module attributes {stable_mosaic.version = 11 : i64} {
  func.func @_mm_kernel(%arg0: i32, %arg1: i32, %arg2: i32, %arg3: memref<128x392xf32, #tpu.memory_space<vmem>>, %arg4: memref<392x2xf32, #tpu.memory_space<vmem>>, %arg5: memref<1x2xf32, #tpu.memory_space<vmem>>, %arg6: memref<128x2xf32, #tpu.memory_space<vmem>>, %arg7: memref<128x2xf32, #tpu.memory_space<vmem>>) attributes {dimension_semantics = [#tpu.dimension_semantics<parallel>, #tpu.dimension_semantics<parallel>, #tpu.dimension_semantics<arbitrary>], iteration_bounds = array<i64: 1, 1, 1>, scalar_prefetch = 0 : i64, scratch_operands = 1 : i64, tpu.core_type = #tpu.core_type<tc>, window_params = [{transform_indices = @transform_0, window_bounds = array<i64: 128, 392>}, {transform_indices = @transform_1, window_bounds = array<i64: 392, 2>}, {transform_indices = @transform_2, window_bounds = array<i64: 1, 2>}, {transform_indices = @transform_3, window_bounds = array<i64: 128, 2>}]} {
    %c0_i32 = arith.constant 0 : i32
    %0 = arith.cmpi eq, %arg2, %c0_i32 : i32
    %1 = arith.extui %0 : i1 to i32
    %c0_i32_0 = arith.constant 0 : i32
    %2 = arith.cmpi ne, %1, %c0_i32_0 : i32
    scf.if %2 {
      %cst_10 = arith.constant 0.000000e+00 : f32
      %14 = vector.broadcast %cst_10 : f32 to vector<128x2xf32>
      %c0_11 = arith.constant 0 : index
      %c0_12 = arith.constant 0 : index
      %15 = vector.load %arg7[%c0_11, %c0_12] : memref<128x2xf32, #tpu.memory_space<vmem>>, vector<128x2xf32>
      tpu.vector_store %arg7[%c0_11, %c0_12], %14 {strides = array<i32>} : memref<128x2xf32, #tpu.memory_space<vmem>>, vector<128x2xf32>,
    } else {
    }
    %c0 = arith.constant 0 : index
    %c0_1 = arith.constant 0 : index
    %3 = vector.load %arg7[%c0, %c0_1] : memref<128x2xf32, #tpu.memory_space<vmem>>, vector<128x2xf32>
    %c0_2 = arith.constant 0 : index
    %c0_3 = arith.constant 0 : index
    %4 = vector.load %arg3[%c0_2, %c0_3] : memref<128x392xf32, #tpu.memory_space<vmem>>, vector<128x392xf32>
    %5 = arith.truncf %4 : vector<128x392xf32> to vector<128x392xbf16>
    %c0_4 = arith.constant 0 : index
    %c0_5 = arith.constant 0 : index
    %6 = vector.load %arg4[%c0_4, %c0_5] : memref<392x2xf32, #tpu.memory_space<vmem>>, vector<392x2xf32>
    %7 = arith.truncf %6 : vector<392x2xf32> to vector<392x2xbf16>
    %cst = arith.constant dense<0.000000e+00> : vector<128x2xf32>
    %8 = tpu.matmul %5, %7, %cst {dimension_numbers = #tpu.dot_dimension_numbers<[1], [0], [0], [1], [0, 0, 1, 1], [], []>} : vector<128x392xbf16>, vector<392x2xbf16>, vector<128x2xf32> -> vector<128x2xf32>
    %9 = arith.addf %3, %8 : vector<128x2xf32>
    %c0_6 = arith.constant 0 : index
    %c0_7 = arith.constant 0 : index
    %10 = vector.load %arg7[%c0_6, %c0_7] : memref<128x2xf32, #tpu.memory_space<vmem>>, vector<128x2xf32>
    tpu.vector_store %arg7[%c0_6, %c0_7], %9 {strides = array<i32>} : memref<128x2xf32, #tpu.memory_space<vmem>>, vector<128x2xf32>,
    %c0_i32_8 = arith.constant 0 : i32
    %11 = arith.cmpi eq, %arg2, %c0_i32_8 : i32
    %12 = arith.extui %11 : i1 to i32
    %c0_i32_9 = arith.constant 0 : i32
    %13 = arith.cmpi ne, %12, %c0_i32_9 : i32
    scf.if %13 {
      %c0_10 = arith.constant 0 : index
      %c0_11 = arith.constant 0 : index
      %14 = vector.load %arg7[%c0_10, %c0_11] : memref<128x2xf32, #tpu.memory_space<vmem>>, vector<128x2xf32>
      %c0_12 = arith.constant 0 : index
      %c0_13 = arith.constant 0 : index
      %15 = vector.load %arg5[%c0_12, %c0_13] : memref<1x2xf32, #tpu.memory_space<vmem>>, vector<1x2xf32>
      %16 = vector.broadcast %15 : vector<1x2xf32> to vector<128x2xf32>
      %17 = arith.addf %14, %16 : vector<128x2xf32>
      %c0_14 = arith.constant 0 : index
      %c0_15 = arith.constant 0 : index
      %18 = vector.load %arg6[%c0_14, %c0_15] : memref<128x2xf32, #tpu.memory_space<vmem>>, vector<128x2xf32>
      tpu.vector_store %arg6[%c0_14, %c0_15], %17 {strides = array<i32>} : memref<128x2xf32, #tpu.memory_space<vmem>>, vector<128x2xf32>,
    } else {
    }
    return
  }
  func.func @transform_0(%arg0: i32, %arg1: i32, %arg2: i32) -> (i32, i32) {
    %c0_i32 = arith.constant 0 : i32
    return %arg0, %arg2 : i32, i32
  }
  func.func @transform_1(%arg0: i32, %arg1: i32, %arg2: i32) -> (i32, i32) {
    %c0_i32 = arith.constant 0 : i32
    return %arg2, %arg1 : i32, i32
  }
  func.func @transform_2(%arg0: i32, %arg1: i32, %arg2: i32) -> (i32, i32) {
    %c0_i32 = arith.constant 0 : i32
    %c0_i32_0 = arith.constant 0 : i32
    return %c0_i32, %arg1 : i32, i32
  }
  func.func @transform_3(%arg0: i32, %arg1: i32, %arg2: i32) -> (i32, i32) {
    %c0_i32 = arith.constant 0 : i32
    return %arg0, %arg1 : i32, i32
  }
}

module attributes {stable_mosaic.version = 11 : i64} {
  func.func @_mm_kernel(%arg0: i32, %arg1: i32, %arg2: i32, %arg3: memref<128x8xf32, #tpu.memory_space<vmem>>, %arg4: memref<8x4xf32, #tpu.memory_space<vmem>>, %arg5: memref<1x4xf32, #tpu.memory_space<vmem>>, %arg6: memref<128x4xf32, #tpu.memory_space<vmem>>, %arg7: memref<128x4xf32, #tpu.memory_space<vmem>>) attributes {dimension_semantics = [#tpu.dimension_semantics<parallel>, #tpu.dimension_semantics<parallel>, #tpu.dimension_semantics<arbitrary>], iteration_bounds = array<i64: 1, 1, 1>, scalar_prefetch = 0 : i64, scratch_operands = 1 : i64, tpu.core_type = #tpu.core_type<tc>, window_params = [{transform_indices = @transform_0, window_bounds = array<i64: 128, 8>}, {transform_indices = @transform_1, window_bounds = array<i64: 8, 4>}, {transform_indices = @transform_2, window_bounds = array<i64: 1, 4>}, {transform_indices = @transform_3, window_bounds = array<i64: 128, 4>}]} {
    %c0_i32 = arith.constant 0 : i32
    %0 = arith.cmpi eq, %arg2, %c0_i32 : i32
    %1 = arith.extui %0 : i1 to i32
    %c0_i32_0 = arith.constant 0 : i32
    %2 = arith.cmpi ne, %1, %c0_i32_0 : i32
    scf.if %2 {
      %cst_10 = arith.constant 0.000000e+00 : f32
      %14 = vector.broadcast %cst_10 : f32 to vector<128x4xf32>
      %c0_11 = arith.constant 0 : index
      %c0_12 = arith.constant 0 : index
      %15 = vector.load %arg7[%c0_11, %c0_12] : memref<128x4xf32, #tpu.memory_space<vmem>>, vector<128x4xf32>
      tpu.vector_store %arg7[%c0_11, %c0_12], %14 {strides = array<i32>} : memref<128x4xf32, #tpu.memory_space<vmem>>, vector<128x4xf32>,
    } else {
    }
    %c0 = arith.constant 0 : index
    %c0_1 = arith.constant 0 : index
    %3 = vector.load %arg7[%c0, %c0_1] : memref<128x4xf32, #tpu.memory_space<vmem>>, vector<128x4xf32>
    %c0_2 = arith.constant 0 : index
    %c0_3 = arith.constant 0 : index
    %4 = vector.load %arg3[%c0_2, %c0_3] : memref<128x8xf32, #tpu.memory_space<vmem>>, vector<128x8xf32>
    %5 = arith.truncf %4 : vector<128x8xf32> to vector<128x8xbf16>
    %c0_4 = arith.constant 0 : index
    %c0_5 = arith.constant 0 : index
    %6 = vector.load %arg4[%c0_4, %c0_5] : memref<8x4xf32, #tpu.memory_space<vmem>>, vector<8x4xf32>
    %7 = arith.truncf %6 : vector<8x4xf32> to vector<8x4xbf16>
    %cst = arith.constant dense<0.000000e+00> : vector<128x4xf32>
    %8 = tpu.matmul %5, %7, %cst {dimension_numbers = #tpu.dot_dimension_numbers<[1], [0], [0], [1], [0, 0, 1, 1], [], []>} : vector<128x8xbf16>, vector<8x4xbf16>, vector<128x4xf32> -> vector<128x4xf32>
    %9 = arith.addf %3, %8 : vector<128x4xf32>
    %c0_6 = arith.constant 0 : index
    %c0_7 = arith.constant 0 : index
    %10 = vector.load %arg7[%c0_6, %c0_7] : memref<128x4xf32, #tpu.memory_space<vmem>>, vector<128x4xf32>
    tpu.vector_store %arg7[%c0_6, %c0_7], %9 {strides = array<i32>} : memref<128x4xf32, #tpu.memory_space<vmem>>, vector<128x4xf32>,
    %c0_i32_8 = arith.constant 0 : i32
    %11 = arith.cmpi eq, %arg2, %c0_i32_8 : i32
    %12 = arith.extui %11 : i1 to i32
    %c0_i32_9 = arith.constant 0 : i32
    %13 = arith.cmpi ne, %12, %c0_i32_9 : i32
    scf.if %13 {
      %c0_10 = arith.constant 0 : index
      %c0_11 = arith.constant 0 : index
      %14 = vector.load %arg7[%c0_10, %c0_11] : memref<128x4xf32, #tpu.memory_space<vmem>>, vector<128x4xf32>
      %c0_12 = arith.constant 0 : index
      %c0_13 = arith.constant 0 : index
      %15 = vector.load %arg5[%c0_12, %c0_13] : memref<1x4xf32, #tpu.memory_space<vmem>>, vector<1x4xf32>
      %16 = vector.broadcast %15 : vector<1x4xf32> to vector<128x4xf32>
      %17 = arith.addf %14, %16 : vector<128x4xf32>
      %c0_14 = arith.constant 0 : index
      %c0_15 = arith.constant 0 : index
      %18 = vector.load %arg6[%c0_14, %c0_15] : memref<128x4xf32, #tpu.memory_space<vmem>>, vector<128x4xf32>
      tpu.vector_store %arg6[%c0_14, %c0_15], %17 {strides = array<i32>} : memref<128x4xf32, #tpu.memory_space<vmem>>, vector<128x4xf32>,
    } else {
    }
    return
  }
  func.func @transform_0(%arg0: i32, %arg1: i32, %arg2: i32) -> (i32, i32) {
    %c0_i32 = arith.constant 0 : i32
    return %arg0, %arg2 : i32, i32
  }
  func.func @transform_1(%arg0: i32, %arg1: i32, %arg2: i32) -> (i32, i32) {
    %c0_i32 = arith.constant 0 : i32
    return %arg2, %arg1 : i32, i32
  }
  func.func @transform_2(%arg0: i32, %arg1: i32, %arg2: i32) -> (i32, i32) {
    %c0_i32 = arith.constant 0 : i32
    %c0_i32_0 = arith.constant 0 : i32
    return %c0_i32, %arg1 : i32, i32
  }
  func.func @transform_3(%arg0: i32, %arg1: i32, %arg2: i32) -> (i32, i32) {
    %c0_i32 = arith.constant 0 : i32
    return %arg0, %arg1 : i32, i32
  }
}

module attributes {stable_mosaic.version = 11 : i64} {
  func.func @_mm_kernel(%arg0: i32, %arg1: i32, %arg2: i32, %arg3: memref<128x32xf32, #tpu.memory_space<vmem>>, %arg4: memref<32x8xf32, #tpu.memory_space<vmem>>, %arg5: memref<1x8xf32, #tpu.memory_space<vmem>>, %arg6: memref<128x8xf32, #tpu.memory_space<vmem>>, %arg7: memref<128x8xf32, #tpu.memory_space<vmem>>, %arg8: memref<128x8xf32, #tpu.memory_space<vmem>>) attributes {dimension_semantics = [#tpu.dimension_semantics<parallel>, #tpu.dimension_semantics<parallel>, #tpu.dimension_semantics<arbitrary>], iteration_bounds = array<i64: 1, 1, 1>, scalar_prefetch = 0 : i64, scratch_operands = 1 : i64, tpu.core_type = #tpu.core_type<tc>, window_params = [{transform_indices = @transform_0, window_bounds = array<i64: 128, 32>}, {transform_indices = @transform_1, window_bounds = array<i64: 32, 8>}, {transform_indices = @transform_2, window_bounds = array<i64: 1, 8>}, {transform_indices = @transform_3, window_bounds = array<i64: 128, 8>}, {transform_indices = @transform_4, window_bounds = array<i64: 128, 8>}]} {
    %c0_i32 = arith.constant 0 : i32
    %0 = arith.cmpi eq, %arg2, %c0_i32 : i32
    %1 = arith.extui %0 : i1 to i32
    %c0_i32_0 = arith.constant 0 : i32
    %2 = arith.cmpi ne, %1, %c0_i32_0 : i32
    scf.if %2 {
      %cst_10 = arith.constant 0.000000e+00 : f32
      %14 = vector.broadcast %cst_10 : f32 to vector<128x8xf32>
      %c0_11 = arith.constant 0 : index
      %c0_12 = arith.constant 0 : index
      %15 = vector.load %arg8[%c0_11, %c0_12] : memref<128x8xf32, #tpu.memory_space<vmem>>, vector<128x8xf32>
      tpu.vector_store %arg8[%c0_11, %c0_12], %14 {strides = array<i32>} : memref<128x8xf32, #tpu.memory_space<vmem>>, vector<128x8xf32>,
    } else {
    }
    %c0 = arith.constant 0 : index
    %c0_1 = arith.constant 0 : index
    %3 = vector.load %arg8[%c0, %c0_1] : memref<128x8xf32, #tpu.memory_space<vmem>>, vector<128x8xf32>
    %c0_2 = arith.constant 0 : index
    %c0_3 = arith.constant 0 : index
    %4 = vector.load %arg3[%c0_2, %c0_3] : memref<128x32xf32, #tpu.memory_space<vmem>>, vector<128x32xf32>
    %5 = arith.truncf %4 : vector<128x32xf32> to vector<128x32xbf16>
    %c0_4 = arith.constant 0 : index
    %c0_5 = arith.constant 0 : index
    %6 = vector.load %arg4[%c0_4, %c0_5] : memref<32x8xf32, #tpu.memory_space<vmem>>, vector<32x8xf32>
    %7 = arith.truncf %6 : vector<32x8xf32> to vector<32x8xbf16>
    %cst = arith.constant dense<0.000000e+00> : vector<128x8xf32>
    %8 = tpu.matmul %5, %7, %cst {dimension_numbers = #tpu.dot_dimension_numbers<[1], [0], [0], [1], [0, 0, 1, 1], [], []>} : vector<128x32xbf16>, vector<32x8xbf16>, vector<128x8xf32> -> vector<128x8xf32>
    %9 = arith.addf %3, %8 : vector<128x8xf32>
    %c0_6 = arith.constant 0 : index
    %c0_7 = arith.constant 0 : index
    %10 = vector.load %arg8[%c0_6, %c0_7] : memref<128x8xf32, #tpu.memory_space<vmem>>, vector<128x8xf32>
    tpu.vector_store %arg8[%c0_6, %c0_7], %9 {strides = array<i32>} : memref<128x8xf32, #tpu.memory_space<vmem>>, vector<128x8xf32>,
    %c0_i32_8 = arith.constant 0 : i32
    %11 = arith.cmpi eq, %arg2, %c0_i32_8 : i32
    %12 = arith.extui %11 : i1 to i32
    %c0_i32_9 = arith.constant 0 : i32
    %13 = arith.cmpi ne, %12, %c0_i32_9 : i32
    scf.if %13 {
      %c0_10 = arith.constant 0 : index
      %c0_11 = arith.constant 0 : index
      %14 = vector.load %arg8[%c0_10, %c0_11] : memref<128x8xf32, #tpu.memory_space<vmem>>, vector<128x8xf32>
      %c0_12 = arith.constant 0 : index
      %c0_13 = arith.constant 0 : index
      %15 = vector.load %arg5[%c0_12, %c0_13] : memref<1x8xf32, #tpu.memory_space<vmem>>, vector<1x8xf32>
      %16 = vector.broadcast %15 : vector<1x8xf32> to vector<128x8xf32>
      %17 = arith.addf %14, %16 : vector<128x8xf32>
      %cst_14 = arith.constant 5.000000e-01 : f32
      %18 = vector.broadcast %cst_14 : f32 to vector<128x8xf32>
      %19 = arith.mulf %18, %17 : vector<128x8xf32>
      %cst_15 = arith.constant 4.471500e-02 : f32
      %20 = vector.broadcast %cst_15 : f32 to vector<128x8xf32>
      %21 = arith.mulf %20, %17 : vector<128x8xf32>
      %22 = arith.mulf %21, %17 : vector<128x8xf32>
      %23 = arith.mulf %22, %17 : vector<128x8xf32>
      %24 = arith.addf %17, %23 : vector<128x8xf32>
      %cst_16 = arith.constant 0.797884583 : f32
      %25 = vector.broadcast %cst_16 : f32 to vector<128x8xf32>
      %26 = arith.mulf %25, %24 : vector<128x8xf32>
      %27 = math.tanh %26 : vector<128x8xf32>
      %cst_17 = arith.constant 1.000000e+00 : f32
      %28 = vector.broadcast %cst_17 : f32 to vector<128x8xf32>
      %29 = arith.addf %28, %27 : vector<128x8xf32>
      %30 = arith.mulf %19, %29 : vector<128x8xf32>
      %c0_18 = arith.constant 0 : index
      %c0_19 = arith.constant 0 : index
      %31 = vector.load %arg6[%c0_18, %c0_19] : memref<128x8xf32, #tpu.memory_space<vmem>>, vector<128x8xf32>
      %32 = arith.addf %30, %31 : vector<128x8xf32>
      %c0_20 = arith.constant 0 : index
      %c0_21 = arith.constant 0 : index
      %33 = vector.load %arg7[%c0_20, %c0_21] : memref<128x8xf32, #tpu.memory_space<vmem>>, vector<128x8xf32>
      tpu.vector_store %arg7[%c0_20, %c0_21], %32 {strides = array<i32>} : memref<128x8xf32, #tpu.memory_space<vmem>>, vector<128x8xf32>,
    } else {
    }
    return
  }
  func.func @transform_0(%arg0: i32, %arg1: i32, %arg2: i32) -> (i32, i32) {
    %c0_i32 = arith.constant 0 : i32
    return %arg0, %arg2 : i32, i32
  }
  func.func @transform_1(%arg0: i32, %arg1: i32, %arg2: i32) -> (i32, i32) {
    %c0_i32 = arith.constant 0 : i32
    return %arg2, %arg1 : i32, i32
  }
  func.func @transform_2(%arg0: i32, %arg1: i32, %arg2: i32) -> (i32, i32) {
    %c0_i32 = arith.constant 0 : i32
    %c0_i32_0 = arith.constant 0 : i32
    return %c0_i32, %arg1 : i32, i32
  }
  func.func @transform_3(%arg0: i32, %arg1: i32, %arg2: i32) -> (i32, i32) {
    %c0_i32 = arith.constant 0 : i32
    return %arg0, %arg1 : i32, i32
  }
  func.func @transform_4(%arg0: i32, %arg1: i32, %arg2: i32) -> (i32, i32) {
    %c0_i32 = arith.constant 0 : i32
    return %arg0, %arg1 : i32, i32
  }
}

module attributes {stable_mosaic.version = 11 : i64} {
  func.func @_mm_kernel(%arg0: i32, %arg1: i32, %arg2: i32, %arg3: memref<128x8xf32, #tpu.memory_space<vmem>>, %arg4: memref<8x32xf32, #tpu.memory_space<vmem>>, %arg5: memref<1x32xf32, #tpu.memory_space<vmem>>, %arg6: memref<128x32xf32, #tpu.memory_space<vmem>>, %arg7: memref<128x32xf32, #tpu.memory_space<vmem>>) attributes {dimension_semantics = [#tpu.dimension_semantics<parallel>, #tpu.dimension_semantics<parallel>, #tpu.dimension_semantics<arbitrary>], iteration_bounds = array<i64: 1, 1, 1>, scalar_prefetch = 0 : i64, scratch_operands = 1 : i64, tpu.core_type = #tpu.core_type<tc>, window_params = [{transform_indices = @transform_0, window_bounds = array<i64: 128, 8>}, {transform_indices = @transform_1, window_bounds = array<i64: 8, 32>}, {transform_indices = @transform_2, window_bounds = array<i64: 1, 32>}, {transform_indices = @transform_3, window_bounds = array<i64: 128, 32>}]} {
    %c0_i32 = arith.constant 0 : i32
    %0 = arith.cmpi eq, %arg2, %c0_i32 : i32
    %1 = arith.extui %0 : i1 to i32
    %c0_i32_0 = arith.constant 0 : i32
    %2 = arith.cmpi ne, %1, %c0_i32_0 : i32
    scf.if %2 {
      %cst_10 = arith.constant 0.000000e+00 : f32
      %14 = vector.broadcast %cst_10 : f32 to vector<128x32xf32>
      %c0_11 = arith.constant 0 : index
      %c0_12 = arith.constant 0 : index
      %15 = vector.load %arg7[%c0_11, %c0_12] : memref<128x32xf32, #tpu.memory_space<vmem>>, vector<128x32xf32>
      tpu.vector_store %arg7[%c0_11, %c0_12], %14 {strides = array<i32>} : memref<128x32xf32, #tpu.memory_space<vmem>>, vector<128x32xf32>,
    } else {
    }
    %c0 = arith.constant 0 : index
    %c0_1 = arith.constant 0 : index
    %3 = vector.load %arg7[%c0, %c0_1] : memref<128x32xf32, #tpu.memory_space<vmem>>, vector<128x32xf32>
    %c0_2 = arith.constant 0 : index
    %c0_3 = arith.constant 0 : index
    %4 = vector.load %arg3[%c0_2, %c0_3] : memref<128x8xf32, #tpu.memory_space<vmem>>, vector<128x8xf32>
    %5 = arith.truncf %4 : vector<128x8xf32> to vector<128x8xbf16>
    %c0_4 = arith.constant 0 : index
    %c0_5 = arith.constant 0 : index
    %6 = vector.load %arg4[%c0_4, %c0_5] : memref<8x32xf32, #tpu.memory_space<vmem>>, vector<8x32xf32>
    %7 = arith.truncf %6 : vector<8x32xf32> to vector<8x32xbf16>
    %cst = arith.constant dense<0.000000e+00> : vector<128x32xf32>
    %8 = tpu.matmul %5, %7, %cst {dimension_numbers = #tpu.dot_dimension_numbers<[1], [0], [0], [1], [0, 0, 1, 1], [], []>} : vector<128x8xbf16>, vector<8x32xbf16>, vector<128x32xf32> -> vector<128x32xf32>
    %9 = arith.addf %3, %8 : vector<128x32xf32>
    %c0_6 = arith.constant 0 : index
    %c0_7 = arith.constant 0 : index
    %10 = vector.load %arg7[%c0_6, %c0_7] : memref<128x32xf32, #tpu.memory_space<vmem>>, vector<128x32xf32>
    tpu.vector_store %arg7[%c0_6, %c0_7], %9 {strides = array<i32>} : memref<128x32xf32, #tpu.memory_space<vmem>>, vector<128x32xf32>,
    %c0_i32_8 = arith.constant 0 : i32
    %11 = arith.cmpi eq, %arg2, %c0_i32_8 : i32
    %12 = arith.extui %11 : i1 to i32
    %c0_i32_9 = arith.constant 0 : i32
    %13 = arith.cmpi ne, %12, %c0_i32_9 : i32
    scf.if %13 {
      %c0_10 = arith.constant 0 : index
      %c0_11 = arith.constant 0 : index
      %14 = vector.load %arg7[%c0_10, %c0_11] : memref<128x32xf32, #tpu.memory_space<vmem>>, vector<128x32xf32>
      %c0_12 = arith.constant 0 : index
      %c0_13 = arith.constant 0 : index
      %15 = vector.load %arg5[%c0_12, %c0_13] : memref<1x32xf32, #tpu.memory_space<vmem>>, vector<1x32xf32>
      %16 = vector.broadcast %15 : vector<1x32xf32> to vector<128x32xf32>
      %17 = arith.addf %14, %16 : vector<128x32xf32>
      %cst_14 = arith.constant 5.000000e-01 : f32
      %18 = vector.broadcast %cst_14 : f32 to vector<128x32xf32>
      %19 = arith.mulf %18, %17 : vector<128x32xf32>
      %cst_15 = arith.constant 4.471500e-02 : f32
      %20 = vector.broadcast %cst_15 : f32 to vector<128x32xf32>
      %21 = arith.mulf %20, %17 : vector<128x32xf32>
      %22 = arith.mulf %21, %17 : vector<128x32xf32>
      %23 = arith.mulf %22, %17 : vector<128x32xf32>
      %24 = arith.addf %17, %23 : vector<128x32xf32>
      %cst_16 = arith.constant 0.797884583 : f32
      %25 = vector.broadcast %cst_16 : f32 to vector<128x32xf32>
      %26 = arith.mulf %25, %24 : vector<128x32xf32>
      %27 = math.tanh %26 : vector<128x32xf32>
      %cst_17 = arith.constant 1.000000e+00 : f32
      %28 = vector.broadcast %cst_17 : f32 to vector<128x32xf32>
      %29 = arith.addf %28, %27 : vector<128x32xf32>
      %30 = arith.mulf %19, %29 : vector<128x32xf32>
      %c0_18 = arith.constant 0 : index
      %c0_19 = arith.constant 0 : index
      %31 = vector.load %arg6[%c0_18, %c0_19] : memref<128x32xf32, #tpu.memory_space<vmem>>, vector<128x32xf32>
      tpu.vector_store %arg6[%c0_18, %c0_19], %30 {strides = array<i32>} : memref<128x32xf32, #tpu.memory_space<vmem>>, vector<128x32xf32>,
    } else {
    }
    return
  }
  func.func @transform_0(%arg0: i32, %arg1: i32, %arg2: i32) -> (i32, i32) {
    %c0_i32 = arith.constant 0 : i32
    return %arg0, %arg2 : i32, i32
  }
  func.func @transform_1(%arg0: i32, %arg1: i32, %arg2: i32) -> (i32, i32) {
    %c0_i32 = arith.constant 0 : i32
    return %arg2, %arg1 : i32, i32
  }
  func.func @transform_2(%arg0: i32, %arg1: i32, %arg2: i32) -> (i32, i32) {
    %c0_i32 = arith.constant 0 : i32
    %c0_i32_0 = arith.constant 0 : i32
    return %c0_i32, %arg1 : i32, i32
  }
  func.func @transform_3(%arg0: i32, %arg1: i32, %arg2: i32) -> (i32, i32) {
    %c0_i32 = arith.constant 0 : i32
    return %arg0, %arg1 : i32, i32
  }
}

module attributes {stable_mosaic.version = 11 : i64} {
  func.func @_grouped_mm_kernel(%arg0: i32, %arg1: i32, %arg2: memref<1x512x36xf32, #tpu.memory_space<vmem>>, %arg3: memref<1x36x8xf32, #tpu.memory_space<vmem>>, %arg4: memref<1x1x8xf32, #tpu.memory_space<vmem>>, %arg5: memref<1x512x8xf32, #tpu.memory_space<vmem>>) attributes {dimension_semantics = [#tpu.dimension_semantics<parallel>, #tpu.dimension_semantics<parallel>], iteration_bounds = array<i64: 2, 1>, scalar_prefetch = 0 : i64, scratch_operands = 0 : i64, tpu.core_type = #tpu.core_type<tc>, window_params = [{transform_indices = @transform_0, window_bounds = array<i64: 1, 512, 36>}, {transform_indices = @transform_1, window_bounds = array<i64: 1, 36, 8>}, {transform_indices = @transform_2, window_bounds = array<i64: 1, 1, 8>}, {transform_indices = @transform_3, window_bounds = array<i64: 1, 512, 8>}]} {
    %c0 = arith.constant 0 : index
    %c0_0 = arith.constant 0 : index
    %c0_1 = arith.constant 0 : index
    %0 = vector.load %arg2[%c0, %c0_0, %c0_1] : memref<1x512x36xf32, #tpu.memory_space<vmem>>, vector<1x512x36xf32>
    %1 = vector.shape_cast %0 : vector<1x512x36xf32> to vector<512x36xf32>
    %2 = arith.truncf %1 : vector<512x36xf32> to vector<512x36xbf16>
    %c0_2 = arith.constant 0 : index
    %c0_3 = arith.constant 0 : index
    %c0_4 = arith.constant 0 : index
    %3 = vector.load %arg3[%c0_2, %c0_3, %c0_4] : memref<1x36x8xf32, #tpu.memory_space<vmem>>, vector<1x36x8xf32>
    %4 = vector.shape_cast %3 : vector<1x36x8xf32> to vector<36x8xf32>
    %5 = arith.truncf %4 : vector<36x8xf32> to vector<36x8xbf16>
    %cst = arith.constant dense<0.000000e+00> : vector<512x8xf32>
    %6 = tpu.matmul %2, %5, %cst {dimension_numbers = #tpu.dot_dimension_numbers<[1], [0], [0], [1], [0, 0, 1, 1], [], []>} : vector<512x36xbf16>, vector<36x8xbf16>, vector<512x8xf32> -> vector<512x8xf32>
    %c0_5 = arith.constant 0 : index
    %c0_6 = arith.constant 0 : index
    %c0_7 = arith.constant 0 : index
    %7 = vector.load %arg4[%c0_5, %c0_6, %c0_7] : memref<1x1x8xf32, #tpu.memory_space<vmem>>, vector<1x1x8xf32>
    %8 = vector.shape_cast %7 : vector<1x1x8xf32> to vector<1x8xf32>
    %9 = vector.broadcast %8 : vector<1x8xf32> to vector<512x8xf32>
    %10 = arith.addf %6, %9 : vector<512x8xf32>
    %c0_8 = arith.constant 0 : index
    %c0_9 = arith.constant 0 : index
    %c0_10 = arith.constant 0 : index
    %11 = vector.load %arg5[%c0_8, %c0_9, %c0_10] : memref<1x512x8xf32, #tpu.memory_space<vmem>>, vector<1x512x8xf32>
    %12 = vector.shape_cast %11 : vector<1x512x8xf32> to vector<512x8xf32>
    %13 = vector.shape_cast %10 : vector<512x8xf32> to vector<1x512x8xf32>
    tpu.vector_store %arg5[%c0_8, %c0_9, %c0_10], %13 {strides = array<i32>} : memref<1x512x8xf32, #tpu.memory_space<vmem>>, vector<1x512x8xf32>,
    return
  }
  func.func @transform_0(%arg0: i32, %arg1: i32) -> (i32, i32, i32) {
    %c0_i32 = arith.constant 0 : i32
    %c0_i32_0 = arith.constant 0 : i32
    return %arg0, %arg1, %c0_i32 : i32, i32, i32
  }
  func.func @transform_1(%arg0: i32, %arg1: i32) -> (i32, i32, i32) {
    %c0_i32 = arith.constant 0 : i32
    %c0_i32_0 = arith.constant 0 : i32
    %c0_i32_1 = arith.constant 0 : i32
    return %arg0, %c0_i32, %c0_i32_0 : i32, i32, i32
  }
  func.func @transform_2(%arg0: i32, %arg1: i32) -> (i32, i32, i32) {
    %c0_i32 = arith.constant 0 : i32
    %c0_i32_0 = arith.constant 0 : i32
    %c0_i32_1 = arith.constant 0 : i32
    return %arg0, %c0_i32, %c0_i32_0 : i32, i32, i32
  }
  func.func @transform_3(%arg0: i32, %arg1: i32) -> (i32, i32, i32) {
    %c0_i32 = arith.constant 0 : i32
    %c0_i32_0 = arith.constant 0 : i32
    return %arg0, %arg1, %c0_i32 : i32, i32, i32
  }
}

</mosaic_0001>

<bundles_post_ra>
// kernel: lsrformer_forward.11
= control target key start
LH: loop header
LB: loop body
LE: loop exit
PB: predicated region body
PF: predicated region fallthrough
CT: control target
= control target key end

     0   :  { %s656_s12 = smov 0   ;;  %s658_s13 = smov 0   ;;  %s764_s0 = inlined_call_operand.vmem [shape: f32[2,128,32], index: 0, kind: input, shape index: {}]   ;;  %s765_s1 = inlined_call_operand.vmem [shape: f32[2,32,4], index: 1, kind: input, shape index: {}]   ;;  %s766_s2 = inlined_call_operand.vmem [shape: f32[2,1,4], index: 2, kind: input, shape index: {}]   ;;  %s767_s3 = inlined_call_operand.vmem [shape: f32[2,128,4], index: 3, kind: output, shape index: {}]  }
   0x1   :  { %s660_s14 = smov 0  }
   0x2 LB: > { %s25_s15 = sadd.s32 1, %s630_s13  ;;  %p533_p0 = scmp.ge.s32.totalorder %s634_s14, 1  ;;  %s634_s14 = sphi %s660_s14, %s13_s14   ;;  %s630_s13 = sphi %s658_s13, %s769_s13   ;;  %s626_s12 = sphi %s656_s12, %s768_s12  }
   0x3   : > { %p27_p1 = scmp.ge.s32.totalorder %s25_s15, 2  ;;  %p176_p2 = scmp.lt.s32.totalorder %s634_s14, 3 }
   0x5   : > { %s771_s15 = smov (%p27_p1, %s25_s15), 0  ;;  %p177_p3 = pnand %p533_p0, %p176_p2 }
   0x6   : > { %p217_p4 = scmp.lt.s32.totalorder (!%p177_p3), %s626_s12, 1  ;;  %vm282_vm0 = vcmask (!%p177_p3), 261120   ;;  %vm404_vm1 = vcmask (!%p177_p3), 31744  }
   0x7   : > { %180 = sbr.rel (%p177_p3) target bundleno = 254 (0xfe), region = 32 }
   0xe   : > { %s773_s12 = smov (!%p217_p4, %s626_s12), 1 }
   0xf   : > { %s551_s16 = sshll.u32 %s773_s12, 7  ;;  %s552_s17 = sshll.u32 %s773_s12, 5 }
  0x10   : > { %s683_s20 = scalar_lea.vmem %s764_s0, %s551_s16  ;;  %s230_s23 = scalar_lea.vmem %s765_s1, %s552_s17 }
  0x11   : > { %v269_v0 = vld [vmem:[%s230_s23] sm:$0xff]  ;;  %v270_v1 = vld [vmem:[%s230_s23 + $0x8] sm:$0xff]  ;;  %v271_v2 = vld [vmem:[%s230_s23 + $0x10] sm:$0xff]  ;;  %s233_s26 = scalar_lea.vmem %s766_s2, %s773_s12  ;;  %s721_s29 = scalar_lea.vmem %s767_s3, %s551_s16 }
  0x12   : > { %v273_v3 = vpack.c.bf16 %v270_v1, %v269_v0  ;;  %v272_v4 = vld [vmem:[%s230_s23 + $0x18] sm:$0xff]  ;;  %v245_v5 = vld [vmem:[%s683_s20] sm:$0xff]  ;;  %v246_v7 = vld [vmem:[%s683_s20 + $0x8] sm:$0xff] }
  0x13   : > { %v274_v6 = vpack.c.bf16 %v272_v4, %v271_v2  ;;  %v253_v8 = vld [vmem:[%s683_s20 + $0x40] sm:$0xff]  ;;  %v254_v9 = vld [vmem:[%s683_s20 + $0x48] sm:$0xff]  ;;  %v261_v10 = vpack.c.bf16 %v246_v7, %v245_v5  ;;  %v247_v12 = vld [vmem:[%s683_s20 + $0x10] sm:$0xff] }
  0x14   : > { %564 = vmatprep.subr.bf16.mxu0 %v273_v3  ;;  %584 = vmatprep.subr.bf16.mxu1 %v273_v3  ;;  %v265_v11 = vpack.c.bf16 %v254_v9, %v253_v8  ;;  %v248_v13 = vld [vmem:[%s683_s20 + $0x18] sm:$0xff]  ;;  %v255_v14 = vld [vmem:[%s683_s20 + $0x50] sm:$0xff]  ;;  %v249_v16 = vld [vmem:[%s683_s20 + $0x20] sm:$0xff] }
  0x15   : > { %565 = vmatpush3.bf16.msra.mxu0 %v273_v3  ;;  %586 = vmatpush3.bf16.msra.mxu1 %v273_v3  ;;  %v256_v15 = vld [vmem:[%s683_s20 + $0x58] sm:$0xff]  ;;  %v250_v17 = vld [vmem:[%s683_s20 + $0x28] sm:$0xff]  ;;  %v257_v18 = vld [vmem:[%s683_s20 + $0x60] sm:$0xff]  ;;  %v262_v20 = vpack.c.bf16 %v248_v13, %v247_v12 }
  0x16   : > { %566 = vmatprep.subr.bf16.mxu0 %v274_v6  ;;  %585 = vmatprep.subr.bf16.mxu1 %v274_v6  ;;  %v258_v19 = vld [vmem:[%s683_s20 + $0x68] sm:$0xff]  ;;  %v266_v21 = vpack.c.bf16 %v256_v15, %v255_v14  ;;  %v263_v22 = vpack.c.bf16 %v250_v17, %v249_v16  ;;  %v251_v24 = vld [vmem:[%s683_s20 + $0x30] sm:$0xff]  ;;  %v252_v25 = vld [vmem:[%s683_s20 + $0x38] sm:$0xff] }
  0x17   : > { %568 = vmatprep.mubr.msk.bf16.mxu0 %vm282_vm0, %v261_v10  ;;  %576 = vmatprep.mubr.msk.bf16.mxu1 %vm282_vm0, %v265_v11  ;;  %v267_v23 = vpack.c.bf16 %v258_v19, %v257_v18  ;;  %v259_v26 = vld [vmem:[%s683_s20 + $0x70] sm:$0xff]  ;;  %v260_v27 = vld [vmem:[%s683_s20 + $0x78] sm:$0xff]  ;;  %v264_v28 = vpack.c.bf16 %v252_v25, %v251_v24  ;;  %v540_v30 = vld [vmem:[%s233_s26] ss:$0 sm:$0xff] }
  0x18   : > { %v268_v29 = vpack.c.bf16 %v260_v27, %v259_v26 }
  0x19   : > { %567 = vmatpush3.bf16.msra.mxu0 %v274_v6  ;;  %587 = vmatpush3.bf16.msra.mxu1 %v274_v6 }
  0x1c   : > { %569 = vmatmul.mubr.msk.bf16.vlgmr.msra.gmra.mrb[0].mxu0 %vm282_vm0, %v262_v20  ;;  %577 = vmatmul.mubr.msk.bf16.vlgmr.msra.gmra.mrb[0].mxu1 %vm282_vm0, %v266_v21 }
  0x1d   : > { %572 = vmatprep.mubr.msk.bf16.mxu0 %vm282_vm0, %v263_v22  ;;  %580 = vmatprep.mubr.msk.bf16.mxu1 %vm282_vm0, %v267_v23 }
  0x24   : > { %573 = vmatmul.mubr.msk.bf16.gmra.mrb[4].mxu0 %vm282_vm0, %v264_v28  ;;  %581 = vmatmul.mubr.msk.bf16.gmra.mrb[4].mxu1 %vm282_vm0, %v268_v29 }
  0xef   : > { %v570_v31 = vpop.f32.mrb[0].mxu0  ;;  %v578_v32 = vpop.f32.mrb[0].mxu1 }
  0xf0   : > { %v350_v33 = vadd.f32 %v570_v31, %v540_v30  ;;  %v382_v34 = vadd.f32 %v578_v32, %v540_v30  ;;  %v341_v35 = vpop.f32.mrb[1].mxu0  ;;  %v373_v36 = vpop.f32.mrb[1].mxu1 }
  0xf1   : > { %v342_v37 = vadd.f32 %v540_v30, %v341_v35  ;;  %v374_v38 = vadd.f32 %v540_v30, %v373_v36  ;;  %v571_v39 = vpop.f32.mrb[2].mxu0  ;;  %v579_v40 = vpop.f32.mrb[2].mxu1 }
  0xf2   : > { %407 = vst.msk [vmem:[%s721_s29 + $0x10] sm:$0xff] %vm404_vm1, %v350_v33  ;;  %415 = vst.msk [vmem:[%s721_s29 + $0x50] sm:$0xff] %vm404_vm1, %v382_v34  ;;  %v353_v41 = vadd.f32 %v571_v39, %v540_v30  ;;  %v385_v42 = vadd.f32 %v579_v40, %v540_v30  ;;  %v344_v43 = vpop.f32.mrb[3].mxu0  ;;  %v376_v44 = vpop.f32.mrb[3].mxu1 }
  0xf3   : > { %405 = vst.msk [vmem:[%s721_s29] sm:$0xff] %vm404_vm1, %v342_v37  ;;  %413 = vst.msk [vmem:[%s721_s29 + $0x40] sm:$0xff] %vm404_vm1, %v374_v38  ;;  %v345_v45 = vadd.f32 %v540_v30, %v344_v43  ;;  %v377_v46 = vadd.f32 %v540_v30, %v376_v44 }
  0xf4   : > { %408 = vst.msk [vmem:[%s721_s29 + $0x18] sm:$0xff] %vm404_vm1, %v353_v41  ;;  %416 = vst.msk [vmem:[%s721_s29 + $0x58] sm:$0xff] %vm404_vm1, %v385_v42 }
  0xf5   : > { %406 = vst.msk [vmem:[%s721_s29 + $0x8] sm:$0xff] %vm404_vm1, %v345_v45  ;;  %414 = vst.msk [vmem:[%s721_s29 + $0x48] sm:$0xff] %vm404_vm1, %v377_v46 }
  0xf7   : > { %v574_v47 = vpop.f32.mrb[4].mxu0  ;;  %v582_v48 = vpop.f32.mrb[4].mxu1 }
  0xf8   : > { %v366_v49 = vadd.f32 %v574_v47, %v540_v30  ;;  %v398_v50 = vadd.f32 %v582_v48, %v540_v30  ;;  %v357_v51 = vpop.f32.mrb[5].mxu0  ;;  %v389_v52 = vpop.f32.mrb[5].mxu1 }
  0xf9   : > { %v358_v53 = vadd.f32 %v540_v30, %v357_v51  ;;  %v390_v54 = vadd.f32 %v540_v30, %v389_v52  ;;  %v575_v55 = vpop.f32.mrb[6].mxu0  ;;  %v583_v56 = vpop.f32.mrb[6].mxu1 }
  0xfa   : > { %411 = vst.msk [vmem:[%s721_s29 + $0x30] sm:$0xff] %vm404_vm1, %v366_v49  ;;  %419 = vst.msk [vmem:[%s721_s29 + $0x70] sm:$0xff] %vm404_vm1, %v398_v50  ;;  %v369_v57 = vadd.f32 %v575_v55, %v540_v30  ;;  %v401_v58 = vadd.f32 %v583_v56, %v540_v30  ;;  %v360_v59 = vpop.f32.mrb[7].mxu0  ;;  %v392_v60 = vpop.f32.mrb[7].mxu1 }
  0xfb   : > { %409 = vst.msk [vmem:[%s721_s29 + $0x20] sm:$0xff] %vm404_vm1, %v358_v53  ;;  %417 = vst.msk [vmem:[%s721_s29 + $0x60] sm:$0xff] %vm404_vm1, %v390_v54  ;;  %v361_v61 = vadd.f32 %v540_v30, %v360_v59  ;;  %v393_v62 = vadd.f32 %v540_v30, %v392_v60 }
  0xfc   : > { %412 = vst.msk [vmem:[%s721_s29 + $0x38] sm:$0xff] %vm404_vm1, %v369_v57  ;;  %420 = vst.msk [vmem:[%s721_s29 + $0x78] sm:$0xff] %vm404_vm1, %v401_v58 }
  0xfd   : > { %410 = vst.msk [vmem:[%s721_s29 + $0x28] sm:$0xff] %vm404_vm1, %v361_v61  ;;  %418 = vst.msk [vmem:[%s721_s29 + $0x68] sm:$0xff] %vm404_vm1, %v393_v62 }
  0xfe PF: > { %s13_s14 = sadd.s32 1, %s634_s14   ;;  %s768_s12 = smov %s630_s13 }
  0xff   : > { %p10_p5 = scmp.ge.s32.totalorder %s13_s14, 4   ;;  %s769_s13 = smov %s771_s15 }
 0x101   :  { %12 = sbr.rel (!%p10_p5) target bundleno = 2 (0x2), region = 68 }

// kernel: lsrformer_forward.12
= control target key start
LH: loop header
LB: loop body
LE: loop exit
PB: predicated region body
PF: predicated region fallthrough
CT: control target
= control target key end

     0   :  { %vm19_vm0 = vcmask 64512   ;;  %v109_v0 = vmov 0.0   ;;  %vm110_vm1 = vmmov 0   ;;  %vm30_vm2 = vcmask 261120   ;;  %s155_s1 = inlined_call_operand.vmem [shape: f32[32,8], index: 1, kind: input, shape index: {}]   ;;  %s156_s0 = inlined_call_operand.vmem [shape: f32[8,32], index: 0, kind: input, shape index: {}]   ;;  %s157_s2 = inlined_call_operand.vmem [shape: f32[1,8], index: 2, kind: input, shape index: {}]   ;;  %s158_s3 = inlined_call_operand.vmem [shape: f32[8,8], index: 3, kind: output, shape index: {}]  }
   0x1   :  { %20 = vst.msk [vmem:[#allocation2] sm:$0xff] %vm19_vm0, %v109_v0  ;;  %99 = vmatprep.subr.bf16.mxu0 %v109_v0  ;;  %v24_v1 = vld [vmem:[%s155_s1] sm:$0xff]  ;;  %v25_v2 = vld [vmem:[%s155_s1 + $0x8] sm:$0xff]  ;;  %v26_v3 = vld [vmem:[%s155_s1 + $0x10] sm:$0xff]  ;;  %103 = vmatprep.mubr.msk.bf16.mxu0 %vm110_vm1, %v109_v0 }
   0x2   :  { %v28_v4 = vpack.c.bf16 %v25_v2, %v24_v1  ;;  %v27_v5 = vld [vmem:[%s155_s1 + $0x18] sm:$0xff]  ;;  %v22_v7 = vld [vmem:[%s156_s0] sm:$0xff] }
   0x3   :  { %v29_v6 = vpack.c.bf16 %v27_v5, %v26_v3  ;;  %v23_v8 = vpack.c.bf16 %v22_v7, %v22_v7  ;;  %v95_v15 = vld [vmem:[%s157_s2] ss:$0 sm:$0xff] }
   0x4   :  { %100 = vmatpush3.bf16.msra.mxu0 %v28_v4 }
   0x5   :  { %101 = vmatprep.subr.bf16.mxu0 %v109_v0 }
   0x8   :  { %102 = vmatpush3.bf16.msra.mxu0 %v29_v6  ;;  %v21_v9 = vld [vmem:[#allocation2] sm:$0xff] }
   0xb   :  { %104 = vmatmul.mubr.msk.bf16.vlgmr.msra.gmra.mrb[0].mxu0 %vm30_vm2, %v23_v8 }
  0xde   :  { %v68_v10 = vpop.f32.mrb[0].mxu0 }
  0xdf   :  { %v74_v11 = vadd.f32 %v68_v10, %v21_v9  ;;  %v105_v12 = vpop.f32.mrb[1].mxu0 }
  0xe0   :  { %v71_v13 = vpop.f32.mrb[2].mxu0 }
  0xe1   :  { %76 = vst.msk [vmem:[#allocation2] sm:$0xff] %vm19_vm0, %v74_v11  ;;  %v106_v14 = vpop.f32.mrb[3].mxu0 }
  0xe8   :  { %v80_v16 = vld [vmem:[#allocation2] sm:$0xff] }
  0xe9   :  { %v88_v17 = vadd.f32 %v95_v15, %v80_v16 }
  0xeb   :  { %89 = vst.msk [vmem:[%s158_s3] sm:$0xff] %vm19_vm0, %v88_v17 }

// kernel: lsrformer_forward.14
= control target key start
LH: loop header
LB: loop body
LE: loop exit
PB: predicated region body
PF: predicated region fallthrough
CT: control target
= control target key end

     0   :  { %v1302_v0 = vmov 0.0   ;;  %vm47_vm0 = vcmask 1043456   ;;  %vm1303_vm1 = vmmov 0   ;;  %vm43_vm2 = vcmask 64512   ;;  %s1306_s25 = smov 116   ;;  %s1307_s26 = smov 124   ;;  %s1540_s1 = inlined_call_operand.vmem [shape: f32[8,24], index: 1, kind: input, shape index: {}]   ;;  %s1541_s0 = inlined_call_operand.vmem [shape: f32[4,4,8], index: 0, kind: input, shape index: {}]   ;;  %s1542_s2 = inlined_call_operand.vmem [shape: f32[1,24], index: 2, kind: input, shape index: {}]   ;;  %s1543_s3 = inlined_call_operand.vmem [shape: f32[8,8], index: 3, kind: input, shape index: {}]   ;;  %s1544_s4 = inlined_call_operand.vmem [shape: f32[1,8], index: 4, kind: input, shape index: {}]   ;;  %s1545_s5 = inlined_call_operand.vmem [shape: f32[4,4,8], index: 5, kind: output, shape index: {}]  }
   0x1   :  { %1147 = vmatprep.subr.bf16.mxu0 %v1302_v0  ;;  %v34_v1 = vld [vmem:[%s1540_s1] sm:$0xff]  ;;  %1149 = vmatprep.mubr.msk.bf16.mxu0 %vm1303_vm1, %v1302_v0  ;;  %v1269_v4 = vld [vmem:[%s1541_s0 + $0x8] sm:$0xff]   ;;  %vm117_vm3 = vcmask 31744   ;;  %vm311_vm4 = vcmask 27648   ;;  %vm365_vm5 = vcmask 1041408   ;;  %s1308_s27 = smov 108  }
   0x2   :  { %v35_v2 = vpack.c.bf16 %v34_v1, %v34_v1  ;;  %1153 = vmatprep.subr.bf16.mxu1 %v1302_v0  ;;  %1155 = vmatprep.mubr.msk.bf16.mxu1 %vm1303_vm1, %v1302_v0  ;;  %v1268_v3 = vld [vmem:[%s1541_s0] sm:$0xff]   ;;  %s1304_s0 = smov 120   ;;  %vm1082_vm6 = vcmask 60416  }
   0x3   :  { %v33_v6 = vpack.c.bf16 %v1269_v4, %v1268_v3  ;;  %v1091_v7 = vld [vmem:[%s1542_s2] ss:$0 sm:$0xff]  ;;  %s1305_s2 = smov 112  }
   0x4   :  { %v49_v5 = vsel %vm47_vm0, %v35_v2, 0 }
   0x5   :  { %1148 = vmatpush3.bf16.msra.mxu0 %v49_v5 }
   0x6   :  { %1159 = vmatprep.subr.bf16.mxu0 %v1302_v0 }
   0x8   :  { %1150 = vmatmul.mubr.msk.bf16.vlgmr.msra.gmra.mrb[0].mxu0 %vm43_vm2, %v33_v6 }
   0x9   :  { %1161 = vmatprep.mubr.msk.bf16.mxu0 %vm1303_vm1, %v1302_v0 }
  0xdb   :  { %v85_v8 = vpop.f32.mrb[0].mxu0 }
  0xdc   :  { %v86_v9 = vadd.f32 %v1091_v7, %v85_v8  ;;  %v1151_v10 = vpop.f32.mrb[1].mxu0 }
  0xdd   :  { %v88_v11 = vpop.f32.mrb[2].mxu0 }
  0xde   :  { %v102_v12 = vcombine.high %v86_v9, %v86_v9  ;;  %v1363_v13 = vpack.c.bf16 %v86_v9, %v86_v9  ;;  %v89_v14 = vadd.f32 %v1091_v7, %v88_v11  ;;  %v1152_v15 = vpop.f32.mrb[3].mxu0  ;;  %v92_v22 = vmul.f32 0.5, %v86_v9 }
  0xe0   :  { %115 = vrot.lane.b32.xlu0 %v1363_v13, %s1304_s0  ;;  %v103_v16 = vcombine.high %v89_v14, %v89_v14  ;;  %v1366_v17 = vpack.c.bf16 %v89_v14, %v89_v14  ;;  %v1368_v18 = vpack.c.bf16 %v102_v12, %v102_v12  ;;  %v96_v26 = vcombine.high %v92_v22, %v92_v22 }
  0xe1   :  { %v1378_v27 = vpack.c.bf16 %v92_v22, %v92_v22  ;;  %v93_v31 = vmul.f32 0.5, %v89_v14 }
  0xe2   :  { %214 = vrot.lane.b32.xlu1 %v1366_v17, %s1304_s0  ;;  %v1372_v19 = vpack.c.bf16 %v103_v16, %v103_v16  ;;  %v1386_v30 = vpack.c.bf16 %v96_v26, %v96_v26 }
  0xe3   :  { %v97_v33 = vcombine.high %v93_v31, %v93_v31  ;;  %v1394_v34 = vpack.c.bf16 %v93_v31, %v93_v31 }
  0xe4   :  { %165 = vrot.lane.b32.xlu0 %v1368_v18, %s1304_s0 }
  0xe5   :  { %v1401_v35 = vpack.c.bf16 %v97_v33, %v97_v33 }
  0xe6   :  { %263 = vrot.lane.b32.xlu1 %v1372_v19, %s1304_s0 }
 0x152   :  { %v116_v20 = vpop.permute.xlu0 %115 }
 0x153   :  { %v122_v21 = vsel %vm117_vm3, %v116_v20, 0 }
 0x154   :  { %1154 = vmatpush3.bf16.xpose.msra.mxu1 %v122_v21  ;;  %v215_v23 = vpop.permute.xlu1 %214 }
 0x155   :  { %1165 = vmatprep.subr.bf16.mxu1 %v1302_v0  ;;  %v220_v28 = vsel %vm117_vm3, %v215_v23, 0 }
 0x156   :  { %v166_v24 = vpop.permute.xlu0 %165 }
 0x157   :  { %v171_v25 = vsel %vm117_vm3, %v166_v24, 0 }
 0x158   :  { %1160 = vmatpush3.bf16.xpose.msra.mxu0 %v171_v25  ;;  %v264_v29 = vpop.permute.xlu1 %263 }
 0x159   :  { %1171 = vmatprep.subr.bf16.mxu0 %v1302_v0  ;;  %v269_v32 = vsel %vm117_vm3, %v264_v29, 0 }
 0x15b   :  { %1156 = vmatmul.mubr.msk.bf16.vlgmr.msra.gmra.mrb[0].mxu1 %vm117_vm3, %v1378_v27 }
 0x15c   :  { %1166 = vmatpush3.bf16.xpose.msra.mxu1 %v220_v28  ;;  %1167 = vmatprep.mubr.msk.bf16.mxu1 %vm1303_vm1, %v1302_v0 }
 0x15d   :  { %1177 = vmatprep.subr.bf16.mxu1 %v1302_v0 }
 0x15f   :  { %1162 = vmatmul.mubr.msk.bf16.vlgmr.msra.gmra.mrb[4].mxu0 %vm117_vm3, %v1386_v30 }
 0x160   :  { %1172 = vmatpush3.bf16.xpose.msra.mxu0 %v269_v32  ;;  %1173 = vmatprep.mubr.msk.bf16.mxu0 %vm1303_vm1, %v1302_v0 }
 0x161   :  { %1183 = vmatprep.subr.bf16.mxu0 %v1302_v0 }
 0x163   :  { %1168 = vmatmul.mubr.msk.bf16.vlgmr.msra.gmra.mrb[4].mxu1 %vm117_vm3, %v1394_v34 }
 0x164   :  { %1179 = vmatprep.mubr.msk.bf16.mxu1 %vm1303_vm1, %v1302_v0 }
 0x167   :  { %1174 = vmatmul.mubr.msk.bf16.vlgmr.msra.gmra.mrb[8].mxu0 %vm117_vm3, %v1401_v35 }
 0x168   :  { %1185 = vmatprep.mubr.msk.bf16.mxu0 %vm1303_vm1, %v1302_v0 }
 0x22e   :  { %v158_v36 = vpop.f32.mrb[0].mxu1 }
 0x22f   :  { %v1157_v37 = vpop.f32.mrb[1].mxu1  ;;  %v312_v38 = vsel %vm311_vm4, %v158_v36, -inf }
 0x230   :  { %313 = vmax.xlane.f32.xlu0 %v312_v38  ;;  %v161_v39 = vpop.f32.mrb[2].mxu1 }
 0x231   :  { %v1158_v40 = vpop.f32.mrb[3].mxu1 }
 0x232   :  { %v207_v41 = vpop.f32.mrb[4].mxu0 }
 0x233   :  { %v1163_v42 = vpop.f32.mrb[5].mxu0  ;;  %v315_v43 = vsel %vm311_vm4, %v207_v41, -inf }
 0x234   :  { %316 = vmax.xlane.f32.xlu1 %v315_v43  ;;  %v210_v44 = vpop.f32.mrb[6].mxu0 }
 0x235   :  { %v1164_v45 = vpop.f32.mrb[7].mxu0 }
 0x236   :  { %v256_v46 = vpop.f32.mrb[4].mxu1 }
 0x237   :  { %v1169_v47 = vpop.f32.mrb[5].mxu1  ;;  %v318_v48 = vsel %vm311_vm4, %v256_v46, -inf }
 0x238   :  { %319 = vmax.xlane.f32.xlu0 %v318_v48  ;;  %v259_v49 = vpop.f32.mrb[6].mxu1 }
 0x239   :  { %v1170_v50 = vpop.f32.mrb[7].mxu1 }
 0x23a   :  { %v305_v51 = vpop.f32.mrb[8].mxu0 }
 0x23b   :  { %v1175_v52 = vpop.f32.mrb[9].mxu0  ;;  %v321_v53 = vsel %vm311_vm4, %v305_v51, -inf }
 0x23c   :  { %322 = vmax.xlane.f32.xlu0 %v321_v53  ;;  %v308_v54 = vpop.f32.mrb[10].mxu0 }
 0x23d   :  { %v1176_v55 = vpop.f32.mrb[11].mxu0 }
 0x245   :  { %360 = vrot.lane.b32.xlu1 %v1363_v13, %s1305_s2 }
 0x2bd   :  { %v314_v56 = vpop.xlane.xlu0 %313 }
 0x2be   :  { %v324_v57 = vsub.f32 %v158_v36, %v314_v56 }
 0x2c0   :  { %v328_v58 = vmul.f32 1.442695, %v324_v57 }
 0x2c1   :  { %v317_v59 = vpop.xlane.xlu1 %316 }
 0x2c2   :  { %1270 = vpow2.f32 %v328_v58  ;;  %v325_v60 = vsub.f32 %v207_v41, %v317_v59 }
 0x2c4   :  { %v330_v61 = vmul.f32 1.442695, %v325_v60 }
 0x2c5   :  { %v361_v62 = vpop.permute.xlu1 %360  ;;  %v320_v5 = vpop.xlane.xlu0 %319 }
 0x2c6   :  { %1272 = vpow2.f32 %v330_v61  ;;  %v367_v63 = vsel %vm365_vm5, %v361_v62, 0  ;;  %v326_v7 = vsub.f32 %v256_v46, %v320_v5 }
 0x2c7   :  { %1178 = vmatpush3.bf16.msra.mxu1 %v367_v63 }
 0x2c8   :  { %1189 = vmatprep.subr.bf16.mxu1 %v1302_v0  ;;  %v332_v9 = vmul.f32 1.442695, %v326_v7 }
 0x2c9   :  { %v323_v6 = vpop.xlane.xlu0 %322 }
 0x2ca   :  { %v327_v8 = vsub.f32 %v305_v51, %v323_v6  ;;  %1274 = vpow2.f32 %v332_v9 }
 0x2cc   :  { %v1271_v1 = vpop.eup %1270  ;;  %v334_v10 = vmul.f32 1.442695, %v327_v8 }
 0x2cd   :  { %v336_v2 = vsel %vm311_vm4, %v1271_v1, 0.0 }
 0x2ce   :  { %337 = vadd.xlane.f32.xlu1 %v336_v2  ;;  %1276 = vpow2.f32 %v334_v10 }
 0x2d0   :  { %v1273_v3 = vpop.eup %1272 }
 0x2d1   :  { %v339_v4 = vsel %vm311_vm4, %v1273_v3, 0.0 }
 0x2d2   :  { %340 = vadd.xlane.f32.xlu0 %v339_v4 }
 0x2d4   :  { %v1275_v11 = vpop.eup %1274 }
 0x2d5   :  { %v342_v14 = vsel %vm311_vm4, %v1275_v11, 0.0 }
 0x2d8   :  { %v1277_v12 = vpop.eup %1276 }
 0x2d9   :  { %v345_v15 = vsel %vm311_vm4, %v1277_v12, 0.0 }
 0x2df   :  { %457 = vrot.lane.b32.xlu1 %v1366_v17, %s1305_s2 }
 0x2e3   :  { %505 = vrot.lane.b32.xlu1 %v1372_v19, %s1305_s2 }
 0x2e8   :  { %409 = vrot.lane.b32.xlu0 %v1368_v18, %s1305_s2 }
 0x307   :  { %343 = vadd.xlane.f32.xlu1 %v342_v14  ;;  %346 = vadd.xlane.f32.xlu0 %v345_v15 }
 0x318   :  { %607 = vrot.lane.b32.xlu1 %v1368_v18, %s1306_s25 }
 0x31c   :  { %605 = vrot.lane.b32.xlu1 %v1386_v30, %s1307_s26 }
 0x31d   :  { %556 = vrot.lane.b32.xlu0 %v1363_v13, %s1306_s25 }
 0x320   :  { %709 = vrot.lane.b32.xlu1 %v1372_v19, %s1306_s25 }
 0x321   :  { %554 = vrot.lane.b32.xlu0 %v1378_v27, %s1307_s26 }
 0x324   :  { %707 = vrot.lane.b32.xlu1 %v1401_v35, %s1307_s26 }
 0x325   :  { %658 = vrot.lane.b32.xlu0 %v1366_v17, %s1306_s25 }
 0x329   :  { %656 = vrot.lane.b32.xlu0 %v1394_v34, %s1307_s26 }
 0x35b   :  { %v338_v16 = vpop.xlane.xlu1 %337 }
 0x35c   :  { %1278 = vrcp.f32 %v338_v16 }
 0x35f   :  { %v341_v20 = vpop.xlane.xlu0 %340  ;;  %v458_v24 = vpop.permute.xlu1 %457 }
 0x360   :  { %1280 = vrcp.f32 %v341_v20  ;;  %v463_v28 = vsel %vm365_vm5, %v458_v24, 0 }
 0x363   :  { %v410_v21 = vpop.permute.xlu0 %409  ;;  %v506_v30 = vpop.permute.xlu1 %505 }
 0x364   :  { %v415_v22 = vsel %vm365_vm5, %v410_v21, 0  ;;  %v511_v32 = vsel %vm365_vm5, %v506_v30, 0 }
 0x365   :  { %1184 = vmatpush3.bf16.msra.mxu0 %v415_v22 }
 0x366   :  { %v1279_v23 = vpop.eup %1278  ;;  %1195 = vmatprep.subr.bf16.mxu0 %v1302_v0 }
 0x367   :  { %v352_v25 = vmul.f32 %v1279_v23, %v1271_v1 }
 0x369   :  { %v356_v26 = vpack.c.bf16 %v352_v25, %v352_v25 }
 0x36a   :  { %v1281_v27 = vpop.eup %1280 }
 0x36b   :  { %v353_v29 = vmul.f32 %v1281_v27, %v1273_v3  ;;  %1180 = vmatmul.mubr.msk.bf16.vlgmr.msra.gmra.mrb[8].mxu1 %vm117_vm3, %v356_v26 }
 0x36c   :  { %1190 = vmatpush3.bf16.msra.mxu1 %v463_v28  ;;  %1191 = vmatprep.mubr.msk.bf16.mxu1 %vm1303_vm1, %v1302_v0 }
 0x36d   :  { %v357_v31 = vpack.c.bf16 %v353_v29, %v353_v29  ;;  %1201 = vmatprep.subr.bf16.mxu1 %v1302_v0 }
 0x36f   :  { %1186 = vmatmul.mubr.msk.bf16.vlgmr.msra.gmra.mrb[12].mxu0 %vm117_vm3, %v357_v31 }
 0x370   :  { %1196 = vmatpush3.bf16.msra.mxu0 %v511_v32  ;;  %1197 = vmatprep.mubr.msk.bf16.mxu0 %vm1303_vm1, %v1302_v0 }
 0x371   :  { %1207 = vmatprep.subr.bf16.mxu0 %v1302_v0 }
 0x394   :  { %v344_v33 = vpop.xlane.xlu1 %343  ;;  %v347_v34 = vpop.xlane.xlu0 %346 }
 0x395   :  { %1282 = vrcp.f32 %v344_v33 }
 0x396   :  { %1284 = vrcp.f32 %v347_v34 }
 0x398   :  { %v557_v35 = vpop.permute.xlu0 %556  ;;  %v608_v36 = vpop.permute.xlu1 %607 }
 0x399   :  { %v562_v44 = vsel %vm117_vm3, %v557_v35, 0  ;;  %v613_v46 = vsel %vm117_vm3, %v608_v36, 0 }
 0x39c   :  { %v555_v42 = vpop.permute.xlu0 %554  ;;  %v606_v45 = vpop.permute.xlu1 %605 }
 0x39f   :  { %v1283_v37 = vpop.eup %1282 }
 0x3a0   :  { %v1285_v38 = vpop.eup %1284  ;;  %v354_v39 = vmul.f32 %v1283_v37, %v1275_v11  ;;  %v659_v47 = vpop.permute.xlu0 %658 }
 0x3a1   :  { %v355_v40 = vmul.f32 %v1285_v38, %v1277_v12  ;;  %v710_v48 = vpop.permute.xlu1 %709  ;;  %v664_v49 = vsel %vm117_vm3, %v659_v47, 0 }
 0x3a2   :  { %v358_v41 = vpack.c.bf16 %v354_v39, %v354_v39  ;;  %v715_v50 = vsel %vm117_vm3, %v710_v48, 0 }
 0x3a3   :  { %v359_v43 = vpack.c.bf16 %v355_v40, %v355_v40 }
 0x3a4   :  { %1192 = vmatmul.mubr.msk.bf16.vlgmr.msra.gmra.mrb[12].mxu1 %vm117_vm3, %v358_v41  ;;  %v657_v51 = vpop.permute.xlu0 %656 }
 0x3a5   :  { %1198 = vmatmul.mubr.msk.bf16.vlgmr.msra.gmra.mrb[16].mxu0 %vm117_vm3, %v359_v43  ;;  %1202 = vmatpush3.bf16.xpose.msra.mxu1 %v562_v44  ;;  %v708_v52 = vpop.permute.xlu1 %707 }
 0x3a6   :  { %1208 = vmatpush3.bf16.xpose.msra.mxu0 %v613_v46  ;;  %1203 = vmatprep.mubr.msk.bf16.mxu1 %vm1303_vm1, %v1302_v0 }
 0x3a7   :  { %1209 = vmatprep.mubr.msk.bf16.mxu0 %vm1303_vm1, %v1302_v0  ;;  %1213 = vmatprep.subr.bf16.mxu1 %v1302_v0 }
 0x3a8   :  { %1219 = vmatprep.subr.bf16.mxu0 %v1302_v0 }
 0x3ac   :  { %1204 = vmatmul.mubr.msk.bf16.vlgmr.msra.gmra.mrb[16].mxu1 %vm117_vm3, %v555_v42 }
 0x3ad   :  { %1210 = vmatmul.mubr.msk.bf16.vlgmr.msra.gmra.mrb[20].mxu0 %vm117_vm3, %v606_v45  ;;  %1214 = vmatpush3.bf16.xpose.msra.mxu1 %v664_v49 }
 0x3ae   :  { %1220 = vmatpush3.bf16.xpose.msra.mxu0 %v715_v50  ;;  %1215 = vmatprep.mubr.msk.bf16.mxu1 %vm1303_vm1, %v1302_v0 }
 0x3af   :  { %1221 = vmatprep.mubr.msk.bf16.mxu0 %vm1303_vm1, %v1302_v0  ;;  %1225 = vmatprep.subr.bf16.mxu1 %v1302_v0 }
 0x3b0   :  { %1231 = vmatprep.subr.bf16.mxu0 %v1302_v0 }
 0x3b4   :  { %1216 = vmatmul.mubr.msk.bf16.vlgmr.msra.gmra.mrb[20].mxu1 %vm117_vm3, %v657_v51 }
 0x3b5   :  { %1222 = vmatmul.mubr.msk.bf16.vlgmr.msra.gmra.mrb[24].mxu0 %vm117_vm3, %v708_v52  ;;  %1227 = vmatprep.mubr.msk.bf16.mxu1 %vm1303_vm1, %v1302_v0 }
 0x3b6   :  { %1233 = vmatprep.mubr.msk.bf16.mxu0 %vm1303_vm1, %v1302_v0 }
 0x43e   :  { %v1467_v53 = vpop.f32.mrb[8].mxu1 }
 0x43f   :  { %v1181_v54 = vpop.f32.mrb[9].mxu1 }
 0x440   :  { %v406_v55 = vpop.f32.mrb[10].mxu1 }
 0x441   :  { %v1182_v56 = vpop.f32.mrb[11].mxu1 }
 0x442   :  { %v1469_v57 = vpop.f32.mrb[12].mxu0 }
 0x443   :  { %v1001_v58 = vcombine.low %v1467_v53, %v1469_v57  ;;  %v1187_v59 = vpop.f32.mrb[13].mxu0 }
 0x444   :  { %v454_v60 = vpop.f32.mrb[14].mxu0 }
 0x445   :  { %v1188_v61 = vpop.f32.mrb[15].mxu0 }
 0x477   :  { %v1473_v62 = vpop.f32.mrb[12].mxu1 }
 0x478   :  { %v1475_v63 = vpop.f32.mrb[16].mxu0  ;;  %v1193_v1 = vpop.f32.mrb[13].mxu1 }
 0x479   :  { %v1002_v2 = vcombine.low %v1473_v62, %v1475_v63  ;;  %v1199_v3 = vpop.f32.mrb[17].mxu0  ;;  %v502_v4 = vpop.f32.mrb[14].mxu1 }
 0x47a   :  { %v550_v5 = vpop.f32.mrb[18].mxu0  ;;  %v1194_v6 = vpop.f32.mrb[15].mxu1 }
 0x47b   :  { %v1200_v7 = vpop.f32.mrb[19].mxu0 }
 0x47f   :  { %v598_v8 = vpop.f32.mrb[16].mxu1 }
 0x480   :  { %v649_v9 = vpop.f32.mrb[20].mxu0  ;;  %v1205_v10 = vpop.f32.mrb[17].mxu1  ;;  %v757_v11 = vsel %vm311_vm4, %v598_v8, -inf }
 0x481   :  { %v1211_v12 = vpop.f32.mrb[21].mxu0  ;;  %758 = vmax.xlane.f32.xlu0 %v757_v11  ;;  %v601_v14 = vpop.f32.mrb[18].mxu1  ;;  %v760_v15 = vsel %vm311_vm4, %v649_v9, -inf }
 0x482   :  { %761 = vmax.xlane.f32.xlu1 %v760_v15  ;;  %v652_v16 = vpop.f32.mrb[22].mxu0  ;;  %v1206_v20 = vpop.f32.mrb[19].mxu1 }
 0x483   :  { %v1212_v21 = vpop.f32.mrb[23].mxu0 }
 0x487   :  { %v700_v22 = vpop.f32.mrb[20].mxu1 }
 0x488   :  { %v751_v23 = vpop.f32.mrb[24].mxu0  ;;  %v1217_v24 = vpop.f32.mrb[21].mxu1  ;;  %v763_v25 = vsel %vm311_vm4, %v700_v22, -inf }
 0x489   :  { %v1223_v26 = vpop.f32.mrb[25].mxu0  ;;  %764 = vmax.xlane.f32.xlu0 %v763_v25  ;;  %v703_v27 = vpop.f32.mrb[22].mxu1  ;;  %v766_v31 = vsel %vm311_vm4, %v751_v23, -inf }
 0x48a   :  { %v754_v28 = vpop.f32.mrb[26].mxu0  ;;  %v1218_v29 = vpop.f32.mrb[23].mxu1 }
 0x48b   :  { %v1224_v30 = vpop.f32.mrb[27].mxu0 }
 0x48d   :  { %767 = vmax.xlane.f32.xlu0 %v766_v31 }
 0x493   :  { %805 = vrot.lane.b32.xlu1 %v1363_v13, %s1308_s27 }
 0x50e   :  { %v759_v32 = vpop.xlane.xlu0 %758 }
 0x50f   :  { %v769_v33 = vsub.f32 %v598_v8, %v759_v32  ;;  %v762_v34 = vpop.xlane.xlu1 %761 }
 0x510   :  { %v770_v35 = vsub.f32 %v649_v9, %v762_v34 }
 0x511   :  { %v773_v36 = vmul.f32 1.442695, %v769_v33 }
 0x512   :  { %v775_v37 = vmul.f32 1.442695, %v770_v35 }
 0x513   :  { %1286 = vpow2.f32 %v773_v36  ;;  %v806_v38 = vpop.permute.xlu1 %805 }
 0x514   :  { %1288 = vpow2.f32 %v775_v37  ;;  %v811_v39 = vsel %vm365_vm5, %v806_v38, 0 }
 0x515   :  { %1226 = vmatpush3.bf16.msra.mxu1 %v811_v39 }
 0x516   :  { %v765_v40 = vpop.xlane.xlu0 %764  ;;  %1237 = vmatprep.subr.bf16.mxu1 %v1302_v0 }
 0x517   :  { %v771_v41 = vsub.f32 %v700_v22, %v765_v40 }
 0x519   :  { %v777_v42 = vmul.f32 1.442695, %v771_v41 }
 0x51a   :  { %v768_v43 = vpop.xlane.xlu0 %767 }
 0x51b   :  { %1290 = vpow2.f32 %v777_v42  ;;  %v772_v13 = vsub.f32 %v751_v23, %v768_v43 }
 0x51d   :  { %v1287_v44 = vpop.eup %1286  ;;  %v779_v45 = vmul.f32 1.442695, %v772_v13 }
 0x51e   :  { %v1289_v46 = vpop.eup %1288  ;;  %v781_v47 = vsel %vm311_vm4, %v1287_v44, 0.0 }
 0x51f   :  { %1292 = vpow2.f32 %v779_v45  ;;  %782 = vadd.xlane.f32.xlu1 %v781_v47  ;;  %v784_v48 = vsel %vm311_vm4, %v1289_v46, 0.0  ;;  %v1109_v45 = vld [vmem:[%s1544_s4] ss:$0 sm:$0xff] }
 0x520   :  { %785 = vadd.xlane.f32.xlu0 %v784_v48 }
 0x525   :  { %v1291_v49 = vpop.eup %1290 }
 0x526   :  { %v787_v50 = vsel %vm311_vm4, %v1291_v49, 0.0 }
 0x527   :  { %788 = vadd.xlane.f32.xlu1 %v787_v50 }
 0x529   :  { %v1293_v51 = vpop.eup %1292 }
 0x52a   :  { %v790_v52 = vsel %vm311_vm4, %v1293_v51, 0.0 }
 0x52b   :  { %791 = vadd.xlane.f32.xlu0 %v790_v52 }
 0x538   :  { %901 = vrot.lane.b32.xlu1 %v1366_v17, %s1308_s27  ;;  %v1020_v17 = vld [vmem:[%s1543_s3] sm:$0xff]  ;;  %s1309_s3 = smov 4  }
 0x539   :  { %v1021_v7 = vpack.c.bf16 %v1020_v17, %v1020_v17 }
 0x53b   :  { %v1033_v14 = vsel %vm47_vm0, %v1021_v7, 0 }
 0x53c   :  { %949 = vrot.lane.b32.xlu1 %v1372_v19, %s1308_s27 }
 0x541   :  { %853 = vrot.lane.b32.xlu0 %v1368_v18, %s1308_s27 }
 0x5ac   :  { %v783_v54 = vpop.xlane.xlu1 %782 }
 0x5ad   :  { %1294 = vrcp.f32 %v783_v54  ;;  %v786_v55 = vpop.xlane.xlu0 %785 }
 0x5ae   :  { %1296 = vrcp.f32 %v786_v55 }
 0x5b4   :  { %v789_v56 = vpop.xlane.xlu1 %788 }
 0x5b5   :  { %1298 = vrcp.f32 %v789_v56 }
 0x5b7   :  { %v1295_v59 = vpop.eup %1294 }
 0x5b8   :  { %v1297_v60 = vpop.eup %1296  ;;  %v797_v61 = vmul.f32 %v1295_v59, %v1287_v44  ;;  %v902_v1 = vpop.permute.xlu1 %901 }
 0x5b9   :  { %v792_v3 = vpop.xlane.xlu0 %791  ;;  %v798_v19 = vmul.f32 %v1297_v60, %v1289_v46  ;;  %v907_v18 = vsel %vm365_vm5, %v902_v1, 0 }
 0x5ba   :  { %1300 = vrcp.f32 %v792_v3  ;;  %v801_v4 = vpack.c.bf16 %v797_v61, %v797_v61 }
 0x5bb   :  { %v802_v10 = vpack.c.bf16 %v798_v19, %v798_v19 }
 0x5bc   :  { %1228 = vmatmul.mubr.msk.bf16.vlgmr.msra.gmra.mrb[24].mxu1 %vm117_vm3, %v801_v4  ;;  %v950_v8 = vpop.permute.xlu1 %949 }
 0x5bd   :  { %v854_v5 = vpop.permute.xlu0 %853  ;;  %1238 = vmatpush3.bf16.msra.mxu1 %v907_v18  ;;  %1239 = vmatprep.mubr.msk.bf16.mxu1 %vm1303_vm1, %v1302_v0  ;;  %v955_v12 = vsel %vm365_vm5, %v950_v8, 0 }
 0x5be   :  { %v859_v6 = vsel %vm365_vm5, %v854_v5, 0  ;;  %1249 = vmatprep.subr.bf16.mxu1 %v1302_v0 }
 0x5bf   :  { %1232 = vmatpush3.bf16.msra.mxu0 %v859_v6  ;;  %v1299_v9 = vpop.eup %1298 }
 0x5c0   :  { %1243 = vmatprep.subr.bf16.mxu0 %v1302_v0  ;;  %v799_v11 = vmul.f32 %v1299_v9, %v1291_v49 }
 0x5c2   :  { %1234 = vmatmul.mubr.msk.bf16.vlgmr.msra.gmra.mrb[28].mxu0 %vm117_vm3, %v802_v10  ;;  %v803_v15 = vpack.c.bf16 %v799_v11, %v799_v11 }
 0x5c3   :  { %1244 = vmatpush3.bf16.msra.mxu0 %v955_v12  ;;  %1245 = vmatprep.mubr.msk.bf16.mxu0 %vm1303_vm1, %v1302_v0 }
 0x5c4   :  { %v1301_v16 = vpop.eup %1300  ;;  %1240 = vmatmul.mubr.msk.bf16.vlgmr.msra.gmra.mrb[28].mxu1 %vm117_vm3, %v803_v15 }
 0x5c5   :  { %v800_v20 = vmul.f32 %v1301_v16, %v1293_v51  ;;  %1250 = vmatpush3.bf16.msra.mxu1 %v1033_v14  ;;  %1251 = vmatprep.mubr.msk.bf16.mxu1 %vm1303_vm1, %v1302_v0 }
 0x5c7   :  { %v804_v21 = vpack.c.bf16 %v800_v20, %v800_v20 }
 0x5ca   :  { %1246 = vmatmul.mubr.msk.bf16.vlgmr.msra.gmra.mrb[32].mxu0 %vm117_vm3, %v804_v21 }
 0x68f   :  { %v847_v22 = vpop.f32.mrb[24].mxu1 }
 0x690   :  { %v1229_v23 = vpop.f32.mrb[25].mxu1 }
 0x691   :  { %v850_v24 = vpop.f32.mrb[26].mxu1 }
 0x692   :  { %v1230_v25 = vpop.f32.mrb[27].mxu1 }
 0x695   :  { %v895_v26 = vpop.f32.mrb[28].mxu0 }
 0x696   :  { %v1009_v27 = vcombine.low %v847_v22, %v895_v26  ;;  %v1235_v28 = vpop.f32.mrb[29].mxu0 }
 0x697   :  { %v898_v29 = vpop.f32.mrb[30].mxu0  ;;  %v943_v31 = vpop.f32.mrb[28].mxu1 }
 0x698   :  { %v1236_v30 = vpop.f32.mrb[31].mxu0  ;;  %v1241_v32 = vpop.f32.mrb[29].mxu1 }
 0x699   :  { %v946_v33 = vpop.f32.mrb[30].mxu1 }
 0x69a   :  { %v1242_v34 = vpop.f32.mrb[31].mxu1 }
 0x69d   :  { %v991_v35 = vpop.f32.mrb[32].mxu0 }
 0x69e   :  { %v1010_v36 = vcombine.low %v943_v31, %v991_v35  ;;  %v1247_v37 = vpop.f32.mrb[33].mxu0 }
 0x69f   :  { %v994_v0 = vpop.f32.mrb[34].mxu0 }
 0x6a0   :  { %v1263_v38 = vpack.i.bf16 %v1010_v36, %v1009_v27  ;;  %v1248_v39 = vpop.f32.mrb[35].mxu0 }
 0x6a2   :  { %1264 = vrot.lane.b32.xlu0 %v1263_v38, %s1309_s3 }
 0x714   :  { %v1265_v40 = vpop.permute.xlu0 %1264 }
 0x715   :  { %v1267_v41 = vunpack.i.h.bf16 %v1265_v40  ;;  %v1266_v42 = vunpack.i.l.bf16 %v1265_v40 }
 0x717   :  { %v1018_v43 = vsel %vm117_vm3, %v1002_v2, %v1267_v41  ;;  %v1017_v13 = vsel %vm117_vm3, %v1001_v58, %v1266_v42 }
 0x718   :  { %v1019_v44 = vpack.c.bf16 %v1018_v43, %v1017_v13 }
 0x71a   :  { %1252 = vmatmul.mubr.msk.bf16.vlgmr.msra.gmra.mrb[32].mxu1 %vm43_vm2, %v1019_v44 }
 0x7ed   :  { %v1069_v46 = vpop.f32.mrb[32].mxu1 }
 0x7ee   :  { %v1070_v47 = vadd.f32 %v1109_v45, %v1069_v46  ;;  %v1253_v48 = vpop.f32.mrb[33].mxu1 }
 0x7ef   :  { %v1072_v49 = vpop.f32.mrb[34].mxu1 }
 0x7f0   :  { %v1078_v62 = vcombine.high %v1070_v47, %v1070_v47  ;;  %1083 = vst.msk [vmem:[%s1545_s5] sm:$0xf] %vm1082_vm6, %v1070_v47  ;;  %v1073_v53 = vadd.f32 %v1109_v45, %v1072_v49  ;;  %v1254_v57 = vpop.f32.mrb[35].mxu1 }
 0x7f2   :  { %1084 = vst.msk [vmem:[%s1545_s5 + $0x4] sm:$0xf] %vm1082_vm6, %v1078_v62  ;;  %v1079_v58 = vcombine.high %v1073_v53, %v1073_v53  ;;  %1085 = vst.msk [vmem:[%s1545_s5 + $0x8] sm:$0xf] %vm1082_vm6, %v1073_v53 }
 0x7f4   :  { %1086 = vst.msk [vmem:[%s1545_s5 + $0xc] sm:$0xf] %vm1082_vm6, %v1079_v58 }

// kernel: lsrformer_forward.15
= control target key start
LH: loop header
LB: loop body
LE: loop exit
PB: predicated region body
PF: predicated region fallthrough
CT: control target
= control target key end

     0   :  { %vm88_vm0 = vcmask 1043456   ;;  %vm63_vm1 = vcmask 64512   ;;  %v3237_v27 = vmov 0.0   ;;  %vm3238_vm2 = vmmov 0   ;;  %s3241_s21 = smov 116   ;;  %s3242_s22 = smov 124   ;;  %s4357_s1 = inlined_call_operand.vmem [shape: f32[8,24], index: 1, kind: input, shape index: {}]   ;;  %s4358_s0 = inlined_call_operand.vmem [shape: f32[8,16,8], index: 0, kind: input, shape index: {}]   ;;  %s4359_s2 = inlined_call_operand.vmem [shape: f32[1,24], index: 2, kind: input, shape index: {}]   ;;  %s4360_s5 = inlined_call_operand.vmem [shape: f32[2,16,16], index: 5, kind: input, shape index: {}]   ;;  %s4361_s3 = inlined_call_operand.vmem [shape: f32[8,8], index: 3, kind: input, shape index: {}]   ;;  %s4362_s4 = inlined_call_operand.vmem [shape: f32[1,8], index: 4, kind: input, shape index: {}]   ;;  %s4363_s6 = inlined_call_operand.vmem [shape: f32[1,8], index: 6, kind: input, shape index: {}]   ;;  %s4364_s7 = inlined_call_operand.vmem [shape: f32[1,8], index: 7, kind: input, shape index: {}]   ;;  %s4365_s8 = inlined_call_operand.vmem [shape: f32[8,16,8], index: 8, kind: output, shape index: {}]  }
   0x1   :  { %v54_v0 = vld [vmem:[%s4357_s1] sm:$0xff]  ;;  %v31_v2 = vld [vmem:[%s4358_s0 + $0x8] sm:$0xff]  ;;  %v32_v5 = vld [vmem:[%s4358_s0 + $0x10] sm:$0xff]  ;;  %vm226_vm3 = vcmask 31744   ;;  %vm624_vm4 = vcmask 130048   ;;  %s3243_s23 = smov 108  }
   0x2   :  { %v30_v1 = vld [vmem:[%s4358_s0] sm:$0xff]  ;;  %v55_v3 = vpack.c.bf16 %v54_v0, %v54_v0  ;;  %v33_v6 = vld [vmem:[%s4358_s0 + $0x18] sm:$0xff]  ;;  %v39_v8 = vld [vmem:[%s4358_s0 + $0x48] sm:$0xff] }
   0x3   :  { %v46_v4 = vpack.c.bf16 %v31_v2, %v30_v1  ;;  %v38_v7 = vld [vmem:[%s4358_s0 + $0x40] sm:$0xff]  ;;  %v40_v9 = vld [vmem:[%s4358_s0 + $0x50] sm:$0xff]  ;;  %v41_v10 = vld [vmem:[%s4358_s0 + $0x58] sm:$0xff]  ;;  %v47_v12 = vpack.c.bf16 %v33_v6, %v32_v5 }
   0x4   :  { %3026 = vmatprep.subr.msk.bf16.mxu0 %vm88_vm0, %v55_v3  ;;  %v90_v11 = vsel %vm88_vm0, %v55_v3, 0  ;;  %v50_v13 = vpack.c.bf16 %v39_v8, %v38_v7  ;;  %v34_v14 = vld [vmem:[%s4358_s0 + $0x20] sm:$0xff]  ;;  %v35_v15 = vld [vmem:[%s4358_s0 + $0x28] sm:$0xff]  ;;  %3027 = vmatprep.subr.msk.bf16.mxu1 %vm88_vm0, %v55_v3  ;;  %v51_v16 = vpack.c.bf16 %v41_v10, %v40_v9  ;;  %v36_v21 = vld [vmem:[%s4358_s0 + $0x30] sm:$0xff] }
   0x5   :  { %2798 = vmatprep.mubr.msk.bf16.mxu0 %vm63_vm1, %v46_v4  ;;  %2797 = vmatpush3.bf16.msra.mxu0 %v90_v11  ;;  %v48_v17 = vpack.c.bf16 %v35_v15, %v34_v14  ;;  %v42_v18 = vld [vmem:[%s4358_s0 + $0x60] sm:$0xff]  ;;  %v43_v19 = vld [vmem:[%s4358_s0 + $0x68] sm:$0xff]  ;;  %v37_v22 = vld [vmem:[%s4358_s0 + $0x38] sm:$0xff] }
   0x6   :  { %3025 = vmatpush3.bf16.msra.mxu1 %v90_v11  ;;  %2806 = vmatprep.mubr.msk.bf16.mxu1 %vm63_vm1, %v50_v13  ;;  %v52_v20 = vpack.c.bf16 %v43_v19, %v42_v18  ;;  %v44_v23 = vld [vmem:[%s4358_s0 + $0x70] sm:$0xff]  ;;  %v45_v24 = vld [vmem:[%s4358_s0 + $0x78] sm:$0xff]  ;;  %v49_v25 = vpack.c.bf16 %v37_v22, %v36_v21  ;;  %v2660_v28 = vld [vmem:[%s4359_s2] ss:$0 sm:$0xff]  ;;  %s3239_s0 = smov 120   ;;  %s3240_s2 = smov 112  }
   0x7   :  { %v53_v26 = vpack.c.bf16 %v45_v24, %v44_v23  ;;  %2814 = vmatprep.subr.bf16.mxu1 %v3237_v27  ;;  %2838 = vmatprep.subr.bf16.mxu0 %v3237_v27 }
   0x8   :  { %2799 = vmatmul.mubr.msk.bf16.vlgmr.msra.gmra.mrb[0].mxu0 %vm63_vm1, %v47_v12 }
   0x9   :  { %2807 = vmatmul.mubr.msk.bf16.vlgmr.msra.gmra.mrb[0].mxu1 %vm63_vm1, %v51_v16  ;;  %2802 = vmatprep.mubr.msk.bf16.mxu0 %vm63_vm1, %v48_v17 }
   0xa   :  { %2810 = vmatprep.mubr.msk.bf16.mxu1 %vm63_vm1, %v52_v20 }
  0x10   :  { %2803 = vmatmul.mubr.msk.bf16.gmra.mrb[4].mxu0 %vm63_vm1, %v49_v25 }
  0x11   :  { %2811 = vmatmul.mubr.msk.bf16.gmra.mrb[4].mxu1 %vm63_vm1, %v53_v26  ;;  %2840 = vmatprep.mubr.msk.bf16.mxu0 %vm3238_vm2, %v3237_v27 }
  0x12   :  { %2816 = vmatprep.mubr.msk.bf16.mxu1 %vm3238_vm2, %v3237_v27 }
  0xdb   :  { %v2800_v29 = vpop.f32.mrb[0].mxu0 }
  0xdc   :  { %v135_v30 = vadd.f32 %v2800_v29, %v2660_v28  ;;  %v126_v31 = vpop.f32.mrb[1].mxu0  ;;  %v2808_v32 = vpop.f32.mrb[0].mxu1 }
  0xdd   :  { %v127_v33 = vadd.f32 %v2660_v28, %v126_v31  ;;  %v2801_v34 = vpop.f32.mrb[2].mxu0  ;;  %v167_v35 = vadd.f32 %v2808_v32, %v2660_v28  ;;  %v158_v36 = vpop.f32.mrb[1].mxu1 }
  0xde   :  { %v191_v37 = vmul.f32 0.5, %v135_v30  ;;  %v138_v38 = vadd.f32 %v2801_v34, %v2660_v28  ;;  %v129_v39 = vpop.f32.mrb[3].mxu0  ;;  %v159_v40 = vadd.f32 %v2660_v28, %v158_v36  ;;  %v2809_v41 = vpop.f32.mrb[2].mxu1 }
  0xdf   :  { %v189_v42 = vmul.f32 0.5, %v127_v33  ;;  %v130_v43 = vadd.f32 %v2660_v28, %v129_v39  ;;  %v199_v44 = vmul.f32 0.5, %v167_v35  ;;  %v170_v45 = vadd.f32 %v2809_v41, %v2660_v28  ;;  %v161_v46 = vpop.f32.mrb[3].mxu1 }
  0xe0   :  { %v192_v47 = vmul.f32 0.5, %v138_v38  ;;  %v3361_v48 = vpack.c.bf16 %v138_v38, %v135_v30  ;;  %v197_v49 = vmul.f32 0.5, %v159_v40  ;;  %v162_v50 = vadd.f32 %v2660_v28, %v161_v46 }
  0xe1   :  { %v190_v51 = vmul.f32 0.5, %v130_v43  ;;  %v3363_v52 = vpack.c.bf16 %v130_v43, %v127_v33  ;;  %v200_v53 = vmul.f32 0.5, %v170_v45  ;;  %v3365_v54 = vpack.c.bf16 %v170_v45, %v167_v35 }
  0xe2   :  { %v3367_v55 = vpack.c.bf16 %v192_v47, %v191_v37  ;;  %v198_v56 = vmul.f32 0.5, %v162_v50  ;;  %v3369_v57 = vpack.c.bf16 %v162_v50, %v159_v40 }
  0xe3   :  { %v3371_v58 = vpack.c.bf16 %v190_v51, %v189_v42  ;;  %v3373_v59 = vpack.c.bf16 %v200_v53, %v199_v44  ;;  %v2804_v60 = vpop.f32.mrb[4].mxu0  ;;  %224 = vrot.lane.b32.xlu0 %v3363_v52, %s3239_s0 }
  0xe4   :  { %v151_v61 = vadd.f32 %v2804_v60, %v2660_v28  ;;  %v3377_v62 = vpack.c.bf16 %v198_v56, %v197_v49  ;;  %v142_v63 = vpop.f32.mrb[5].mxu0  ;;  %v2812_v0 = vpop.f32.mrb[4].mxu1  ;;  %v3470_v49 = vld [vmem:[%s4360_s5] sm:$0xff] }
  0xe5   :  { %v143_v1 = vadd.f32 %v2660_v28, %v142_v63  ;;  %v2805_v2 = vpop.f32.mrb[6].mxu0  ;;  %v183_v3 = vadd.f32 %v2812_v0, %v2660_v28  ;;  %v174_v4 = vpop.f32.mrb[5].mxu1  ;;  %v3480_v63 = vld [vmem:[%s4360_s5 + $0x8] sm:$0xff] }
  0xe6   :  { %v195_v5 = vmul.f32 0.5, %v151_v61  ;;  %v154_v6 = vadd.f32 %v2805_v2, %v2660_v28  ;;  %v145_v7 = vpop.f32.mrb[7].mxu0  ;;  %v175_v8 = vadd.f32 %v2660_v28, %v174_v4  ;;  %v2813_v9 = vpop.f32.mrb[6].mxu1 }
  0xe7   :  { %v193_v10 = vmul.f32 0.5, %v143_v1  ;;  %v146_v11 = vadd.f32 %v2660_v28, %v145_v7  ;;  %v203_v12 = vmul.f32 0.5, %v183_v3  ;;  %275 = vrot.lane.b32.xlu0 %v3361_v48, %s3239_s0  ;;  %v186_v13 = vadd.f32 %v2813_v9, %v2660_v28  ;;  %v177_v14 = vpop.f32.mrb[7].mxu1 }
  0xe8   :  { %v196_v15 = vmul.f32 0.5, %v154_v6  ;;  %v3381_v16 = vpack.c.bf16 %v154_v6, %v151_v61  ;;  %v201_v17 = vmul.f32 0.5, %v175_v8  ;;  %v178_v18 = vadd.f32 %v2660_v28, %v177_v14 }
  0xe9   :  { %v194_v19 = vmul.f32 0.5, %v146_v11  ;;  %v3383_v20 = vpack.c.bf16 %v146_v11, %v143_v1  ;;  %v204_v21 = vmul.f32 0.5, %v186_v13  ;;  %v3385_v22 = vpack.c.bf16 %v186_v13, %v183_v3 }
  0xea   :  { %v3387_v23 = vpack.c.bf16 %v196_v15, %v195_v5  ;;  %v202_v24 = vmul.f32 0.5, %v178_v18  ;;  %v3389_v25 = vpack.c.bf16 %v178_v18, %v175_v8 }
  0xeb   :  { %v3391_v26 = vpack.c.bf16 %v194_v19, %v193_v10  ;;  %v3393_v29 = vpack.c.bf16 %v204_v21, %v203_v12  ;;  %325 = vrot.lane.b32.xlu1 %v3383_v20, %s3239_s0  ;;  %425 = vrot.lane.b32.xlu0 %v3369_v57, %s3239_s0 }
  0xec   :  { %v3399_v28 = vpack.c.bf16 %v202_v24, %v201_v17 }
  0xef   :  { %375 = vrot.lane.b32.xlu1 %v3381_v16, %s3239_s0  ;;  %525 = vrot.lane.b32.xlu0 %v3389_v25, %s3239_s0 }
  0xf3   :  { %475 = vrot.lane.b32.xlu1 %v3365_v54, %s3239_s0  ;;  %856 = vrot.lane.b32.xlu0 %v3361_v48, %s3240_s2 }
  0xf7   :  { %575 = vrot.lane.b32.xlu1 %v3385_v22, %s3239_s0 }
  0xfb   :  { %809 = vrot.lane.b32.xlu1 %v3363_v52, %s3240_s2 }
  0xff   :  { %950 = vrot.lane.b32.xlu1 %v3381_v16, %s3240_s2 }
 0x103   :  { %903 = vrot.lane.b32.xlu1 %v3383_v20, %s3240_s2 }
 0x155   :  { %v225_v30 = vpop.permute.xlu0 %224 }
 0x156   :  { %v231_v31 = vsel %vm226_vm3, %v225_v30, 0 }
 0x157   :  { %2815 = vmatpush3.bf16.xpose.msra.mxu1 %v231_v31 }
 0x158   :  { %2820 = vmatprep.subr.bf16.mxu1 %v3237_v27 }
 0x159   :  { %v276_v32 = vpop.permute.xlu0 %275 }
 0x15a   :  { %v281_v35 = vsel %vm226_vm3, %v276_v32, 0 }
 0x15d   :  { %v326_v33 = vpop.permute.xlu1 %325  ;;  %v426_v34 = vpop.permute.xlu0 %425 }
 0x15e   :  { %v431_v36 = vsel %vm226_vm3, %v426_v34, 0  ;;  %2817 = vmatmul.mubr.msk.bf16.vlgmr.msra.gmra.mrb[8].mxu1 %vm226_vm3, %v3371_v58  ;;  %v331_v39 = vsel %vm226_vm3, %v326_v33, 0 }
 0x15f   :  { %2821 = vmatpush3.bf16.xpose.msra.mxu1 %v281_v35  ;;  %2839 = vmatpush3.bf16.xpose.msra.mxu0 %v431_v36 }
 0x160   :  { %2822 = vmatprep.mubr.msk.bf16.mxu1 %vm3238_vm2, %v3237_v27  ;;  %2826 = vmatprep.subr.bf16.mxu1 %v3237_v27 }
 0x161   :  { %v376_v37 = vpop.permute.xlu1 %375  ;;  %2850 = vmatprep.subr.bf16.mxu0 %v3237_v27  ;;  %v526_v38 = vpop.permute.xlu0 %525 }
 0x162   :  { %v531_v40 = vsel %vm226_vm3, %v526_v38, 0  ;;  %v381_v44 = vsel %vm226_vm3, %v376_v37, 0 }
 0x165   :  { %v476_v41 = vpop.permute.xlu1 %475  ;;  %v857_v47 = vpop.permute.xlu0 %856 }
 0x166   :  { %2823 = vmatmul.mubr.msk.bf16.vlgmr.msra.gmra.mrb[12].mxu1 %vm226_vm3, %v3367_v55  ;;  %2841 = vmatmul.mubr.msk.bf16.vlgmr.msra.gmra.mrb[8].mxu0 %vm226_vm3, %v3377_v62  ;;  %v481_v45 = vsel %vm226_vm3, %v476_v41, 0 }
 0x167   :  { %2827 = vmatpush3.bf16.xpose.msra.mxu1 %v331_v39  ;;  %2851 = vmatpush3.bf16.xpose.msra.mxu0 %v531_v40 }
 0x168   :  { %2828 = vmatprep.mubr.msk.bf16.mxu1 %vm3238_vm2, %v3237_v27  ;;  %2852 = vmatprep.mubr.msk.bf16.mxu0 %vm3238_vm2, %v3237_v27 }
 0x169   :  { %v576_v42 = vpop.permute.xlu1 %575  ;;  %2832 = vmatprep.subr.bf16.mxu1 %v3237_v27  ;;  %2862 = vmatprep.subr.bf16.mxu0 %v3237_v27 }
 0x16a   :  { %v581_v46 = vsel %vm226_vm3, %v576_v42, 0 }
 0x16d   :  { %v810_v43 = vpop.permute.xlu1 %809 }
 0x16e   :  { %2829 = vmatmul.mubr.msk.bf16.vlgmr.msra.gmra.mrb[16].mxu1 %vm226_vm3, %v3391_v26  ;;  %2853 = vmatmul.mubr.msk.bf16.vlgmr.msra.gmra.mrb[12].mxu0 %vm226_vm3, %v3399_v28 }
 0x16f   :  { %2833 = vmatpush3.bf16.xpose.msra.mxu1 %v381_v44  ;;  %2863 = vmatpush3.bf16.msra.mxu0 %v810_v43 }
 0x170   :  { %2834 = vmatprep.mubr.msk.bf16.mxu1 %vm3238_vm2, %v3237_v27  ;;  %2844 = vmatprep.subr.bf16.mxu1 %v3237_v27 }
 0x171   :  { %2864 = vmatprep.mubr.msk.bf16.mxu0 %vm3238_vm2, %v3237_v27  ;;  %2874 = vmatprep.subr.bf16.mxu0 %v3237_v27 }
 0x176   :  { %2835 = vmatmul.mubr.msk.bf16.vlgmr.msra.gmra.mrb[20].mxu1 %vm226_vm3, %v3387_v23 }
 0x177   :  { %2845 = vmatpush3.bf16.xpose.msra.mxu1 %v481_v45  ;;  %2846 = vmatprep.mubr.msk.bf16.mxu1 %vm3238_vm2, %v3237_v27 }
 0x178   :  { %2856 = vmatprep.subr.bf16.mxu1 %v3237_v27 }
 0x17e   :  { %2847 = vmatmul.mubr.msk.bf16.vlgmr.msra.gmra.mrb[24].mxu1 %vm226_vm3, %v3373_v59 }
 0x17f   :  { %2857 = vmatpush3.bf16.xpose.msra.mxu1 %v581_v46  ;;  %2858 = vmatprep.mubr.msk.bf16.mxu1 %vm3238_vm2, %v3237_v27 }
 0x180   :  { %2868 = vmatprep.subr.bf16.mxu1 %v3237_v27 }
 0x186   :  { %2859 = vmatmul.mubr.msk.bf16.vlgmr.msra.gmra.mrb[28].mxu1 %vm226_vm3, %v3393_v29 }
 0x187   :  { %2869 = vmatpush3.bf16.msra.mxu1 %v857_v47  ;;  %2870 = vmatprep.mubr.msk.bf16.mxu1 %vm3238_vm2, %v3237_v27 }
 0x188   :  { %2880 = vmatprep.subr.bf16.mxu1 %v3237_v27 }
 0x231   :  { %v267_v50 = vpop.f32.mrb[8].mxu1 }
 0x232   :  { %v3473_v51 = vadd.f32 %v267_v50, %v3470_v49  ;;  %v2818_v53 = vpop.f32.mrb[9].mxu1 }
 0x233   :  { %v270_v56 = vpop.f32.mrb[10].mxu1 }
 0x234   :  { %v2819_v60 = vpop.f32.mrb[11].mxu1  ;;  %v625_v61 = vsel %vm624_vm4, %v3473_v51, -inf  ;;  %v3486_v7 = vadd.f32 %v270_v56, %v3480_v63 }
 0x235   :  { %626 = vmax.xlane.f32.xlu0 %v625_v61 }
 0x236   :  { %v628_v14 = vsel %vm624_vm4, %v3486_v7, -inf }
 0x239   :  { %v317_v0 = vpop.f32.mrb[12].mxu1  ;;  %v467_v1 = vpop.f32.mrb[8].mxu0 }
 0x23a   :  { %v3483_v2 = vadd.f32 %v467_v1, %v3470_v49  ;;  %v2824_v3 = vpop.f32.mrb[13].mxu1  ;;  %v2842_v4 = vpop.f32.mrb[9].mxu0  ;;  %v3494_v12 = vadd.f32 %v317_v0, %v3470_v49 }
 0x23b   :  { %v320_v5 = vpop.f32.mrb[14].mxu1  ;;  %v470_v6 = vpop.f32.mrb[10].mxu0 }
 0x23c   :  { %v3489_v8 = vadd.f32 %v470_v6, %v3480_v63  ;;  %v2825_v9 = vpop.f32.mrb[15].mxu1  ;;  %v2843_v10 = vpop.f32.mrb[11].mxu0  ;;  %v649_v11 = vsel %vm624_vm4, %v3483_v2, -inf  ;;  %v3501_v18 = vadd.f32 %v320_v5, %v3480_v63  ;;  %v631_v30 = vsel %vm624_vm4, %v3494_v12, -inf }
 0x23d   :  { %650 = vmax.xlane.f32.xlu1 %v649_v11 }
 0x23e   :  { %v652_v13 = vsel %vm624_vm4, %v3489_v8, -inf  ;;  %v634_v38 = vsel %vm624_vm4, %v3501_v18, -inf }
 0x23f   :  { %653 = vmax.xlane.f32.xlu0 %v652_v13 }
 0x241   :  { %v567_v15 = vpop.f32.mrb[12].mxu0  ;;  %629 = vmax.xlane.f32.xlu1 %v628_v14  ;;  %v367_v17 = vpop.f32.mrb[16].mxu1 }
 0x242   :  { %v3504_v19 = vadd.f32 %v567_v15, %v3470_v49  ;;  %v2830_v21 = vpop.f32.mrb[17].mxu1  ;;  %v2854_v24 = vpop.f32.mrb[13].mxu0  ;;  %v3509_v33 = vadd.f32 %v367_v17, %v3470_v49 }
 0x243   :  { %v570_v31 = vpop.f32.mrb[14].mxu0  ;;  %632 = vmax.xlane.f32.xlu0 %v631_v30  ;;  %v370_v32 = vpop.f32.mrb[18].mxu1 }
 0x244   :  { %v2831_v34 = vpop.f32.mrb[19].mxu1  ;;  %v2855_v35 = vpop.f32.mrb[15].mxu0  ;;  %v661_v36 = vsel %vm624_vm4, %v3504_v19, -inf  ;;  %v3514_v37 = vadd.f32 %v570_v31, %v3480_v63  ;;  %v637_v39 = vsel %vm624_vm4, %v3509_v33, -inf  ;;  %v3521_v41 = vadd.f32 %v370_v32, %v3480_v63 }
 0x245   :  { %662 = vmax.xlane.f32.xlu1 %v661_v36 }
 0x246   :  { %v664_v44 = vsel %vm624_vm4, %v3514_v37, -inf  ;;  %v640_v53 = vsel %vm624_vm4, %v3521_v41, -inf }
 0x247   :  { %635 = vmax.xlane.f32.xlu0 %v634_v38 }
 0x249   :  { %638 = vmax.xlane.f32.xlu1 %v637_v39  ;;  %v417_v40 = vpop.f32.mrb[20].mxu1 }
 0x24a   :  { %v3524_v42 = vadd.f32 %v417_v40, %v3470_v49  ;;  %v2836_v43 = vpop.f32.mrb[21].mxu1 }
 0x24b   :  { %665 = vmax.xlane.f32.xlu0 %v664_v44  ;;  %v420_v45 = vpop.f32.mrb[22].mxu1 }
 0x24c   :  { %v2837_v46 = vpop.f32.mrb[23].mxu1  ;;  %v643_v47 = vsel %vm624_vm4, %v3524_v42, -inf  ;;  %v3531_v50 = vadd.f32 %v420_v45, %v3480_v63 }
 0x24d   :  { %644 = vmax.xlane.f32.xlu1 %v643_v47 }
 0x24e   :  { %v646_v0 = vsel %vm624_vm4, %v3531_v50, -inf }
 0x24f   :  { %641 = vmax.xlane.f32.xlu0 %v640_v53 }
 0x251   :  { %v517_v56 = vpop.f32.mrb[24].mxu1 }
 0x252   :  { %v3536_v60 = vadd.f32 %v517_v56, %v3470_v49  ;;  %v2848_v61 = vpop.f32.mrb[25].mxu1 }
 0x253   :  { %647 = vmax.xlane.f32.xlu0 %v646_v0  ;;  %v520_v1 = vpop.f32.mrb[26].mxu1 }
 0x254   :  { %v3541_v3 = vadd.f32 %v520_v1, %v3480_v63  ;;  %v2849_v4 = vpop.f32.mrb[27].mxu1  ;;  %v655_v5 = vsel %vm624_vm4, %v3536_v60, -inf }
 0x255   :  { %656 = vmax.xlane.f32.xlu1 %v655_v5 }
 0x256   :  { %v658_v6 = vsel %vm624_vm4, %v3541_v3, -inf }
 0x257   :  { %659 = vmax.xlane.f32.xlu0 %v658_v6 }
 0x259   :  { %v617_v9 = vpop.f32.mrb[28].mxu1 }
 0x25a   :  { %v3548_v10 = vadd.f32 %v617_v9, %v3470_v49  ;;  %v2860_v11 = vpop.f32.mrb[29].mxu1  ;;  %v3561_v49 = vpop.permute.xlu1 %950 }
 0x25b   :  { %v620_v13 = vpop.f32.mrb[30].mxu1 }
 0x25c   :  { %v3551_v14 = vadd.f32 %v620_v13, %v3480_v63  ;;  %v2861_v15 = vpop.f32.mrb[31].mxu1  ;;  %v667_v17 = vsel %vm624_vm4, %v3548_v10, -inf }
 0x25d   :  { %668 = vmax.xlane.f32.xlu1 %v667_v17 }
 0x25e   :  { %v670_v21 = vsel %vm624_vm4, %v3551_v14, -inf  ;;  %v3564_v31 = vpop.permute.xlu1 %903 }
 0x25f   :  { %671 = vmax.xlane.f32.xlu0 %v670_v21 }
 0x26e   :  { %1044 = vrot.lane.b32.xlu1 %v3365_v54, %s3240_s2 }
 0x275   :  { %997 = vrot.lane.b32.xlu0 %v3369_v57, %s3240_s2 }
 0x2c2   :  { %v627_v24 = vpop.xlane.xlu0 %626 }
 0x2c3   :  { %v673_v63 = vsub.f32 %v3473_v51, %v627_v24 }
 0x2c5   :  { %v689_v30 = vmul.f32 1.442695, %v673_v63 }
 0x2c7   :  { %3077 = vpow2.f32 %v689_v30 }
 0x2ca   :  { %v651_v32 = vpop.xlane.xlu1 %650 }
 0x2cb   :  { %v681_v34 = vsub.f32 %v3483_v2, %v651_v32 }
 0x2cc   :  { %v654_v35 = vpop.xlane.xlu0 %653 }
 0x2cd   :  { %v705_v36 = vmul.f32 1.442695, %v681_v34  ;;  %v682_v38 = vsub.f32 %v3489_v8, %v654_v35 }
 0x2ce   :  { %v630_v39 = vpop.xlane.xlu1 %629 }
 0x2cf   :  { %3079 = vpow2.f32 %v705_v36  ;;  %v674_v40 = vsub.f32 %v3486_v7, %v630_v39  ;;  %v707_v43 = vmul.f32 1.442695, %v682_v38 }
 0x2d0   :  { %v633_v44 = vpop.xlane.xlu0 %632 }
 0x2d1   :  { %v3569_v45 = vpop.eup %3077  ;;  %v691_v51 = vmul.f32 1.442695, %v674_v40  ;;  %v675_v46 = vsub.f32 %v3494_v12, %v633_v44 }
 0x2d2   :  { %v663_v47 = vpop.xlane.xlu1 %662  ;;  %v721_v53 = vsel %vm624_vm4, %v3569_v45, 0.0 }
 0x2d3   :  { %3081 = vpow2.f32 %v691_v51  ;;  %v693_v2 = vmul.f32 1.442695, %v675_v46  ;;  %v685_v56 = vsub.f32 %v3504_v19, %v663_v47  ;;  %722 = vadd.xlane.f32.xlu1 %v721_v53 }
 0x2d4   :  { %3083 = vpow2.f32 %v707_v43  ;;  %v636_v8 = vpop.xlane.xlu0 %635 }
 0x2d5   :  { %3085 = vpow2.f32 %v693_v2  ;;  %v713_v7 = vmul.f32 1.442695, %v685_v56  ;;  %v676_v61 = vsub.f32 %v3501_v18, %v636_v8 }
 0x2d6   :  { %v639_v0 = vpop.xlane.xlu1 %638 }
 0x2d7   :  { %3087 = vpow2.f32 %v713_v7  ;;  %v695_v1 = vmul.f32 1.442695, %v676_v61  ;;  %v677_v12 = vsub.f32 %v3509_v33, %v639_v0 }
 0x2d8   :  { %v666_v4 = vpop.xlane.xlu0 %665 }
 0x2d9   :  { %v3577_v5 = vpop.eup %3079  ;;  %3089 = vpow2.f32 %v695_v1  ;;  %v697_v6 = vmul.f32 1.442695, %v677_v12  ;;  %v686_v9 = vsub.f32 %v3514_v37, %v666_v4 }
 0x2da   :  { %v645_v19 = vpop.xlane.xlu1 %644  ;;  %v745_v11 = vsel %vm624_vm4, %v3577_v5, 0.0 }
 0x2db   :  { %3091 = vpow2.f32 %v697_v6  ;;  %v715_v13 = vmul.f32 1.442695, %v686_v9  ;;  %v679_v18 = vsub.f32 %v3524_v42, %v645_v19  ;;  %746 = vadd.xlane.f32.xlu1 %v745_v11 }
 0x2dc   :  { %v642_v15 = vpop.xlane.xlu0 %641 }
 0x2dd   :  { %v3583_v17 = vpop.eup %3081  ;;  %3093 = vpow2.f32 %v715_v13  ;;  %v701_v33 = vmul.f32 1.442695, %v679_v18  ;;  %v678_v21 = vsub.f32 %v3521_v41, %v642_v15 }
 0x2de   :  { %v3586_v24 = vpop.eup %3083  ;;  %v724_v37 = vsel %vm624_vm4, %v3583_v17, 0.0 }
 0x2df   :  { %v3590_v63 = vpop.eup %3085  ;;  %3095 = vpow2.f32 %v701_v33  ;;  %v699_v30 = vmul.f32 1.442695, %v678_v21  ;;  %725 = vadd.xlane.f32.xlu0 %v724_v37  ;;  %v748_v36 = vsel %vm624_vm4, %v3586_v24, 0.0 }
 0x2e0   :  { %v648_v32 = vpop.xlane.xlu0 %647  ;;  %v727_v42 = vsel %vm624_vm4, %v3590_v63, 0.0 }
 0x2e1   :  { %v3594_v34 = vpop.eup %3087  ;;  %3097 = vpow2.f32 %v699_v30  ;;  %v680_v35 = vsub.f32 %v3531_v50, %v648_v32  ;;  %728 = vadd.xlane.f32.xlu1 %v727_v42 }
 0x2e2   :  { %v657_v41 = vpop.xlane.xlu1 %656  ;;  %v757_v44 = vsel %vm624_vm4, %v3594_v34, 0.0 }
 0x2e3   :  { %v3599_v38 = vpop.eup %3089  ;;  %v703_v39 = vmul.f32 1.442695, %v680_v35  ;;  %v683_v40 = vsub.f32 %v3536_v60, %v657_v41  ;;  %749 = vadd.xlane.f32.xlu0 %v748_v36 }
 0x2e4   :  { %v660_v43 = vpop.xlane.xlu0 %659  ;;  %v730_v47 = vsel %vm624_vm4, %v3599_v38, 0.0 }
 0x2e5   :  { %v3604_v51 = vpop.eup %3091  ;;  %3099 = vpow2.f32 %v703_v39  ;;  %v709_v46 = vmul.f32 1.442695, %v683_v40  ;;  %v684_v50 = vsub.f32 %v3541_v3, %v660_v43  ;;  %758 = vadd.xlane.f32.xlu1 %v757_v44 }
 0x2e6   :  { %v733_v60 = vsel %vm624_vm4, %v3604_v51, 0.0 }
 0x2e7   :  { %v3609_v53 = vpop.eup %3093  ;;  %3101 = vpow2.f32 %v709_v46  ;;  %v711_v2 = vmul.f32 1.442695, %v684_v50  ;;  %731 = vadd.xlane.f32.xlu0 %v730_v47 }
 0x2e8   :  { %v760_v8 = vsel %vm624_vm4, %v3609_v53, 0.0 }
 0x2e9   :  { %v3613_v56 = vpop.eup %3095  ;;  %3103 = vpow2.f32 %v711_v2  ;;  %734 = vadd.xlane.f32.xlu1 %v733_v60 }
 0x2ea   :  { %v739_v7 = vsel %vm624_vm4, %v3613_v56, 0.0  ;;  %v669_v19 = vpop.xlane.xlu1 %668 }
 0x2eb   :  { %v3617_v3 = vpop.eup %3097  ;;  %761 = vadd.xlane.f32.xlu0 %v760_v8  ;;  %v687_v11 = vsub.f32 %v3548_v10, %v669_v19 }
 0x2ec   :  { %v736_v61 = vsel %vm624_vm4, %v3617_v3, 0.0  ;;  %v672_v13 = vpop.xlane.xlu0 %671 }
 0x2ed   :  { %740 = vadd.xlane.f32.xlu1 %v739_v7  ;;  %v717_v18 = vmul.f32 1.442695, %v687_v11  ;;  %v688_v15 = vsub.f32 %v3551_v14, %v672_v13 }
 0x2ef   :  { %v3623_v0 = vpop.eup %3099  ;;  %737 = vadd.xlane.f32.xlu0 %v736_v61  ;;  %3105 = vpow2.f32 %v717_v18  ;;  %v719_v33 = vmul.f32 1.442695, %v688_v15 }
 0x2f0   :  { %v742_v4 = vsel %vm624_vm4, %v3623_v0, 0.0 }
 0x2f1   :  { %v3625_v1 = vpop.eup %3101  ;;  %3107 = vpow2.f32 %v719_v33 }
 0x2f2   :  { %v751_v12 = vsel %vm624_vm4, %v3625_v1, 0.0 }
 0x2f3   :  { %v3631_v6 = vpop.eup %3103  ;;  %752 = vadd.xlane.f32.xlu1 %v751_v12  ;;  %743 = vadd.xlane.f32.xlu0 %v742_v4 }
 0x2f4   :  { %v754_v9 = vsel %vm624_vm4, %v3631_v6, 0.0 }
 0x2f7   :  { %755 = vadd.xlane.f32.xlu0 %v754_v9 }
 0x2f9   :  { %v3641_v21 = vpop.eup %3105 }
 0x2fa   :  { %v763_v37 = vsel %vm624_vm4, %v3641_v21, 0.0 }
 0x2fb   :  { %v3645_v30 = vpop.eup %3107 }
 0x2fc   :  { %v766_v32 = vsel %vm624_vm4, %v3645_v30, 0.0 }
 0x304   :  { %1138 = vrot.lane.b32.xlu1 %v3385_v22, %s3240_s2 }
 0x30d   :  { %1091 = vrot.lane.b32.xlu0 %v3389_v25, %s3240_s2 }
 0x328   :  { %764 = vadd.xlane.f32.xlu1 %v763_v37 }
 0x32c   :  { %767 = vadd.xlane.f32.xlu0 %v766_v32 }
 0x339   :  { %1243 = vrot.lane.b32.xlu1 %v3361_v48, %s3241_s21 }
 0x33d   :  { %1295 = vrot.lane.b32.xlu1 %v3383_v20, %s3241_s21 }
 0x341   :  { %1347 = vrot.lane.b32.xlu1 %v3381_v16, %s3241_s21 }
 0x342   :  { %1191 = vrot.lane.b32.xlu0 %v3363_v52, %s3241_s21 }
 0x345   :  { %1399 = vrot.lane.b32.xlu1 %v3369_v57, %s3241_s21 }
 0x346   :  { %1189 = vrot.lane.b32.xlu0 %v3371_v58, %s3242_s22 }
 0x349   :  { %1451 = vrot.lane.b32.xlu1 %v3365_v54, %s3241_s21 }
 0x34a   :  { %1241 = vrot.lane.b32.xlu0 %v3367_v55, %s3242_s22  ;;  %v3667_v55 = vpop.permute.xlu1 %1044 }
 0x34d   :  { %1503 = vrot.lane.b32.xlu1 %v3389_v25, %s3241_s21 }
 0x34e   :  { %1293 = vrot.lane.b32.xlu0 %v3391_v26, %s3242_s22  ;;  %v998_v26 = vpop.permute.xlu0 %997 }
 0x351   :  { %1555 = vrot.lane.b32.xlu1 %v3385_v22, %s3241_s21 }
 0x352   :  { %1345 = vrot.lane.b32.xlu0 %v3387_v23, %s3242_s22 }
 0x355   :  { %1553 = vrot.lane.b32.xlu1 %v3393_v29, %s3242_s22 }
 0x356   :  { %1397 = vrot.lane.b32.xlu0 %v3377_v62, %s3242_s22 }
 0x359   :  { %1788 = vrot.lane.b32.xlu1 %v3363_v52, %s3243_s23 }
 0x35a   :  { %1449 = vrot.lane.b32.xlu0 %v3373_v59, %s3242_s22 }
 0x35e   :  { %1501 = vrot.lane.b32.xlu0 %v3399_v28, %s3242_s22 }
 0x360   :  { %v723_v58 = vpop.xlane.xlu1 %722 }
 0x361   :  { %3109 = vrcp.f32 %v723_v58 }
 0x368   :  { %v747_v10 = vpop.xlane.xlu1 %746 }
 0x36b   :  { %v3110_v35 = vpop.eup %3109 }
 0x36c   :  { %v726_v14 = vpop.xlane.xlu0 %725  ;;  %v785_v59 = vmul.f32 %v3110_v35, %v3569_v45 }
 0x36d   :  { %3111 = vrcp.f32 %v726_v14 }
 0x36e   :  { %v729_v23 = vpop.xlane.xlu1 %728 }
 0x36f   :  { %3113 = vrcp.f32 %v729_v23 }
 0x370   :  { %v750_v29 = vpop.xlane.xlu0 %749 }
 0x372   :  { %v759_v42 = vpop.xlane.xlu1 %758 }
 0x374   :  { %v732_v62 = vpop.xlane.xlu0 %731 }
 0x375   :  { %3115 = vrcp.f32 %v732_v62 }
 0x376   :  { %v735_v41 = vpop.xlane.xlu1 %734 }
 0x377   :  { %v3112_v52 = vpop.eup %3111  ;;  %3117 = vrcp.f32 %v735_v41 }
 0x378   :  { %v786_v28 = vmul.f32 %v3112_v52, %v3583_v17  ;;  %v762_v36 = vpop.xlane.xlu0 %761 }
 0x379   :  { %v3114_v43 = vpop.eup %3113 }
 0x37a   :  { %v801_v39 = vpack.c.bf16 %v786_v28, %v785_v59  ;;  %v741_v44 = vpop.xlane.xlu1 %740  ;;  %v787_v45 = vmul.f32 %v3114_v43, %v3590_v63 }
 0x37c   :  { %2865 = vmatmul.mubr.msk.bf16.vlgmr.msra.gmra.mrb[16].mxu0 %vm624_vm4, %v801_v39  ;;  %v738_v40 = vpop.xlane.xlu0 %737 }
 0x37d   :  { %2875 = vmatpush3.bf16.msra.mxu0 %v3564_v31  ;;  %3119 = vrcp.f32 %v738_v40  ;;  %2876 = vmatprep.mubr.msk.bf16.mxu0 %vm3238_vm2, %v3237_v27 }
 0x37e   :  { %2886 = vmatprep.subr.bf16.mxu0 %v3237_v27  ;;  %3121 = vrcp.f32 %v741_v44 }
 0x37f   :  { %v3116_v46 = vpop.eup %3115  ;;  %3123 = vrcp.f32 %v750_v29 }
 0x380   :  { %v788_v17 = vmul.f32 %v3116_v46, %v3599_v38  ;;  %v744_v50 = vpop.xlane.xlu0 %743  ;;  %v753_v60 = vpop.xlane.xlu1 %752 }
 0x381   :  { %3125 = vrcp.f32 %v744_v50  ;;  %v3118_v2 = vpop.eup %3117 }
 0x382   :  { %v802_v47 = vpack.c.bf16 %v788_v17, %v787_v45  ;;  %3127 = vrcp.f32 %v747_v10  ;;  %v789_v38 = vmul.f32 %v3118_v2, %v3604_v51 }
 0x384   :  { %2871 = vmatmul.mubr.msk.bf16.vlgmr.msra.gmra.mrb[32].mxu1 %vm624_vm4, %v802_v47  ;;  %v756_v31 = vpop.xlane.xlu0 %755 }
 0x385   :  { %2881 = vmatpush3.bf16.msra.mxu1 %v3561_v49  ;;  %2882 = vmatprep.mubr.msk.bf16.mxu1 %vm3238_vm2, %v3237_v27  ;;  %3129 = vrcp.f32 %v756_v31 }
 0x386   :  { %2892 = vmatprep.subr.bf16.mxu1 %v3237_v27  ;;  %3131 = vrcp.f32 %v753_v60 }
 0x387   :  { %v3120_v63 = vpop.eup %3119  ;;  %3133 = vrcp.f32 %v762_v36 }
 0x388   :  { %v790_v8 = vmul.f32 %v3120_v63, %v3617_v3  ;;  %v3122_v7 = vpop.eup %3121  ;;  %3135 = vrcp.f32 %v759_v42 }
 0x389   :  { %v3124_v12 = vpop.eup %3123  ;;  %v791_v9 = vmul.f32 %v3122_v7, %v3613_v56 }
 0x38a   :  { %v803_v61 = vpack.c.bf16 %v790_v8, %v789_v38  ;;  %v794_v51 = vmul.f32 %v3124_v12, %v3586_v24  ;;  %v1092_v24 = vpop.permute.xlu0 %1091 }
 0x38b   :  { %v3126_v4 = vpop.eup %3125 }
 0x38c   :  { %2877 = vmatmul.mubr.msk.bf16.vlgmr.msra.gmra.mrb[20].mxu0 %vm624_vm4, %v803_v61  ;;  %v3128_v49 = vpop.eup %3127  ;;  %v792_v19 = vmul.f32 %v3126_v4, %v3623_v0 }
 0x38d   :  { %2887 = vmatpush3.bf16.msra.mxu0 %v998_v26  ;;  %2888 = vmatprep.mubr.msk.bf16.mxu0 %vm3238_vm2, %v3237_v27  ;;  %v793_v13 = vmul.f32 %v3128_v49, %v3577_v5 }
 0x38e   :  { %2898 = vmatprep.subr.bf16.mxu0 %v3237_v27  ;;  %v804_v3 = vpack.c.bf16 %v792_v19, %v791_v9 }
 0x38f   :  { %v3130_v11 = vpop.eup %3129  ;;  %v805_v56 = vpack.c.bf16 %v794_v51, %v793_v13 }
 0x390   :  { %2883 = vmatmul.mubr.msk.bf16.vlgmr.msra.gmra.mrb[36].mxu1 %vm624_vm4, %v804_v3  ;;  %v3132_v18 = vpop.eup %3131  ;;  %v796_v15 = vmul.f32 %v3130_v11, %v3631_v6  ;;  %v1139_v6 = vpop.permute.xlu1 %1138 }
 0x391   :  { %2893 = vmatpush3.bf16.msra.mxu1 %v3667_v55  ;;  %2894 = vmatprep.mubr.msk.bf16.mxu1 %vm3238_vm2, %v3237_v27  ;;  %v3134_v0 = vpop.eup %3133  ;;  %v795_v5 = vmul.f32 %v3132_v18, %v3625_v1 }
 0x392   :  { %2904 = vmatprep.subr.bf16.mxu1 %v3237_v27  ;;  %v3136_v33 = vpop.eup %3135  ;;  %v798_v37 = vmul.f32 %v3134_v0, %v3609_v53 }
 0x393   :  { %v806_v32 = vpack.c.bf16 %v796_v15, %v795_v5  ;;  %v797_v55 = vmul.f32 %v3136_v33, %v3594_v34 }
 0x394   :  { %2889 = vmatmul.mubr.msk.bf16.vlgmr.msra.gmra.mrb[24].mxu0 %vm624_vm4, %v805_v56 }
 0x395   :  { %2899 = vmatpush3.bf16.msra.mxu0 %v1092_v24  ;;  %2900 = vmatprep.mubr.msk.bf16.mxu0 %vm3238_vm2, %v3237_v27  ;;  %v807_v58 = vpack.c.bf16 %v798_v37, %v797_v55 }
 0x396   :  { %2910 = vmatprep.subr.bf16.mxu0 %v3237_v27 }
 0x398   :  { %2895 = vmatmul.mubr.msk.bf16.vlgmr.msra.gmra.mrb[40].mxu1 %vm624_vm4, %v806_v32 }
 0x399   :  { %2905 = vmatpush3.bf16.msra.mxu1 %v1139_v6  ;;  %2906 = vmatprep.mubr.msk.bf16.mxu1 %vm3238_vm2, %v3237_v27 }
 0x39a   :  { %2916 = vmatprep.subr.bf16.mxu1 %v3237_v27 }
 0x39c   :  { %2901 = vmatmul.mubr.msk.bf16.vlgmr.msra.gmra.mrb[28].mxu0 %vm624_vm4, %v807_v58 }
 0x39d   :  { %2912 = vmatprep.mubr.msk.bf16.mxu0 %vm3238_vm2, %v3237_v27 }
 0x3b5   :  { %v765_v53 = vpop.xlane.xlu1 %764 }
 0x3b6   :  { %3137 = vrcp.f32 %v765_v53 }
 0x3b9   :  { %v1244_v1 = vpop.permute.xlu1 %1243  ;;  %v768_v26 = vpop.xlane.xlu0 %767 }
 0x3ba   :  { %3139 = vrcp.f32 %v768_v26  ;;  %v1249_v39 = vsel %vm226_vm3, %v1244_v1, 0 }
 0x3bd   :  { %v1296_v34 = vpop.permute.xlu1 %1295  ;;  %v1192_v10 = vpop.permute.xlu0 %1191 }
 0x3be   :  { %v1197_v14 = vsel %vm226_vm3, %v1192_v10, 0  ;;  %v1301_v28 = vsel %vm226_vm3, %v1296_v34, 0  ;;  %v3790_v10 = vld [vmem:[%s4360_s5 + $0x10] sm:$0xff] }
 0x3bf   :  { %2911 = vmatpush3.bf16.xpose.msra.mxu0 %v1197_v14 }
 0x3c0   :  { %2922 = vmatprep.subr.bf16.mxu0 %v3237_v27  ;;  %v3138_v42 = vpop.eup %3137 }
 0x3c1   :  { %v1348_v23 = vpop.permute.xlu1 %1347  ;;  %v1190_v29 = vpop.permute.xlu0 %1189  ;;  %v799_v35 = vmul.f32 %v3138_v42, %v3641_v21 }
 0x3c2   :  { %v1353_v46 = vsel %vm226_vm3, %v1348_v23, 0  ;;  %v3795_v23 = vld [vmem:[%s4360_s5 + $0x18] sm:$0xff]  ;;  %s3244_s5 = smov 4  }
 0x3c4   :  { %v3140_v62 = vpop.eup %3139 }
 0x3c5   :  { %v800_v52 = vmul.f32 %v3140_v62, %v3645_v30  ;;  %v1400_v41 = vpop.permute.xlu1 %1399  ;;  %v1242_v59 = vpop.permute.xlu0 %1241 }
 0x3c6   :  { %2913 = vmatmul.mubr.msk.bf16.vlgmr.msra.gmra.mrb[32].mxu0 %vm226_vm3, %v1190_v29  ;;  %v1405_v44 = vsel %vm226_vm3, %v1400_v41, 0 }
 0x3c7   :  { %2923 = vmatpush3.bf16.xpose.msra.mxu0 %v1301_v28  ;;  %v808_v36 = vpack.c.bf16 %v800_v52, %v799_v35  ;;  %2924 = vmatprep.mubr.msk.bf16.mxu0 %vm3238_vm2, %v3237_v27 }
 0x3c8   :  { %2934 = vmatprep.subr.bf16.mxu0 %v3237_v27 }
 0x3c9   :  { %v1452_v40 = vpop.permute.xlu1 %1451  ;;  %2907 = vmatmul.mubr.msk.bf16.vlgmr.msra.gmra.mrb[44].mxu1 %vm624_vm4, %v808_v36  ;;  %v1294_v21 = vpop.permute.xlu0 %1293 }
 0x3ca   :  { %2917 = vmatpush3.bf16.xpose.msra.mxu1 %v1249_v39  ;;  %2918 = vmatprep.mubr.msk.bf16.mxu1 %vm3238_vm2, %v3237_v27  ;;  %v1457_v2 = vsel %vm226_vm3, %v1452_v40, 0 }
 0x3cb   :  { %2928 = vmatprep.subr.bf16.mxu1 %v3237_v27 }
 0x3cd   :  { %v1504_v30 = vpop.permute.xlu1 %1503  ;;  %v1346_v43 = vpop.permute.xlu0 %1345 }
 0x3ce   :  { %2925 = vmatmul.mubr.msk.bf16.vlgmr.msra.gmra.mrb[36].mxu0 %vm226_vm3, %v1294_v21  ;;  %v1509_v50 = vsel %vm226_vm3, %v1504_v30, 0 }
 0x3cf   :  { %2935 = vmatpush3.bf16.xpose.msra.mxu0 %v1405_v44  ;;  %2936 = vmatprep.mubr.msk.bf16.mxu0 %vm3238_vm2, %v3237_v27 }
 0x3d0   :  { %2946 = vmatprep.subr.bf16.mxu0 %v3237_v27 }
 0x3d1   :  { %2919 = vmatmul.mubr.msk.bf16.vlgmr.msra.gmra.mrb[48].mxu1 %vm226_vm3, %v1242_v59  ;;  %v1398_v45 = vpop.permute.xlu0 %1397  ;;  %v1556_v17 = vpop.permute.xlu1 %1555 }
 0x3d2   :  { %2929 = vmatpush3.bf16.xpose.msra.mxu1 %v1353_v46  ;;  %2930 = vmatprep.mubr.msk.bf16.mxu1 %vm3238_vm2, %v3237_v27  ;;  %v1561_v38 = vsel %vm226_vm3, %v1556_v17, 0 }
 0x3d3   :  { %2940 = vmatprep.subr.bf16.mxu1 %v3237_v27 }
 0x3d5   :  { %v1450_v47 = vpop.permute.xlu0 %1449  ;;  %v1554_v31 = vpop.permute.xlu1 %1553 }
 0x3d6   :  { %2937 = vmatmul.mubr.msk.bf16.vlgmr.msra.gmra.mrb[40].mxu0 %vm226_vm3, %v1398_v45 }
 0x3d7   :  { %2947 = vmatpush3.bf16.xpose.msra.mxu0 %v1509_v50  ;;  %2948 = vmatprep.mubr.msk.bf16.mxu0 %vm3238_vm2, %v3237_v27 }
 0x3d8   :  { %2958 = vmatprep.subr.bf16.mxu0 %v3237_v27 }
 0x3d9   :  { %2931 = vmatmul.mubr.msk.bf16.vlgmr.msra.gmra.mrb[52].mxu1 %vm226_vm3, %v1346_v43  ;;  %v1502_v60 = vpop.permute.xlu0 %1501  ;;  %v1789_v63 = vpop.permute.xlu1 %1788 }
 0x3da   :  { %2941 = vmatpush3.bf16.xpose.msra.mxu1 %v1457_v2  ;;  %2942 = vmatprep.mubr.msk.bf16.mxu1 %vm3238_vm2, %v3237_v27 }
 0x3db   :  { %2952 = vmatprep.subr.bf16.mxu1 %v3237_v27 }
 0x3de   :  { %2949 = vmatmul.mubr.msk.bf16.vlgmr.msra.gmra.mrb[44].mxu0 %vm226_vm3, %v1502_v60 }
 0x3df   :  { %2959 = vmatpush3.bf16.msra.mxu0 %v1789_v63  ;;  %2960 = vmatprep.mubr.msk.bf16.mxu0 %vm3238_vm2, %v3237_v27 }
 0x3e0   :  { %2970 = vmatprep.subr.bf16.mxu0 %v3237_v27 }
 0x3e1   :  { %2943 = vmatmul.mubr.msk.bf16.vlgmr.msra.gmra.mrb[56].mxu1 %vm226_vm3, %v1450_v47 }
 0x3e2   :  { %2953 = vmatpush3.bf16.xpose.msra.mxu1 %v1561_v38  ;;  %2954 = vmatprep.mubr.msk.bf16.mxu1 %vm3238_vm2, %v3237_v27 }
 0x3e3   :  { %2964 = vmatprep.subr.bf16.mxu1 %v3237_v27 }
 0x3e9   :  { %2955 = vmatmul.mubr.msk.bf16.vlgmr.msra.gmra.mrb[60].mxu1 %vm226_vm3, %v1554_v31 }
 0x3ea   :  { %2966 = vmatprep.mubr.msk.bf16.mxu1 %vm3238_vm2, %v3237_v27 }
 0x44f   :  { %v3759_v8 = vpop.f32.mrb[16].mxu0 }
 0x450   :  { %v2866_v7 = vpop.f32.mrb[17].mxu0 }
 0x451   :  { %v3761_v61 = vpop.f32.mrb[18].mxu0 }
 0x452   :  { %v2867_v12 = vpop.f32.mrb[19].mxu0 }
 0x457   :  { %v3763_v4 = vpop.f32.mrb[32].mxu1 }
 0x458   :  { %v2872_v49 = vpop.f32.mrb[33].mxu1 }
 0x459   :  { %v3765_v9 = vpop.f32.mrb[34].mxu1 }
 0x45a   :  { %v2873_v19 = vpop.f32.mrb[35].mxu1 }
 0x45f   :  { %v3767_v51 = vpop.f32.mrb[20].mxu0 }
 0x460   :  { %v2878_v3 = vpop.f32.mrb[21].mxu0 }
 0x461   :  { %v3769_v11 = vpop.f32.mrb[22].mxu0 }
 0x462   :  { %v2879_v13 = vpop.f32.mrb[23].mxu0 }
 0x463   :  { %v3771_v18 = vpop.f32.mrb[36].mxu1 }
 0x464   :  { %v2884_v56 = vpop.f32.mrb[37].mxu1 }
 0x465   :  { %v3773_v0 = vpop.f32.mrb[38].mxu1 }
 0x466   :  { %v2885_v15 = vpop.f32.mrb[39].mxu1 }
 0x467   :  { %v3775_v24 = vpop.f32.mrb[24].mxu0 }
 0x468   :  { %v2890_v33 = vpop.f32.mrb[25].mxu0 }
 0x469   :  { %v3777_v5 = vpop.f32.mrb[26].mxu0 }
 0x46a   :  { %v2891_v37 = vpop.f32.mrb[27].mxu0 }
 0x46b   :  { %v3779_v32 = vpop.f32.mrb[40].mxu1 }
 0x46c   :  { %v2896_v55 = vpop.f32.mrb[41].mxu1 }
 0x46d   :  { %v3781_v6 = vpop.f32.mrb[42].mxu1 }
 0x46e   :  { %v2897_v58 = vpop.f32.mrb[43].mxu1 }
 0x46f   :  { %v3783_v53 = vpop.f32.mrb[28].mxu0 }
 0x470   :  { %v2902_v1 = vpop.f32.mrb[29].mxu0 }
 0x471   :  { %v3785_v26 = vpop.f32.mrb[30].mxu0 }
 0x472   :  { %v2903_v34 = vpop.f32.mrb[31].mxu0 }
 0x499   :  { %v1233_v14 = vpop.f32.mrb[32].mxu0 }
 0x49a   :  { %v3798_v29 = vadd.f32 %v3790_v10, %v1233_v14  ;;  %v2914_v42 = vpop.f32.mrb[33].mxu0 }
 0x49b   :  { %v1236_v62 = vpop.f32.mrb[34].mxu0 }
 0x49c   :  { %v3801_v35 = vadd.f32 %v3795_v23, %v1236_v62  ;;  %v3803_v52 = vpop.f32.mrb[44].mxu1  ;;  %v2915_v41 = vpop.f32.mrb[35].mxu0  ;;  %v1604_v59 = vsel %vm624_vm4, %v3798_v29, -inf }
 0x49d   :  { %1605 = vmax.xlane.f32.xlu0 %v1604_v59  ;;  %v2908_v28 = vpop.f32.mrb[45].mxu1 }
 0x49e   :  { %v3807_v36 = vpop.f32.mrb[46].mxu1  ;;  %v1607_v39 = vsel %vm624_vm4, %v3801_v35, -inf }
 0x49f   :  { %1608 = vmax.xlane.f32.xlu1 %v1607_v39  ;;  %v2909_v40 = vpop.f32.mrb[47].mxu1 }
 0x4a1   :  { %v1337_v21 = vpop.f32.mrb[36].mxu0 }
 0x4a2   :  { %v3812_v30 = vadd.f32 %v3790_v10, %v1337_v21  ;;  %v2926_v43 = vpop.f32.mrb[37].mxu0 }
 0x4a3   :  { %v1340_v44 = vpop.f32.mrb[38].mxu0 }
 0x4a4   :  { %v1285_v46 = vpop.f32.mrb[48].mxu1  ;;  %v2927_v45 = vpop.f32.mrb[39].mxu0  ;;  %v1616_v17 = vsel %vm624_vm4, %v3812_v30, -inf  ;;  %v3825_v12 = vadd.f32 %v3795_v23, %v1340_v44 }
 0x4a5   :  { %v3817_v50 = vadd.f32 %v3790_v10, %v1285_v46  ;;  %1617 = vmax.xlane.f32.xlu1 %v1616_v17  ;;  %v2920_v47 = vpop.f32.mrb[49].mxu1 }
 0x4a6   :  { %v1288_v31 = vpop.f32.mrb[50].mxu1  ;;  %v1619_v1 = vsel %vm624_vm4, %v3825_v12, -inf }
 0x4a7   :  { %v3820_v2 = vadd.f32 %v3795_v23, %v1288_v31  ;;  %v2921_v60 = vpop.f32.mrb[51].mxu1  ;;  %v1610_v63 = vsel %vm624_vm4, %v3817_v50, -inf }
 0x4a8   :  { %1611 = vmax.xlane.f32.xlu0 %v1610_v63 }
 0x4a9   :  { %v1441_v38 = vpop.f32.mrb[40].mxu0  ;;  %v1613_v19 = vsel %vm624_vm4, %v3820_v2, -inf }
 0x4aa   :  { %v2938_v7 = vpop.f32.mrb[41].mxu0  ;;  %v3833_v37 = vadd.f32 %v3790_v10, %v1441_v38 }
 0x4ab   :  { %v1444_v49 = vpop.f32.mrb[42].mxu0 }
 0x4ac   :  { %v2939_v3 = vpop.f32.mrb[43].mxu0  ;;  %1614 = vmax.xlane.f32.xlu0 %v1613_v19  ;;  %v1389_v13 = vpop.f32.mrb[52].mxu1  ;;  %v3843_v62 = vadd.f32 %v3795_v23, %v1444_v49  ;;  %v1628_v59 = vsel %vm624_vm4, %v3833_v37, -inf }
 0x4ad   :  { %v3830_v56 = vadd.f32 %v3790_v10, %v1389_v13  ;;  %v2932_v15 = vpop.f32.mrb[53].mxu1 }
 0x4ae   :  { %v1392_v33 = vpop.f32.mrb[54].mxu1  ;;  %v1631_v47 = vsel %vm624_vm4, %v3843_v62, -inf }
 0x4af   :  { %v3836_v55 = vadd.f32 %v3795_v23, %v1392_v33  ;;  %v2933_v58 = vpop.f32.mrb[55].mxu1  ;;  %v1622_v34 = vsel %vm624_vm4, %v3830_v56, -inf }
 0x4b0   :  { %1620 = vmax.xlane.f32.xlu0 %v1619_v1  ;;  %1623 = vmax.xlane.f32.xlu1 %v1622_v34 }
 0x4b1   :  { %v1545_v14 = vpop.f32.mrb[44].mxu0  ;;  %v1625_v28 = vsel %vm624_vm4, %v3836_v55, -inf }
 0x4b2   :  { %v2950_v42 = vpop.f32.mrb[45].mxu0  ;;  %v3853_v46 = vadd.f32 %v3790_v10, %v1545_v14 }
 0x4b3   :  { %v1548_v41 = vpop.f32.mrb[46].mxu0 }
 0x4b4   :  { %v2951_v39 = vpop.f32.mrb[47].mxu0  ;;  %1629 = vmax.xlane.f32.xlu1 %v1628_v59  ;;  %1626 = vmax.xlane.f32.xlu0 %v1625_v28  ;;  %v1493_v40 = vpop.f32.mrb[56].mxu1  ;;  %v3863_v60 = vadd.f32 %v3795_v23, %v1548_v41  ;;  %v1640_v63 = vsel %vm624_vm4, %v3853_v46, -inf }
 0x4b5   :  { %v3850_v21 = vadd.f32 %v3790_v10, %v1493_v40  ;;  %v2944_v43 = vpop.f32.mrb[57].mxu1 }
 0x4b6   :  { %v1496_v44 = vpop.f32.mrb[58].mxu1  ;;  %v1643_v33 = vsel %vm624_vm4, %v3863_v60, -inf }
 0x4b7   :  { %v3856_v45 = vadd.f32 %v3795_v23, %v1496_v44  ;;  %v2945_v17 = vpop.f32.mrb[59].mxu1  ;;  %v1634_v31 = vsel %vm624_vm4, %v3850_v21, -inf }
 0x4b8   :  { %1632 = vmax.xlane.f32.xlu0 %v1631_v47  ;;  %1635 = vmax.xlane.f32.xlu1 %v1634_v31 }
 0x4b9   :  { %v1637_v38 = vsel %vm624_vm4, %v3856_v45, -inf }
 0x4bc   :  { %1641 = vmax.xlane.f32.xlu1 %v1640_v63  ;;  %1638 = vmax.xlane.f32.xlu0 %v1637_v38  ;;  %v1597_v7 = vpop.f32.mrb[60].mxu1 }
 0x4bd   :  { %v3870_v49 = vadd.f32 %v3790_v10, %v1597_v7  ;;  %v2956_v19 = vpop.f32.mrb[61].mxu1 }
 0x4be   :  { %v1600_v3 = vpop.f32.mrb[62].mxu1 }
 0x4bf   :  { %v3873_v13 = vadd.f32 %v3795_v23, %v1600_v3  ;;  %v2957_v15 = vpop.f32.mrb[63].mxu1  ;;  %v1646_v58 = vsel %vm624_vm4, %v3870_v49, -inf }
 0x4c0   :  { %1644 = vmax.xlane.f32.xlu0 %v1643_v33  ;;  %1647 = vmax.xlane.f32.xlu1 %v1646_v58 }
 0x4c1   :  { %v1649_v1 = vsel %vm624_vm4, %v3873_v13, -inf }
 0x4c4   :  { %1650 = vmax.xlane.f32.xlu0 %v1649_v1 }
 0x4d1   :  { %1882 = vrot.lane.b32.xlu1 %v3383_v20, %s3243_s23 }
 0x4d5   :  { %1929 = vrot.lane.b32.xlu1 %v3381_v16, %s3243_s23 }
 0x4d9   :  { %2023 = vrot.lane.b32.xlu1 %v3365_v54, %s3243_s23 }
 0x4da   :  { %1835 = vrot.lane.b32.xlu0 %v3361_v48, %s3243_s23 }
 0x4de   :  { %1976 = vrot.lane.b32.xlu0 %v3369_v57, %s3243_s23 }
 0x52a   :  { %v1606_v10 = vpop.xlane.xlu0 %1605 }
 0x52b   :  { %v1652_v23 = vsub.f32 %v3798_v29, %v1606_v10 }
 0x52c   :  { %v1609_v34 = vpop.xlane.xlu1 %1608 }
 0x52d   :  { %v1668_v14 = vmul.f32 1.442695, %v1652_v23  ;;  %v1653_v42 = vsub.f32 %v3801_v35, %v1609_v34 }
 0x52f   :  { %3141 = vpow2.f32 %v1668_v14  ;;  %v1670_v20 = vmul.f32 1.442695, %v1653_v42 }
 0x531   :  { %3143 = vpow2.f32 %v1670_v20 }
 0x532   :  { %v1618_v16 = vpop.xlane.xlu1 %1617 }
 0x533   :  { %v1656_v41 = vsub.f32 %v3812_v30, %v1618_v16 }
 0x535   :  { %v1612_v54 = vpop.xlane.xlu0 %1611  ;;  %v1676_v48 = vmul.f32 1.442695, %v1656_v41 }
 0x536   :  { %v1654_v59 = vsub.f32 %v3817_v50, %v1612_v54 }
 0x538   :  { %v1672_v28 = vmul.f32 1.442695, %v1654_v59 }
 0x539   :  { %v3895_v39 = vpop.eup %3141  ;;  %v1615_v57 = vpop.xlane.xlu0 %1614 }
 0x53a   :  { %3145 = vpow2.f32 %v1672_v28  ;;  %v1655_v29 = vsub.f32 %v3820_v2, %v1615_v57  ;;  %v1700_v35 = vsel %vm624_vm4, %v3895_v39, 0.0 }
 0x53b   :  { %v3900_v40 = vpop.eup %3143  ;;  %1701 = vadd.xlane.f32.xlu1 %v1700_v35  ;;  %3147 = vpow2.f32 %v1676_v48 }
 0x53c   :  { %v1674_v43 = vmul.f32 1.442695, %v1655_v29  ;;  %v1703_v30 = vsel %vm624_vm4, %v3900_v40, 0.0 }
 0x53d   :  { %v1621_v50 = vpop.xlane.xlu0 %1620  ;;  %v1624_v44 = vpop.xlane.xlu1 %1623  ;;  %1704 = vadd.xlane.f32.xlu0 %v1703_v30 }
 0x53e   :  { %3149 = vpow2.f32 %v1674_v43  ;;  %v1657_v17 = vsub.f32 %v3825_v12, %v1621_v50  ;;  %v1658_v47 = vsub.f32 %v3830_v56, %v1624_v44 }
 0x540   :  { %v1678_v2 = vmul.f32 1.442695, %v1657_v17  ;;  %v1680_v31 = vmul.f32 1.442695, %v1658_v47 }
 0x541   :  { %v1630_v63 = vpop.xlane.xlu1 %1629  ;;  %v1627_v38 = vpop.xlane.xlu0 %1626 }
 0x542   :  { %3151 = vpow2.f32 %v1678_v2  ;;  %v1660_v7 = vsub.f32 %v3833_v37, %v1630_v63  ;;  %v1659_v19 = vsub.f32 %v3836_v55, %v1627_v38 }
 0x543   :  { %3153 = vpow2.f32 %v1680_v31 }
 0x544   :  { %v3908_v3 = vpop.eup %3145  ;;  %v1684_v15 = vmul.f32 1.442695, %v1660_v7  ;;  %v1682_v33 = vmul.f32 1.442695, %v1659_v19 }
 0x545   :  { %v1633_v58 = vpop.xlane.xlu0 %1632  ;;  %v1636_v1 = vpop.xlane.xlu1 %1635  ;;  %v1706_v12 = vsel %vm624_vm4, %v3908_v3, 0.0 }
 0x546   :  { %v3912_v56 = vpop.eup %3147  ;;  %3155 = vpow2.f32 %v1684_v15  ;;  %v1661_v10 = vsub.f32 %v3843_v62, %v1633_v58  ;;  %v1662_v23 = vsub.f32 %v3850_v21, %v1636_v1  ;;  %1707 = vadd.xlane.f32.xlu1 %v1706_v12 }
 0x547   :  { %3157 = vpow2.f32 %v1682_v33  ;;  %v1712_v20 = vsel %vm624_vm4, %v3912_v56, 0.0 }
 0x548   :  { %v3916_v37 = vpop.eup %3149  ;;  %v1686_v55 = vmul.f32 1.442695, %v1661_v10  ;;  %v1688_v34 = vmul.f32 1.442695, %v1662_v23 }
 0x549   :  { %v1642_v14 = vpop.xlane.xlu1 %1641  ;;  %v1639_v42 = vpop.xlane.xlu0 %1638  ;;  %v1709_v16 = vsel %vm624_vm4, %v3916_v37, 0.0 }
 0x54a   :  { %3159 = vpow2.f32 %v1686_v55  ;;  %v1664_v41 = vsub.f32 %v3853_v46, %v1642_v14  ;;  %v1663_v62 = vsub.f32 %v3856_v45, %v1639_v42  ;;  %1713 = vadd.xlane.f32.xlu1 %v1712_v20  ;;  %1710 = vadd.xlane.f32.xlu0 %v1709_v16 }
 0x54b   :  { %3161 = vpow2.f32 %v1688_v34 }
 0x54c   :  { %v3924_v21 = vpop.eup %3151  ;;  %v1692_v54 = vmul.f32 1.442695, %v1664_v41  ;;  %v1690_v59 = vmul.f32 1.442695, %v1663_v62 }
 0x54d   :  { %v3926_v48 = vpop.eup %3153  ;;  %v1645_v28 = vpop.xlane.xlu0 %1644  ;;  %v1715_v29 = vsel %vm624_vm4, %v3924_v21, 0.0 }
 0x54e   :  { %v1648_v57 = vpop.xlane.xlu1 %1647  ;;  %3163 = vpow2.f32 %v1692_v54  ;;  %v1665_v35 = vsub.f32 %v3863_v60, %v1645_v28  ;;  %v1718_v45 = vsel %vm624_vm4, %v3926_v48, 0.0  ;;  %1716 = vadd.xlane.f32.xlu0 %v1715_v29 }
 0x54f   :  { %v1666_v46 = vsub.f32 %v3870_v49, %v1648_v57  ;;  %3165 = vpow2.f32 %v1690_v59  ;;  %1719 = vadd.xlane.f32.xlu1 %v1718_v45 }
 0x550   :  { %v3934_v43 = vpop.eup %3155  ;;  %v1694_v30 = vmul.f32 1.442695, %v1665_v35 }
 0x551   :  { %v1696_v50 = vmul.f32 1.442695, %v1666_v46  ;;  %v3936_v44 = vpop.eup %3157  ;;  %v1651_v17 = vpop.xlane.xlu0 %1650  ;;  %v1724_v47 = vsel %vm624_vm4, %v3934_v43, 0.0 }
 0x552   :  { %3167 = vpow2.f32 %v1694_v30  ;;  %v1667_v60 = vsub.f32 %v3873_v13, %v1651_v17  ;;  %v1721_v49 = vsel %vm624_vm4, %v3936_v44, 0.0  ;;  %v1883_v14 = vpop.permute.xlu1 %1882 }
 0x553   :  { %3169 = vpow2.f32 %v1696_v50  ;;  %1725 = vadd.xlane.f32.xlu1 %v1724_v47  ;;  %1722 = vadd.xlane.f32.xlu0 %v1721_v49 }
 0x554   :  { %v3943_v2 = vpop.eup %3159  ;;  %v1698_v31 = vmul.f32 1.442695, %v1667_v60 }
 0x555   :  { %v3945_v63 = vpop.eup %3161  ;;  %v1836_v38 = vpop.permute.xlu0 %1835  ;;  %v1727_v7 = vsel %vm624_vm4, %v3943_v2, 0.0 }
 0x556   :  { %3171 = vpow2.f32 %v1698_v31  ;;  %v1730_v19 = vsel %vm624_vm4, %v3945_v63, 0.0  ;;  %2965 = vmatpush3.bf16.msra.mxu1 %v1836_v38  ;;  %v1930_v42 = vpop.permute.xlu1 %1929 }
 0x557   :  { %1731 = vadd.xlane.f32.xlu1 %v1730_v19  ;;  %1728 = vadd.xlane.f32.xlu0 %v1727_v7 }
 0x558   :  { %v3951_v13 = vpop.eup %3163  ;;  %2976 = vmatprep.subr.bf16.mxu1 %v3237_v27 }
 0x559   :  { %v3954_v15 = vpop.eup %3165  ;;  %v1736_v33 = vsel %vm624_vm4, %v3951_v13, 0.0  ;;  %v1977_v16 = vpop.permute.xlu0 %1976 }
 0x55a   :  { %v1733_v58 = vsel %vm624_vm4, %v3954_v15, 0.0  ;;  %v3976_v20 = vpop.permute.xlu1 %2023 }
 0x55b   :  { %1737 = vadd.xlane.f32.xlu1 %v1736_v33  ;;  %1734 = vadd.xlane.f32.xlu0 %v1733_v58 }
 0x55c   :  { %v3960_v1 = vpop.eup %3167 }
 0x55d   :  { %v3962_v12 = vpop.eup %3169  ;;  %v1739_v10 = vsel %vm624_vm4, %v3960_v1, 0.0 }
 0x55e   :  { %v1742_v23 = vsel %vm624_vm4, %v3962_v12, 0.0 }
 0x55f   :  { %1743 = vadd.xlane.f32.xlu1 %v1742_v23  ;;  %1740 = vadd.xlane.f32.xlu0 %v1739_v10 }
 0x560   :  { %v3968_v55 = vpop.eup %3171 }
 0x561   :  { %v1745_v34 = vsel %vm624_vm4, %v3968_v55, 0.0 }
 0x563   :  { %1746 = vadd.xlane.f32.xlu0 %v1745_v34 }
 0x570   :  { %2117 = vrot.lane.b32.xlu1 %v3385_v22, %s3243_s23 }
 0x579   :  { %2070 = vrot.lane.b32.xlu0 %v3389_v25, %s3243_s23 }
 0x5c8   :  { %v1702_v41 = vpop.xlane.xlu1 %1701 }
 0x5c9   :  { %3173 = vrcp.f32 %v1702_v41 }
 0x5ca   :  { %v1705_v62 = vpop.xlane.xlu0 %1704 }
 0x5cb   :  { %3175 = vrcp.f32 %v1705_v62 }
 0x5d3   :  { %v3174_v54 = vpop.eup %3173  ;;  %v1708_v59 = vpop.xlane.xlu1 %1707 }
 0x5d4   :  { %v1764_v57 = vmul.f32 %v3174_v54, %v3895_v39  ;;  %3177 = vrcp.f32 %v1708_v59 }
 0x5d5   :  { %v3176_v28 = vpop.eup %3175 }
 0x5d6   :  { %v1765_v29 = vmul.f32 %v3176_v28, %v3900_v40 }
 0x5d7   :  { %v1714_v22 = vpop.xlane.xlu1 %1713  ;;  %v1711_v35 = vpop.xlane.xlu0 %1710 }
 0x5d8   :  { %v1780_v25 = vpack.c.bf16 %v1765_v29, %v1764_v57  ;;  %3179 = vrcp.f32 %v1711_v35 }
 0x5d9   :  { %3181 = vrcp.f32 %v1714_v22 }
 0x5da   :  { %2961 = vmatmul.mubr.msk.bf16.vlgmr.msra.gmra.mrb[48].mxu0 %vm624_vm4, %v1780_v25 }
 0x5db   :  { %2971 = vmatpush3.bf16.msra.mxu0 %v1883_v14  ;;  %v1717_v46 = vpop.xlane.xlu0 %1716  ;;  %2972 = vmatprep.mubr.msk.bf16.mxu0 %vm3238_vm2, %v3237_v27 }
 0x5dc   :  { %v1720_v45 = vpop.xlane.xlu1 %1719  ;;  %3183 = vrcp.f32 %v1717_v46  ;;  %2982 = vmatprep.subr.bf16.mxu0 %v3237_v27 }
 0x5dd   :  { %3185 = vrcp.f32 %v1720_v45 }
 0x5de   :  { %v3178_v30 = vpop.eup %3177 }
 0x5df   :  { %v1766_v47 = vmul.f32 %v3178_v30, %v3908_v3 }
 0x5e0   :  { %v1726_v39 = vpop.xlane.xlu1 %1725  ;;  %v1723_v40 = vpop.xlane.xlu0 %1722 }
 0x5e1   :  { %3187 = vrcp.f32 %v1723_v40 }
 0x5e2   :  { %v3180_v50 = vpop.eup %3179  ;;  %3189 = vrcp.f32 %v1726_v39 }
 0x5e3   :  { %v3182_v17 = vpop.eup %3181  ;;  %v1767_v60 = vmul.f32 %v3180_v50, %v3916_v37 }
 0x5e4   :  { %v1732_v49 = vpop.xlane.xlu1 %1731  ;;  %v1729_v31 = vpop.xlane.xlu0 %1728  ;;  %v1768_v19 = vmul.f32 %v3182_v17, %v3912_v56 }
 0x5e5   :  { %3191 = vrcp.f32 %v1729_v31  ;;  %v1781_v7 = vpack.c.bf16 %v1767_v60, %v1766_v47 }
 0x5e6   :  { %v3184_v38 = vpop.eup %3183  ;;  %3193 = vrcp.f32 %v1732_v49 }
 0x5e7   :  { %v1769_v33 = vmul.f32 %v3184_v38, %v3924_v21  ;;  %2967 = vmatmul.mubr.msk.bf16.vlgmr.msra.gmra.mrb[64].mxu1 %vm624_vm4, %v1781_v7  ;;  %v3186_v3 = vpop.eup %3185 }
 0x5e8   :  { %v1738_v58 = vpop.xlane.xlu1 %1737  ;;  %v1735_v10 = vpop.xlane.xlu0 %1734  ;;  %2977 = vmatpush3.bf16.msra.mxu1 %v1930_v42  ;;  %2978 = vmatprep.mubr.msk.bf16.mxu1 %vm3238_vm2, %v3237_v27  ;;  %v1770_v34 = vmul.f32 %v3186_v3, %v3926_v48 }
 0x5e9   :  { %v1782_v23 = vpack.c.bf16 %v1769_v33, %v1768_v19  ;;  %3195 = vrcp.f32 %v1735_v10  ;;  %2988 = vmatprep.subr.bf16.mxu1 %v3237_v27 }
 0x5ea   :  { %3197 = vrcp.f32 %v1738_v58 }
 0x5eb   :  { %2973 = vmatmul.mubr.msk.bf16.vlgmr.msra.gmra.mrb[52].mxu0 %vm624_vm4, %v1782_v23  ;;  %v3188_v37 = vpop.eup %3187 }
 0x5ec   :  { %v1744_v56 = vpop.xlane.xlu1 %1743  ;;  %2983 = vmatpush3.bf16.msra.mxu0 %v1977_v16  ;;  %v1741_v21 = vpop.xlane.xlu0 %1740  ;;  %2984 = vmatprep.mubr.msk.bf16.mxu0 %vm3238_vm2, %v3237_v27  ;;  %v1771_v14 = vmul.f32 %v3188_v37, %v3936_v44 }
 0x5ed   :  { %2994 = vmatprep.subr.bf16.mxu0 %v3237_v27  ;;  %v3190_v42 = vpop.eup %3189  ;;  %3199 = vrcp.f32 %v1741_v21 }
 0x5ee   :  { %3201 = vrcp.f32 %v1744_v56  ;;  %v1783_v41 = vpack.c.bf16 %v1771_v14, %v1770_v34  ;;  %v1772_v59 = vmul.f32 %v3190_v42, %v3934_v43 }
 0x5ef   :  { %v3192_v62 = vpop.eup %3191 }
 0x5f0   :  { %v1747_v54 = vpop.xlane.xlu0 %1746  ;;  %v1773_v16 = vmul.f32 %v3192_v62, %v3943_v2  ;;  %2979 = vmatmul.mubr.msk.bf16.vlgmr.msra.gmra.mrb[68].mxu1 %vm624_vm4, %v1783_v41  ;;  %v3194_v28 = vpop.eup %3193 }
 0x5f1   :  { %3203 = vrcp.f32 %v1747_v54  ;;  %2989 = vmatpush3.bf16.msra.mxu1 %v3976_v20  ;;  %2990 = vmatprep.mubr.msk.bf16.mxu1 %vm3238_vm2, %v3237_v27  ;;  %v1774_v29 = vmul.f32 %v3194_v28, %v3945_v63  ;;  %v2118_v45 = vpop.permute.xlu1 %2117 }
 0x5f2   :  { %v1784_v48 = vpack.c.bf16 %v1773_v16, %v1772_v59  ;;  %3000 = vmatprep.subr.bf16.mxu1 %v3237_v27 }
 0x5f3   :  { %v3196_v44 = vpop.eup %3195 }
 0x5f4   :  { %v2071_v57 = vpop.permute.xlu0 %2070  ;;  %v1775_v43 = vmul.f32 %v3196_v44, %v3954_v15  ;;  %2985 = vmatmul.mubr.msk.bf16.vlgmr.msra.gmra.mrb[56].mxu0 %vm624_vm4, %v1784_v48  ;;  %v3198_v2 = vpop.eup %3197 }
 0x5f5   :  { %2995 = vmatpush3.bf16.msra.mxu0 %v2071_v57  ;;  %2996 = vmatprep.mubr.msk.bf16.mxu0 %vm3238_vm2, %v3237_v27  ;;  %v1776_v25 = vmul.f32 %v3198_v2, %v3951_v13 }
 0x5f6   :  { %v1785_v20 = vpack.c.bf16 %v1775_v43, %v1774_v29 }
 0x5f7   :  { %v3200_v22 = vpop.eup %3199 }
 0x5f8   :  { %v3202_v35 = vpop.eup %3201  ;;  %v1777_v46 = vmul.f32 %v3200_v22, %v3960_v1  ;;  %2991 = vmatmul.mubr.msk.bf16.vlgmr.msra.gmra.mrb[72].mxu1 %vm624_vm4, %v1785_v20 }
 0x5f9   :  { %3001 = vmatpush3.bf16.msra.mxu1 %v2118_v45  ;;  %3002 = vmatprep.mubr.msk.bf16.mxu1 %vm3238_vm2, %v3237_v27  ;;  %v1778_v39 = vmul.f32 %v3202_v35, %v3962_v12  ;;  %v2252_v27 = vld [vmem:[%s4361_s3] sm:$0xff] }
 0x5fa   :  { %v1786_v15 = vpack.c.bf16 %v1777_v46, %v1776_v25  ;;  %v2253_v12 = vpack.c.bf16 %v2252_v27, %v2252_v27 }
 0x5fb   :  { %v3204_v63 = vpop.eup %3203 }
 0x5fc   :  { %v1779_v40 = vmul.f32 %v3204_v63, %v3968_v55  ;;  %2997 = vmatmul.mubr.msk.bf16.vlgmr.msra.gmra.mrb[60].mxu0 %vm624_vm4, %v1786_v15  ;;  %3028 = vmatprep.subr.msk.bf16.mxu0 %vm88_vm0, %v2253_v12  ;;  %v2286_v55 = vsel %vm88_vm0, %v2253_v12, 0 }
 0x5fd   :  { %3007 = vmatpush3.bf16.msra.mxu0 %v2286_v55 }
 0x5fe   :  { %v1787_v30 = vpack.c.bf16 %v1779_v40, %v1778_v39 }
 0x600   :  { %3003 = vmatmul.mubr.msk.bf16.vlgmr.msra.gmra.mrb[76].mxu1 %vm624_vm4, %v1787_v30 }
 0x6ad   :  { %v1828_v13 = vpop.f32.mrb[48].mxu0 }
 0x6ae   :  { %v2962_v1 = vpop.f32.mrb[49].mxu0 }
 0x6af   :  { %v1831_v50 = vpop.f32.mrb[50].mxu0 }
 0x6b0   :  { %v3037_v17 = vpack.i.bf16 %v1831_v50, %v1828_v13  ;;  %v2963_v47 = vpop.f32.mrb[51].mxu0 }
 0x6b2   :  { %3038 = vrot.lane.b32.xlu0 %v3037_v17, %s3244_s5 }
 0x6ba   :  { %v1875_v60 = vpop.f32.mrb[64].mxu1 }
 0x6bb   :  { %v2968_v49 = vpop.f32.mrb[65].mxu1 }
 0x6bc   :  { %v1878_v31 = vpop.f32.mrb[66].mxu1 }
 0x6bd   :  { %v3042_v38 = vpack.i.bf16 %v1878_v31, %v1875_v60  ;;  %v2969_v7 = vpop.f32.mrb[67].mxu1 }
 0x6be   :  { %v1922_v19 = vpop.f32.mrb[52].mxu0 }
 0x6bf   :  { %v2974_v33 = vpop.f32.mrb[53].mxu0  ;;  %3043 = vrot.lane.b32.xlu1 %v3042_v38, %s3244_s5 }
 0x6c0   :  { %v1925_v58 = vpop.f32.mrb[54].mxu0 }
 0x6c1   :  { %v3047_v10 = vpack.i.bf16 %v1925_v58, %v1922_v19  ;;  %v2975_v23 = vpop.f32.mrb[55].mxu0 }
 0x6c3   :  { %3048 = vrot.lane.b32.xlu0 %v3047_v10, %s3244_s5  ;;  %v1969_v3 = vpop.f32.mrb[68].mxu1 }
 0x6c4   :  { %v2980_v37 = vpop.f32.mrb[69].mxu1 }
 0x6c5   :  { %v1972_v56 = vpop.f32.mrb[70].mxu1 }
 0x6c6   :  { %v3052_v21 = vpack.i.bf16 %v1972_v56, %v1969_v3  ;;  %v2981_v34 = vpop.f32.mrb[71].mxu1 }
 0x6c7   :  { %v2016_v14 = vpop.f32.mrb[56].mxu0 }
 0x6c8   :  { %v2986_v42 = vpop.f32.mrb[57].mxu0  ;;  %3053 = vrot.lane.b32.xlu1 %v3052_v21, %s3244_s5 }
 0x6c9   :  { %v2019_v41 = vpop.f32.mrb[58].mxu0 }
 0x6ca   :  { %v3057_v62 = vpack.i.bf16 %v2019_v41, %v2016_v14  ;;  %v2987_v54 = vpop.f32.mrb[59].mxu0 }
 0x6cb   :  { %v2063_v59 = vpop.f32.mrb[72].mxu1 }
 0x6cc   :  { %3058 = vrot.lane.b32.xlu0 %v3057_v62, %s3244_s5  ;;  %v2992_v16 = vpop.f32.mrb[73].mxu1 }
 0x6cd   :  { %v2066_v28 = vpop.f32.mrb[74].mxu1 }
 0x6ce   :  { %v3062_v48 = vpack.i.bf16 %v2066_v28, %v2063_v59  ;;  %v2993_v44 = vpop.f32.mrb[75].mxu1 }
 0x6cf   :  { %v2110_v57 = vpop.f32.mrb[60].mxu0 }
 0x6d0   :  { %v2998_v29 = vpop.f32.mrb[61].mxu0  ;;  %3063 = vrot.lane.b32.xlu1 %v3062_v48, %s3244_s5 }
 0x6d1   :  { %v2113_v43 = vpop.f32.mrb[62].mxu0 }
 0x6d2   :  { %v3067_v2 = vpack.i.bf16 %v2113_v43, %v2110_v57  ;;  %v2999_v20 = vpop.f32.mrb[63].mxu0 }
 0x6d3   :  { %v2157_v22 = vpop.f32.mrb[76].mxu1 }
 0x6d4   :  { %3068 = vrot.lane.b32.xlu0 %v3067_v2, %s3244_s5  ;;  %v3004_v35 = vpop.f32.mrb[77].mxu1 }
 0x6d5   :  { %v2160_v25 = vpop.f32.mrb[78].mxu1 }
 0x6d6   :  { %v3072_v46 = vpack.i.bf16 %v2160_v25, %v2157_v22  ;;  %v3005_v45 = vpop.f32.mrb[79].mxu1 }
 0x6d8   :  { %3073 = vrot.lane.b32.xlu1 %v3072_v46, %s3244_s5 }
 0x724   :  { %v3039_v63 = vpop.permute.xlu0 %3038 }
 0x725   :  { %v3041_v15 = vunpack.i.h.bf16 %v3039_v63  ;;  %v3040_v39 = vunpack.i.l.bf16 %v3039_v63 }
 0x727   :  { %v2229_v40 = vsel %vm226_vm3, %v3761_v61, %v3041_v15  ;;  %v2228_v30 = vsel %vm226_vm3, %v3759_v8, %v3040_v39 }
 0x728   :  { %v2244_v13 = vpack.c.bf16 %v2229_v40, %v2228_v30 }
 0x72a   :  { %3008 = vmatprep.mubr.msk.bf16.mxu0 %vm63_vm1, %v2244_v13 }
 0x731   :  { %v3044_v1 = vpop.permute.xlu1 %3043 }
 0x732   :  { %v3046_v50 = vunpack.i.h.bf16 %v3044_v1  ;;  %v3045_v17 = vunpack.i.l.bf16 %v3044_v1 }
 0x734   :  { %v2231_v47 = vsel %vm226_vm3, %v3765_v9, %v3046_v50  ;;  %v2230_v27 = vsel %vm226_vm3, %v3763_v4, %v3045_v17 }
 0x735   :  { %v3049_v12 = vpop.permute.xlu0 %3048  ;;  %v2245_v55 = vpack.c.bf16 %v2231_v47, %v2230_v27 }
 0x736   :  { %v3051_v60 = vunpack.i.h.bf16 %v3049_v12  ;;  %v3050_v49 = vunpack.i.l.bf16 %v3049_v12 }
 0x737   :  { %3009 = vmatmul.mubr.msk.bf16.vlgmr.msra.gmra.mrb[64].mxu0 %vm63_vm1, %v2245_v55 }
 0x738   :  { %v2233_v61 = vsel %vm226_vm3, %v3769_v11, %v3051_v60  ;;  %v2232_v8 = vsel %vm226_vm3, %v3767_v51, %v3050_v49 }
 0x739   :  { %v2246_v31 = vpack.c.bf16 %v2233_v61, %v2232_v8 }
 0x73a   :  { %v3054_v38 = vpop.permute.xlu1 %3053 }
 0x73b   :  { %3012 = vmatprep.mubr.msk.bf16.mxu0 %vm63_vm1, %v2246_v31  ;;  %v3056_v9 = vunpack.i.h.bf16 %v3054_v38  ;;  %v3055_v7 = vunpack.i.l.bf16 %v3054_v38 }
 0x73d   :  { %v2235_v4 = vsel %vm226_vm3, %v3773_v0, %v3056_v9  ;;  %v2234_v19 = vsel %vm226_vm3, %v3771_v18, %v3055_v7 }
 0x73e   :  { %v2247_v33 = vpack.c.bf16 %v2235_v4, %v2234_v19  ;;  %v3059_v58 = vpop.permute.xlu0 %3058 }
 0x73f   :  { %v3061_v11 = vunpack.i.h.bf16 %v3059_v58  ;;  %v3060_v10 = vunpack.i.l.bf16 %v3059_v58 }
 0x740   :  { %3013 = vmatmul.mubr.msk.bf16.gmra.mrb[68].mxu0 %vm63_vm1, %v2247_v33 }
 0x741   :  { %v2237_v51 = vsel %vm226_vm3, %v3777_v5, %v3061_v11  ;;  %v2236_v23 = vsel %vm226_vm3, %v3775_v24, %v3060_v10 }
 0x742   :  { %v2248_v3 = vpack.c.bf16 %v2237_v51, %v2236_v23  ;;  %v3064_v37 = vpop.permute.xlu1 %3063 }
 0x743   :  { %v3066_v56 = vunpack.i.h.bf16 %v3064_v37  ;;  %v3065_v21 = vunpack.i.l.bf16 %v3064_v37 }
 0x744   :  { %3016 = vmatprep.mubr.msk.bf16.mxu0 %vm63_vm1, %v2248_v3 }
 0x745   :  { %v2239_v18 = vsel %vm226_vm3, %v3781_v6, %v3066_v56  ;;  %v2238_v0 = vsel %vm226_vm3, %v3779_v32, %v3065_v21 }
 0x746   :  { %v2249_v34 = vpack.c.bf16 %v2239_v18, %v2238_v0  ;;  %v3069_v14 = vpop.permute.xlu0 %3068 }
 0x747   :  { %v3071_v42 = vunpack.i.h.bf16 %v3069_v14  ;;  %v3070_v41 = vunpack.i.l.bf16 %v3069_v14 }
 0x748   :  { %3017 = vmatmul.mubr.msk.bf16.gmra.mrb[72].mxu0 %vm63_vm1, %v2249_v34 }
 0x749   :  { %v2241_v24 = vsel %vm226_vm3, %v3785_v26, %v3071_v42  ;;  %v2240_v5 = vsel %vm226_vm3, %v3783_v53, %v3070_v41  ;;  %v2703_v26 = vld [vmem:[%s4362_s4] ss:$0 sm:$0xff] }
 0x74a   :  { %v2250_v62 = vpack.c.bf16 %v2241_v24, %v2240_v5  ;;  %v3074_v54 = vpop.permute.xlu1 %3073 }
 0x74b   :  { %v3076_v59 = vunpack.i.h.bf16 %v3074_v54  ;;  %v3075_v16 = vunpack.i.l.bf16 %v3074_v54 }
 0x74c   :  { %3020 = vmatprep.mubr.msk.bf16.mxu0 %vm63_vm1, %v2250_v62 }
 0x74d   :  { %v2243_v32 = vsel %vm226_vm3, %v3807_v36, %v3076_v59  ;;  %v2242_v6 = vsel %vm226_vm3, %v3803_v52, %v3075_v16 }
 0x74e   :  { %v2251_v28 = vpack.c.bf16 %v2243_v32, %v2242_v6 }
 0x750   :  { %3021 = vmatmul.mubr.msk.bf16.gmra.mrb[76].mxu0 %vm63_vm1, %v2251_v28 }
 0x80a   :  { %v3010_v53 = vpop.f32.mrb[64].mxu0 }
 0x80b   :  { %v4075_v48 = vadd.f32 %v3010_v53, %v2703_v26  ;;  %v2322_v44 = vpop.f32.mrb[65].mxu0 }
 0x80c   :  { %v3011_v57 = vpop.f32.mrb[66].mxu0  ;;  %v4077_v29 = vadd.f32 %v2703_v26, %v2322_v44 }
 0x80d   :  { %v2325_v43 = vpop.f32.mrb[67].mxu0  ;;  %v2391_v36 = vsel %vm63_vm1, %v4075_v48, 0.0  ;;  %v4085_v20 = vadd.f32 %v3011_v57, %v2703_v26 }
 0x80e   :  { %v4081_v2 = vadd.f32 %v2703_v26, %v2325_v43  ;;  %2392 = vadd.xlane.f32.xlu0 %v2391_v36  ;;  %v2385_v22 = vsel %vm63_vm1, %v4077_v29, 0.0 }
 0x80f   :  { %v2394_v63 = vsel %vm63_vm1, %v4085_v20, 0.0 }
 0x810   :  { %v2388_v52 = vsel %vm63_vm1, %v4081_v2, 0.0 }
 0x811   :  { %2389 = vadd.xlane.f32.xlu1 %v2388_v52 }
 0x812   :  { %2386 = vadd.xlane.f32.xlu0 %v2385_v22 }
 0x813   :  { %v3014_v35 = vpop.f32.mrb[68].mxu0 }
 0x814   :  { %v4089_v25 = vadd.f32 %v3014_v35, %v2703_v26  ;;  %v2338_v46 = vpop.f32.mrb[69].mxu0 }
 0x815   :  { %v3015_v45 = vpop.f32.mrb[70].mxu0  ;;  %v4093_v15 = vadd.f32 %v2703_v26, %v2338_v46 }
 0x816   :  { %v4095_v39 = vadd.f32 %v3015_v45, %v2703_v26  ;;  %v2341_v40 = vpop.f32.mrb[71].mxu0  ;;  %2395 = vadd.xlane.f32.xlu0 %v2394_v63  ;;  %v2403_v30 = vsel %vm63_vm1, %v4089_v25, 0.0 }
 0x817   :  { %2404 = vadd.xlane.f32.xlu1 %v2403_v30  ;;  %v4099_v13 = vadd.f32 %v2703_v26, %v2341_v40  ;;  %v2397_v50 = vsel %vm63_vm1, %v4093_v15, 0.0 }
 0x818   :  { %v2406_v1 = vsel %vm63_vm1, %v4095_v39, 0.0 }
 0x819   :  { %v2400_v55 = vsel %vm63_vm1, %v4099_v13, 0.0 }
 0x81a   :  { %2407 = vadd.xlane.f32.xlu0 %v2406_v1 }
 0x81b   :  { %v3018_v17 = vpop.f32.mrb[72].mxu0  ;;  %2398 = vadd.xlane.f32.xlu1 %v2397_v50 }
 0x81c   :  { %v4105_v47 = vadd.f32 %v3018_v17, %v2703_v26  ;;  %v2354_v27 = vpop.f32.mrb[73].mxu0 }
 0x81d   :  { %v3019_v12 = vpop.f32.mrb[74].mxu0  ;;  %v4109_v60 = vadd.f32 %v2703_v26, %v2354_v27 }
 0x81e   :  { %v4111_v49 = vadd.f32 %v3019_v12, %v2703_v26  ;;  %v2357_v61 = vpop.f32.mrb[75].mxu0  ;;  %2401 = vadd.xlane.f32.xlu0 %v2400_v55  ;;  %v2415_v8 = vsel %vm63_vm1, %v4105_v47, 0.0 }
 0x81f   :  { %2416 = vadd.xlane.f32.xlu1 %v2415_v8  ;;  %v4115_v31 = vadd.f32 %v2703_v26, %v2357_v61  ;;  %v2409_v9 = vsel %vm63_vm1, %v4109_v60, 0.0 }
 0x820   :  { %v2418_v38 = vsel %vm63_vm1, %v4111_v49, 0.0 }
 0x821   :  { %v2412_v58 = vsel %vm63_vm1, %v4115_v31, 0.0 }
 0x822   :  { %2419 = vadd.xlane.f32.xlu0 %v2418_v38 }
 0x823   :  { %2410 = vadd.xlane.f32.xlu1 %v2409_v9  ;;  %v3022_v7 = vpop.f32.mrb[76].mxu0 }
 0x824   :  { %v2370_v4 = vpop.f32.mrb[77].mxu0  ;;  %v4125_v10 = vadd.f32 %v3022_v7, %v2703_v26 }
 0x825   :  { %v4121_v19 = vadd.f32 %v2703_v26, %v2370_v4  ;;  %v3023_v33 = vpop.f32.mrb[78].mxu0 }
 0x826   :  { %v2373_v11 = vpop.f32.mrb[79].mxu0  ;;  %2413 = vadd.xlane.f32.xlu0 %v2412_v58  ;;  %v4131_v3 = vadd.f32 %v3023_v33, %v2703_v26  ;;  %v2427_v56 = vsel %vm63_vm1, %v4125_v10, 0.0 }
 0x827   :  { %v4127_v51 = vadd.f32 %v2703_v26, %v2373_v11  ;;  %v2421_v23 = vsel %vm63_vm1, %v4121_v19, 0.0 }
 0x828   :  { %2422 = vadd.xlane.f32.xlu1 %v2421_v23  ;;  %v2430_v21 = vsel %vm63_vm1, %v4131_v3, 0.0 }
 0x829   :  { %v2424_v37 = vsel %vm63_vm1, %v4127_v51, 0.0 }
 0x82a   :  { %2425 = vadd.xlane.f32.xlu0 %v2424_v37 }
 0x82c   :  { %2428 = vadd.xlane.f32.xlu1 %v2427_v56 }
 0x82e   :  { %2431 = vadd.xlane.f32.xlu0 %v2430_v21 }
 0x89b   :  { %v2393_v18 = vpop.xlane.xlu0 %2392 }
 0x89c   :  { %v2436_v0 = vmul.f32 0.125, %v2393_v18 }
 0x89e   :  { %v4140_v34 = vsub.f32 %v4075_v48, %v2436_v0  ;;  %v2390_v14 = vpop.xlane.xlu1 %2389 }
 0x89f   :  { %v2387_v42 = vpop.xlane.xlu0 %2386  ;;  %v2435_v5 = vmul.f32 0.125, %v2390_v14 }
 0x8a0   :  { %v2434_v41 = vmul.f32 0.125, %v2387_v42  ;;  %v2468_v24 = vmul.f32 %v4140_v34, %v4140_v34 }
 0x8a1   :  { %v4151_v26 = vsub.f32 %v4081_v2, %v2435_v5 }
 0x8a2   :  { %v4145_v62 = vsub.f32 %v4077_v29, %v2434_v41  ;;  %v2488_v54 = vsel %vm63_vm1, %v2468_v24, 0.0 }
 0x8a3   :  { %v2396_v59 = vpop.xlane.xlu0 %2395  ;;  %2489 = vadd.xlane.f32.xlu1 %v2488_v54  ;;  %v2467_v35 = vmul.f32 %v4151_v26, %v4151_v26 }
 0x8a4   :  { %v2437_v16 = vmul.f32 0.125, %v2396_v59  ;;  %v2405_v32 = vpop.xlane.xlu1 %2404  ;;  %v2466_v6 = vmul.f32 %v4145_v62, %v4145_v62 }
 0x8a5   :  { %v2440_v28 = vmul.f32 0.125, %v2405_v32  ;;  %v2485_v50 = vsel %vm63_vm1, %v2467_v35, 0.0 }
 0x8a6   :  { %v4154_v53 = vsub.f32 %v4085_v20, %v2437_v16  ;;  %v2482_v48 = vsel %vm63_vm1, %v2466_v6, 0.0 }
 0x8a7   :  { %v4158_v44 = vsub.f32 %v4089_v25, %v2440_v28  ;;  %v2408_v57 = vpop.xlane.xlu0 %2407  ;;  %2483 = vadd.xlane.f32.xlu1 %v2482_v48 }
 0x8a8   :  { %v2441_v29 = vmul.f32 0.125, %v2408_v57  ;;  %v2399_v43 = vpop.xlane.xlu1 %2398  ;;  %v2469_v36 = vmul.f32 %v4154_v53, %v4154_v53 }
 0x8a9   :  { %v2438_v52 = vmul.f32 0.125, %v2399_v43  ;;  %v2472_v2 = vmul.f32 %v4158_v44, %v4158_v44 }
 0x8aa   :  { %v4165_v22 = vsub.f32 %v4095_v39, %v2441_v29  ;;  %v2491_v20 = vsel %vm63_vm1, %v2469_v36, 0.0 }
 0x8ab   :  { %v4171_v25 = vsub.f32 %v4093_v15, %v2438_v52  ;;  %v2402_v46 = vpop.xlane.xlu0 %2401  ;;  %2492 = vadd.xlane.f32.xlu0 %v2491_v20  ;;  %v2500_v45 = vsel %vm63_vm1, %v2472_v2, 0.0 }
 0x8ac   :  { %v2439_v63 = vmul.f32 0.125, %v2402_v46  ;;  %v2417_v40 = vpop.xlane.xlu1 %2416  ;;  %2501 = vadd.xlane.f32.xlu1 %v2500_v45  ;;  %v2473_v15 = vmul.f32 %v4165_v22, %v4165_v22 }
 0x8ad   :  { %v2444_v30 = vmul.f32 0.125, %v2417_v40  ;;  %v2470_v39 = vmul.f32 %v4171_v25, %v4171_v25 }
 0x8ae   :  { %v4177_v1 = vsub.f32 %v4099_v13, %v2439_v63  ;;  %v2503_v9 = vsel %vm63_vm1, %v2473_v15, 0.0 }
 0x8af   :  { %v4183_v17 = vsub.f32 %v4105_v47, %v2444_v30  ;;  %v2420_v27 = vpop.xlane.xlu0 %2419  ;;  %2486 = vadd.xlane.f32.xlu0 %v2485_v50  ;;  %v2494_v12 = vsel %vm63_vm1, %v2470_v39, 0.0 }
 0x8b0   :  { %v2445_v55 = vmul.f32 0.125, %v2420_v27  ;;  %v2411_v61 = vpop.xlane.xlu1 %2410  ;;  %2495 = vadd.xlane.f32.xlu1 %v2494_v12  ;;  %v2471_v47 = vmul.f32 %v4177_v1, %v4177_v1 }
 0x8b1   :  { %v2442_v8 = vmul.f32 0.125, %v2411_v61  ;;  %v2476_v13 = vmul.f32 %v4183_v17, %v4183_v17  ;;  %v4238_v61 = vld [vmem:[%s4363_s6] ss:$0 sm:$0xff] }
 0x8b2   :  { %v4189_v38 = vsub.f32 %v4111_v49, %v2445_v55 }
 0x8b3   :  { %v4195_v7 = vsub.f32 %v4109_v60, %v2442_v8  ;;  %v2414_v4 = vpop.xlane.xlu0 %2413  ;;  %2504 = vadd.xlane.f32.xlu0 %v2503_v9  ;;  %v2512_v33 = vsel %vm63_vm1, %v2476_v13, 0.0  ;;  %v2497_v60 = vsel %vm63_vm1, %v2471_v47, 0.0 }
 0x8b4   :  { %v2443_v58 = vmul.f32 0.125, %v2414_v4  ;;  %2513 = vadd.xlane.f32.xlu1 %v2512_v33  ;;  %v2477_v49 = vmul.f32 %v4189_v38, %v4189_v38  ;;  %v4244_v4 = vld [vmem:[%s4364_s7] ss:$0 sm:$0xff] }
 0x8b5   :  { %v2423_v11 = vpop.xlane.xlu1 %2422  ;;  %v2474_v23 = vmul.f32 %v4195_v7, %v4195_v7 }
 0x8b6   :  { %v4203_v37 = vsub.f32 %v4115_v31, %v2443_v58  ;;  %v2446_v56 = vmul.f32 0.125, %v2423_v11  ;;  %v2515_v41 = vsel %vm63_vm1, %v2477_v49, 0.0 }
 0x8b7   :  { %2498 = vadd.xlane.f32.xlu0 %v2497_v60  ;;  %v2426_v21 = vpop.xlane.xlu0 %2425  ;;  %v2506_v18 = vsel %vm63_vm1, %v2474_v23, 0.0 }
 0x8b8   :  { %v4208_v0 = vsub.f32 %v4121_v19, %v2446_v56  ;;  %v2447_v14 = vmul.f32 0.125, %v2426_v21  ;;  %2507 = vadd.xlane.f32.xlu1 %v2506_v18  ;;  %v2475_v54 = vmul.f32 %v4203_v37, %v4203_v37 }
 0x8b9   :  { %v2429_v42 = vpop.xlane.xlu1 %2428 }
 0x8ba   :  { %v4212_v24 = vsub.f32 %v4127_v51, %v2447_v14  ;;  %v2448_v31 = vmul.f32 0.125, %v2429_v42  ;;  %v2478_v5 = vmul.f32 %v4208_v0, %v4208_v0  ;;  %v2509_v51 = vsel %vm63_vm1, %v2475_v54, 0.0 }
 0x8bb   :  { %2516 = vadd.xlane.f32.xlu0 %v2515_v41  ;;  %v2432_v59 = vpop.xlane.xlu0 %2431 }
 0x8bc   :  { %v4219_v19 = vsub.f32 %v4125_v10, %v2448_v31  ;;  %v2449_v16 = vmul.f32 0.125, %v2432_v59  ;;  %v2518_v32 = vsel %vm63_vm1, %v2478_v5, 0.0  ;;  %v2479_v48 = vmul.f32 %v4212_v24, %v4212_v24 }
 0x8bd   :  { %2519 = vadd.xlane.f32.xlu1 %v2518_v32 }
 0x8be   :  { %v4223_v6 = vsub.f32 %v4131_v3, %v2449_v16  ;;  %v2480_v28 = vmul.f32 %v4219_v19, %v4219_v19  ;;  %v2521_v10 = vsel %vm63_vm1, %v2479_v48, 0.0 }
 0x8bf   :  { %2510 = vadd.xlane.f32.xlu0 %v2509_v51 }
 0x8c0   :  { %v2524_v57 = vsel %vm63_vm1, %v2480_v28, 0.0  ;;  %v2481_v29 = vmul.f32 %v4223_v6, %v4223_v6 }
 0x8c1   :  { %2525 = vadd.xlane.f32.xlu1 %v2524_v57 }
 0x8c2   :  { %v2527_v3 = vsel %vm63_vm1, %v2481_v29, 0.0 }
 0x8c3   :  { %2522 = vadd.xlane.f32.xlu0 %v2521_v10 }
 0x8c7   :  { %2528 = vadd.xlane.f32.xlu0 %v2527_v3 }
 0x930   :  { %v2490_v43 = vpop.xlane.xlu1 %2489 }
 0x931   :  { %v2532_v36 = vmul.f32 0.125, %v2490_v43 }
 0x933   :  { %v2548_v52 = vadd.f32 1e-05, %v2532_v36 }
 0x934   :  { %v2484_v2 = vpop.xlane.xlu1 %2483 }
 0x935   :  { %3205 = vrsqrt.f32 %v2548_v52  ;;  %v2530_v20 = vmul.f32 0.125, %v2484_v2 }
 0x937   :  { %v2546_v35 = vadd.f32 1e-05, %v2530_v20 }
 0x938   :  { %v2493_v46 = vpop.xlane.xlu0 %2492 }
 0x939   :  { %3207 = vrsqrt.f32 %v2546_v35  ;;  %v2533_v45 = vmul.f32 0.125, %v2493_v46  ;;  %v2502_v63 = vpop.xlane.xlu1 %2501 }
 0x93a   :  { %v2536_v40 = vmul.f32 0.125, %v2502_v63 }
 0x93b   :  { %v2549_v30 = vadd.f32 1e-05, %v2533_v45 }
 0x93c   :  { %v2552_v39 = vadd.f32 1e-05, %v2536_v40  ;;  %v2487_v50 = vpop.xlane.xlu0 %2486 }
 0x93d   :  { %3209 = vrsqrt.f32 %v2549_v30  ;;  %v2531_v15 = vmul.f32 0.125, %v2487_v50  ;;  %v2496_v27 = vpop.xlane.xlu1 %2495 }
 0x93e   :  { %3211 = vrsqrt.f32 %v2552_v39  ;;  %v2534_v12 = vmul.f32 0.125, %v2496_v27 }
 0x93f   :  { %v3206_v55 = vpop.eup %3205  ;;  %v2547_v8 = vadd.f32 1e-05, %v2531_v15 }
 0x940   :  { %v2580_v13 = vmul.f32 %v3206_v55, %v4140_v34  ;;  %v2550_v9 = vadd.f32 1e-05, %v2534_v12  ;;  %v2505_v47 = vpop.xlane.xlu0 %2504 }
 0x941   :  { %3213 = vrsqrt.f32 %v2547_v8  ;;  %v2537_v33 = vmul.f32 0.125, %v2505_v47  ;;  %v2514_v58 = vpop.xlane.xlu1 %2513 }
 0x942   :  { %v2603_v11 = vmul.f32 %v4238_v61, %v2580_v13  ;;  %3215 = vrsqrt.f32 %v2550_v9  ;;  %v2540_v23 = vmul.f32 0.125, %v2514_v58 }
 0x943   :  { %v3208_v49 = vpop.eup %3207  ;;  %v2553_v56 = vadd.f32 1e-05, %v2537_v33 }
 0x944   :  { %v2626_v60 = vadd.f32 %v4244_v4, %v2603_v11  ;;  %v2578_v34 = vmul.f32 %v3208_v49, %v4145_v62  ;;  %v2556_v21 = vadd.f32 1e-05, %v2540_v23  ;;  %v2499_v18 = vpop.xlane.xlu0 %2498 }
 0x945   :  { %3217 = vrsqrt.f32 %v2553_v56  ;;  %v2535_v14 = vmul.f32 0.125, %v2499_v18  ;;  %v2508_v42 = vpop.xlane.xlu1 %2507 }
 0x946   :  { %2642 = vst.msk [vmem:[%s4365_s8 + $0x10] sm:$0xff] %vm63_vm1, %v2626_v60  ;;  %v2601_v41 = vmul.f32 %v4238_v61, %v2578_v34  ;;  %3219 = vrsqrt.f32 %v2556_v21  ;;  %v2538_v31 = vmul.f32 0.125, %v2508_v42 }
 0x947   :  { %v3210_v5 = vpop.eup %3209  ;;  %v2551_v54 = vadd.f32 1e-05, %v2535_v14 }
 0x948   :  { %v3212_v59 = vpop.eup %3211  ;;  %v2624_v16 = vadd.f32 %v4244_v4, %v2601_v41  ;;  %v2581_v62 = vmul.f32 %v3210_v5, %v4154_v53  ;;  %v2554_v32 = vadd.f32 1e-05, %v2538_v31  ;;  %v2517_v51 = vpop.xlane.xlu0 %2516 }
 0x949   :  { %v2584_v28 = vmul.f32 %v3212_v59, %v4158_v44  ;;  %3221 = vrsqrt.f32 %v2551_v54  ;;  %v2541_v48 = vmul.f32 0.125, %v2517_v51 }
 0x94a   :  { %2640 = vst.msk [vmem:[%s4365_s8] sm:$0xff] %vm63_vm1, %v2624_v16  ;;  %v2604_v57 = vmul.f32 %v4238_v61, %v2581_v62  ;;  %3223 = vrsqrt.f32 %v2554_v32  ;;  %v2520_v10 = vpop.xlane.xlu1 %2519 }
 0x94b   :  { %v3214_v29 = vpop.eup %3213  ;;  %v2607_v3 = vmul.f32 %v4238_v61, %v2584_v28  ;;  %v2557_v43 = vadd.f32 1e-05, %v2541_v48  ;;  %v2542_v53 = vmul.f32 0.125, %v2520_v10 }
 0x94c   :  { %v3216_v36 = vpop.eup %3215  ;;  %v2627_v52 = vadd.f32 %v4244_v4, %v2604_v57  ;;  %v2579_v44 = vmul.f32 %v3214_v29, %v4151_v26  ;;  %v2511_v2 = vpop.xlane.xlu0 %2510 }
 0x94d   :  { %v2630_v20 = vadd.f32 %v4244_v4, %v2607_v3  ;;  %v2582_v35 = vmul.f32 %v3216_v36, %v4171_v25  ;;  %3225 = vrsqrt.f32 %v2557_v43  ;;  %v2558_v46 = vadd.f32 1e-05, %v2542_v53 }
 0x94e   :  { %2643 = vst.msk [vmem:[%s4365_s8 + $0x18] sm:$0xff] %vm63_vm1, %v2627_v52  ;;  %v2602_v45 = vmul.f32 %v4238_v61, %v2579_v44  ;;  %v2539_v63 = vmul.f32 0.125, %v2511_v2  ;;  %v2526_v40 = vpop.xlane.xlu1 %2525 }
 0x94f   :  { %v3218_v30 = vpop.eup %3217  ;;  %2646 = vst.msk [vmem:[%s4365_s8 + $0x30] sm:$0xff] %vm63_vm1, %v2630_v20  ;;  %v2605_v26 = vmul.f32 %v4238_v61, %v2582_v35  ;;  %3227 = vrsqrt.f32 %v2558_v46  ;;  %v2544_v25 = vmul.f32 0.125, %v2526_v40 }
 0x950   :  { %v3220_v39 = vpop.eup %3219  ;;  %v2625_v50 = vadd.f32 %v4244_v4, %v2602_v45  ;;  %v2585_v15 = vmul.f32 %v3218_v30, %v4165_v22  ;;  %v2555_v27 = vadd.f32 1e-05, %v2539_v63  ;;  %v2523_v12 = vpop.xlane.xlu0 %2522 }
 0x951   :  { %v2628_v55 = vadd.f32 %v4244_v4, %v2605_v26  ;;  %v2588_v8 = vmul.f32 %v3220_v39, %v4183_v17  ;;  %v2560_v13 = vadd.f32 1e-05, %v2544_v25  ;;  %v2543_v9 = vmul.f32 0.125, %v2523_v12 }
 0x952   :  { %2641 = vst.msk [vmem:[%s4365_s8 + $0x8] sm:$0xff] %vm63_vm1, %v2625_v50  ;;  %v2608_v47 = vmul.f32 %v4238_v61, %v2585_v15  ;;  %3229 = vrsqrt.f32 %v2555_v27 }
 0x953   :  { %v3222_v33 = vpop.eup %3221  ;;  %2644 = vst.msk [vmem:[%s4365_s8 + $0x20] sm:$0xff] %vm63_vm1, %v2628_v55  ;;  %v2611_v22 = vmul.f32 %v4238_v61, %v2588_v8  ;;  %3231 = vrsqrt.f32 %v2560_v13  ;;  %v2559_v17 = vadd.f32 1e-05, %v2543_v9 }
 0x954   :  { %v3224_v58 = vpop.eup %3223  ;;  %v2631_v11 = vadd.f32 %v4244_v4, %v2608_v47  ;;  %v2583_v23 = vmul.f32 %v3222_v33, %v4177_v1  ;;  %v2529_v49 = vpop.xlane.xlu0 %2528 }
 0x955   :  { %v2634_v56 = vadd.f32 %v4244_v4, %v2611_v22  ;;  %v2586_v60 = vmul.f32 %v3224_v58, %v4195_v7  ;;  %3233 = vrsqrt.f32 %v2559_v17  ;;  %v2545_v34 = vmul.f32 0.125, %v2529_v49 }
 0x956   :  { %2647 = vst.msk [vmem:[%s4365_s8 + $0x38] sm:$0xff] %vm63_vm1, %v2631_v11  ;;  %v2606_v21 = vmul.f32 %v4238_v61, %v2583_v23 }
 0x957   :  { %v3226_v18 = vpop.eup %3225  ;;  %2650 = vst.msk [vmem:[%s4365_s8 + $0x50] sm:$0xff] %vm63_vm1, %v2634_v56  ;;  %v2609_v1 = vmul.f32 %v4238_v61, %v2586_v60  ;;  %v2561_v14 = vadd.f32 1e-05, %v2545_v34 }
 0x958   :  { %v2629_v7 = vadd.f32 %v4244_v4, %v2606_v21  ;;  %v2589_v42 = vmul.f32 %v3226_v18, %v4189_v38 }
 0x959   :  { %v3228_v41 = vpop.eup %3227  ;;  %v2632_v31 = vadd.f32 %v4244_v4, %v2609_v1  ;;  %3235 = vrsqrt.f32 %v2561_v14 }
 0x95a   :  { %2645 = vst.msk [vmem:[%s4365_s8 + $0x28] sm:$0xff] %vm63_vm1, %v2629_v7  ;;  %v2612_v5 = vmul.f32 %v4238_v61, %v2589_v42  ;;  %v2590_v54 = vmul.f32 %v3228_v41, %v4208_v0 }
 0x95b   :  { %2648 = vst.msk [vmem:[%s4365_s8 + $0x40] sm:$0xff] %vm63_vm1, %v2632_v31 }
 0x95c   :  { %v3230_v59 = vpop.eup %3229  ;;  %v2635_v38 = vadd.f32 %v4244_v4, %v2612_v5  ;;  %v2613_v16 = vmul.f32 %v4238_v61, %v2590_v54 }
 0x95d   :  { %v3232_v62 = vpop.eup %3231  ;;  %v2587_v32 = vmul.f32 %v3230_v59, %v4203_v37 }
 0x95e   :  { %2651 = vst.msk [vmem:[%s4365_s8 + $0x58] sm:$0xff] %vm63_vm1, %v2635_v38  ;;  %v2636_v0 = vadd.f32 %v4244_v4, %v2613_v16  ;;  %v2592_v51 = vmul.f32 %v3232_v62, %v4219_v19 }
 0x95f   :  { %v3234_v28 = vpop.eup %3233  ;;  %v2610_v48 = vmul.f32 %v4238_v61, %v2587_v32 }
 0x960   :  { %2652 = vst.msk [vmem:[%s4365_s8 + $0x60] sm:$0xff] %vm63_vm1, %v2636_v0  ;;  %v2615_v57 = vmul.f32 %v4238_v61, %v2592_v51  ;;  %v2591_v37 = vmul.f32 %v3234_v28, %v4212_v24 }
 0x961   :  { %v2633_v10 = vadd.f32 %v4244_v4, %v2610_v48 }
 0x962   :  { %v2638_v29 = vadd.f32 %v4244_v4, %v2615_v57  ;;  %v2614_v3 = vmul.f32 %v4238_v61, %v2591_v37 }
 0x963   :  { %v3236_v43 = vpop.eup %3235  ;;  %2649 = vst.msk [vmem:[%s4365_s8 + $0x48] sm:$0xff] %vm63_vm1, %v2633_v10 }
 0x964   :  { %2654 = vst.msk [vmem:[%s4365_s8 + $0x70] sm:$0xff] %vm63_vm1, %v2638_v29  ;;  %v2637_v19 = vadd.f32 %v4244_v4, %v2614_v3  ;;  %v2593_v24 = vmul.f32 %v3236_v43, %v4223_v6 }
 0x966   :  { %2653 = vst.msk [vmem:[%s4365_s8 + $0x68] sm:$0xff] %vm63_vm1, %v2637_v19  ;;  %v2616_v53 = vmul.f32 %v4238_v61, %v2593_v24 }
 0x968   :  { %v2639_v36 = vadd.f32 %v4244_v4, %v2616_v53 }
 0x96a   :  { %2655 = vst.msk [vmem:[%s4365_s8 + $0x78] sm:$0xff] %vm63_vm1, %v2639_v36 }

// kernel: lsrformer_forward.17
= control target key start
LH: loop header
LB: loop body
LE: loop exit
PB: predicated region body
PF: predicated region fallthrough
CT: control target
= control target key end

     0   :  { %vm19_vm0 = vcmask 15360   ;;  %v372_v3 = vmov 0.0   ;;  %vm90_vm1 = vcmask 588800   ;;  %vm115_vm2 = vcmask 1043456   ;;  %s593_s1 = inlined_call_operand.vmem [shape: f32[72,2], index: 1, kind: input, shape index: {}]   ;;  %s594_s0 = inlined_call_operand.vmem [shape: f32[128,72], index: 0, kind: input, shape index: {}]   ;;  %s595_s2 = inlined_call_operand.vmem [shape: f32[1,2], index: 2, kind: input, shape index: {}]   ;;  %s596_s3 = inlined_call_operand.vmem [shape: f32[128,2], index: 3, kind: output, shape index: {}]  }
   0x1   :  { %v76_v0 = vld [vmem:[%s593_s1] sm:$0xff]  ;;  %v77_v1 = vld [vmem:[%s593_s1 + $0x8] sm:$0xff]  ;;  %v78_v2 = vld [vmem:[%s593_s1 + $0x10] sm:$0xff]  ;;  %22 = vst.msk [vmem:[#allocation2 + $0x10] sm:$0xff] %vm19_vm0, %v372_v3 }
   0x2   :  { %20 = vst.msk [vmem:[#allocation2] sm:$0xff] %vm19_vm0, %v372_v3  ;;  %21 = vst.msk [vmem:[#allocation2 + $0x8] sm:$0xff] %vm19_vm0, %v372_v3  ;;  %v85_v4 = vpack.c.bf16 %v77_v1, %v76_v0  ;;  %v79_v5 = vld [vmem:[%s593_s1 + $0x18] sm:$0xff]  ;;  %v80_v7 = vld [vmem:[%s593_s1 + $0x20] sm:$0xff] }
   0x3   :  { %23 = vst.msk [vmem:[#allocation2 + $0x18] sm:$0xff] %vm19_vm0, %v372_v3  ;;  %24 = vst.msk [vmem:[#allocation2 + $0x20] sm:$0xff] %vm19_vm0, %v372_v3  ;;  %v86_v6 = vpack.c.bf16 %v79_v5, %v78_v2  ;;  %v81_v8 = vld [vmem:[%s593_s1 + $0x28] sm:$0xff]  ;;  %v52_v9 = vld [vmem:[%s594_s0] sm:$0xff] }
   0x4   :  { %25 = vst.msk [vmem:[#allocation2 + $0x28] sm:$0xff] %vm19_vm0, %v372_v3  ;;  %26 = vst.msk [vmem:[#allocation2 + $0x30] sm:$0xff] %vm19_vm0, %v372_v3  ;;  %333 = vmatprep.subr.bf16.mxu0 %v85_v4  ;;  %359 = vmatprep.subr.bf16.mxu1 %v85_v4  ;;  %v53_v10 = vld [vmem:[%s594_s0 + $0x8] sm:$0xff]  ;;  %v60_v11 = vld [vmem:[%s594_s0 + $0x40] sm:$0xff]  ;;  %v87_v14 = vpack.c.bf16 %v81_v8, %v80_v7 }
   0x5   :  { %27 = vst.msk [vmem:[#allocation2 + $0x38] sm:$0xff] %vm19_vm0, %v372_v3  ;;  %28 = vst.msk [vmem:[#allocation2 + $0x40] sm:$0xff] %vm19_vm0, %v372_v3  ;;  %334 = vmatpush3.bf16.msra.mxu0 %v85_v4  ;;  %364 = vmatpush3.bf16.msra.mxu1 %v85_v4  ;;  %v68_v12 = vpack.c.bf16 %v53_v10, %v52_v9  ;;  %v61_v13 = vld [vmem:[%s594_s0 + $0x48] sm:$0xff]  ;;  %v82_v16 = vld [vmem:[%s593_s1 + $0x30] sm:$0xff] }
   0x6   :  { %29 = vst.msk [vmem:[#allocation2 + $0x48] sm:$0xff] %vm19_vm0, %v372_v3  ;;  %30 = vst.msk [vmem:[#allocation2 + $0x50] sm:$0xff] %vm19_vm0, %v372_v3  ;;  %335 = vmatprep.subr.bf16.mxu0 %v86_v6  ;;  %360 = vmatprep.subr.bf16.mxu1 %v86_v6  ;;  %v72_v15 = vpack.c.bf16 %v61_v13, %v60_v11  ;;  %v83_v17 = vld [vmem:[%s593_s1 + $0x38] sm:$0xff]  ;;  %v84_v19 = vld [vmem:[%s593_s1 + $0x40] sm:$0xff] }
   0x7   :  { %31 = vst.msk [vmem:[#allocation2 + $0x58] sm:$0xff] %vm19_vm0, %v372_v3  ;;  %32 = vst.msk [vmem:[#allocation2 + $0x60] sm:$0xff] %vm19_vm0, %v372_v3  ;;  %343 = vmatprep.mubr.msk.bf16.mxu0 %vm90_vm1, %v68_v12  ;;  %v88_v18 = vpack.c.bf16 %v83_v17, %v82_v16  ;;  %v89_v20 = vpack.c.bf16 %v84_v19, %v84_v19  ;;  %v54_v21 = vld [vmem:[%s594_s0 + $0x10] sm:$0xff]  ;;  %v55_v22 = vld [vmem:[%s594_s0 + $0x18] sm:$0xff] }
   0x8   :  { %33 = vst.msk [vmem:[#allocation2 + $0x68] sm:$0xff] %vm19_vm0, %v372_v3  ;;  %34 = vst.msk [vmem:[#allocation2 + $0x70] sm:$0xff] %vm19_vm0, %v372_v3  ;;  %351 = vmatprep.mubr.msk.bf16.mxu1 %vm90_vm1, %v72_v15  ;;  %v62_v23 = vld [vmem:[%s594_s0 + $0x50] sm:$0xff]  ;;  %v63_v24 = vld [vmem:[%s594_s0 + $0x58] sm:$0xff]  ;;  %v69_v30 = vpack.c.bf16 %v55_v22, %v54_v21 }
   0x9   :  { %35 = vst.msk [vmem:[#allocation2 + $0x78] sm:$0xff] %vm19_vm0, %v372_v3  ;;  %336 = vmatpush3.bf16.msra.mxu0 %v86_v6  ;;  %365 = vmatpush3.bf16.msra.mxu1 %v86_v6  ;;  %v56_v25 = vld [vmem:[%s594_s0 + $0x20] sm:$0xff]  ;;  %v117_v26 = vsel %vm115_vm2, %v89_v20, 0  ;;  %v57_v27 = vld [vmem:[%s594_s0 + $0x28] sm:$0xff]  ;;  %v73_v31 = vpack.c.bf16 %v63_v24, %v62_v23  ;;  %v58_v34 = vld [vmem:[%s594_s0 + $0x30] sm:$0xff] }
   0xa   :  { %337 = vmatprep.subr.bf16.mxu0 %v87_v14  ;;  %361 = vmatprep.subr.bf16.mxu1 %v87_v14  ;;  %v64_v28 = vld [vmem:[%s594_s0 + $0x60] sm:$0xff]  ;;  %v65_v29 = vld [vmem:[%s594_s0 + $0x68] sm:$0xff]  ;;  %v70_v32 = vpack.c.bf16 %v57_v27, %v56_v25  ;;  %v59_v35 = vld [vmem:[%s594_s0 + $0x38] sm:$0xff] }
   0xb   :  { %v74_v33 = vpack.c.bf16 %v65_v29, %v64_v28  ;;  %v66_v36 = vld [vmem:[%s594_s0 + $0x70] sm:$0xff]  ;;  %v67_v37 = vld [vmem:[%s594_s0 + $0x78] sm:$0xff]  ;;  %v71_v38 = vpack.c.bf16 %v59_v35, %v58_v34  ;;  %v36_v42 = vld [vmem:[#allocation2] sm:$0xff] }
   0xc   :  { %v75_v39 = vpack.c.bf16 %v67_v37, %v66_v36  ;;  %v38_v40 = vld [vmem:[#allocation2 + $0x10] sm:$0xff]  ;;  %v44_v43 = vld [vmem:[#allocation2 + $0x40] sm:$0xff]  ;;  %v39_v46 = vld [vmem:[#allocation2 + $0x18] sm:$0xff] }
   0xd   :  { %338 = vmatpush3.bf16.msra.mxu0 %v87_v14  ;;  %366 = vmatpush3.bf16.msra.mxu1 %v87_v14  ;;  %v46_v41 = vld [vmem:[#allocation2 + $0x50] sm:$0xff]  ;;  %v37_v52 = vld [vmem:[#allocation2 + $0x8] sm:$0xff]  ;;  %v40_v2 = vld [vmem:[#allocation2 + $0x20] sm:$0xff] }
   0xe   :  { %339 = vmatprep.subr.bf16.mxu0 %v88_v18  ;;  %362 = vmatprep.subr.bf16.mxu1 %v88_v18  ;;  %v47_v47 = vld [vmem:[#allocation2 + $0x58] sm:$0xff]  ;;  %v45_v53 = vld [vmem:[#allocation2 + $0x48] sm:$0xff]  ;;  %v42_v0 = vld [vmem:[#allocation2 + $0x30] sm:$0xff] }
   0xf   :  { %v50_v1 = vld [vmem:[#allocation2 + $0x70] sm:$0xff]  ;;  %v48_v3 = vld [vmem:[#allocation2 + $0x60] sm:$0xff]  ;;  %v43_v7 = vld [vmem:[#allocation2 + $0x38] sm:$0xff] }
  0x10   :  { %v503_v4 = vld [vmem:[%s595_s2] ss:$0 sm:$0xff]  ;;  %v51_v8 = vld [vmem:[#allocation2 + $0x78] sm:$0xff]  ;;  %v41_v13 = vld [vmem:[#allocation2 + $0x28] sm:$0xff] }
  0x11   :  { %340 = vmatpush3.bf16.msra.mxu0 %v88_v18  ;;  %367 = vmatpush3.bf16.msra.mxu1 %v88_v18  ;;  %v49_v14 = vld [vmem:[#allocation2 + $0x68] sm:$0xff] }
  0x12   :  { %369 = vmatprep.subr.msk.bf16.mxu0 %vm115_vm2, %v89_v20  ;;  %370 = vmatprep.subr.msk.bf16.mxu1 %vm115_vm2, %v89_v20 }
  0x15   :  { %342 = vmatpush3.bf16.msra.mxu0 %v117_v26  ;;  %368 = vmatpush3.bf16.msra.mxu1 %v117_v26 }
  0x18   :  { %344 = vmatmul.mubr.msk.bf16.vlgmr.msra.gmra.mrb[0].mxu0 %vm90_vm1, %v69_v30  ;;  %352 = vmatmul.mubr.msk.bf16.vlgmr.msra.gmra.mrb[0].mxu1 %vm90_vm1, %v73_v31 }
  0x19   :  { %347 = vmatprep.mubr.msk.bf16.mxu0 %vm90_vm1, %v70_v32  ;;  %355 = vmatprep.mubr.msk.bf16.mxu1 %vm90_vm1, %v74_v33 }
  0x20   :  { %348 = vmatmul.mubr.msk.bf16.gmra.mrb[4].mxu0 %vm90_vm1, %v71_v38  ;;  %356 = vmatmul.mubr.msk.bf16.gmra.mrb[4].mxu1 %vm90_vm1, %v75_v39 }
  0xeb   :  { %v345_v44 = vpop.f32.mrb[0].mxu0  ;;  %v353_v45 = vpop.f32.mrb[0].mxu1 }
  0xec   :  { %v218_v48 = vadd.f32 %v345_v44, %v38_v40  ;;  %v226_v49 = vadd.f32 %v353_v45, %v46_v41  ;;  %v153_v50 = vpop.f32.mrb[1].mxu0  ;;  %v185_v51 = vpop.f32.mrb[1].mxu1 }
  0xed   :  { %v216_v54 = vadd.f32 %v153_v50, %v36_v42  ;;  %v224_v55 = vadd.f32 %v185_v51, %v44_v43  ;;  %v346_v56 = vpop.f32.mrb[2].mxu0  ;;  %v354_v57 = vpop.f32.mrb[2].mxu1 }
  0xee   :  { %235 = vst.msk [vmem:[#allocation2 + $0x10] sm:$0xff] %vm19_vm0, %v218_v48  ;;  %243 = vst.msk [vmem:[#allocation2 + $0x50] sm:$0xff] %vm19_vm0, %v226_v49  ;;  %v219_v58 = vadd.f32 %v346_v56, %v39_v46  ;;  %v227_v59 = vadd.f32 %v354_v57, %v47_v47  ;;  %v156_v60 = vpop.f32.mrb[3].mxu0  ;;  %v188_v61 = vpop.f32.mrb[3].mxu1 }
  0xef   :  { %233 = vst.msk [vmem:[#allocation2] sm:$0xff] %vm19_vm0, %v216_v54  ;;  %241 = vst.msk [vmem:[#allocation2 + $0x40] sm:$0xff] %vm19_vm0, %v224_v55  ;;  %v217_v62 = vadd.f32 %v156_v60, %v37_v52  ;;  %v225_v63 = vadd.f32 %v188_v61, %v45_v53 }
  0xf0   :  { %236 = vst.msk [vmem:[#allocation2 + $0x18] sm:$0xff] %vm19_vm0, %v219_v58  ;;  %244 = vst.msk [vmem:[#allocation2 + $0x58] sm:$0xff] %vm19_vm0, %v227_v59 }
  0xf1   :  { %234 = vst.msk [vmem:[#allocation2 + $0x8] sm:$0xff] %vm19_vm0, %v217_v62  ;;  %242 = vst.msk [vmem:[#allocation2 + $0x48] sm:$0xff] %vm19_vm0, %v225_v63 }
  0xf3   :  { %v349_v5 = vpop.f32.mrb[4].mxu0  ;;  %v357_v6 = vpop.f32.mrb[4].mxu1 }
  0xf4   :  { %v222_v9 = vadd.f32 %v349_v5, %v42_v0  ;;  %v230_v10 = vadd.f32 %v357_v6, %v50_v1  ;;  %v169_v11 = vpop.f32.mrb[5].mxu0  ;;  %v201_v12 = vpop.f32.mrb[5].mxu1 }
  0xf5   :  { %v254_v15 = vld [vmem:[#allocation2 + $0x10] sm:$0xff]  ;;  %v220_v17 = vadd.f32 %v169_v11, %v40_v2  ;;  %v228_v18 = vadd.f32 %v201_v12, %v48_v3  ;;  %v350_v19 = vpop.f32.mrb[6].mxu0  ;;  %v358_v20 = vpop.f32.mrb[6].mxu1 }
  0xf6   :  { %v262_v16 = vld [vmem:[#allocation2 + $0x50] sm:$0xff]  ;;  %v277_v21 = vadd.f32 %v503_v4, %v254_v15  ;;  %v252_v23 = vld [vmem:[#allocation2] sm:$0xff]  ;;  %239 = vst.msk [vmem:[#allocation2 + $0x30] sm:$0xff] %vm19_vm0, %v222_v9  ;;  %247 = vst.msk [vmem:[#allocation2 + $0x70] sm:$0xff] %vm19_vm0, %v230_v10  ;;  %v223_v25 = vadd.f32 %v350_v19, %v43_v7  ;;  %v231_v26 = vadd.f32 %v358_v20, %v51_v8  ;;  %v172_v27 = vpop.f32.mrb[7].mxu0  ;;  %v204_v28 = vpop.f32.mrb[7].mxu1 }
  0xf7   :  { %v285_v22 = vadd.f32 %v503_v4, %v262_v16  ;;  %v260_v24 = vld [vmem:[#allocation2 + $0x40] sm:$0xff]  ;;  %v275_v29 = vadd.f32 %v503_v4, %v252_v23  ;;  %v255_v31 = vld [vmem:[#allocation2 + $0x18] sm:$0xff]  ;;  %237 = vst.msk [vmem:[#allocation2 + $0x20] sm:$0xff] %vm19_vm0, %v220_v17  ;;  %245 = vst.msk [vmem:[#allocation2 + $0x60] sm:$0xff] %vm19_vm0, %v228_v18  ;;  %v221_v33 = vadd.f32 %v172_v27, %v41_v13 }
  0xf8   :  { %v283_v30 = vadd.f32 %v503_v4, %v260_v24  ;;  %v263_v32 = vld [vmem:[#allocation2 + $0x58] sm:$0xff]  ;;  %v229_v34 = vadd.f32 %v204_v28, %v49_v14  ;;  %293 = vst.msk [vmem:[%s596_s3 + $0x10] sm:$0xff] %vm19_vm0, %v277_v21  ;;  %v278_v35 = vadd.f32 %v503_v4, %v255_v31  ;;  %v253_v37 = vld [vmem:[#allocation2 + $0x8] sm:$0xff]  ;;  %240 = vst.msk [vmem:[#allocation2 + $0x38] sm:$0xff] %vm19_vm0, %v223_v25 }
  0xf9   :  { %301 = vst.msk [vmem:[%s596_s3 + $0x50] sm:$0xff] %vm19_vm0, %v285_v22  ;;  %v286_v36 = vadd.f32 %v503_v4, %v263_v32  ;;  %v261_v38 = vld [vmem:[#allocation2 + $0x48] sm:$0xff]  ;;  %248 = vst.msk [vmem:[#allocation2 + $0x78] sm:$0xff] %vm19_vm0, %v231_v26  ;;  %v276_v39 = vadd.f32 %v503_v4, %v253_v37 }
  0xfa   :  { %291 = vst.msk [vmem:[%s596_s3] sm:$0xff] %vm19_vm0, %v275_v29  ;;  %299 = vst.msk [vmem:[%s596_s3 + $0x40] sm:$0xff] %vm19_vm0, %v283_v30  ;;  %v284_v40 = vadd.f32 %v503_v4, %v261_v38 }
  0xfb   :  { %238 = vst.msk [vmem:[#allocation2 + $0x28] sm:$0xff] %vm19_vm0, %v221_v33  ;;  %246 = vst.msk [vmem:[#allocation2 + $0x68] sm:$0xff] %vm19_vm0, %v229_v34 }
  0xfc   :  { %294 = vst.msk [vmem:[%s596_s3 + $0x18] sm:$0xff] %vm19_vm0, %v278_v35  ;;  %302 = vst.msk [vmem:[%s596_s3 + $0x58] sm:$0xff] %vm19_vm0, %v286_v36 }
  0xfd   :  { %292 = vst.msk [vmem:[%s596_s3 + $0x8] sm:$0xff] %vm19_vm0, %v276_v39  ;;  %300 = vst.msk [vmem:[%s596_s3 + $0x48] sm:$0xff] %vm19_vm0, %v284_v40  ;;  %v258_v41 = vld [vmem:[#allocation2 + $0x30] sm:$0xff] }
  0xfe   :  { %v266_v42 = vld [vmem:[#allocation2 + $0x70] sm:$0xff]  ;;  %v281_v43 = vadd.f32 %v503_v4, %v258_v41  ;;  %v256_v45 = vld [vmem:[#allocation2 + $0x20] sm:$0xff] }
  0xff   :  { %v289_v44 = vadd.f32 %v503_v4, %v266_v42  ;;  %v264_v46 = vld [vmem:[#allocation2 + $0x60] sm:$0xff]  ;;  %v279_v47 = vadd.f32 %v503_v4, %v256_v45  ;;  %v259_v49 = vld [vmem:[#allocation2 + $0x38] sm:$0xff] }
 0x100   :  { %v287_v48 = vadd.f32 %v503_v4, %v264_v46  ;;  %v267_v50 = vld [vmem:[#allocation2 + $0x78] sm:$0xff]  ;;  %297 = vst.msk [vmem:[%s596_s3 + $0x30] sm:$0xff] %vm19_vm0, %v281_v43  ;;  %v282_v51 = vadd.f32 %v503_v4, %v259_v49 }
 0x101   :  { %305 = vst.msk [vmem:[%s596_s3 + $0x70] sm:$0xff] %vm19_vm0, %v289_v44  ;;  %v290_v52 = vadd.f32 %v503_v4, %v267_v50  ;;  %295 = vst.msk [vmem:[%s596_s3 + $0x20] sm:$0xff] %vm19_vm0, %v279_v47 }
 0x102   :  { %v257_v53 = vld [vmem:[#allocation2 + $0x28] sm:$0xff]  ;;  %303 = vst.msk [vmem:[%s596_s3 + $0x60] sm:$0xff] %vm19_vm0, %v287_v48  ;;  %298 = vst.msk [vmem:[%s596_s3 + $0x38] sm:$0xff] %vm19_vm0, %v282_v51 }
 0x103   :  { %v265_v54 = vld [vmem:[#allocation2 + $0x68] sm:$0xff]  ;;  %v280_v55 = vadd.f32 %v503_v4, %v257_v53  ;;  %306 = vst.msk [vmem:[%s596_s3 + $0x78] sm:$0xff] %vm19_vm0, %v290_v52 }
 0x104   :  { %v288_v56 = vadd.f32 %v503_v4, %v265_v54 }
 0x105   :  { %296 = vst.msk [vmem:[%s596_s3 + $0x28] sm:$0xff] %vm19_vm0, %v280_v55 }
 0x106   :  { %304 = vst.msk [vmem:[%s596_s3 + $0x68] sm:$0xff] %vm19_vm0, %v288_v56 }

// kernel: lsrformer_forward.18
= control target key start
LH: loop header
LB: loop body
LE: loop exit
PB: predicated region body
PF: predicated region fallthrough
CT: control target
= control target key end

     0   :  { %v615_v0 = vmov 0   ;;  %vm222_vm0 = vcmask 64512   ;;  %vm247_vm1 = vcmask 1043456   ;;  %vm19_vm2 = vcmask 15360   ;;  %s1110_s1 = inlined_call_operand.vmem [shape: f32[392,2], index: 1, kind: input, shape index: {}]   ;;  %s1111_s0 = inlined_call_operand.vmem [shape: f32[128,392], index: 0, kind: input, shape index: {}]   ;;  %s1112_s2 = inlined_call_operand.vmem [shape: f32[1,2], index: 2, kind: input, shape index: {}]   ;;  %s1113_s3 = inlined_call_operand.vmem [shape: f32[128,2], index: 3, kind: output, shape index: {}]  }
   0x1   :  { %348 = vmatprep.subr.bf16.mxu1 %v615_v0  ;;  %v164_v1 = vld [vmem:[%s1110_s1 + $0x80] sm:$0xff]  ;;  %v165_v2 = vld [vmem:[%s1110_s1 + $0x88] sm:$0xff]  ;;  %v166_v10 = vld [vmem:[%s1110_s1 + $0x90] sm:$0xff] }
   0x2   :  { %v180_v3 = vld [vmem:[%s1110_s1 + $0x100] sm:$0xff]  ;;  %v205_v4 = vpack.c.bf16 %v165_v2, %v164_v1  ;;  %v181_v5 = vld [vmem:[%s1110_s1 + $0x108] sm:$0xff]  ;;  %v167_v11 = vld [vmem:[%s1110_s1 + $0x98] sm:$0xff] }
   0x3   :  { %v148_v6 = vld [vmem:[%s1110_s1] sm:$0xff]  ;;  %v149_v7 = vld [vmem:[%s1110_s1 + $0x8] sm:$0xff]  ;;  %v213_v8 = vpack.c.bf16 %v181_v5, %v180_v3  ;;  %v182_v12 = vld [vmem:[%s1110_s1 + $0x110] sm:$0xff]  ;;  %v206_v13 = vpack.c.bf16 %v167_v11, %v166_v10 }
   0x4   :  { %v197_v9 = vpack.c.bf16 %v149_v7, %v148_v6  ;;  %549 = vmatprep.subr.bf16.mxu0 %v205_v4  ;;  %v183_v14 = vld [vmem:[%s1110_s1 + $0x118] sm:$0xff]  ;;  %v150_v15 = vld [vmem:[%s1110_s1 + $0x10] sm:$0xff]  ;;  %v168_v19 = vld [vmem:[%s1110_s1 + $0xa0] sm:$0xff] }
   0x5   :  { %v151_v16 = vld [vmem:[%s1110_s1 + $0x18] sm:$0xff]  ;;  %349 = vmatpush1.bf16.msra.mxu1 %v213_v8  ;;  %v214_v17 = vpack.c.bf16 %v183_v14, %v182_v12  ;;  %v169_v20 = vld [vmem:[%s1110_s1 + $0xa8] sm:$0xff]  ;;  %v184_v21 = vld [vmem:[%s1110_s1 + $0x120] sm:$0xff] }
   0x6   :  { %550 = vmatpush3.bf16.msra.mxu0 %v197_v9  ;;  %v198_v18 = vpack.c.bf16 %v151_v16, %v150_v15  ;;  %350 = vmatprep.subr.bf16.mxu1 %v615_v0  ;;  %v207_v22 = vpack.c.bf16 %v169_v20, %v168_v19  ;;  %v185_v23 = vld [vmem:[%s1110_s1 + $0x128] sm:$0xff]  ;;  %v152_v24 = vld [vmem:[%s1110_s1 + $0x20] sm:$0xff]  ;;  %v170_v26 = vld [vmem:[%s1110_s1 + $0xb0] sm:$0xff] }
   0x7   :  { %551 = vmatprep.subr.bf16.mxu0 %v206_v13  ;;  %v153_v25 = vld [vmem:[%s1110_s1 + $0x28] sm:$0xff]  ;;  %v171_v27 = vld [vmem:[%s1110_s1 + $0xb8] sm:$0xff]  ;;  %v215_v28 = vpack.c.bf16 %v185_v23, %v184_v21  ;;  %v186_v30 = vld [vmem:[%s1110_s1 + $0x130] sm:$0xff] }
   0x8   :  { %v199_v29 = vpack.c.bf16 %v153_v25, %v152_v24  ;;  %v208_v31 = vpack.c.bf16 %v171_v27, %v170_v26  ;;  %v187_v32 = vld [vmem:[%s1110_s1 + $0x138] sm:$0xff]  ;;  %v154_v33 = vld [vmem:[%s1110_s1 + $0x30] sm:$0xff]  ;;  %v172_v35 = vld [vmem:[%s1110_s1 + $0xc0] sm:$0xff] }
   0x9   :  { %351 = vmatpush1.bf16.msra.mxu1 %v214_v17  ;;  %v155_v34 = vld [vmem:[%s1110_s1 + $0x38] sm:$0xff]  ;;  %v173_v36 = vld [vmem:[%s1110_s1 + $0xc8] sm:$0xff]  ;;  %v216_v37 = vpack.c.bf16 %v187_v32, %v186_v30  ;;  %v188_v39 = vld [vmem:[%s1110_s1 + $0x140] sm:$0xff] }
   0xa   :  { %552 = vmatpush3.bf16.msra.mxu0 %v198_v18  ;;  %352 = vmatprep.subr.bf16.mxu1 %v615_v0  ;;  %v200_v38 = vpack.c.bf16 %v155_v34, %v154_v33  ;;  %v209_v40 = vpack.c.bf16 %v173_v36, %v172_v35  ;;  %v189_v41 = vld [vmem:[%s1110_s1 + $0x148] sm:$0xff]  ;;  %v156_v42 = vld [vmem:[%s1110_s1 + $0x40] sm:$0xff]  ;;  %v174_v44 = vld [vmem:[%s1110_s1 + $0xd0] sm:$0xff] }
   0xb   :  { %553 = vmatprep.subr.bf16.mxu0 %v207_v22  ;;  %v157_v43 = vld [vmem:[%s1110_s1 + $0x48] sm:$0xff]  ;;  %v175_v45 = vld [vmem:[%s1110_s1 + $0xd8] sm:$0xff]  ;;  %v190_v46 = vld [vmem:[%s1110_s1 + $0x150] sm:$0xff]  ;;  %v217_v47 = vpack.c.bf16 %v189_v41, %v188_v39 }
   0xc   :  { %v201_v48 = vpack.c.bf16 %v157_v43, %v156_v42  ;;  %v191_v49 = vld [vmem:[%s1110_s1 + $0x158] sm:$0xff]  ;;  %v53_v50 = vld [vmem:[%s1111_s0 + $0x8] sm:$0xff]  ;;  %v210_v52 = vpack.c.bf16 %v175_v45, %v174_v44  ;;  %v158_v53 = vld [vmem:[%s1110_s1 + $0x50] sm:$0xff] }
   0xd   :  { %353 = vmatpush1.bf16.msra.mxu1 %v215_v28  ;;  %v57_v51 = vld [vmem:[%s1111_s0 + $0x28] sm:$0xff]  ;;  %v159_v54 = vld [vmem:[%s1110_s1 + $0x58] sm:$0xff]  ;;  %v176_v57 = vld [vmem:[%s1110_s1 + $0xe0] sm:$0xff]  ;;  %v218_v61 = vpack.c.bf16 %v191_v49, %v190_v46 }
   0xe   :  { %554 = vmatpush3.bf16.msra.mxu0 %v199_v29  ;;  %354 = vmatprep.subr.bf16.mxu1 %v615_v0  ;;  %v117_v55 = vpack.c.bf16 %v57_v51, %v53_v50  ;;  %v55_v56 = vld [vmem:[%s1111_s0 + $0x18] sm:$0xff]  ;;  %v177_v58 = vld [vmem:[%s1110_s1 + $0xe8] sm:$0xff]  ;;  %v202_v62 = vpack.c.bf16 %v159_v54, %v158_v53  ;;  %v192_v63 = vld [vmem:[%s1110_s1 + $0x160] sm:$0xff] }
   0xf   :  { %555 = vmatprep.subr.bf16.mxu0 %v208_v31  ;;  %v59_v59 = vld [vmem:[%s1111_s0 + $0x38] sm:$0xff]  ;;  %v211_v1 = vpack.c.bf16 %v177_v58, %v176_v57  ;;  %v193_v2 = vld [vmem:[%s1110_s1 + $0x168] sm:$0xff]  ;;  %v160_v3 = vld [vmem:[%s1110_s1 + $0x60] sm:$0xff] }
  0x10   :  { %283 = vmatprep.mubr.bf16.mxu0 %v117_v55  ;;  %v119_v60 = vpack.c.bf16 %v59_v59, %v55_v56  ;;  %v161_v4 = vld [vmem:[%s1110_s1 + $0x68] sm:$0xff]  ;;  %v178_v5 = vld [vmem:[%s1110_s1 + $0xf0] sm:$0xff]  ;;  %v179_v6 = vld [vmem:[%s1110_s1 + $0xf8] sm:$0xff]  ;;  %v219_v7 = vpack.c.bf16 %v193_v2, %v192_v63 }
  0x11   :  { %355 = vmatpush1.bf16.msra.mxu1 %v216_v37  ;;  %v203_v8 = vpack.c.bf16 %v161_v4, %v160_v3  ;;  %v194_v9 = vld [vmem:[%s1110_s1 + $0x170] sm:$0xff]  ;;  %v212_v10 = vpack.c.bf16 %v179_v6, %v178_v5  ;;  %v195_v11 = vld [vmem:[%s1110_s1 + $0x178] sm:$0xff]  ;;  %v196_v14 = vld [vmem:[%s1110_s1 + $0x180] sm:$0xff] }
  0x12   :  { %556 = vmatpush3.bf16.msra.mxu0 %v200_v38  ;;  %356 = vmatprep.subr.bf16.mxu1 %v615_v0  ;;  %v162_v12 = vld [vmem:[%s1110_s1 + $0x70] sm:$0xff]  ;;  %v163_v13 = vld [vmem:[%s1110_s1 + $0x78] sm:$0xff]  ;;  %v220_v15 = vpack.c.bf16 %v195_v11, %v194_v9  ;;  %v52_v17 = vld [vmem:[%s1111_s0] sm:$0xff]  ;;  %v221_v19 = vpack.c.bf16 %v196_v14, %v196_v14 }
  0x13   :  { %557 = vmatprep.subr.bf16.mxu0 %v209_v40  ;;  %540 = vmatprep.mubr.msk.bf16.mxu1 %vm222_vm0, %v119_v60  ;;  %v204_v16 = vpack.c.bf16 %v163_v13, %v162_v12  ;;  %v56_v18 = vld [vmem:[%s1111_s0 + $0x20] sm:$0xff]  ;;  %v61_v20 = vld [vmem:[%s1111_s0 + $0x48] sm:$0xff]  ;;  %v54_v23 = vld [vmem:[%s1111_s0 + $0x10] sm:$0xff] }
  0x14   :  { %v65_v21 = vld [vmem:[%s1111_s0 + $0x68] sm:$0xff]  ;;  %v116_v22 = vpack.c.bf16 %v56_v18, %v52_v17  ;;  %v58_v24 = vld [vmem:[%s1111_s0 + $0x30] sm:$0xff]  ;;  %v249_v26 = vsel %vm247_vm1, %v221_v19, 0  ;;  %v63_v27 = vld [vmem:[%s1111_s0 + $0x58] sm:$0xff] }
  0x15   :  { %357 = vmatpush1.bf16.msra.mxu1 %v217_v47  ;;  %v121_v25 = vpack.c.bf16 %v65_v21, %v61_v20  ;;  %v67_v28 = vld [vmem:[%s1111_s0 + $0x78] sm:$0xff]  ;;  %v118_v29 = vpack.c.bf16 %v58_v24, %v54_v23  ;;  %v60_v30 = vld [vmem:[%s1111_s0 + $0x40] sm:$0xff]  ;;  %v69_v32 = vld [vmem:[%s1111_s0 + $0x88] sm:$0xff] }
  0x16   :  { %558 = vmatpush3.bf16.msra.mxu0 %v201_v48  ;;  %358 = vmatprep.subr.bf16.mxu1 %v615_v0  ;;  %v123_v31 = vpack.c.bf16 %v67_v28, %v63_v27  ;;  %v73_v33 = vld [vmem:[%s1111_s0 + $0xa8] sm:$0xff]  ;;  %v62_v35 = vld [vmem:[%s1111_s0 + $0x50] sm:$0xff]  ;;  %v71_v38 = vld [vmem:[%s1111_s0 + $0x98] sm:$0xff] }
  0x17   :  { %559 = vmatprep.subr.bf16.mxu0 %v210_v52  ;;  %v66_v36 = vld [vmem:[%s1111_s0 + $0x70] sm:$0xff]  ;;  %v125_v37 = vpack.c.bf16 %v73_v33, %v69_v32  ;;  %v75_v39 = vld [vmem:[%s1111_s0 + $0xb8] sm:$0xff]  ;;  %v68_v41 = vld [vmem:[%s1111_s0 + $0x80] sm:$0xff] }
  0x18   :  { %v122_v40 = vpack.c.bf16 %v66_v36, %v62_v35  ;;  %v72_v42 = vld [vmem:[%s1111_s0 + $0xa0] sm:$0xff]  ;;  %v127_v43 = vpack.c.bf16 %v75_v39, %v71_v38  ;;  %v77_v44 = vld [vmem:[%s1111_s0 + $0xc8] sm:$0xff]  ;;  %v70_v47 = vld [vmem:[%s1111_s0 + $0x90] sm:$0xff] }
  0x19   :  { %359 = vmatpush1.bf16.msra.mxu1 %v218_v61  ;;  %v81_v45 = vld [vmem:[%s1111_s0 + $0xe8] sm:$0xff]  ;;  %v124_v46 = vpack.c.bf16 %v72_v42, %v68_v41  ;;  %v74_v48 = vld [vmem:[%s1111_s0 + $0xb0] sm:$0xff]  ;;  %v79_v50 = vld [vmem:[%s1111_s0 + $0xd8] sm:$0xff] }
  0x1a   :  { %560 = vmatpush3.bf16.msra.mxu0 %v202_v62  ;;  %360 = vmatprep.subr.bf16.mxu1 %v615_v0  ;;  %v129_v49 = vpack.c.bf16 %v81_v45, %v77_v44  ;;  %v83_v51 = vld [vmem:[%s1111_s0 + $0xf8] sm:$0xff]  ;;  %v126_v52 = vpack.c.bf16 %v74_v48, %v70_v47  ;;  %v76_v53 = vld [vmem:[%s1111_s0 + $0xc0] sm:$0xff]  ;;  %v85_v56 = vld [vmem:[%s1111_s0 + $0x108] sm:$0xff]  ;;  %v616_v44 = vmov 0.0  }
  0x1b   :  { %561 = vmatprep.subr.bf16.mxu0 %v211_v1  ;;  %v80_v54 = vld [vmem:[%s1111_s0 + $0xe0] sm:$0xff]  ;;  %v131_v55 = vpack.c.bf16 %v83_v51, %v79_v50  ;;  %v89_v57 = vld [vmem:[%s1111_s0 + $0x128] sm:$0xff]  ;;  %v78_v59 = vld [vmem:[%s1111_s0 + $0xd0] sm:$0xff]  ;;  %20 = vst.msk [vmem:[#allocation2] sm:$0xff] %vm19_vm2, %v616_v44 }
  0x1c   :  { %v128_v58 = vpack.c.bf16 %v80_v54, %v76_v53  ;;  %v82_v60 = vld [vmem:[%s1111_s0 + $0xf0] sm:$0xff]  ;;  %v133_v61 = vpack.c.bf16 %v89_v57, %v85_v56  ;;  %v87_v62 = vld [vmem:[%s1111_s0 + $0x118] sm:$0xff]  ;;  %v84_v2 = vld [vmem:[%s1111_s0 + $0x100] sm:$0xff]  ;;  %21 = vst.msk [vmem:[#allocation2 + $0x8] sm:$0xff] %vm19_vm2, %v616_v44 }
  0x1d   :  { %361 = vmatpush1.bf16.msra.mxu1 %v219_v7  ;;  %v91_v63 = vld [vmem:[%s1111_s0 + $0x138] sm:$0xff]  ;;  %v130_v1 = vpack.c.bf16 %v82_v60, %v78_v59  ;;  %v88_v3 = vld [vmem:[%s1111_s0 + $0x120] sm:$0xff]  ;;  %v93_v5 = vld [vmem:[%s1111_s0 + $0x148] sm:$0xff]  ;;  %22 = vst.msk [vmem:[#allocation2 + $0x10] sm:$0xff] %vm19_vm2, %v616_v44 }
  0x1e   :  { %562 = vmatpush3.bf16.msra.mxu0 %v203_v8  ;;  %362 = vmatprep.subr.bf16.mxu1 %v615_v0  ;;  %v135_v4 = vpack.c.bf16 %v91_v63, %v87_v62  ;;  %v97_v6 = vld [vmem:[%s1111_s0 + $0x168] sm:$0xff]  ;;  %v132_v7 = vpack.c.bf16 %v88_v3, %v84_v2  ;;  %v86_v8 = vld [vmem:[%s1111_s0 + $0x110] sm:$0xff]  ;;  %v95_v11 = vld [vmem:[%s1111_s0 + $0x158] sm:$0xff]  ;;  %23 = vst.msk [vmem:[#allocation2 + $0x18] sm:$0xff] %vm19_vm2, %v616_v44 }
  0x1f   :  { %563 = vmatprep.subr.bf16.mxu0 %v212_v10  ;;  %v90_v9 = vld [vmem:[%s1111_s0 + $0x130] sm:$0xff]  ;;  %v137_v10 = vpack.c.bf16 %v97_v6, %v93_v5  ;;  %v99_v12 = vld [vmem:[%s1111_s0 + $0x178] sm:$0xff]  ;;  %v92_v14 = vld [vmem:[%s1111_s0 + $0x140] sm:$0xff]  ;;  %24 = vst.msk [vmem:[#allocation2 + $0x20] sm:$0xff] %vm19_vm2, %v616_v44 }
  0x20   :  { %v134_v13 = vpack.c.bf16 %v90_v9, %v86_v8  ;;  %v101_v17 = vld [vmem:[%s1111_s0 + $0x188] sm:$0xff]  ;;  %v94_v20 = vld [vmem:[%s1111_s0 + $0x150] sm:$0xff]  ;;  %v103_v23 = vld [vmem:[%s1111_s0 + $0x198] sm:$0xff]  ;;  %25 = vst.msk [vmem:[#allocation2 + $0x28] sm:$0xff] %vm19_vm2, %v616_v44 }
  0x21   :  { %363 = vmatpush1.bf16.msra.mxu1 %v220_v15  ;;  %v96_v15 = vld [vmem:[%s1111_s0 + $0x160] sm:$0xff]  ;;  %v105_v18 = vld [vmem:[%s1111_s0 + $0x1a8] sm:$0xff]  ;;  %v98_v21 = vld [vmem:[%s1111_s0 + $0x170] sm:$0xff]  ;;  %26 = vst.msk [vmem:[#allocation2 + $0x30] sm:$0xff] %vm19_vm2, %v616_v44 }
  0x22   :  { %564 = vmatpush3.bf16.msra.mxu0 %v204_v16  ;;  %364 = vmatprep.subr.bf16.mxu1 %v615_v0  ;;  %v64_v0 = vld [vmem:[%s1111_s0 + $0x60] sm:$0xff]  ;;  %v139_v16 = vpack.c.bf16 %v99_v12, %v95_v11  ;;  %v136_v19 = vpack.c.bf16 %v96_v15, %v92_v14  ;;  %v107_v24 = vld [vmem:[%s1111_s0 + $0x1b8] sm:$0xff]  ;;  %v106_v32 = vld [vmem:[%s1111_s0 + $0x1b0] sm:$0xff]  ;;  %27 = vst.msk [vmem:[#allocation2 + $0x38] sm:$0xff] %vm19_vm2, %v616_v44 }
  0x23   :  { %v120_v34 = vpack.c.bf16 %v64_v0, %v60_v30  ;;  %v104_v27 = vld [vmem:[%s1111_s0 + $0x1a0] sm:$0xff]  ;;  %v143_v28 = vpack.c.bf16 %v107_v24, %v103_v23  ;;  %v113_v30 = vld [vmem:[%s1111_s0 + $0x1e8] sm:$0xff]  ;;  %v115_v35 = vld [vmem:[%s1111_s0 + $0x1f8] sm:$0xff]  ;;  %28 = vst.msk [vmem:[#allocation2 + $0x40] sm:$0xff] %vm19_vm2, %v616_v44 }
  0x24   :  { %v112_v38 = vld [vmem:[%s1111_s0 + $0x1e0] sm:$0xff]  ;;  %v110_v41 = vld [vmem:[%s1111_s0 + $0x1d0] sm:$0xff]  ;;  %29 = vst.msk [vmem:[#allocation2 + $0x48] sm:$0xff] %vm19_vm2, %v616_v44  ;;  %30 = vst.msk [vmem:[#allocation2 + $0x50] sm:$0xff] %vm19_vm2, %v616_v44 }
  0x25   :  { %284 = vmatmul.mubr.bf16.vlgmr.msra.gmra.mrb[0].mxu0 %v116_v22  ;;  %365 = vmatpush1.bf16.msra.mxu1 %v249_v26  ;;  %v141_v22 = vpack.c.bf16 %v105_v18, %v101_v17  ;;  %v100_v26 = vld [vmem:[%s1111_s0 + $0x180] sm:$0xff]  ;;  %v114_v42 = vld [vmem:[%s1111_s0 + $0x1f0] sm:$0xff]  ;;  %31 = vst.msk [vmem:[#allocation2 + $0x58] sm:$0xff] %vm19_vm2, %v616_v44  ;;  %32 = vst.msk [vmem:[#allocation2 + $0x60] sm:$0xff] %vm19_vm2, %v616_v44 }
  0x26   :  { %291 = vmatprep.mubr.bf16.mxu0 %v121_v25  ;;  %v138_v25 = vpack.c.bf16 %v98_v21, %v94_v20  ;;  %v140_v0 = vpack.c.bf16 %v104_v27, %v100_v26  ;;  %33 = vst.msk [vmem:[#allocation2 + $0x68] sm:$0xff] %vm19_vm2, %v616_v44  ;;  %34 = vst.msk [vmem:[#allocation2 + $0x70] sm:$0xff] %vm19_vm2, %v616_v44  ;;  %v36_v51 = vld [vmem:[#allocation2] sm:$0xff]  ;;  %v39_v9 = vld [vmem:[#allocation2 + $0x18] sm:$0xff] }
  0x27   :  { %35 = vst.msk [vmem:[#allocation2 + $0x78] sm:$0xff] %vm19_vm2, %v616_v44  ;;  %v1014_v8 = vld [vmem:[%s1112_s2] ss:$0 sm:$0xff] }
  0x28   :  { %381 = vmatmul.mubr.bf16.vlgmr.msra.gmra.mrb[0].mxu1 %v118_v29  ;;  %v109_v29 = vld [vmem:[%s1111_s0 + $0x1c8] sm:$0xff]  ;;  %v42_v44 = vld [vmem:[#allocation2 + $0x30] sm:$0xff] }
  0x29   :  { %541 = vmatprep.mubr.msk.bf16.mxu1 %vm222_vm0, %v123_v31  ;;  %v102_v31 = vld [vmem:[%s1111_s0 + $0x190] sm:$0xff]  ;;  %v145_v33 = vpack.c.bf16 %v113_v30, %v109_v29  ;;  %v41_v29 = vld [vmem:[#allocation2 + $0x28] sm:$0xff] }
  0x2a   :  { %v142_v36 = vpack.c.bf16 %v106_v32, %v102_v31 }
  0x2d   :  { %292 = vmatmul.mubr.bf16.gmra.mrb[4].mxu0 %v120_v34  ;;  %v111_v34 = vld [vmem:[%s1111_s0 + $0x1d8] sm:$0xff] }
  0x2e   :  { %299 = vmatprep.mubr.bf16.mxu0 %v125_v37  ;;  %v108_v37 = vld [vmem:[%s1111_s0 + $0x1c0] sm:$0xff]  ;;  %v147_v39 = vpack.c.bf16 %v115_v35, %v111_v34 }
  0x30   :  { %389 = vmatmul.mubr.bf16.gmra.mrb[4].mxu1 %v122_v40  ;;  %v144_v40 = vpack.c.bf16 %v112_v38, %v108_v37 }
  0x31   :  { %542 = vmatprep.mubr.msk.bf16.mxu1 %vm222_vm0, %v127_v43  ;;  %v146_v43 = vpack.c.bf16 %v114_v42, %v110_v41 }
  0x35   :  { %300 = vmatmul.mubr.bf16.gmra.mrb[8].mxu0 %v124_v46 }
  0x36   :  { %307 = vmatprep.mubr.bf16.mxu0 %v129_v49 }
  0x38   :  { %397 = vmatmul.mubr.bf16.gmra.mrb[8].mxu1 %v126_v52 }
  0x39   :  { %543 = vmatprep.mubr.msk.bf16.mxu1 %vm222_vm0, %v131_v55  ;;  %v37_v55 = vld [vmem:[#allocation2 + $0x8] sm:$0xff] }
  0x3d   :  { %308 = vmatmul.mubr.bf16.gmra.mrb[12].mxu0 %v128_v58 }
  0x3e   :  { %315 = vmatprep.mubr.bf16.mxu0 %v133_v61 }
  0x40   :  { %405 = vmatmul.mubr.bf16.gmra.mrb[12].mxu1 %v130_v1 }
  0x41   :  { %544 = vmatprep.mubr.msk.bf16.mxu1 %vm222_vm0, %v135_v4  ;;  %v38_v4 = vld [vmem:[#allocation2 + $0x10] sm:$0xff] }
  0x45   :  { %316 = vmatmul.mubr.bf16.gmra.mrb[16].mxu0 %v132_v7 }
  0x46   :  { %323 = vmatprep.mubr.bf16.mxu0 %v137_v10 }
  0x48   :  { %413 = vmatmul.mubr.bf16.gmra.mrb[16].mxu1 %v134_v13 }
  0x49   :  { %545 = vmatprep.mubr.msk.bf16.mxu1 %vm222_vm0, %v139_v16 }
  0x4d   :  { %324 = vmatmul.mubr.bf16.gmra.mrb[20].mxu0 %v136_v19 }
  0x4e   :  { %331 = vmatprep.mubr.bf16.mxu0 %v141_v22 }
  0x50   :  { %421 = vmatmul.mubr.bf16.gmra.mrb[20].mxu1 %v138_v25  ;;  %v40_v25 = vld [vmem:[#allocation2 + $0x20] sm:$0xff] }
  0x51   :  { %546 = vmatprep.mubr.msk.bf16.mxu1 %vm222_vm0, %v143_v28 }
  0x55   :  { %332 = vmatmul.mubr.bf16.gmra.mrb[24].mxu0 %v140_v0 }
  0x56   :  { %339 = vmatprep.mubr.bf16.mxu0 %v145_v33 }
  0x58   :  { %429 = vmatmul.mubr.bf16.gmra.mrb[24].mxu1 %v142_v36 }
  0x59   :  { %547 = vmatprep.mubr.msk.bf16.mxu1 %vm222_vm0, %v147_v39 }
  0x5d   :  { %340 = vmatmul.mubr.bf16.gmra.mrb[28].mxu0 %v144_v40 }
  0x60   :  { %437 = vmatmul.mubr.bf16.gmra.mrb[28].mxu1 %v146_v43 }
  0xf8   :  { %v565_v45 = vpop.f32.mrb[0].mxu0 }
  0xf9   :  { %v566_v46 = vpop.f32.mrb[1].mxu0 }
  0xfa   :  { %v567_v47 = vadd.f32 %v566_v46, %v565_v45  ;;  %v568_v48 = vpop.f32.mrb[2].mxu0 }
  0xfb   :  { %v569_v49 = vpop.f32.mrb[3].mxu0  ;;  %v382_v52 = vpop.f32.mrb[0].mxu1 }
  0xfc   :  { %v570_v50 = vadd.f32 %v569_v49, %v568_v48  ;;  %v383_v53 = vadd.f32 %v567_v47, %v382_v52  ;;  %v384_v54 = vpop.f32.mrb[1].mxu1  ;;  %v43_v48 = vld [vmem:[#allocation2 + $0x38] sm:$0xff] }
  0xfd   :  { %v385_v56 = vpop.f32.mrb[2].mxu1 }
  0xfe   :  { %v445_v57 = vadd.f32 %v383_v53, %v36_v51  ;;  %v386_v58 = vadd.f32 %v570_v50, %v385_v56  ;;  %v387_v59 = vpop.f32.mrb[3].mxu1 }
 0x100   :  { %v571_v60 = vpop.f32.mrb[4].mxu0  ;;  %462 = vst.msk [vmem:[#allocation2] sm:$0xff] %vm19_vm2, %v445_v57  ;;  %v446_v61 = vadd.f32 %v386_v58, %v37_v55 }
 0x101   :  { %v572_v62 = vpop.f32.mrb[5].mxu0 }
 0x102   :  { %v573_v63 = vadd.f32 %v572_v62, %v571_v60  ;;  %v574_v1 = vpop.f32.mrb[6].mxu0  ;;  %463 = vst.msk [vmem:[#allocation2 + $0x8] sm:$0xff] %vm19_vm2, %v446_v61 }
 0x103   :  { %v575_v2 = vpop.f32.mrb[7].mxu0  ;;  %v390_v5 = vpop.f32.mrb[4].mxu1 }
 0x104   :  { %v576_v3 = vadd.f32 %v575_v2, %v574_v1  ;;  %v391_v6 = vadd.f32 %v573_v63, %v390_v5  ;;  %v392_v7 = vpop.f32.mrb[5].mxu1  ;;  %v44_v1 = vld [vmem:[#allocation2 + $0x40] sm:$0xff]  ;;  %v45_v5 = vld [vmem:[#allocation2 + $0x48] sm:$0xff] }
 0x105   :  { %v393_v10 = vpop.f32.mrb[6].mxu1 }
 0x106   :  { %v447_v11 = vadd.f32 %v391_v6, %v38_v4  ;;  %v394_v12 = vadd.f32 %v576_v3, %v393_v10  ;;  %v395_v13 = vpop.f32.mrb[7].mxu1 }
 0x107   :  { %v481_v14 = vld [vmem:[#allocation2] sm:$0xff] }
 0x108   :  { %v577_v15 = vpop.f32.mrb[8].mxu0  ;;  %v504_v16 = vadd.f32 %v1014_v8, %v481_v14  ;;  %464 = vst.msk [vmem:[#allocation2 + $0x10] sm:$0xff] %vm19_vm2, %v447_v11  ;;  %v448_v17 = vadd.f32 %v394_v12, %v39_v9 }
 0x109   :  { %v578_v18 = vpop.f32.mrb[9].mxu0  ;;  %v482_v19 = vld [vmem:[#allocation2 + $0x8] sm:$0xff] }
 0x10a   :  { %v579_v20 = vadd.f32 %v578_v18, %v577_v15  ;;  %v580_v21 = vpop.f32.mrb[10].mxu0  ;;  %520 = vst.msk [vmem:[%s1113_s3] sm:$0xff] %vm19_vm2, %v504_v16  ;;  %v505_v22 = vadd.f32 %v1014_v8, %v482_v19  ;;  %465 = vst.msk [vmem:[#allocation2 + $0x18] sm:$0xff] %vm19_vm2, %v448_v17 }
 0x10b   :  { %v581_v23 = vpop.f32.mrb[11].mxu0  ;;  %v398_v26 = vpop.f32.mrb[8].mxu1 }
 0x10c   :  { %v582_v24 = vadd.f32 %v581_v23, %v580_v21  ;;  %521 = vst.msk [vmem:[%s1113_s3 + $0x8] sm:$0xff] %vm19_vm2, %v505_v22  ;;  %v399_v27 = vadd.f32 %v579_v20, %v398_v26  ;;  %v400_v28 = vpop.f32.mrb[9].mxu1  ;;  %v46_v22 = vld [vmem:[#allocation2 + $0x50] sm:$0xff]  ;;  %v47_v26 = vld [vmem:[#allocation2 + $0x58] sm:$0xff] }
 0x10d   :  { %v401_v30 = vpop.f32.mrb[10].mxu1 }
 0x10e   :  { %v449_v0 = vadd.f32 %v399_v27, %v40_v25  ;;  %v402_v31 = vadd.f32 %v582_v24, %v401_v30  ;;  %v403_v32 = vpop.f32.mrb[11].mxu1 }
 0x10f   :  { %v483_v33 = vld [vmem:[#allocation2 + $0x10] sm:$0xff] }
 0x110   :  { %v583_v34 = vpop.f32.mrb[12].mxu0  ;;  %v506_v35 = vadd.f32 %v1014_v8, %v483_v33  ;;  %466 = vst.msk [vmem:[#allocation2 + $0x20] sm:$0xff] %vm19_vm2, %v449_v0  ;;  %v450_v36 = vadd.f32 %v402_v31, %v41_v29 }
 0x111   :  { %v584_v37 = vpop.f32.mrb[13].mxu0  ;;  %v484_v38 = vld [vmem:[#allocation2 + $0x18] sm:$0xff] }
 0x112   :  { %v585_v39 = vadd.f32 %v584_v37, %v583_v34  ;;  %v586_v40 = vpop.f32.mrb[14].mxu0  ;;  %522 = vst.msk [vmem:[%s1113_s3 + $0x10] sm:$0xff] %vm19_vm2, %v506_v35  ;;  %v507_v41 = vadd.f32 %v1014_v8, %v484_v38  ;;  %467 = vst.msk [vmem:[#allocation2 + $0x28] sm:$0xff] %vm19_vm2, %v450_v36 }
 0x113   :  { %v587_v42 = vpop.f32.mrb[15].mxu0  ;;  %v406_v45 = vpop.f32.mrb[12].mxu1 }
 0x114   :  { %v588_v43 = vadd.f32 %v587_v42, %v586_v40  ;;  %523 = vst.msk [vmem:[%s1113_s3 + $0x18] sm:$0xff] %vm19_vm2, %v507_v41  ;;  %v407_v46 = vadd.f32 %v585_v39, %v406_v45  ;;  %v408_v47 = vpop.f32.mrb[13].mxu1  ;;  %v48_v41 = vld [vmem:[#allocation2 + $0x60] sm:$0xff]  ;;  %v49_v45 = vld [vmem:[#allocation2 + $0x68] sm:$0xff] }
 0x115   :  { %v409_v49 = vpop.f32.mrb[14].mxu1 }
 0x116   :  { %v451_v50 = vadd.f32 %v407_v46, %v42_v44  ;;  %v410_v51 = vadd.f32 %v588_v43, %v409_v49  ;;  %v411_v52 = vpop.f32.mrb[15].mxu1 }
 0x117   :  { %v485_v53 = vld [vmem:[#allocation2 + $0x20] sm:$0xff] }
 0x118   :  { %v589_v54 = vpop.f32.mrb[16].mxu0  ;;  %v508_v55 = vadd.f32 %v1014_v8, %v485_v53  ;;  %468 = vst.msk [vmem:[#allocation2 + $0x30] sm:$0xff] %vm19_vm2, %v451_v50  ;;  %v452_v56 = vadd.f32 %v410_v51, %v43_v48 }
 0x119   :  { %v590_v57 = vpop.f32.mrb[17].mxu0  ;;  %v486_v58 = vld [vmem:[#allocation2 + $0x28] sm:$0xff] }
 0x11a   :  { %v591_v59 = vadd.f32 %v590_v57, %v589_v54  ;;  %v592_v60 = vpop.f32.mrb[18].mxu0  ;;  %524 = vst.msk [vmem:[%s1113_s3 + $0x20] sm:$0xff] %vm19_vm2, %v508_v55  ;;  %v509_v61 = vadd.f32 %v1014_v8, %v486_v58  ;;  %469 = vst.msk [vmem:[#allocation2 + $0x38] sm:$0xff] %vm19_vm2, %v452_v56 }
 0x11b   :  { %v593_v62 = vpop.f32.mrb[19].mxu0  ;;  %v414_v2 = vpop.f32.mrb[16].mxu1 }
 0x11c   :  { %v594_v63 = vadd.f32 %v593_v62, %v592_v60  ;;  %525 = vst.msk [vmem:[%s1113_s3 + $0x28] sm:$0xff] %vm19_vm2, %v509_v61  ;;  %v415_v3 = vadd.f32 %v591_v59, %v414_v2  ;;  %v416_v4 = vpop.f32.mrb[17].mxu1  ;;  %v50_v61 = vld [vmem:[#allocation2 + $0x70] sm:$0xff]  ;;  %v51_v2 = vld [vmem:[#allocation2 + $0x78] sm:$0xff] }
 0x11d   :  { %v417_v6 = vpop.f32.mrb[18].mxu1 }
 0x11e   :  { %v453_v7 = vadd.f32 %v415_v3, %v44_v1  ;;  %v418_v9 = vadd.f32 %v594_v63, %v417_v6  ;;  %v419_v10 = vpop.f32.mrb[19].mxu1 }
 0x11f   :  { %v487_v11 = vld [vmem:[#allocation2 + $0x30] sm:$0xff] }
 0x120   :  { %v595_v12 = vpop.f32.mrb[20].mxu0  ;;  %v510_v13 = vadd.f32 %v1014_v8, %v487_v11  ;;  %470 = vst.msk [vmem:[#allocation2 + $0x40] sm:$0xff] %vm19_vm2, %v453_v7  ;;  %v454_v14 = vadd.f32 %v418_v9, %v45_v5 }
 0x121   :  { %v596_v15 = vpop.f32.mrb[21].mxu0  ;;  %v488_v16 = vld [vmem:[#allocation2 + $0x38] sm:$0xff] }
 0x122   :  { %v597_v17 = vadd.f32 %v596_v15, %v595_v12  ;;  %v598_v18 = vpop.f32.mrb[22].mxu0  ;;  %526 = vst.msk [vmem:[%s1113_s3 + $0x30] sm:$0xff] %vm19_vm2, %v510_v13  ;;  %v511_v19 = vadd.f32 %v1014_v8, %v488_v16  ;;  %471 = vst.msk [vmem:[#allocation2 + $0x48] sm:$0xff] %vm19_vm2, %v454_v14 }
 0x123   :  { %v599_v20 = vpop.f32.mrb[23].mxu0  ;;  %v422_v23 = vpop.f32.mrb[20].mxu1 }
 0x124   :  { %v600_v21 = vadd.f32 %v599_v20, %v598_v18  ;;  %527 = vst.msk [vmem:[%s1113_s3 + $0x38] sm:$0xff] %vm19_vm2, %v511_v19  ;;  %v423_v24 = vadd.f32 %v597_v17, %v422_v23  ;;  %v424_v25 = vpop.f32.mrb[21].mxu1 }
 0x125   :  { %v425_v27 = vpop.f32.mrb[22].mxu1 }
 0x126   :  { %v455_v28 = vadd.f32 %v423_v24, %v46_v22  ;;  %v426_v29 = vadd.f32 %v600_v21, %v425_v27  ;;  %v427_v30 = vpop.f32.mrb[23].mxu1 }
 0x127   :  { %v489_v0 = vld [vmem:[#allocation2 + $0x40] sm:$0xff] }
 0x128   :  { %v601_v31 = vpop.f32.mrb[24].mxu0  ;;  %v512_v32 = vadd.f32 %v1014_v8, %v489_v0  ;;  %472 = vst.msk [vmem:[#allocation2 + $0x50] sm:$0xff] %vm19_vm2, %v455_v28  ;;  %v456_v33 = vadd.f32 %v426_v29, %v47_v26 }
 0x129   :  { %v602_v34 = vpop.f32.mrb[25].mxu0  ;;  %v490_v35 = vld [vmem:[#allocation2 + $0x48] sm:$0xff] }
 0x12a   :  { %v603_v36 = vadd.f32 %v602_v34, %v601_v31  ;;  %v604_v37 = vpop.f32.mrb[26].mxu0  ;;  %528 = vst.msk [vmem:[%s1113_s3 + $0x40] sm:$0xff] %vm19_vm2, %v512_v32  ;;  %v513_v38 = vadd.f32 %v1014_v8, %v490_v35  ;;  %473 = vst.msk [vmem:[#allocation2 + $0x58] sm:$0xff] %vm19_vm2, %v456_v33 }
 0x12b   :  { %v605_v39 = vpop.f32.mrb[27].mxu0  ;;  %v430_v42 = vpop.f32.mrb[24].mxu1 }
 0x12c   :  { %v606_v40 = vadd.f32 %v605_v39, %v604_v37  ;;  %529 = vst.msk [vmem:[%s1113_s3 + $0x48] sm:$0xff] %vm19_vm2, %v513_v38  ;;  %v431_v43 = vadd.f32 %v603_v36, %v430_v42  ;;  %v432_v44 = vpop.f32.mrb[25].mxu1 }
 0x12d   :  { %v433_v46 = vpop.f32.mrb[26].mxu1 }
 0x12e   :  { %v457_v47 = vadd.f32 %v431_v43, %v48_v41  ;;  %v434_v48 = vadd.f32 %v606_v40, %v433_v46  ;;  %v435_v49 = vpop.f32.mrb[27].mxu1 }
 0x12f   :  { %v491_v50 = vld [vmem:[#allocation2 + $0x50] sm:$0xff] }
 0x130   :  { %v607_v51 = vpop.f32.mrb[28].mxu0  ;;  %v514_v52 = vadd.f32 %v1014_v8, %v491_v50  ;;  %474 = vst.msk [vmem:[#allocation2 + $0x60] sm:$0xff] %vm19_vm2, %v457_v47  ;;  %v458_v53 = vadd.f32 %v434_v48, %v49_v45 }
 0x131   :  { %v608_v54 = vpop.f32.mrb[29].mxu0  ;;  %v492_v55 = vld [vmem:[#allocation2 + $0x58] sm:$0xff] }
 0x132   :  { %v609_v56 = vadd.f32 %v608_v54, %v607_v51  ;;  %v610_v57 = vpop.f32.mrb[30].mxu0  ;;  %530 = vst.msk [vmem:[%s1113_s3 + $0x50] sm:$0xff] %vm19_vm2, %v514_v52  ;;  %v515_v58 = vadd.f32 %v1014_v8, %v492_v55  ;;  %475 = vst.msk [vmem:[#allocation2 + $0x68] sm:$0xff] %vm19_vm2, %v458_v53 }
 0x133   :  { %v611_v59 = vpop.f32.mrb[31].mxu0  ;;  %v438_v62 = vpop.f32.mrb[28].mxu1 }
 0x134   :  { %v612_v60 = vadd.f32 %v611_v59, %v610_v57  ;;  %531 = vst.msk [vmem:[%s1113_s3 + $0x58] sm:$0xff] %vm19_vm2, %v515_v58  ;;  %v439_v63 = vadd.f32 %v609_v56, %v438_v62  ;;  %v440_v1 = vpop.f32.mrb[29].mxu1 }
 0x135   :  { %v441_v3 = vpop.f32.mrb[30].mxu1 }
 0x136   :  { %v459_v4 = vadd.f32 %v439_v63, %v50_v61  ;;  %v442_v5 = vadd.f32 %v612_v60, %v441_v3  ;;  %v443_v6 = vpop.f32.mrb[31].mxu1 }
 0x137   :  { %v493_v7 = vld [vmem:[#allocation2 + $0x60] sm:$0xff] }
 0x138   :  { %v516_v9 = vadd.f32 %v1014_v8, %v493_v7  ;;  %476 = vst.msk [vmem:[#allocation2 + $0x70] sm:$0xff] %vm19_vm2, %v459_v4  ;;  %v460_v10 = vadd.f32 %v442_v5, %v51_v2 }
 0x139   :  { %v494_v11 = vld [vmem:[#allocation2 + $0x68] sm:$0xff] }
 0x13a   :  { %532 = vst.msk [vmem:[%s1113_s3 + $0x60] sm:$0xff] %vm19_vm2, %v516_v9  ;;  %v517_v12 = vadd.f32 %v1014_v8, %v494_v11  ;;  %477 = vst.msk [vmem:[#allocation2 + $0x78] sm:$0xff] %vm19_vm2, %v460_v10 }
 0x13c   :  { %533 = vst.msk [vmem:[%s1113_s3 + $0x68] sm:$0xff] %vm19_vm2, %v517_v12 }
 0x13f   :  { %v495_v13 = vld [vmem:[#allocation2 + $0x70] sm:$0xff] }
 0x140   :  { %v518_v14 = vadd.f32 %v1014_v8, %v495_v13 }
 0x141   :  { %v496_v15 = vld [vmem:[#allocation2 + $0x78] sm:$0xff] }
 0x142   :  { %534 = vst.msk [vmem:[%s1113_s3 + $0x70] sm:$0xff] %vm19_vm2, %v518_v14  ;;  %v519_v16 = vadd.f32 %v1014_v8, %v496_v15 }
 0x144   :  { %535 = vst.msk [vmem:[%s1113_s3 + $0x78] sm:$0xff] %vm19_vm2, %v519_v16 }

// kernel: lsrformer_forward.16
= control target key start
LH: loop header
LB: loop body
LE: loop exit
PB: predicated region body
PF: predicated region fallthrough
CT: control target
= control target key end

     0   :  { %vm19_vm0 = vcmask 31744   ;;  %vm103_vm1 = vcmask 1043456   ;;  %v340_v3 = vmov 0.0   ;;  %vm78_vm2 = vcmask 64512   ;;  %s540_s1 = inlined_call_operand.vmem [shape: f32[8,4], index: 1, kind: input, shape index: {}]   ;;  %s541_s0 = inlined_call_operand.vmem [shape: f32[128,8], index: 0, kind: input, shape index: {}]   ;;  %s542_s2 = inlined_call_operand.vmem [shape: f32[1,4], index: 2, kind: input, shape index: {}]   ;;  %s543_s3 = inlined_call_operand.vmem [shape: f32[128,4], index: 3, kind: output, shape index: {}]  }
   0x1   :  { %v76_v0 = vld [vmem:[%s540_s1] sm:$0xff]  ;;  %v53_v2 = vld [vmem:[%s541_s0 + $0x8] sm:$0xff]  ;;  %22 = vst.msk [vmem:[#allocation2 + $0x10] sm:$0xff] %vm19_vm0, %v340_v3  ;;  %20 = vst.msk [vmem:[#allocation2] sm:$0xff] %vm19_vm0, %v340_v3 }
   0x2   :  { %v52_v1 = vld [vmem:[%s541_s0] sm:$0xff]  ;;  %21 = vst.msk [vmem:[#allocation2 + $0x8] sm:$0xff] %vm19_vm0, %v340_v3  ;;  %23 = vst.msk [vmem:[#allocation2 + $0x18] sm:$0xff] %vm19_vm0, %v340_v3  ;;  %v77_v4 = vpack.c.bf16 %v76_v0, %v76_v0  ;;  %v61_v7 = vld [vmem:[%s541_s0 + $0x48] sm:$0xff] }
   0x3   :  { %24 = vst.msk [vmem:[#allocation2 + $0x20] sm:$0xff] %vm19_vm0, %v340_v3  ;;  %25 = vst.msk [vmem:[#allocation2 + $0x28] sm:$0xff] %vm19_vm0, %v340_v3  ;;  %v68_v5 = vpack.c.bf16 %v53_v2, %v52_v1  ;;  %v60_v6 = vld [vmem:[%s541_s0 + $0x40] sm:$0xff]  ;;  %v54_v8 = vld [vmem:[%s541_s0 + $0x10] sm:$0xff] }
   0x4   :  { %26 = vst.msk [vmem:[#allocation2 + $0x30] sm:$0xff] %vm19_vm0, %v340_v3  ;;  %27 = vst.msk [vmem:[#allocation2 + $0x38] sm:$0xff] %vm19_vm0, %v340_v3  ;;  %v72_v9 = vpack.c.bf16 %v61_v7, %v60_v6  ;;  %v55_v10 = vld [vmem:[%s541_s0 + $0x18] sm:$0xff]  ;;  %v62_v11 = vld [vmem:[%s541_s0 + $0x50] sm:$0xff]  ;;  %337 = vmatprep.subr.msk.bf16.mxu0 %vm103_vm1, %v77_v4  ;;  %338 = vmatprep.subr.msk.bf16.mxu1 %vm103_vm1, %v77_v4  ;;  %v105_v13 = vsel %vm103_vm1, %v77_v4, 0 }
   0x5   :  { %28 = vst.msk [vmem:[#allocation2 + $0x40] sm:$0xff] %vm19_vm0, %v340_v3  ;;  %29 = vst.msk [vmem:[#allocation2 + $0x48] sm:$0xff] %vm19_vm0, %v340_v3  ;;  %v63_v12 = vld [vmem:[%s541_s0 + $0x58] sm:$0xff]  ;;  %v69_v14 = vpack.c.bf16 %v55_v10, %v54_v8  ;;  %v56_v16 = vld [vmem:[%s541_s0 + $0x20] sm:$0xff]  ;;  %318 = vmatpush3.bf16.msra.mxu0 %v105_v13  ;;  %336 = vmatpush3.bf16.msra.mxu1 %v105_v13 }
   0x6   :  { %30 = vst.msk [vmem:[#allocation2 + $0x50] sm:$0xff] %vm19_vm0, %v340_v3  ;;  %31 = vst.msk [vmem:[#allocation2 + $0x58] sm:$0xff] %vm19_vm0, %v340_v3  ;;  %v73_v15 = vpack.c.bf16 %v63_v12, %v62_v11  ;;  %v57_v17 = vld [vmem:[%s541_s0 + $0x28] sm:$0xff]  ;;  %v64_v18 = vld [vmem:[%s541_s0 + $0x60] sm:$0xff]  ;;  %319 = vmatprep.mubr.msk.bf16.mxu0 %vm78_vm2, %v68_v5  ;;  %327 = vmatprep.mubr.msk.bf16.mxu1 %vm78_vm2, %v72_v9 }
   0x7   :  { %32 = vst.msk [vmem:[#allocation2 + $0x60] sm:$0xff] %vm19_vm0, %v340_v3  ;;  %33 = vst.msk [vmem:[#allocation2 + $0x68] sm:$0xff] %vm19_vm0, %v340_v3  ;;  %v70_v19 = vpack.c.bf16 %v57_v17, %v56_v16  ;;  %v65_v20 = vld [vmem:[%s541_s0 + $0x68] sm:$0xff]  ;;  %v58_v22 = vld [vmem:[%s541_s0 + $0x30] sm:$0xff] }
   0x8   :  { %34 = vst.msk [vmem:[#allocation2 + $0x70] sm:$0xff] %vm19_vm0, %v340_v3  ;;  %35 = vst.msk [vmem:[#allocation2 + $0x78] sm:$0xff] %vm19_vm0, %v340_v3  ;;  %v74_v21 = vpack.c.bf16 %v65_v20, %v64_v18  ;;  %320 = vmatmul.mubr.msk.bf16.vlgmr.msra.gmra.mrb[0].mxu0 %vm78_vm2, %v69_v14  ;;  %328 = vmatmul.mubr.msk.bf16.vlgmr.msra.gmra.mrb[0].mxu1 %vm78_vm2, %v73_v15  ;;  %v59_v23 = vld [vmem:[%s541_s0 + $0x38] sm:$0xff]  ;;  %v66_v24 = vld [vmem:[%s541_s0 + $0x70] sm:$0xff] }
   0x9   :  { %323 = vmatprep.mubr.msk.bf16.mxu0 %vm78_vm2, %v70_v19  ;;  %v67_v25 = vld [vmem:[%s541_s0 + $0x78] sm:$0xff]  ;;  %v71_v26 = vpack.c.bf16 %v59_v23, %v58_v22  ;;  %v38_v28 = vld [vmem:[#allocation2 + $0x10] sm:$0xff]  ;;  %v36_v30 = vld [vmem:[#allocation2] sm:$0xff] }
   0xa   :  { %331 = vmatprep.mubr.msk.bf16.mxu1 %vm78_vm2, %v74_v21  ;;  %v75_v27 = vpack.c.bf16 %v67_v25, %v66_v24  ;;  %v39_v34 = vld [vmem:[#allocation2 + $0x18] sm:$0xff]  ;;  %v37_v40 = vld [vmem:[#allocation2 + $0x8] sm:$0xff]  ;;  %v40_v54 = vld [vmem:[#allocation2 + $0x20] sm:$0xff] }
   0xb   :  { %v42_v52 = vld [vmem:[#allocation2 + $0x30] sm:$0xff]  ;;  %v450_v56 = vld [vmem:[%s542_s2] ss:$0 sm:$0xff]  ;;  %v43_v59 = vld [vmem:[#allocation2 + $0x38] sm:$0xff] }
   0xc   :  { %v44_v31 = vld [vmem:[#allocation2 + $0x40] sm:$0xff]  ;;  %v45_v41 = vld [vmem:[#allocation2 + $0x48] sm:$0xff] }
   0xd   :  { %v46_v29 = vld [vmem:[#allocation2 + $0x50] sm:$0xff]  ;;  %v47_v35 = vld [vmem:[#allocation2 + $0x58] sm:$0xff]  ;;  %v41_v1 = vld [vmem:[#allocation2 + $0x28] sm:$0xff] }
   0xe   :  { %v48_v55 = vld [vmem:[#allocation2 + $0x60] sm:$0xff]  ;;  %v49_v2 = vld [vmem:[#allocation2 + $0x68] sm:$0xff] }
   0xf   :  { %v50_v53 = vld [vmem:[#allocation2 + $0x70] sm:$0xff]  ;;  %v51_v60 = vld [vmem:[#allocation2 + $0x78] sm:$0xff] }
  0x10   :  { %324 = vmatmul.mubr.msk.bf16.gmra.mrb[4].mxu0 %vm78_vm2, %v71_v26  ;;  %332 = vmatmul.mubr.msk.bf16.gmra.mrb[4].mxu1 %vm78_vm2, %v75_v27 }
  0xdb   :  { %v321_v32 = vpop.f32.mrb[0].mxu0  ;;  %v329_v33 = vpop.f32.mrb[0].mxu1 }
  0xdc   :  { %v206_v36 = vadd.f32 %v321_v32, %v38_v28  ;;  %v214_v37 = vadd.f32 %v329_v33, %v46_v29  ;;  %v141_v38 = vpop.f32.mrb[1].mxu0  ;;  %v173_v39 = vpop.f32.mrb[1].mxu1 }
  0xdd   :  { %v204_v42 = vadd.f32 %v141_v38, %v36_v30  ;;  %v212_v43 = vadd.f32 %v173_v39, %v44_v31  ;;  %v322_v44 = vpop.f32.mrb[2].mxu0  ;;  %v330_v45 = vpop.f32.mrb[2].mxu1 }
  0xde   :  { %223 = vst.msk [vmem:[#allocation2 + $0x10] sm:$0xff] %vm19_vm0, %v206_v36  ;;  %231 = vst.msk [vmem:[#allocation2 + $0x50] sm:$0xff] %vm19_vm0, %v214_v37  ;;  %v207_v46 = vadd.f32 %v322_v44, %v39_v34  ;;  %v215_v47 = vadd.f32 %v330_v45, %v47_v35  ;;  %v144_v48 = vpop.f32.mrb[3].mxu0  ;;  %v176_v49 = vpop.f32.mrb[3].mxu1 }
  0xdf   :  { %221 = vst.msk [vmem:[#allocation2] sm:$0xff] %vm19_vm0, %v204_v42  ;;  %229 = vst.msk [vmem:[#allocation2 + $0x40] sm:$0xff] %vm19_vm0, %v212_v43  ;;  %v205_v50 = vadd.f32 %v144_v48, %v37_v40  ;;  %v213_v51 = vadd.f32 %v176_v49, %v45_v41 }
  0xe0   :  { %224 = vst.msk [vmem:[#allocation2 + $0x18] sm:$0xff] %vm19_vm0, %v207_v46  ;;  %232 = vst.msk [vmem:[#allocation2 + $0x58] sm:$0xff] %vm19_vm0, %v215_v47 }
  0xe1   :  { %222 = vst.msk [vmem:[#allocation2 + $0x8] sm:$0xff] %vm19_vm0, %v205_v50  ;;  %230 = vst.msk [vmem:[#allocation2 + $0x48] sm:$0xff] %vm19_vm0, %v213_v51 }
  0xe3   :  { %v325_v57 = vpop.f32.mrb[4].mxu0  ;;  %v333_v58 = vpop.f32.mrb[4].mxu1 }
  0xe4   :  { %v210_v61 = vadd.f32 %v325_v57, %v42_v52  ;;  %v218_v62 = vadd.f32 %v333_v58, %v50_v53  ;;  %v157_v63 = vpop.f32.mrb[5].mxu0  ;;  %v189_v0 = vpop.f32.mrb[5].mxu1 }
  0xe5   :  { %v242_v3 = vld [vmem:[#allocation2 + $0x10] sm:$0xff]  ;;  %v208_v5 = vadd.f32 %v157_v63, %v40_v54  ;;  %v216_v6 = vadd.f32 %v189_v0, %v48_v55  ;;  %v326_v7 = vpop.f32.mrb[6].mxu0  ;;  %v334_v8 = vpop.f32.mrb[6].mxu1 }
  0xe6   :  { %v250_v4 = vld [vmem:[#allocation2 + $0x50] sm:$0xff]  ;;  %v265_v9 = vadd.f32 %v450_v56, %v242_v3  ;;  %v240_v11 = vld [vmem:[#allocation2] sm:$0xff]  ;;  %227 = vst.msk [vmem:[#allocation2 + $0x30] sm:$0xff] %vm19_vm0, %v210_v61  ;;  %235 = vst.msk [vmem:[#allocation2 + $0x70] sm:$0xff] %vm19_vm0, %v218_v62  ;;  %v211_v13 = vadd.f32 %v326_v7, %v43_v59  ;;  %v219_v14 = vadd.f32 %v334_v8, %v51_v60  ;;  %v160_v15 = vpop.f32.mrb[7].mxu0  ;;  %v192_v16 = vpop.f32.mrb[7].mxu1 }
  0xe7   :  { %v273_v10 = vadd.f32 %v450_v56, %v250_v4  ;;  %v248_v12 = vld [vmem:[#allocation2 + $0x40] sm:$0xff]  ;;  %v263_v17 = vadd.f32 %v450_v56, %v240_v11  ;;  %v243_v19 = vld [vmem:[#allocation2 + $0x18] sm:$0xff]  ;;  %225 = vst.msk [vmem:[#allocation2 + $0x20] sm:$0xff] %vm19_vm0, %v208_v5  ;;  %233 = vst.msk [vmem:[#allocation2 + $0x60] sm:$0xff] %vm19_vm0, %v216_v6  ;;  %v209_v21 = vadd.f32 %v160_v15, %v41_v1 }
  0xe8   :  { %v271_v18 = vadd.f32 %v450_v56, %v248_v12  ;;  %v251_v20 = vld [vmem:[#allocation2 + $0x58] sm:$0xff]  ;;  %v217_v22 = vadd.f32 %v192_v16, %v49_v2  ;;  %281 = vst.msk [vmem:[%s543_s3 + $0x10] sm:$0xff] %vm19_vm0, %v265_v9  ;;  %v266_v23 = vadd.f32 %v450_v56, %v243_v19  ;;  %v241_v25 = vld [vmem:[#allocation2 + $0x8] sm:$0xff]  ;;  %228 = vst.msk [vmem:[#allocation2 + $0x38] sm:$0xff] %vm19_vm0, %v211_v13 }
  0xe9   :  { %289 = vst.msk [vmem:[%s543_s3 + $0x50] sm:$0xff] %vm19_vm0, %v273_v10  ;;  %v274_v24 = vadd.f32 %v450_v56, %v251_v20  ;;  %v249_v26 = vld [vmem:[#allocation2 + $0x48] sm:$0xff]  ;;  %236 = vst.msk [vmem:[#allocation2 + $0x78] sm:$0xff] %vm19_vm0, %v219_v14  ;;  %v264_v27 = vadd.f32 %v450_v56, %v241_v25 }
  0xea   :  { %279 = vst.msk [vmem:[%s543_s3] sm:$0xff] %vm19_vm0, %v263_v17  ;;  %287 = vst.msk [vmem:[%s543_s3 + $0x40] sm:$0xff] %vm19_vm0, %v271_v18  ;;  %v272_v28 = vadd.f32 %v450_v56, %v249_v26 }
  0xeb   :  { %226 = vst.msk [vmem:[#allocation2 + $0x28] sm:$0xff] %vm19_vm0, %v209_v21  ;;  %234 = vst.msk [vmem:[#allocation2 + $0x68] sm:$0xff] %vm19_vm0, %v217_v22 }
  0xec   :  { %282 = vst.msk [vmem:[%s543_s3 + $0x18] sm:$0xff] %vm19_vm0, %v266_v23  ;;  %290 = vst.msk [vmem:[%s543_s3 + $0x58] sm:$0xff] %vm19_vm0, %v274_v24 }
  0xed   :  { %280 = vst.msk [vmem:[%s543_s3 + $0x8] sm:$0xff] %vm19_vm0, %v264_v27  ;;  %288 = vst.msk [vmem:[%s543_s3 + $0x48] sm:$0xff] %vm19_vm0, %v272_v28  ;;  %v246_v29 = vld [vmem:[#allocation2 + $0x30] sm:$0xff] }
  0xee   :  { %v254_v30 = vld [vmem:[#allocation2 + $0x70] sm:$0xff]  ;;  %v269_v31 = vadd.f32 %v450_v56, %v246_v29  ;;  %v244_v33 = vld [vmem:[#allocation2 + $0x20] sm:$0xff] }
  0xef   :  { %v277_v32 = vadd.f32 %v450_v56, %v254_v30  ;;  %v252_v34 = vld [vmem:[#allocation2 + $0x60] sm:$0xff]  ;;  %v267_v35 = vadd.f32 %v450_v56, %v244_v33  ;;  %v247_v37 = vld [vmem:[#allocation2 + $0x38] sm:$0xff] }
  0xf0   :  { %v275_v36 = vadd.f32 %v450_v56, %v252_v34  ;;  %v255_v38 = vld [vmem:[#allocation2 + $0x78] sm:$0xff]  ;;  %285 = vst.msk [vmem:[%s543_s3 + $0x30] sm:$0xff] %vm19_vm0, %v269_v31  ;;  %v270_v39 = vadd.f32 %v450_v56, %v247_v37 }
  0xf1   :  { %293 = vst.msk [vmem:[%s543_s3 + $0x70] sm:$0xff] %vm19_vm0, %v277_v32  ;;  %v278_v40 = vadd.f32 %v450_v56, %v255_v38  ;;  %283 = vst.msk [vmem:[%s543_s3 + $0x20] sm:$0xff] %vm19_vm0, %v267_v35 }
  0xf2   :  { %v245_v41 = vld [vmem:[#allocation2 + $0x28] sm:$0xff]  ;;  %291 = vst.msk [vmem:[%s543_s3 + $0x60] sm:$0xff] %vm19_vm0, %v275_v36  ;;  %286 = vst.msk [vmem:[%s543_s3 + $0x38] sm:$0xff] %vm19_vm0, %v270_v39 }
  0xf3   :  { %v253_v42 = vld [vmem:[#allocation2 + $0x68] sm:$0xff]  ;;  %v268_v43 = vadd.f32 %v450_v56, %v245_v41  ;;  %294 = vst.msk [vmem:[%s543_s3 + $0x78] sm:$0xff] %vm19_vm0, %v278_v40 }
  0xf4   :  { %v276_v44 = vadd.f32 %v450_v56, %v253_v42 }
  0xf5   :  { %284 = vst.msk [vmem:[%s543_s3 + $0x28] sm:$0xff] %vm19_vm0, %v268_v43 }
  0xf6   :  { %292 = vst.msk [vmem:[%s543_s3 + $0x68] sm:$0xff] %vm19_vm0, %v276_v44 }

// kernel: lsrformer_forward.20
= control target key start
LH: loop header
LB: loop body
LE: loop exit
PB: predicated region body
PF: predicated region fallthrough
CT: control target
= control target key end

     0   :  { %vm22_vm0 = vcmask 64512   ;;  %v554_v3 = vmov 0.0   ;;  %vm85_vm1 = vcmask 261120   ;;  %s921_s1 = inlined_call_operand.vmem [shape: f32[32,8], index: 1, kind: input, shape index: {}]   ;;  %s922_s0 = inlined_call_operand.vmem [shape: f32[128,32], index: 0, kind: input, shape index: {}]   ;;  %s923_s2 = inlined_call_operand.vmem [shape: f32[1,8], index: 2, kind: input, shape index: {}]   ;;  %s924_s3 = inlined_call_operand.vmem [shape: f32[128,8], index: 3, kind: input, shape index: {}]   ;;  %s925_s4 = inlined_call_operand.vmem [shape: f32[128,8], index: 4, kind: output, shape index: {}]  }
   0x1   :  { %v79_v0 = vld [vmem:[%s921_s1] sm:$0xff]  ;;  %v80_v1 = vld [vmem:[%s921_s1 + $0x8] sm:$0xff]  ;;  %v81_v2 = vld [vmem:[%s921_s1 + $0x10] sm:$0xff]  ;;  %25 = vst.msk [vmem:[#allocation2 + $0x10] sm:$0xff] %vm22_vm0, %v554_v3 }
   0x2   :  { %23 = vst.msk [vmem:[#allocation2] sm:$0xff] %vm22_vm0, %v554_v3  ;;  %24 = vst.msk [vmem:[#allocation2 + $0x8] sm:$0xff] %vm22_vm0, %v554_v3  ;;  %v83_v4 = vpack.c.bf16 %v80_v1, %v79_v0  ;;  %v82_v5 = vld [vmem:[%s921_s1 + $0x18] sm:$0xff]  ;;  %v55_v6 = vld [vmem:[%s922_s0] sm:$0xff] }
   0x3   :  { %26 = vst.msk [vmem:[#allocation2 + $0x18] sm:$0xff] %vm22_vm0, %v554_v3  ;;  %27 = vst.msk [vmem:[#allocation2 + $0x20] sm:$0xff] %vm22_vm0, %v554_v3  ;;  %v56_v7 = vld [vmem:[%s922_s0 + $0x8] sm:$0xff]  ;;  %v84_v8 = vpack.c.bf16 %v82_v5, %v81_v2  ;;  %v63_v10 = vld [vmem:[%s922_s0 + $0x40] sm:$0xff] }
   0x4   :  { %28 = vst.msk [vmem:[#allocation2 + $0x28] sm:$0xff] %vm22_vm0, %v554_v3  ;;  %29 = vst.msk [vmem:[#allocation2 + $0x30] sm:$0xff] %vm22_vm0, %v554_v3  ;;  %v71_v9 = vpack.c.bf16 %v56_v7, %v55_v6  ;;  %v64_v11 = vld [vmem:[%s922_s0 + $0x48] sm:$0xff]  ;;  %497 = vmatprep.subr.bf16.mxu0 %v83_v4  ;;  %517 = vmatprep.subr.bf16.mxu1 %v83_v4  ;;  %v57_v13 = vld [vmem:[%s922_s0 + $0x10] sm:$0xff] }
   0x5   :  { %30 = vst.msk [vmem:[#allocation2 + $0x38] sm:$0xff] %vm22_vm0, %v554_v3  ;;  %31 = vst.msk [vmem:[#allocation2 + $0x40] sm:$0xff] %vm22_vm0, %v554_v3  ;;  %v75_v12 = vpack.c.bf16 %v64_v11, %v63_v10  ;;  %v58_v14 = vld [vmem:[%s922_s0 + $0x18] sm:$0xff]  ;;  %498 = vmatpush3.bf16.msra.mxu0 %v83_v4  ;;  %519 = vmatpush3.bf16.msra.mxu1 %v83_v4  ;;  %v65_v15 = vld [vmem:[%s922_s0 + $0x50] sm:$0xff] }
   0x6   :  { %32 = vst.msk [vmem:[#allocation2 + $0x48] sm:$0xff] %vm22_vm0, %v554_v3  ;;  %33 = vst.msk [vmem:[#allocation2 + $0x50] sm:$0xff] %vm22_vm0, %v554_v3  ;;  %v66_v16 = vld [vmem:[%s922_s0 + $0x58] sm:$0xff]  ;;  %v59_v17 = vld [vmem:[%s922_s0 + $0x20] sm:$0xff]  ;;  %499 = vmatprep.subr.bf16.mxu0 %v84_v8  ;;  %518 = vmatprep.subr.bf16.mxu1 %v84_v8  ;;  %v72_v21 = vpack.c.bf16 %v58_v14, %v57_v13 }
   0x7   :  { %34 = vst.msk [vmem:[#allocation2 + $0x58] sm:$0xff] %vm22_vm0, %v554_v3  ;;  %35 = vst.msk [vmem:[#allocation2 + $0x60] sm:$0xff] %vm22_vm0, %v554_v3  ;;  %v60_v18 = vld [vmem:[%s922_s0 + $0x28] sm:$0xff]  ;;  %v67_v19 = vld [vmem:[%s922_s0 + $0x60] sm:$0xff]  ;;  %501 = vmatprep.mubr.msk.bf16.mxu0 %vm85_vm1, %v71_v9  ;;  %509 = vmatprep.mubr.msk.bf16.mxu1 %vm85_vm1, %v75_v12  ;;  %v76_v22 = vpack.c.bf16 %v66_v16, %v65_v15 }
   0x8   :  { %36 = vst.msk [vmem:[#allocation2 + $0x68] sm:$0xff] %vm22_vm0, %v554_v3  ;;  %37 = vst.msk [vmem:[#allocation2 + $0x70] sm:$0xff] %vm22_vm0, %v554_v3  ;;  %v68_v20 = vld [vmem:[%s922_s0 + $0x68] sm:$0xff]  ;;  %v73_v23 = vpack.c.bf16 %v60_v18, %v59_v17  ;;  %v61_v25 = vld [vmem:[%s922_s0 + $0x30] sm:$0xff] }
   0x9   :  { %38 = vst.msk [vmem:[#allocation2 + $0x78] sm:$0xff] %vm22_vm0, %v554_v3  ;;  %500 = vmatpush3.bf16.msra.mxu0 %v84_v8  ;;  %520 = vmatpush3.bf16.msra.mxu1 %v84_v8  ;;  %v77_v24 = vpack.c.bf16 %v68_v20, %v67_v19  ;;  %v62_v26 = vld [vmem:[%s922_s0 + $0x38] sm:$0xff]  ;;  %v69_v27 = vld [vmem:[%s922_s0 + $0x70] sm:$0xff]  ;;  %v39_v33 = vld [vmem:[#allocation2] sm:$0xff] }
   0xa   :  { %v70_v28 = vld [vmem:[%s922_s0 + $0x78] sm:$0xff]  ;;  %v74_v29 = vpack.c.bf16 %v62_v26, %v61_v25  ;;  %v41_v31 = vld [vmem:[#allocation2 + $0x10] sm:$0xff]  ;;  %v40_v43 = vld [vmem:[#allocation2 + $0x8] sm:$0xff] }
   0xb   :  { %v78_v30 = vpack.c.bf16 %v70_v28, %v69_v27  ;;  %v42_v37 = vld [vmem:[#allocation2 + $0x18] sm:$0xff]  ;;  %v45_v55 = vld [vmem:[#allocation2 + $0x30] sm:$0xff]  ;;  %v43_v57 = vld [vmem:[#allocation2 + $0x20] sm:$0xff] }
   0xc   :  { %502 = vmatmul.mubr.msk.bf16.vlgmr.msra.gmra.mrb[0].mxu0 %vm85_vm1, %v72_v21  ;;  %510 = vmatmul.mubr.msk.bf16.vlgmr.msra.gmra.mrb[0].mxu1 %vm85_vm1, %v76_v22  ;;  %v47_v34 = vld [vmem:[#allocation2 + $0x40] sm:$0xff]  ;;  %v46_v62 = vld [vmem:[#allocation2 + $0x38] sm:$0xff]  ;;  %v44_v4 = vld [vmem:[#allocation2 + $0x28] sm:$0xff] }
   0xd   :  { %505 = vmatprep.mubr.msk.bf16.mxu0 %vm85_vm1, %v73_v23  ;;  %513 = vmatprep.mubr.msk.bf16.mxu1 %vm85_vm1, %v77_v24  ;;  %v49_v32 = vld [vmem:[#allocation2 + $0x50] sm:$0xff]  ;;  %v48_v44 = vld [vmem:[#allocation2 + $0x48] sm:$0xff]  ;;  %v675_v59 = vld [vmem:[%s923_s2] ss:$0 sm:$0xff] }
   0xe   :  { %v50_v38 = vld [vmem:[#allocation2 + $0x58] sm:$0xff]  ;;  %v51_v58 = vld [vmem:[#allocation2 + $0x60] sm:$0xff] }
   0xf   :  { %v53_v56 = vld [vmem:[#allocation2 + $0x70] sm:$0xff]  ;;  %v52_v5 = vld [vmem:[#allocation2 + $0x68] sm:$0xff] }
  0x10   :  { %v54_v63 = vld [vmem:[#allocation2 + $0x78] sm:$0xff] }
  0x14   :  { %506 = vmatmul.mubr.msk.bf16.gmra.mrb[4].mxu0 %vm85_vm1, %v74_v29  ;;  %514 = vmatmul.mubr.msk.bf16.gmra.mrb[4].mxu1 %vm85_vm1, %v78_v30 }
  0xdf   :  { %v503_v35 = vpop.f32.mrb[0].mxu0  ;;  %v511_v36 = vpop.f32.mrb[0].mxu1 }
  0xe0   :  { %v209_v39 = vadd.f32 %v503_v35, %v41_v31  ;;  %v217_v40 = vadd.f32 %v511_v36, %v49_v32  ;;  %v144_v41 = vpop.f32.mrb[1].mxu0  ;;  %v176_v42 = vpop.f32.mrb[1].mxu1 }
  0xe1   :  { %v207_v45 = vadd.f32 %v144_v41, %v39_v33  ;;  %v215_v46 = vadd.f32 %v176_v42, %v47_v34  ;;  %v504_v47 = vpop.f32.mrb[2].mxu0  ;;  %v512_v48 = vpop.f32.mrb[2].mxu1 }
  0xe2   :  { %226 = vst.msk [vmem:[#allocation2 + $0x10] sm:$0xff] %vm22_vm0, %v209_v39  ;;  %234 = vst.msk [vmem:[#allocation2 + $0x50] sm:$0xff] %vm22_vm0, %v217_v40  ;;  %v210_v49 = vadd.f32 %v504_v47, %v42_v37  ;;  %v218_v50 = vadd.f32 %v512_v48, %v50_v38  ;;  %v147_v51 = vpop.f32.mrb[3].mxu0  ;;  %v179_v52 = vpop.f32.mrb[3].mxu1 }
  0xe3   :  { %224 = vst.msk [vmem:[#allocation2] sm:$0xff] %vm22_vm0, %v207_v45  ;;  %232 = vst.msk [vmem:[#allocation2 + $0x40] sm:$0xff] %vm22_vm0, %v215_v46  ;;  %v208_v53 = vadd.f32 %v147_v51, %v40_v43  ;;  %v216_v54 = vadd.f32 %v179_v52, %v48_v44 }
  0xe4   :  { %227 = vst.msk [vmem:[#allocation2 + $0x18] sm:$0xff] %vm22_vm0, %v210_v49  ;;  %235 = vst.msk [vmem:[#allocation2 + $0x58] sm:$0xff] %vm22_vm0, %v218_v50 }
  0xe5   :  { %225 = vst.msk [vmem:[#allocation2 + $0x8] sm:$0xff] %vm22_vm0, %v208_v53  ;;  %233 = vst.msk [vmem:[#allocation2 + $0x48] sm:$0xff] %vm22_vm0, %v216_v54 }
  0xe7   :  { %v507_v60 = vpop.f32.mrb[4].mxu0  ;;  %v515_v61 = vpop.f32.mrb[4].mxu1 }
  0xe8   :  { %v213_v0 = vadd.f32 %v507_v60, %v45_v55  ;;  %v221_v1 = vadd.f32 %v515_v61, %v53_v56  ;;  %v160_v2 = vpop.f32.mrb[5].mxu0  ;;  %v192_v3 = vpop.f32.mrb[5].mxu1 }
  0xe9   :  { %v245_v6 = vld [vmem:[#allocation2 + $0x10] sm:$0xff]  ;;  %v211_v8 = vadd.f32 %v160_v2, %v43_v57  ;;  %v219_v9 = vadd.f32 %v192_v3, %v51_v58  ;;  %v508_v10 = vpop.f32.mrb[6].mxu0  ;;  %v516_v11 = vpop.f32.mrb[6].mxu1 }
  0xea   :  { %v253_v7 = vld [vmem:[#allocation2 + $0x50] sm:$0xff]  ;;  %v268_v12 = vadd.f32 %v675_v59, %v245_v6  ;;  %v243_v14 = vld [vmem:[#allocation2] sm:$0xff]  ;;  %230 = vst.msk [vmem:[#allocation2 + $0x30] sm:$0xff] %vm22_vm0, %v213_v0  ;;  %238 = vst.msk [vmem:[#allocation2 + $0x70] sm:$0xff] %vm22_vm0, %v221_v1  ;;  %v214_v16 = vadd.f32 %v508_v10, %v46_v62  ;;  %v222_v17 = vadd.f32 %v516_v11, %v54_v63  ;;  %v163_v18 = vpop.f32.mrb[7].mxu0  ;;  %v195_v19 = vpop.f32.mrb[7].mxu1 }
  0xeb   :  { %v679_v13 = vadd.f32 %v675_v59, %v253_v7  ;;  %v251_v15 = vld [vmem:[#allocation2 + $0x40] sm:$0xff]  ;;  %v684_v20 = vadd.f32 %v675_v59, %v243_v14  ;;  %v246_v22 = vld [vmem:[#allocation2 + $0x18] sm:$0xff]  ;;  %228 = vst.msk [vmem:[#allocation2 + $0x20] sm:$0xff] %vm22_vm0, %v211_v8  ;;  %236 = vst.msk [vmem:[#allocation2 + $0x60] sm:$0xff] %vm22_vm0, %v219_v9  ;;  %v212_v24 = vadd.f32 %v163_v18, %v44_v4 }
  0xec   :  { %v687_v21 = vadd.f32 %v675_v59, %v251_v15  ;;  %v254_v23 = vld [vmem:[#allocation2 + $0x58] sm:$0xff]  ;;  %v220_v25 = vadd.f32 %v195_v19, %v52_v5  ;;  %v300_v26 = vmul.f32 0.044715, %v268_v12  ;;  %231 = vst.msk [vmem:[#allocation2 + $0x38] sm:$0xff] %vm22_vm0, %v214_v16  ;;  %239 = vst.msk [vmem:[#allocation2 + $0x78] sm:$0xff] %vm22_vm0, %v222_v17  ;;  %v700_v32 = vadd.f32 %v675_v59, %v246_v22  ;;  %v244_v34 = vld [vmem:[#allocation2 + $0x8] sm:$0xff] }
  0xed   :  { %v308_v27 = vmul.f32 0.044715, %v679_v13  ;;  %v298_v28 = vmul.f32 0.044715, %v684_v20  ;;  %229 = vst.msk [vmem:[#allocation2 + $0x28] sm:$0xff] %vm22_vm0, %v212_v24  ;;  %v703_v33 = vadd.f32 %v675_v59, %v254_v23  ;;  %v708_v37 = vadd.f32 %v675_v59, %v244_v34  ;;  %v252_v38 = vld [vmem:[#allocation2 + $0x48] sm:$0xff] }
  0xee   :  { %v306_v29 = vmul.f32 0.044715, %v687_v21  ;;  %237 = vst.msk [vmem:[#allocation2 + $0x68] sm:$0xff] %vm22_vm0, %v220_v25  ;;  %v316_v30 = vmul.f32 %v300_v26, %v268_v12  ;;  %v301_v41 = vmul.f32 0.044715, %v700_v32  ;;  %v718_v48 = vadd.f32 %v675_v59, %v252_v38 }
  0xef   :  { %v324_v31 = vmul.f32 %v308_v27, %v679_v13  ;;  %v314_v35 = vmul.f32 %v298_v28, %v684_v20  ;;  %v309_v44 = vmul.f32 0.044715, %v703_v33  ;;  %v299_v52 = vmul.f32 0.044715, %v708_v37 }
  0xf0   :  { %v322_v36 = vmul.f32 %v306_v29, %v687_v21  ;;  %v332_v39 = vmul.f32 %v316_v30, %v268_v12  ;;  %v317_v47 = vmul.f32 %v301_v41, %v700_v32  ;;  %v724_v54 = vmul.f32 0.5, %v268_v12 }
  0xf1   :  { %v340_v40 = vmul.f32 %v324_v31, %v679_v13  ;;  %v330_v42 = vmul.f32 %v314_v35, %v684_v20  ;;  %v325_v51 = vmul.f32 %v309_v44, %v703_v33  ;;  %v249_v53 = vld [vmem:[#allocation2 + $0x30] sm:$0xff]  ;;  %v315_v63 = vmul.f32 %v299_v52, %v708_v37 }
  0xf2   :  { %v338_v43 = vmul.f32 %v322_v36, %v687_v21  ;;  %v348_v45 = vadd.f32 %v332_v39, %v268_v12  ;;  %v333_v57 = vmul.f32 %v317_v47, %v700_v32  ;;  %v257_v58 = vld [vmem:[#allocation2 + $0x70] sm:$0xff]  ;;  %v307_v1 = vmul.f32 0.044715, %v718_v48  ;;  %v247_v9 = vld [vmem:[#allocation2 + $0x20] sm:$0xff] }
  0xf3   :  { %v356_v46 = vadd.f32 %v340_v40, %v679_v13  ;;  %v346_v49 = vadd.f32 %v330_v42, %v684_v20  ;;  %v341_v62 = vmul.f32 %v325_v51, %v703_v33  ;;  %v732_v2 = vadd.f32 %v675_v59, %v249_v53  ;;  %v255_v14 = vld [vmem:[#allocation2 + $0x60] sm:$0xff]  ;;  %v250_v15 = vld [vmem:[#allocation2 + $0x38] sm:$0xff] }
  0xf4   :  { %v354_v50 = vadd.f32 %v338_v43, %v687_v21  ;;  %v364_v55 = vmul.f32 0.7978846, %v348_v45  ;;  %v349_v0 = vadd.f32 %v333_v57, %v700_v32  ;;  %v331_v4 = vmul.f32 %v315_v63, %v708_v37  ;;  %v258_v35 = vld [vmem:[#allocation2 + $0x78] sm:$0xff] }
  0xf5   :  { %v372_v56 = vmul.f32 0.7978846, %v356_v46  ;;  %v362_v60 = vmul.f32 0.7978846, %v346_v49  ;;  %v357_v3 = vadd.f32 %v341_v62, %v703_v33  ;;  %v737_v5 = vadd.f32 %v675_v59, %v257_v58  ;;  %v428_v49 = vld [vmem:[%s924_s3 + $0x10] sm:$0xff]  ;;  %v426_v62 = vld [vmem:[%s924_s3] sm:$0xff] }
  0xf6   :  { %v370_v61 = vmul.f32 0.7978846, %v354_v50  ;;  %522 = vtanh.f32 %v364_v55  ;;  %v292_v6 = vmul.f32 0.5, %v679_v13  ;;  %v365_v7 = vmul.f32 0.7978846, %v349_v0 }
  0xf7   :  { %524 = vtanh.f32 %v372_v56  ;;  %v323_v8 = vmul.f32 %v307_v1, %v718_v48  ;;  %v373_v10 = vmul.f32 0.7978846, %v357_v3  ;;  %v347_v11 = vadd.f32 %v331_v4, %v708_v37  ;;  %v436_v56 = vld [vmem:[%s924_s3 + $0x50] sm:$0xff]  ;;  %v434_v4 = vld [vmem:[%s924_s3 + $0x40] sm:$0xff] }
  0xf8   :  { %526 = vtanh.f32 %v362_v60  ;;  %v304_v12 = vmul.f32 0.044715, %v732_v2  ;;  %v282_v16 = vmul.f32 0.5, %v684_v20  ;;  %v312_v13 = vmul.f32 0.044715, %v737_v5 }
  0xf9   :  { %528 = vtanh.f32 %v370_v61  ;;  %v339_v17 = vmul.f32 %v323_v8, %v718_v48  ;;  %v363_v18 = vmul.f32 0.7978846, %v347_v11  ;;  %v748_v22 = vadd.f32 %v675_v59, %v247_v9 }
  0xfa   :  { %530 = vtanh.f32 %v365_v7  ;;  %v320_v19 = vmul.f32 %v304_v12, %v732_v2  ;;  %v328_v24 = vmul.f32 %v312_v13, %v737_v5  ;;  %v753_v25 = vadd.f32 %v675_v59, %v255_v14  ;;  %v248_v14 = vld [vmem:[#allocation2 + $0x28] sm:$0xff]  ;;  %v437_v13 = vld [vmem:[%s924_s3 + $0x58] sm:$0xff] }
  0xfb   :  { %532 = vtanh.f32 %v373_v10  ;;  %v355_v23 = vadd.f32 %v339_v17, %v718_v48  ;;  %v756_v20 = vadd.f32 %v675_v59, %v250_v15  ;;  %v290_v26 = vmul.f32 0.5, %v687_v21 }
  0xfc   :  { %534 = vtanh.f32 %v363_v18  ;;  %v336_v27 = vmul.f32 %v320_v19, %v732_v2  ;;  %v302_v28 = vmul.f32 0.044715, %v748_v22  ;;  %v285_v29 = vmul.f32 0.5, %v700_v32  ;;  %v256_v19 = vld [vmem:[#allocation2 + $0x68] sm:$0xff] }
  0xfd   :  { %v371_v30 = vmul.f32 0.7978846, %v355_v23  ;;  %v344_v31 = vmul.f32 %v328_v24, %v737_v5  ;;  %v310_v34 = vmul.f32 0.044715, %v753_v25  ;;  %v293_v36 = vmul.f32 0.5, %v703_v33 }
  0xfe   :  { %v352_v38 = vadd.f32 %v336_v27, %v732_v2  ;;  %v318_v39 = vmul.f32 %v302_v28, %v748_v22  ;;  %v305_v21 = vmul.f32 0.044715, %v756_v20  ;;  %v283_v41 = vmul.f32 0.5, %v708_v37  ;;  %v427_v28 = vld [vmem:[%s924_s3 + $0x8] sm:$0xff] }
  0xff   :  { %536 = vtanh.f32 %v371_v30  ;;  %v360_v32 = vadd.f32 %v344_v31, %v737_v5  ;;  %v326_v42 = vmul.f32 %v310_v34, %v753_v25  ;;  %v773_v33 = vadd.f32 %v675_v59, %v258_v35 }
 0x100   :  { %v523_v40 = vpop.eup %522  ;;  %v368_v45 = vmul.f32 0.7978846, %v352_v38  ;;  %v334_v46 = vmul.f32 %v318_v39, %v748_v22  ;;  %v321_v52 = vmul.f32 %v305_v21, %v756_v20  ;;  %v817_v31 = vadd.f32 %v675_v59, %v248_v14 }
 0x101   :  { %v525_v43 = vpop.eup %524  ;;  %v396_v44 = vadd.f32 1.0, %v523_v40  ;;  %v376_v37 = vmul.f32 0.7978846, %v360_v32  ;;  %v342_v51 = vmul.f32 %v326_v42, %v753_v25  ;;  %v313_v30 = vmul.f32 0.044715, %v773_v33 }
 0x102   :  { %v527_v47 = vpop.eup %526  ;;  %v404_v50 = vadd.f32 1.0, %v525_v43  ;;  %538 = vtanh.f32 %v368_v45  ;;  %v350_v58 = vadd.f32 %v334_v46, %v748_v22  ;;  %v337_v18 = vmul.f32 %v321_v52, %v756_v20  ;;  %v432_v52 = vld [vmem:[%s924_s3 + $0x30] sm:$0xff] }
 0x103   :  { %v529_v53 = vpop.eup %528  ;;  %v412_v55 = vmul.f32 %v396_v44, %v724_v54  ;;  %v394_v57 = vadd.f32 1.0, %v527_v47  ;;  %540 = vtanh.f32 %v376_v37  ;;  %v358_v0 = vadd.f32 %v342_v51, %v753_v25 }
 0x104   :  { %v531_v60 = vpop.eup %530  ;;  %v420_v61 = vmul.f32 %v404_v50, %v292_v6  ;;  %v402_v63 = vadd.f32 1.0, %v529_v53  ;;  %v366_v8 = vmul.f32 0.7978846, %v350_v58  ;;  %v429_v6 = vld [vmem:[%s924_s3 + $0x18] sm:$0xff]  ;;  %v824_v38 = vadd.f32 %v675_v59, %v256_v19  ;;  %v435_v59 = vld [vmem:[%s924_s3 + $0x48] sm:$0xff] }
 0x105   :  { %v533_v1 = vpop.eup %532  ;;  %v444_v54 = vadd.f32 %v428_v49, %v412_v55  ;;  %v410_v3 = vmul.f32 %v394_v57, %v282_v16  ;;  %v397_v7 = vadd.f32 1.0, %v531_v60  ;;  %v374_v12 = vmul.f32 0.7978846, %v358_v0 }
 0x106   :  { %v452_v9 = vadd.f32 %v436_v56, %v420_v61  ;;  %v418_v10 = vmul.f32 %v402_v63, %v290_v26  ;;  %v405_v11 = vadd.f32 1.0, %v533_v1  ;;  %v535_v15 = vpop.eup %534  ;;  %542 = vtanh.f32 %v366_v8  ;;  %v430_v8 = vld [vmem:[%s924_s3 + $0x20] sm:$0xff] }
 0x107   :  { %460 = vst.msk [vmem:[%s925_s4 + $0x10] sm:$0xff] %vm22_vm0, %v444_v54  ;;  %v442_v16 = vadd.f32 %v426_v62, %v410_v3  ;;  %v413_v17 = vmul.f32 %v397_v7, %v285_v29  ;;  %v395_v26 = vadd.f32 1.0, %v535_v15  ;;  %544 = vtanh.f32 %v374_v12 }
 0x108   :  { %468 = vst.msk [vmem:[%s925_s4 + $0x50] sm:$0xff] %vm22_vm0, %v452_v9  ;;  %v450_v23 = vadd.f32 %v434_v4, %v418_v10  ;;  %v421_v24 = vmul.f32 %v405_v11, %v293_v36  ;;  %v353_v29 = vadd.f32 %v337_v18, %v756_v20  ;;  %v291_v39 = vmul.f32 0.5, %v718_v48  ;;  %v433_v18 = vld [vmem:[%s924_s3 + $0x38] sm:$0xff] }
 0x109   :  { %458 = vst.msk [vmem:[%s925_s4] sm:$0xff] %vm22_vm0, %v442_v16  ;;  %v445_v27 = vadd.f32 %v429_v6, %v413_v17  ;;  %v537_v34 = vpop.eup %536  ;;  %v411_v36 = vmul.f32 %v395_v26, %v283_v41  ;;  %v329_v32 = vmul.f32 %v313_v30, %v773_v33  ;;  %v303_v42 = vmul.f32 0.044715, %v817_v31  ;;  %v438_v6 = vld [vmem:[%s924_s3 + $0x60] sm:$0xff] }
 0x10a   :  { %466 = vst.msk [vmem:[%s925_s4 + $0x40] sm:$0xff] %vm22_vm0, %v450_v23  ;;  %v453_v35 = vadd.f32 %v437_v13, %v421_v24  ;;  %v403_v21 = vadd.f32 1.0, %v537_v34  ;;  %v369_v40 = vmul.f32 0.7978846, %v353_v29  ;;  %v311_v43 = vmul.f32 0.044715, %v824_v38 }
 0x10b   :  { %461 = vst.msk [vmem:[%s925_s4 + $0x18] sm:$0xff] %vm22_vm0, %v445_v27  ;;  %v443_v41 = vadd.f32 %v427_v28, %v411_v36  ;;  %v345_v45 = vmul.f32 %v329_v32, %v773_v33  ;;  %v288_v47 = vmul.f32 0.5, %v732_v2  ;;  %v319_v50 = vmul.f32 %v303_v42, %v817_v31  ;;  %v440_v2 = vld [vmem:[%s924_s3 + $0x70] sm:$0xff]  ;;  %v441_v27 = vld [vmem:[%s924_s3 + $0x78] sm:$0xff]  ;;  %v439_v32 = vld [vmem:[%s924_s3 + $0x68] sm:$0xff] }
 0x10c   :  { %469 = vst.msk [vmem:[%s925_s4 + $0x58] sm:$0xff] %vm22_vm0, %v453_v35  ;;  %v539_v44 = vpop.eup %538  ;;  %v419_v48 = vmul.f32 %v403_v21, %v291_v39  ;;  %546 = vtanh.f32 %v369_v40  ;;  %v327_v37 = vmul.f32 %v311_v43, %v824_v38  ;;  %v296_v53 = vmul.f32 0.5, %v737_v5  ;;  %v431_v39 = vld [vmem:[%s924_s3 + $0x28] sm:$0xff] }
 0x10d   :  { %v541_v46 = vpop.eup %540  ;;  %459 = vst.msk [vmem:[%s925_s4 + $0x8] sm:$0xff] %vm22_vm0, %v443_v41  ;;  %v400_v49 = vadd.f32 1.0, %v539_v44  ;;  %v361_v56 = vadd.f32 %v345_v45, %v773_v33  ;;  %v335_v58 = vmul.f32 %v319_v50, %v817_v31  ;;  %v286_v5 = vmul.f32 0.5, %v748_v22 }
 0x10e   :  { %v451_v51 = vadd.f32 %v435_v59, %v419_v48  ;;  %v408_v55 = vadd.f32 1.0, %v541_v46  ;;  %v343_v60 = vmul.f32 %v327_v37, %v824_v38  ;;  %v294_v9 = vmul.f32 0.5, %v753_v25 }
 0x10f   :  { %v416_v57 = vmul.f32 %v400_v49, %v288_v47  ;;  %v377_v63 = vmul.f32 0.7978846, %v361_v56  ;;  %v351_v3 = vadd.f32 %v335_v58, %v817_v31  ;;  %v289_v17 = vmul.f32 0.5, %v756_v20 }
 0x110   :  { %v543_v61 = vpop.eup %542  ;;  %467 = vst.msk [vmem:[%s925_s4 + $0x48] sm:$0xff] %vm22_vm0, %v451_v51  ;;  %v424_v62 = vmul.f32 %v408_v55, %v296_v53  ;;  %v359_v4 = vadd.f32 %v343_v60, %v824_v38  ;;  %v297_v20 = vmul.f32 0.5, %v773_v33  ;;  %v287_v34 = vmul.f32 0.5, %v817_v31 }
 0x111   :  { %v545_v0 = vpop.eup %544  ;;  %v448_v1 = vadd.f32 %v432_v52, %v416_v57  ;;  %v398_v54 = vadd.f32 1.0, %v543_v61  ;;  %548 = vtanh.f32 %v377_v63  ;;  %v367_v11 = vmul.f32 0.7978846, %v351_v3 }
 0x112   :  { %v456_v7 = vadd.f32 %v440_v2, %v424_v62  ;;  %v406_v10 = vadd.f32 1.0, %v545_v0  ;;  %v375_v12 = vmul.f32 0.7978846, %v359_v4  ;;  %v295_v21 = vmul.f32 0.5, %v824_v38 }
 0x113   :  { %464 = vst.msk [vmem:[%s925_s4 + $0x30] sm:$0xff] %vm22_vm0, %v448_v1  ;;  %v414_v22 = vmul.f32 %v398_v54, %v286_v5  ;;  %550 = vtanh.f32 %v367_v11 }
 0x114   :  { %472 = vst.msk [vmem:[%s925_s4 + $0x70] sm:$0xff] %vm22_vm0, %v456_v7  ;;  %v422_v25 = vmul.f32 %v406_v10, %v294_v9  ;;  %552 = vtanh.f32 %v375_v12 }
 0x115   :  { %v446_v14 = vadd.f32 %v430_v8, %v414_v22 }
 0x116   :  { %v547_v15 = vpop.eup %546  ;;  %v454_v16 = vadd.f32 %v438_v6, %v422_v25 }
 0x117   :  { %462 = vst.msk [vmem:[%s925_s4 + $0x20] sm:$0xff] %vm22_vm0, %v446_v14  ;;  %v401_v13 = vadd.f32 1.0, %v547_v15 }
 0x118   :  { %470 = vst.msk [vmem:[%s925_s4 + $0x60] sm:$0xff] %vm22_vm0, %v454_v16 }
 0x119   :  { %v417_v19 = vmul.f32 %v401_v13, %v289_v17 }
 0x11b   :  { %v449_v23 = vadd.f32 %v433_v18, %v417_v19  ;;  %v549_v24 = vpop.eup %548 }
 0x11c   :  { %v409_v26 = vadd.f32 1.0, %v549_v24 }
 0x11d   :  { %465 = vst.msk [vmem:[%s925_s4 + $0x38] sm:$0xff] %vm22_vm0, %v449_v23  ;;  %v551_v28 = vpop.eup %550 }
 0x11e   :  { %v425_v29 = vmul.f32 %v409_v26, %v297_v20  ;;  %v553_v30 = vpop.eup %552  ;;  %v399_v35 = vadd.f32 1.0, %v551_v28 }
 0x11f   :  { %v407_v40 = vadd.f32 1.0, %v553_v30 }
 0x120   :  { %v457_v36 = vadd.f32 %v441_v27, %v425_v29  ;;  %v415_v33 = vmul.f32 %v399_v35, %v287_v34 }
 0x121   :  { %v423_v31 = vmul.f32 %v407_v40, %v295_v21 }
 0x122   :  { %473 = vst.msk [vmem:[%s925_s4 + $0x78] sm:$0xff] %vm22_vm0, %v457_v36  ;;  %v447_v41 = vadd.f32 %v431_v39, %v415_v33 }
 0x123   :  { %v455_v59 = vadd.f32 %v439_v32, %v423_v31 }
 0x124   :  { %463 = vst.msk [vmem:[%s925_s4 + $0x28] sm:$0xff] %vm22_vm0, %v447_v41 }
 0x125   :  { %471 = vst.msk [vmem:[%s925_s4 + $0x68] sm:$0xff] %vm22_vm0, %v455_v59 }

// kernel: lsrformer_forward.19
= control target key start
LH: loop header
LB: loop body
LE: loop exit
PB: predicated region body
PF: predicated region fallthrough
CT: control target
= control target key end

     0   :  { %vm19_vm0 = vcmask 261120   ;;  %vm103_vm1 = vcmask 1043456   ;;  %v516_v3 = vmov 0.0   ;;  %vm78_vm2 = vcmask 64512   ;;  %s817_s1 = inlined_call_operand.vmem [shape: f32[8,32], index: 1, kind: input, shape index: {}]   ;;  %s818_s0 = inlined_call_operand.vmem [shape: f32[128,8], index: 0, kind: input, shape index: {}]   ;;  %s819_s2 = inlined_call_operand.vmem [shape: f32[1,32], index: 2, kind: input, shape index: {}]   ;;  %s820_s3 = inlined_call_operand.vmem [shape: f32[128,32], index: 3, kind: output, shape index: {}]  }
   0x1   :  { %v76_v0 = vld [vmem:[%s817_s1] sm:$0xff]  ;;  %v53_v2 = vld [vmem:[%s818_s0 + $0x8] sm:$0xff]  ;;  %22 = vst.msk [vmem:[#allocation2 + $0x10] sm:$0xff] %vm19_vm0, %v516_v3  ;;  %20 = vst.msk [vmem:[#allocation2] sm:$0xff] %vm19_vm0, %v516_v3 }
   0x2   :  { %v52_v1 = vld [vmem:[%s818_s0] sm:$0xff]  ;;  %21 = vst.msk [vmem:[#allocation2 + $0x8] sm:$0xff] %vm19_vm0, %v516_v3  ;;  %23 = vst.msk [vmem:[#allocation2 + $0x18] sm:$0xff] %vm19_vm0, %v516_v3  ;;  %v77_v4 = vpack.c.bf16 %v76_v0, %v76_v0  ;;  %v61_v7 = vld [vmem:[%s818_s0 + $0x48] sm:$0xff] }
   0x3   :  { %24 = vst.msk [vmem:[#allocation2 + $0x20] sm:$0xff] %vm19_vm0, %v516_v3  ;;  %25 = vst.msk [vmem:[#allocation2 + $0x28] sm:$0xff] %vm19_vm0, %v516_v3  ;;  %v68_v5 = vpack.c.bf16 %v53_v2, %v52_v1  ;;  %v60_v6 = vld [vmem:[%s818_s0 + $0x40] sm:$0xff]  ;;  %v54_v8 = vld [vmem:[%s818_s0 + $0x10] sm:$0xff] }
   0x4   :  { %26 = vst.msk [vmem:[#allocation2 + $0x30] sm:$0xff] %vm19_vm0, %v516_v3  ;;  %27 = vst.msk [vmem:[#allocation2 + $0x38] sm:$0xff] %vm19_vm0, %v516_v3  ;;  %v72_v9 = vpack.c.bf16 %v61_v7, %v60_v6  ;;  %v55_v10 = vld [vmem:[%s818_s0 + $0x18] sm:$0xff]  ;;  %v62_v11 = vld [vmem:[%s818_s0 + $0x50] sm:$0xff]  ;;  %481 = vmatprep.subr.msk.bf16.mxu0 %vm103_vm1, %v77_v4  ;;  %482 = vmatprep.subr.msk.bf16.mxu1 %vm103_vm1, %v77_v4  ;;  %v105_v13 = vsel %vm103_vm1, %v77_v4, 0 }
   0x5   :  { %28 = vst.msk [vmem:[#allocation2 + $0x40] sm:$0xff] %vm19_vm0, %v516_v3  ;;  %29 = vst.msk [vmem:[#allocation2 + $0x48] sm:$0xff] %vm19_vm0, %v516_v3  ;;  %v63_v12 = vld [vmem:[%s818_s0 + $0x58] sm:$0xff]  ;;  %v69_v14 = vpack.c.bf16 %v55_v10, %v54_v8  ;;  %v56_v16 = vld [vmem:[%s818_s0 + $0x20] sm:$0xff]  ;;  %462 = vmatpush3.bf16.msra.mxu0 %v105_v13  ;;  %480 = vmatpush3.bf16.msra.mxu1 %v105_v13 }
   0x6   :  { %30 = vst.msk [vmem:[#allocation2 + $0x50] sm:$0xff] %vm19_vm0, %v516_v3  ;;  %31 = vst.msk [vmem:[#allocation2 + $0x58] sm:$0xff] %vm19_vm0, %v516_v3  ;;  %v73_v15 = vpack.c.bf16 %v63_v12, %v62_v11  ;;  %v57_v17 = vld [vmem:[%s818_s0 + $0x28] sm:$0xff]  ;;  %v64_v18 = vld [vmem:[%s818_s0 + $0x60] sm:$0xff]  ;;  %463 = vmatprep.mubr.msk.bf16.mxu0 %vm78_vm2, %v68_v5  ;;  %471 = vmatprep.mubr.msk.bf16.mxu1 %vm78_vm2, %v72_v9 }
   0x7   :  { %32 = vst.msk [vmem:[#allocation2 + $0x60] sm:$0xff] %vm19_vm0, %v516_v3  ;;  %33 = vst.msk [vmem:[#allocation2 + $0x68] sm:$0xff] %vm19_vm0, %v516_v3  ;;  %v70_v19 = vpack.c.bf16 %v57_v17, %v56_v16  ;;  %v65_v20 = vld [vmem:[%s818_s0 + $0x68] sm:$0xff]  ;;  %v58_v22 = vld [vmem:[%s818_s0 + $0x30] sm:$0xff] }
   0x8   :  { %34 = vst.msk [vmem:[#allocation2 + $0x70] sm:$0xff] %vm19_vm0, %v516_v3  ;;  %35 = vst.msk [vmem:[#allocation2 + $0x78] sm:$0xff] %vm19_vm0, %v516_v3  ;;  %v74_v21 = vpack.c.bf16 %v65_v20, %v64_v18  ;;  %464 = vmatmul.mubr.msk.bf16.vlgmr.msra.gmra.mrb[0].mxu0 %vm78_vm2, %v69_v14  ;;  %472 = vmatmul.mubr.msk.bf16.vlgmr.msra.gmra.mrb[0].mxu1 %vm78_vm2, %v73_v15  ;;  %v59_v23 = vld [vmem:[%s818_s0 + $0x38] sm:$0xff]  ;;  %v66_v24 = vld [vmem:[%s818_s0 + $0x70] sm:$0xff] }
   0x9   :  { %467 = vmatprep.mubr.msk.bf16.mxu0 %vm78_vm2, %v70_v19  ;;  %v67_v25 = vld [vmem:[%s818_s0 + $0x78] sm:$0xff]  ;;  %v71_v26 = vpack.c.bf16 %v59_v23, %v58_v22  ;;  %v38_v28 = vld [vmem:[#allocation2 + $0x10] sm:$0xff]  ;;  %v36_v30 = vld [vmem:[#allocation2] sm:$0xff] }
   0xa   :  { %475 = vmatprep.mubr.msk.bf16.mxu1 %vm78_vm2, %v74_v21  ;;  %v75_v27 = vpack.c.bf16 %v67_v25, %v66_v24  ;;  %v39_v34 = vld [vmem:[#allocation2 + $0x18] sm:$0xff]  ;;  %v37_v40 = vld [vmem:[#allocation2 + $0x8] sm:$0xff]  ;;  %v40_v54 = vld [vmem:[#allocation2 + $0x20] sm:$0xff] }
   0xb   :  { %v42_v52 = vld [vmem:[#allocation2 + $0x30] sm:$0xff]  ;;  %v626_v56 = vld [vmem:[%s819_s2] ss:$0 sm:$0xff]  ;;  %v43_v59 = vld [vmem:[#allocation2 + $0x38] sm:$0xff] }
   0xc   :  { %v44_v31 = vld [vmem:[#allocation2 + $0x40] sm:$0xff]  ;;  %v45_v41 = vld [vmem:[#allocation2 + $0x48] sm:$0xff] }
   0xd   :  { %v46_v29 = vld [vmem:[#allocation2 + $0x50] sm:$0xff]  ;;  %v47_v35 = vld [vmem:[#allocation2 + $0x58] sm:$0xff]  ;;  %v41_v1 = vld [vmem:[#allocation2 + $0x28] sm:$0xff] }
   0xe   :  { %v48_v55 = vld [vmem:[#allocation2 + $0x60] sm:$0xff]  ;;  %v49_v2 = vld [vmem:[#allocation2 + $0x68] sm:$0xff] }
   0xf   :  { %v50_v53 = vld [vmem:[#allocation2 + $0x70] sm:$0xff]  ;;  %v51_v60 = vld [vmem:[#allocation2 + $0x78] sm:$0xff] }
  0x10   :  { %468 = vmatmul.mubr.msk.bf16.gmra.mrb[4].mxu0 %vm78_vm2, %v71_v26  ;;  %476 = vmatmul.mubr.msk.bf16.gmra.mrb[4].mxu1 %vm78_vm2, %v75_v27 }
  0xdb   :  { %v465_v32 = vpop.f32.mrb[0].mxu0  ;;  %v473_v33 = vpop.f32.mrb[0].mxu1 }
  0xdc   :  { %v206_v36 = vadd.f32 %v465_v32, %v38_v28  ;;  %v214_v37 = vadd.f32 %v473_v33, %v46_v29  ;;  %v141_v38 = vpop.f32.mrb[1].mxu0  ;;  %v173_v39 = vpop.f32.mrb[1].mxu1 }
  0xdd   :  { %v204_v42 = vadd.f32 %v141_v38, %v36_v30  ;;  %v212_v43 = vadd.f32 %v173_v39, %v44_v31  ;;  %v466_v44 = vpop.f32.mrb[2].mxu0  ;;  %v474_v45 = vpop.f32.mrb[2].mxu1 }
  0xde   :  { %223 = vst.msk [vmem:[#allocation2 + $0x10] sm:$0xff] %vm19_vm0, %v206_v36  ;;  %231 = vst.msk [vmem:[#allocation2 + $0x50] sm:$0xff] %vm19_vm0, %v214_v37  ;;  %v207_v46 = vadd.f32 %v466_v44, %v39_v34  ;;  %v215_v47 = vadd.f32 %v474_v45, %v47_v35  ;;  %v144_v48 = vpop.f32.mrb[3].mxu0  ;;  %v176_v49 = vpop.f32.mrb[3].mxu1 }
  0xdf   :  { %221 = vst.msk [vmem:[#allocation2] sm:$0xff] %vm19_vm0, %v204_v42  ;;  %229 = vst.msk [vmem:[#allocation2 + $0x40] sm:$0xff] %vm19_vm0, %v212_v43  ;;  %v205_v50 = vadd.f32 %v144_v48, %v37_v40  ;;  %v213_v51 = vadd.f32 %v176_v49, %v45_v41 }
  0xe0   :  { %224 = vst.msk [vmem:[#allocation2 + $0x18] sm:$0xff] %vm19_vm0, %v207_v46  ;;  %232 = vst.msk [vmem:[#allocation2 + $0x58] sm:$0xff] %vm19_vm0, %v215_v47 }
  0xe1   :  { %222 = vst.msk [vmem:[#allocation2 + $0x8] sm:$0xff] %vm19_vm0, %v205_v50  ;;  %230 = vst.msk [vmem:[#allocation2 + $0x48] sm:$0xff] %vm19_vm0, %v213_v51 }
  0xe3   :  { %v469_v57 = vpop.f32.mrb[4].mxu0  ;;  %v477_v58 = vpop.f32.mrb[4].mxu1 }
  0xe4   :  { %v210_v61 = vadd.f32 %v469_v57, %v42_v52  ;;  %v218_v62 = vadd.f32 %v477_v58, %v50_v53  ;;  %v157_v63 = vpop.f32.mrb[5].mxu0  ;;  %v189_v0 = vpop.f32.mrb[5].mxu1 }
  0xe5   :  { %v242_v3 = vld [vmem:[#allocation2 + $0x10] sm:$0xff]  ;;  %v208_v5 = vadd.f32 %v157_v63, %v40_v54  ;;  %v216_v6 = vadd.f32 %v189_v0, %v48_v55  ;;  %v470_v7 = vpop.f32.mrb[6].mxu0  ;;  %v478_v8 = vpop.f32.mrb[6].mxu1 }
  0xe6   :  { %v250_v4 = vld [vmem:[#allocation2 + $0x50] sm:$0xff]  ;;  %v265_v9 = vadd.f32 %v626_v56, %v242_v3  ;;  %v240_v11 = vld [vmem:[#allocation2] sm:$0xff]  ;;  %227 = vst.msk [vmem:[#allocation2 + $0x30] sm:$0xff] %vm19_vm0, %v210_v61  ;;  %235 = vst.msk [vmem:[#allocation2 + $0x70] sm:$0xff] %vm19_vm0, %v218_v62  ;;  %v211_v13 = vadd.f32 %v470_v7, %v43_v59  ;;  %v219_v14 = vadd.f32 %v478_v8, %v51_v60  ;;  %v160_v15 = vpop.f32.mrb[7].mxu0  ;;  %v192_v16 = vpop.f32.mrb[7].mxu1 }
  0xe7   :  { %v630_v10 = vadd.f32 %v626_v56, %v250_v4  ;;  %v248_v12 = vld [vmem:[#allocation2 + $0x40] sm:$0xff]  ;;  %v635_v17 = vadd.f32 %v626_v56, %v240_v11  ;;  %v243_v19 = vld [vmem:[#allocation2 + $0x18] sm:$0xff]  ;;  %225 = vst.msk [vmem:[#allocation2 + $0x20] sm:$0xff] %vm19_vm0, %v208_v5  ;;  %233 = vst.msk [vmem:[#allocation2 + $0x60] sm:$0xff] %vm19_vm0, %v216_v6  ;;  %v209_v21 = vadd.f32 %v160_v15, %v41_v1 }
  0xe8   :  { %v638_v18 = vadd.f32 %v626_v56, %v248_v12  ;;  %v251_v20 = vld [vmem:[#allocation2 + $0x58] sm:$0xff]  ;;  %v217_v22 = vadd.f32 %v192_v16, %v49_v2  ;;  %v297_v23 = vmul.f32 0.044715, %v265_v9  ;;  %228 = vst.msk [vmem:[#allocation2 + $0x38] sm:$0xff] %vm19_vm0, %v211_v13  ;;  %236 = vst.msk [vmem:[#allocation2 + $0x78] sm:$0xff] %vm19_vm0, %v219_v14  ;;  %v651_v29 = vadd.f32 %v626_v56, %v243_v19  ;;  %v241_v31 = vld [vmem:[#allocation2 + $0x8] sm:$0xff] }
  0xe9   :  { %v305_v24 = vmul.f32 0.044715, %v630_v10  ;;  %v295_v25 = vmul.f32 0.044715, %v635_v17  ;;  %226 = vst.msk [vmem:[#allocation2 + $0x28] sm:$0xff] %vm19_vm0, %v209_v21  ;;  %v654_v30 = vadd.f32 %v626_v56, %v251_v20  ;;  %v659_v34 = vadd.f32 %v626_v56, %v241_v31  ;;  %v249_v35 = vld [vmem:[#allocation2 + $0x48] sm:$0xff] }
  0xea   :  { %v303_v26 = vmul.f32 0.044715, %v638_v18  ;;  %234 = vst.msk [vmem:[#allocation2 + $0x68] sm:$0xff] %vm19_vm0, %v217_v22  ;;  %v313_v27 = vmul.f32 %v297_v23, %v265_v9  ;;  %v298_v38 = vmul.f32 0.044715, %v651_v29  ;;  %v669_v45 = vadd.f32 %v626_v56, %v249_v35 }
  0xeb   :  { %v321_v28 = vmul.f32 %v305_v24, %v630_v10  ;;  %v311_v32 = vmul.f32 %v295_v25, %v635_v17  ;;  %v306_v41 = vmul.f32 0.044715, %v654_v30  ;;  %v296_v49 = vmul.f32 0.044715, %v659_v34 }
  0xec   :  { %v319_v33 = vmul.f32 %v303_v26, %v638_v18  ;;  %v329_v36 = vmul.f32 %v313_v27, %v265_v9  ;;  %v314_v44 = vmul.f32 %v298_v38, %v651_v29  ;;  %v675_v51 = vmul.f32 0.5, %v265_v9 }
  0xed   :  { %v337_v37 = vmul.f32 %v321_v28, %v630_v10  ;;  %v327_v39 = vmul.f32 %v311_v32, %v635_v17  ;;  %v322_v48 = vmul.f32 %v306_v41, %v654_v30  ;;  %v246_v50 = vld [vmem:[#allocation2 + $0x30] sm:$0xff]  ;;  %v312_v60 = vmul.f32 %v296_v49, %v659_v34 }
  0xee   :  { %v335_v40 = vmul.f32 %v319_v33, %v638_v18  ;;  %v345_v42 = vadd.f32 %v329_v36, %v265_v9  ;;  %v330_v54 = vmul.f32 %v314_v44, %v651_v29  ;;  %v254_v55 = vld [vmem:[#allocation2 + $0x70] sm:$0xff]  ;;  %v304_v62 = vmul.f32 0.044715, %v669_v45  ;;  %v244_v6 = vld [vmem:[#allocation2 + $0x20] sm:$0xff] }
  0xef   :  { %v353_v43 = vadd.f32 %v337_v37, %v630_v10  ;;  %v343_v46 = vadd.f32 %v327_v39, %v635_v17  ;;  %v338_v59 = vmul.f32 %v322_v48, %v654_v30  ;;  %v683_v63 = vadd.f32 %v626_v56, %v246_v50  ;;  %v252_v11 = vld [vmem:[#allocation2 + $0x60] sm:$0xff]  ;;  %v247_v12 = vld [vmem:[#allocation2 + $0x38] sm:$0xff] }
  0xf0   :  { %v351_v47 = vadd.f32 %v335_v40, %v638_v18  ;;  %v361_v52 = vmul.f32 0.7978846, %v345_v42  ;;  %v346_v61 = vadd.f32 %v330_v54, %v651_v29  ;;  %v328_v1 = vmul.f32 %v312_v60, %v659_v34  ;;  %v255_v36 = vld [vmem:[#allocation2 + $0x78] sm:$0xff] }
  0xf1   :  { %v369_v53 = vmul.f32 0.7978846, %v353_v43  ;;  %v359_v57 = vmul.f32 0.7978846, %v343_v46  ;;  %v354_v0 = vadd.f32 %v338_v59, %v654_v30  ;;  %v688_v2 = vadd.f32 %v626_v56, %v254_v55  ;;  %v245_v59 = vld [vmem:[#allocation2 + $0x28] sm:$0xff] }
  0xf2   :  { %v367_v58 = vmul.f32 0.7978846, %v351_v47  ;;  %484 = vtanh.f32 %v361_v52  ;;  %v289_v3 = vmul.f32 0.5, %v630_v10  ;;  %v362_v4 = vmul.f32 0.7978846, %v346_v61 }
  0xf3   :  { %486 = vtanh.f32 %v369_v53  ;;  %v320_v5 = vmul.f32 %v304_v62, %v669_v45  ;;  %v370_v7 = vmul.f32 0.7978846, %v354_v0  ;;  %v344_v8 = vadd.f32 %v328_v1, %v659_v34 }
  0xf4   :  { %488 = vtanh.f32 %v359_v57  ;;  %v301_v9 = vmul.f32 0.044715, %v683_v63  ;;  %v279_v13 = vmul.f32 0.5, %v635_v17  ;;  %v309_v10 = vmul.f32 0.044715, %v688_v2 }
  0xf5   :  { %490 = vtanh.f32 %v367_v58  ;;  %v336_v14 = vmul.f32 %v320_v5, %v669_v45  ;;  %v360_v15 = vmul.f32 0.7978846, %v344_v8  ;;  %v699_v19 = vadd.f32 %v626_v56, %v244_v6  ;;  %v253_v6 = vld [vmem:[#allocation2 + $0x68] sm:$0xff] }
  0xf6   :  { %492 = vtanh.f32 %v362_v4  ;;  %v317_v16 = vmul.f32 %v301_v9, %v683_v63  ;;  %v325_v21 = vmul.f32 %v309_v10, %v688_v2  ;;  %v704_v22 = vadd.f32 %v626_v56, %v252_v11 }
  0xf7   :  { %494 = vtanh.f32 %v370_v7  ;;  %v352_v20 = vadd.f32 %v336_v14, %v669_v45  ;;  %v707_v17 = vadd.f32 %v626_v56, %v247_v12  ;;  %v287_v23 = vmul.f32 0.5, %v638_v18 }
  0xf8   :  { %496 = vtanh.f32 %v360_v15  ;;  %v333_v24 = vmul.f32 %v317_v16, %v683_v63  ;;  %v299_v25 = vmul.f32 0.044715, %v699_v19  ;;  %v282_v26 = vmul.f32 0.5, %v651_v29 }
  0xf9   :  { %v368_v27 = vmul.f32 0.7978846, %v352_v20  ;;  %v341_v28 = vmul.f32 %v325_v21, %v688_v2  ;;  %v307_v31 = vmul.f32 0.044715, %v704_v22  ;;  %v290_v32 = vmul.f32 0.5, %v654_v30 }
  0xfa   :  { %v349_v33 = vadd.f32 %v333_v24, %v683_v63  ;;  %v315_v35 = vmul.f32 %v299_v25, %v699_v19  ;;  %v302_v18 = vmul.f32 0.044715, %v707_v17  ;;  %v280_v38 = vmul.f32 0.5, %v659_v34 }
  0xfb   :  { %498 = vtanh.f32 %v368_v27  ;;  %v357_v29 = vadd.f32 %v341_v28, %v688_v2  ;;  %v323_v39 = vmul.f32 %v307_v31, %v704_v22  ;;  %v726_v49 = vadd.f32 %v626_v56, %v255_v36 }
  0xfc   :  { %v485_v37 = vpop.eup %484  ;;  %v365_v42 = vmul.f32 0.7978846, %v349_v33  ;;  %v331_v30 = vmul.f32 %v315_v35, %v699_v19  ;;  %v318_v43 = vmul.f32 %v302_v18, %v707_v17  ;;  %v747_v11 = vadd.f32 %v626_v56, %v245_v59 }
  0xfd   :  { %v487_v40 = vpop.eup %486  ;;  %v393_v41 = vadd.f32 1.0, %v485_v37  ;;  %v373_v47 = vmul.f32 0.7978846, %v357_v29  ;;  %v339_v48 = vmul.f32 %v323_v39, %v704_v22  ;;  %v310_v5 = vmul.f32 0.044715, %v726_v49 }
  0xfe   :  { %v489_v44 = vpop.eup %488  ;;  %v401_v46 = vadd.f32 1.0, %v487_v40  ;;  %500 = vtanh.f32 %v365_v42  ;;  %v347_v53 = vadd.f32 %v331_v30, %v699_v19  ;;  %v334_v0 = vmul.f32 %v318_v43, %v707_v17 }
  0xff   :  { %v491_v34 = vpop.eup %490  ;;  %v409_v50 = vmul.f32 %v393_v41, %v675_v51  ;;  %v391_v52 = vadd.f32 1.0, %v489_v44  ;;  %502 = vtanh.f32 %v373_v47  ;;  %v355_v58 = vadd.f32 %v339_v48, %v704_v22 }
 0x100   :  { %v493_v54 = vpop.eup %492  ;;  %v417_v55 = vmul.f32 %v401_v46, %v289_v3  ;;  %v399_v57 = vadd.f32 1.0, %v491_v34  ;;  %v363_v51 = vmul.f32 0.7978846, %v347_v53  ;;  %v350_v9 = vadd.f32 %v334_v0, %v707_v17 }
 0x101   :  { %v495_v60 = vpop.eup %494  ;;  %425 = vst.msk [vmem:[%s820_s3 + $0x10] sm:$0xff] %vm19_vm0, %v409_v50  ;;  %v407_v61 = vmul.f32 %v391_v52, %v279_v13  ;;  %v394_v62 = vadd.f32 1.0, %v493_v54  ;;  %v371_v4 = vmul.f32 0.7978846, %v355_v58  ;;  %v326_v14 = vmul.f32 %v310_v5, %v726_v49 }
 0x102   :  { %433 = vst.msk [vmem:[%s820_s3 + $0x50] sm:$0xff] %vm19_vm0, %v417_v55  ;;  %v415_v1 = vmul.f32 %v399_v57, %v287_v23  ;;  %v402_v3 = vadd.f32 1.0, %v495_v60  ;;  %v497_v7 = vpop.eup %496  ;;  %504 = vtanh.f32 %v363_v51  ;;  %v366_v10 = vmul.f32 0.7978846, %v350_v9 }
 0x103   :  { %423 = vst.msk [vmem:[%s820_s3] sm:$0xff] %vm19_vm0, %v407_v61  ;;  %v410_v8 = vmul.f32 %v394_v62, %v282_v26  ;;  %v392_v13 = vadd.f32 1.0, %v497_v7  ;;  %506 = vtanh.f32 %v371_v4  ;;  %v300_v15 = vmul.f32 0.044715, %v747_v11 }
 0x104   :  { %431 = vst.msk [vmem:[%s820_s3 + $0x40] sm:$0xff] %vm19_vm0, %v415_v1  ;;  %v418_v12 = vmul.f32 %v402_v3, %v290_v32  ;;  %v276_v16 = vadd.f32 %v626_v56, %v253_v6  ;;  %v342_v23 = vmul.f32 %v326_v14, %v726_v49  ;;  %v288_v24 = vmul.f32 0.5, %v669_v45 }
 0x105   :  { %426 = vst.msk [vmem:[%s820_s3 + $0x18] sm:$0xff] %vm19_vm0, %v410_v8  ;;  %v499_v20 = vpop.eup %498  ;;  %v408_v21 = vmul.f32 %v392_v13, %v280_v38  ;;  %508 = vtanh.f32 %v366_v10  ;;  %v316_v26 = vmul.f32 %v300_v15, %v747_v11  ;;  %v285_v35 = vmul.f32 0.5, %v683_v63 }
 0x106   :  { %434 = vst.msk [vmem:[%s820_s3 + $0x58] sm:$0xff] %vm19_vm0, %v418_v12  ;;  %v400_v25 = vadd.f32 1.0, %v499_v20  ;;  %v358_v56 = vadd.f32 %v342_v23, %v726_v49  ;;  %v308_v27 = vmul.f32 0.044715, %v276_v16  ;;  %v293_v37 = vmul.f32 0.5, %v688_v2 }
 0x107   :  { %424 = vst.msk [vmem:[%s820_s3 + $0x8] sm:$0xff] %vm19_vm0, %v408_v21  ;;  %v332_v32 = vmul.f32 %v316_v26, %v747_v11  ;;  %v283_v43 = vmul.f32 0.5, %v699_v19  ;;  %v291_v2 = vmul.f32 0.5, %v704_v22  ;;  %v286_v19 = vmul.f32 0.5, %v707_v17 }
 0x108   :  { %v501_v28 = vpop.eup %500  ;;  %v416_v31 = vmul.f32 %v400_v25, %v288_v24  ;;  %v374_v18 = vmul.f32 0.7978846, %v358_v56  ;;  %v324_v36 = vmul.f32 %v308_v27, %v276_v16  ;;  %v294_v55 = vmul.f32 0.5, %v726_v49 }
 0x109   :  { %v503_v33 = vpop.eup %502  ;;  %v397_v45 = vadd.f32 1.0, %v501_v28  ;;  %v348_v29 = vadd.f32 %v332_v32, %v747_v11  ;;  %v284_v17 = vmul.f32 0.5, %v747_v11  ;;  %v292_v51 = vmul.f32 0.5, %v276_v16 }
 0x10a   :  { %432 = vst.msk [vmem:[%s820_s3 + $0x48] sm:$0xff] %vm19_vm0, %v416_v31  ;;  %v405_v38 = vadd.f32 1.0, %v503_v33  ;;  %510 = vtanh.f32 %v374_v18  ;;  %v340_v40 = vmul.f32 %v324_v36, %v276_v16 }
 0x10b   :  { %v413_v39 = vmul.f32 %v397_v45, %v285_v35  ;;  %v364_v30 = vmul.f32 0.7978846, %v348_v29 }
 0x10c   :  { %v505_v41 = vpop.eup %504  ;;  %v421_v42 = vmul.f32 %v405_v38, %v293_v37  ;;  %v356_v46 = vadd.f32 %v340_v40, %v276_v16 }
 0x10d   :  { %v507_v63 = vpop.eup %506  ;;  %429 = vst.msk [vmem:[%s820_s3 + $0x30] sm:$0xff] %vm19_vm0, %v413_v39  ;;  %v395_v44 = vadd.f32 1.0, %v505_v41  ;;  %512 = vtanh.f32 %v364_v30 }
 0x10e   :  { %437 = vst.msk [vmem:[%s820_s3 + $0x70] sm:$0xff] %vm19_vm0, %v421_v42  ;;  %v403_v47 = vadd.f32 1.0, %v507_v63  ;;  %v372_v34 = vmul.f32 0.7978846, %v356_v46 }
 0x10f   :  { %v411_v48 = vmul.f32 %v395_v44, %v283_v43  ;;  %v509_v50 = vpop.eup %508 }
 0x110   :  { %v419_v52 = vmul.f32 %v403_v47, %v291_v2  ;;  %v398_v53 = vadd.f32 1.0, %v509_v50  ;;  %514 = vtanh.f32 %v372_v34 }
 0x111   :  { %427 = vst.msk [vmem:[%s820_s3 + $0x20] sm:$0xff] %vm19_vm0, %v411_v48 }
 0x112   :  { %435 = vst.msk [vmem:[%s820_s3 + $0x60] sm:$0xff] %vm19_vm0, %v419_v52  ;;  %v414_v22 = vmul.f32 %v398_v53, %v286_v19 }
 0x114   :  { %v511_v54 = vpop.eup %510  ;;  %430 = vst.msk [vmem:[%s820_s3 + $0x38] sm:$0xff] %vm19_vm0, %v414_v22 }
 0x115   :  { %v406_v57 = vadd.f32 1.0, %v511_v54 }
 0x117   :  { %v513_v58 = vpop.eup %512  ;;  %v422_v59 = vmul.f32 %v406_v57, %v294_v55 }
 0x118   :  { %v396_v60 = vadd.f32 1.0, %v513_v58 }
 0x119   :  { %438 = vst.msk [vmem:[%s820_s3 + $0x78] sm:$0xff] %vm19_vm0, %v422_v59 }
 0x11a   :  { %v515_v61 = vpop.eup %514  ;;  %v412_v62 = vmul.f32 %v396_v60, %v284_v17 }
 0x11b   :  { %v404_v0 = vadd.f32 1.0, %v515_v61 }
 0x11c   :  { %428 = vst.msk [vmem:[%s820_s3 + $0x28] sm:$0xff] %vm19_vm0, %v412_v62 }
 0x11d   :  { %v420_v49 = vmul.f32 %v404_v0, %v292_v51 }
 0x11f   :  { %436 = vst.msk [vmem:[%s820_s3 + $0x68] sm:$0xff] %vm19_vm0, %v420_v49 }

// kernel: lsrformer_forward.21
= control target key start
LH: loop header
LB: loop body
LE: loop exit
PB: predicated region body
PF: predicated region fallthrough
CT: control target
= control target key end

     0   :  { %s1148_s12 = smov 0   ;;  %s1150_s13 = smov 0   ;;  %s1490_s0 = inlined_call_operand.vmem [shape: f32[2,512,36], index: 0, kind: input, shape index: {}]   ;;  %s1491_s1 = inlined_call_operand.vmem [shape: f32[2,36,8], index: 1, kind: input, shape index: {}]   ;;  %s1492_s2 = inlined_call_operand.vmem [shape: f32[2,1,8], index: 2, kind: input, shape index: {}]   ;;  %s1493_s3 = inlined_call_operand.vmem [shape: f32[2,512,8], index: 3, kind: output, shape index: {}]  }
   0x1   :  { %s1152_s14 = smov 0  }
   0x2 LB: > { %s25_s15 = sadd.s32 1, %s1122_s13  ;;  %p923_p0 = scmp.ge.s32.totalorder %s1126_s14, 1  ;;  %s1126_s14 = sphi %s1152_s14, %s13_s14   ;;  %s1122_s13 = sphi %s1150_s13, %s1495_s13   ;;  %s1118_s12 = sphi %s1148_s12, %s1494_s12  }
   0x3   : > { %p27_p1 = scmp.ge.s32.totalorder %s25_s15, 2  ;;  %p176_p2 = scmp.lt.s32.totalorder %s1126_s14, 3 }
   0x5   : > { %s1497_s15 = smov (%p27_p1, %s25_s15), 0  ;;  %p177_p3 = pnand %p923_p0, %p176_p2 }
   0x6   : > { %p217_p4 = scmp.lt.s32.totalorder (!%p177_p3), %s1118_s12, 1  ;;  %vm356_vm0 = vcmask (!%p177_p3), 293888   ;;  %vm453_vm1 = vcmask (!%p177_p3), 1041408   ;;  %vm746_vm2 = vcmask (!%p177_p3), 64512  }
   0x7   : > { %180 = sbr.rel (%p177_p3) target bundleno = 307 (0x133), region = 32 }
   0xe   : > { %s1499_s12 = smov (!%p217_p4, %s1118_s12), 1 }
   0xf   : > { %s964_s16 = sshll.u32 %s1499_s12, 9  ;;  %s1079_s17 = smul.u32 40, %s1499_s12 }
  0x10   : > { %s1175_s20 = scalar_lea.vmem %s1490_s0, %s964_s16  ;;  %s233_s26 = scalar_lea.vmem %s1492_s2, %s1499_s12 }
  0x11   : > { %s230_s23 = scalar_lea.vmem %s1491_s1, %s1079_s17  ;;  %v245_v0 = vld [vmem:[%s1175_s20] sm:$0xff]  ;;  %v246_v1 = vld [vmem:[%s1175_s20 + $0x8] sm:$0xff]  ;;  %v247_v14 = vld [vmem:[%s1175_s20 + $0x10] sm:$0xff]  ;;  %s1287_s29 = scalar_lea.vmem %s1493_s3, %s964_s16 }
  0x12   : > { %v341_v2 = vld [vmem:[%s230_s23] sm:$0xff]  ;;  %v342_v3 = vld [vmem:[%s230_s23 + $0x8] sm:$0xff]  ;;  %v343_v4 = vld [vmem:[%s230_s23 + $0x10] sm:$0xff]  ;;  %v309_v5 = vpack.c.bf16 %v246_v1, %v245_v0 }
  0x13   : > { %v346_v6 = vpack.c.bf16 %v342_v3, %v341_v2  ;;  %v344_v7 = vld [vmem:[%s230_s23 + $0x18] sm:$0xff]  ;;  %v277_v8 = vld [vmem:[%s1175_s20 + $0x100] sm:$0xff]  ;;  %v278_v11 = vld [vmem:[%s1175_s20 + $0x108] sm:$0xff] }
  0x14   : > { %v347_v9 = vpack.c.bf16 %v344_v7, %v343_v4  ;;  %v345_v10 = vld [vmem:[%s230_s23 + $0x20] sm:$0xf]  ;;  %1007 = vmatprep.mubr.msk.bf16.mxu0 %vm356_vm0, %v309_v5  ;;  %v325_v12 = vpack.c.bf16 %v278_v11, %v277_v8  ;;  %v248_v15 = vld [vmem:[%s1175_s20 + $0x18] sm:$0xff]  ;;  %v279_v16 = vld [vmem:[%s1175_s20 + $0x110] sm:$0xff] }
  0x15   : > { %1001 = vmatprep.subr.bf16.mxu0 %v346_v6  ;;  %1071 = vmatprep.subr.bf16.mxu1 %v346_v6  ;;  %v348_v13 = vpack.c.bf16 %v345_v10, %v345_v10  ;;  %v280_v17 = vld [vmem:[%s1175_s20 + $0x118] sm:$0xff]  ;;  %v249_v18 = vld [vmem:[%s1175_s20 + $0x20] sm:$0xff]  ;;  %v250_v20 = vld [vmem:[%s1175_s20 + $0x28] sm:$0xff]  ;;  %v310_v23 = vpack.c.bf16 %v248_v15, %v247_v14 }
  0x16   : > { %1002 = vmatpush3.bf16.msra.mxu0 %v346_v6  ;;  %1074 = vmatpush3.bf16.msra.mxu1 %v346_v6  ;;  %v281_v21 = vld [vmem:[%s1175_s20 + $0x120] sm:$0xff]  ;;  %v282_v22 = vld [vmem:[%s1175_s20 + $0x128] sm:$0xff]  ;;  %v326_v24 = vpack.c.bf16 %v280_v17, %v279_v16  ;;  %v311_v25 = vpack.c.bf16 %v250_v20, %v249_v18  ;;  %v251_v27 = vld [vmem:[%s1175_s20 + $0x30] sm:$0xff] }
  0x17   : > { %1003 = vmatprep.subr.bf16.mxu0 %v347_v9  ;;  %1072 = vmatprep.subr.bf16.mxu1 %v347_v9  ;;  %v455_v19 = vsel %vm453_vm1, %v348_v13, 0  ;;  %v327_v26 = vpack.c.bf16 %v282_v22, %v281_v21  ;;  %v252_v28 = vld [vmem:[%s1175_s20 + $0x38] sm:$0xff]  ;;  %v283_v29 = vld [vmem:[%s1175_s20 + $0x130] sm:$0xff]  ;;  %v253_v31 = vld [vmem:[%s1175_s20 + $0x40] sm:$0xff] }
  0x18   : > { %1039 = vmatprep.mubr.msk.bf16.mxu1 %vm356_vm0, %v325_v12  ;;  %v284_v30 = vld [vmem:[%s1175_s20 + $0x138] sm:$0xff]  ;;  %v254_v32 = vld [vmem:[%s1175_s20 + $0x48] sm:$0xff]  ;;  %v285_v33 = vld [vmem:[%s1175_s20 + $0x140] sm:$0xff]  ;;  %v312_v35 = vpack.c.bf16 %v252_v28, %v251_v27 }
  0x19   : > { %v286_v34 = vld [vmem:[%s1175_s20 + $0x148] sm:$0xff]  ;;  %v328_v36 = vpack.c.bf16 %v284_v30, %v283_v29  ;;  %v313_v37 = vpack.c.bf16 %v254_v32, %v253_v31  ;;  %v255_v39 = vld [vmem:[%s1175_s20 + $0x50] sm:$0xff]  ;;  %v256_v40 = vld [vmem:[%s1175_s20 + $0x58] sm:$0xff] }
  0x1a   : > { %1004 = vmatpush3.bf16.msra.mxu0 %v347_v9  ;;  %1075 = vmatpush3.bf16.msra.mxu1 %v347_v9  ;;  %v329_v38 = vpack.c.bf16 %v286_v34, %v285_v33  ;;  %v287_v41 = vld [vmem:[%s1175_s20 + $0x150] sm:$0xff]  ;;  %v288_v42 = vld [vmem:[%s1175_s20 + $0x158] sm:$0xff]  ;;  %v257_v43 = vld [vmem:[%s1175_s20 + $0x60] sm:$0xff]  ;;  %v314_v47 = vpack.c.bf16 %v256_v40, %v255_v39 }
  0x1b   : > { %1077 = vmatprep.subr.msk.bf16.mxu0 %vm453_vm1, %v348_v13  ;;  %1078 = vmatprep.subr.msk.bf16.mxu1 %vm453_vm1, %v348_v13  ;;  %v258_v44 = vld [vmem:[%s1175_s20 + $0x68] sm:$0xff]  ;;  %v289_v45 = vld [vmem:[%s1175_s20 + $0x160] sm:$0xff]  ;;  %v330_v48 = vpack.c.bf16 %v288_v42, %v287_v41  ;;  %v259_v51 = vld [vmem:[%s1175_s20 + $0x70] sm:$0xff] }
  0x1c   : > { %v290_v46 = vld [vmem:[%s1175_s20 + $0x168] sm:$0xff]  ;;  %v315_v49 = vpack.c.bf16 %v258_v44, %v257_v43  ;;  %v260_v52 = vld [vmem:[%s1175_s20 + $0x78] sm:$0xff]  ;;  %v291_v53 = vld [vmem:[%s1175_s20 + $0x170] sm:$0xff] }
  0x1d   : > { %v331_v50 = vpack.c.bf16 %v290_v46, %v289_v45  ;;  %v292_v54 = vld [vmem:[%s1175_s20 + $0x178] sm:$0xff]  ;;  %v261_v55 = vld [vmem:[%s1175_s20 + $0x80] sm:$0xff]  ;;  %v262_v56 = vld [vmem:[%s1175_s20 + $0x88] sm:$0xff]  ;;  %v316_v59 = vpack.c.bf16 %v260_v52, %v259_v51 }
  0x1e   : > { %1006 = vmatpush3.bf16.msra.mxu0 %v455_v19  ;;  %1076 = vmatpush3.bf16.msra.mxu1 %v455_v19  ;;  %v293_v57 = vld [vmem:[%s1175_s20 + $0x180] sm:$0xff]  ;;  %v294_v58 = vld [vmem:[%s1175_s20 + $0x188] sm:$0xff]  ;;  %v332_v60 = vpack.c.bf16 %v292_v54, %v291_v53  ;;  %v317_v61 = vpack.c.bf16 %v262_v56, %v261_v55  ;;  %v263_v63 = vld [vmem:[%s1175_s20 + $0x90] sm:$0xff] }
  0x1f   : > { %v333_v62 = vpack.c.bf16 %v294_v58, %v293_v57  ;;  %v264_v0 = vld [vmem:[%s1175_s20 + $0x98] sm:$0xff]  ;;  %v295_v1 = vld [vmem:[%s1175_s20 + $0x190] sm:$0xff]  ;;  %v265_v3 = vld [vmem:[%s1175_s20 + $0xa0] sm:$0xff] }
  0x20   : > { %v296_v2 = vld [vmem:[%s1175_s20 + $0x198] sm:$0xff]  ;;  %v266_v4 = vld [vmem:[%s1175_s20 + $0xa8] sm:$0xff]  ;;  %v297_v5 = vld [vmem:[%s1175_s20 + $0x1a0] sm:$0xff]  ;;  %v318_v7 = vpack.c.bf16 %v264_v0, %v263_v63 }
  0x21   : > { %1008 = vmatmul.mubr.msk.bf16.vlgmr.msra.gmra.mrb[0].mxu0 %vm356_vm0, %v310_v23  ;;  %1040 = vmatmul.mubr.msk.bf16.vlgmr.msra.gmra.mrb[0].mxu1 %vm356_vm0, %v326_v24  ;;  %v298_v6 = vld [vmem:[%s1175_s20 + $0x1a8] sm:$0xff]  ;;  %v334_v8 = vpack.c.bf16 %v296_v2, %v295_v1  ;;  %v319_v9 = vpack.c.bf16 %v266_v4, %v265_v3  ;;  %v267_v11 = vld [vmem:[%s1175_s20 + $0xb0] sm:$0xff]  ;;  %v268_v12 = vld [vmem:[%s1175_s20 + $0xb8] sm:$0xff] }
  0x22   : > { %1011 = vmatprep.mubr.msk.bf16.mxu0 %vm356_vm0, %v311_v25  ;;  %1043 = vmatprep.mubr.msk.bf16.mxu1 %vm356_vm0, %v327_v26  ;;  %v335_v10 = vpack.c.bf16 %v298_v6, %v297_v5  ;;  %v299_v13 = vld [vmem:[%s1175_s20 + $0x1b0] sm:$0xff]  ;;  %v300_v14 = vld [vmem:[%s1175_s20 + $0x1b8] sm:$0xff]  ;;  %v269_v15 = vld [vmem:[%s1175_s20 + $0xc0] sm:$0xff]  ;;  %v320_v19 = vpack.c.bf16 %v268_v12, %v267_v11 }
  0x23   : > { %v270_v16 = vld [vmem:[%s1175_s20 + $0xc8] sm:$0xff]  ;;  %v301_v17 = vld [vmem:[%s1175_s20 + $0x1c0] sm:$0xff]  ;;  %v336_v20 = vpack.c.bf16 %v300_v14, %v299_v13  ;;  %v271_v23 = vld [vmem:[%s1175_s20 + $0xd0] sm:$0xff] }
  0x24   : > { %v302_v18 = vld [vmem:[%s1175_s20 + $0x1c8] sm:$0xff]  ;;  %v321_v21 = vpack.c.bf16 %v270_v16, %v269_v15  ;;  %v272_v24 = vld [vmem:[%s1175_s20 + $0xd8] sm:$0xff]  ;;  %v303_v25 = vld [vmem:[%s1175_s20 + $0x1d0] sm:$0xff] }
  0x25   : > { %v337_v22 = vpack.c.bf16 %v302_v18, %v301_v17  ;;  %v304_v26 = vld [vmem:[%s1175_s20 + $0x1d8] sm:$0xff]  ;;  %v273_v27 = vld [vmem:[%s1175_s20 + $0xe0] sm:$0xff]  ;;  %v274_v28 = vld [vmem:[%s1175_s20 + $0xe8] sm:$0xff]  ;;  %v322_v31 = vpack.c.bf16 %v272_v24, %v271_v23 }
  0x26   : > { %v305_v29 = vld [vmem:[%s1175_s20 + $0x1e0] sm:$0xff]  ;;  %v306_v30 = vld [vmem:[%s1175_s20 + $0x1e8] sm:$0xff]  ;;  %v338_v32 = vpack.c.bf16 %v304_v26, %v303_v25  ;;  %v323_v33 = vpack.c.bf16 %v274_v28, %v273_v27 }
  0x27   : > { %v339_v34 = vpack.c.bf16 %v306_v30, %v305_v29  ;;  %v1280_v41 = vld [vmem:[%s233_s26] ss:$0 sm:$0xff] }
  0x29   : > { %1012 = vmatmul.mubr.msk.bf16.gmra.mrb[4].mxu0 %vm356_vm0, %v312_v35  ;;  %1044 = vmatmul.mubr.msk.bf16.gmra.mrb[4].mxu1 %vm356_vm0, %v328_v36  ;;  %v275_v35 = vld [vmem:[%s1175_s20 + $0xf0] sm:$0xff]  ;;  %v276_v36 = vld [vmem:[%s1175_s20 + $0xf8] sm:$0xff] }
  0x2a   : > { %1015 = vmatprep.mubr.msk.bf16.mxu0 %vm356_vm0, %v313_v37  ;;  %1047 = vmatprep.mubr.msk.bf16.mxu1 %vm356_vm0, %v329_v38  ;;  %v307_v37 = vld [vmem:[%s1175_s20 + $0x1f0] sm:$0xff]  ;;  %v308_v38 = vld [vmem:[%s1175_s20 + $0x1f8] sm:$0xff]  ;;  %v324_v39 = vpack.c.bf16 %v276_v36, %v275_v35 }
  0x2b   : > { %v340_v40 = vpack.c.bf16 %v308_v38, %v307_v37 }
  0x31   : > { %1016 = vmatmul.mubr.msk.bf16.gmra.mrb[8].mxu0 %vm356_vm0, %v314_v47  ;;  %1048 = vmatmul.mubr.msk.bf16.gmra.mrb[8].mxu1 %vm356_vm0, %v330_v48 }
  0x32   : > { %1019 = vmatprep.mubr.msk.bf16.mxu0 %vm356_vm0, %v315_v49  ;;  %1051 = vmatprep.mubr.msk.bf16.mxu1 %vm356_vm0, %v331_v50 }
  0x39   : > { %1020 = vmatmul.mubr.msk.bf16.gmra.mrb[12].mxu0 %vm356_vm0, %v316_v59  ;;  %1052 = vmatmul.mubr.msk.bf16.gmra.mrb[12].mxu1 %vm356_vm0, %v332_v60 }
  0x3a   : > { %1023 = vmatprep.mubr.msk.bf16.mxu0 %vm356_vm0, %v317_v61  ;;  %1055 = vmatprep.mubr.msk.bf16.mxu1 %vm356_vm0, %v333_v62 }
  0x41   : > { %1024 = vmatmul.mubr.msk.bf16.gmra.mrb[16].mxu0 %vm356_vm0, %v318_v7  ;;  %1056 = vmatmul.mubr.msk.bf16.gmra.mrb[16].mxu1 %vm356_vm0, %v334_v8 }
  0x42   : > { %1027 = vmatprep.mubr.msk.bf16.mxu0 %vm356_vm0, %v319_v9  ;;  %1059 = vmatprep.mubr.msk.bf16.mxu1 %vm356_vm0, %v335_v10 }
  0x49   : > { %1028 = vmatmul.mubr.msk.bf16.gmra.mrb[20].mxu0 %vm356_vm0, %v320_v19  ;;  %1060 = vmatmul.mubr.msk.bf16.gmra.mrb[20].mxu1 %vm356_vm0, %v336_v20 }
  0x4a   : > { %1031 = vmatprep.mubr.msk.bf16.mxu0 %vm356_vm0, %v321_v21  ;;  %1063 = vmatprep.mubr.msk.bf16.mxu1 %vm356_vm0, %v337_v22 }
  0x51   : > { %1032 = vmatmul.mubr.msk.bf16.gmra.mrb[24].mxu0 %vm356_vm0, %v322_v31  ;;  %1064 = vmatmul.mubr.msk.bf16.gmra.mrb[24].mxu1 %vm356_vm0, %v338_v32 }
  0x52   : > { %1035 = vmatprep.mubr.msk.bf16.mxu0 %vm356_vm0, %v323_v33  ;;  %1067 = vmatprep.mubr.msk.bf16.mxu1 %vm356_vm0, %v339_v34 }
  0x59   : > { %1036 = vmatmul.mubr.msk.bf16.gmra.mrb[28].mxu0 %vm356_vm0, %v324_v39  ;;  %1068 = vmatmul.mubr.msk.bf16.gmra.mrb[28].mxu1 %vm356_vm0, %v340_v40 }
  0xf4   : > { %v1009_v42 = vpop.f32.mrb[0].mxu0  ;;  %v1041_v43 = vpop.f32.mrb[0].mxu1 }
  0xf5   : > { %v500_v44 = vadd.f32 %v1009_v42, %v1280_v41  ;;  %v628_v45 = vadd.f32 %v1041_v43, %v1280_v41  ;;  %v491_v46 = vpop.f32.mrb[1].mxu0  ;;  %v619_v47 = vpop.f32.mrb[1].mxu1 }
  0xf6   : > { %v492_v48 = vadd.f32 %v1280_v41, %v491_v46  ;;  %v620_v49 = vadd.f32 %v1280_v41, %v619_v47  ;;  %v1010_v50 = vpop.f32.mrb[2].mxu0  ;;  %v1042_v51 = vpop.f32.mrb[2].mxu1 }
  0xf7   : > { %749 = vst.msk [vmem:[%s1287_s29 + $0x10] sm:$0xff] %vm746_vm2, %v500_v44  ;;  %781 = vst.msk [vmem:[%s1287_s29 + $0x110] sm:$0xff] %vm746_vm2, %v628_v45  ;;  %v503_v52 = vadd.f32 %v1010_v50, %v1280_v41  ;;  %v631_v53 = vadd.f32 %v1042_v51, %v1280_v41  ;;  %v494_v54 = vpop.f32.mrb[3].mxu0  ;;  %v622_v55 = vpop.f32.mrb[3].mxu1 }
  0xf8   : > { %747 = vst.msk [vmem:[%s1287_s29] sm:$0xff] %vm746_vm2, %v492_v48  ;;  %779 = vst.msk [vmem:[%s1287_s29 + $0x100] sm:$0xff] %vm746_vm2, %v620_v49  ;;  %v495_v56 = vadd.f32 %v1280_v41, %v494_v54  ;;  %v623_v57 = vadd.f32 %v1280_v41, %v622_v55 }
  0xf9   : > { %750 = vst.msk [vmem:[%s1287_s29 + $0x18] sm:$0xff] %vm746_vm2, %v503_v52  ;;  %782 = vst.msk [vmem:[%s1287_s29 + $0x118] sm:$0xff] %vm746_vm2, %v631_v53 }
  0xfa   : > { %748 = vst.msk [vmem:[%s1287_s29 + $0x8] sm:$0xff] %vm746_vm2, %v495_v56  ;;  %780 = vst.msk [vmem:[%s1287_s29 + $0x108] sm:$0xff] %vm746_vm2, %v623_v57 }
  0xfc   : > { %v1013_v58 = vpop.f32.mrb[4].mxu0  ;;  %v1045_v59 = vpop.f32.mrb[4].mxu1 }
  0xfd   : > { %v516_v60 = vadd.f32 %v1013_v58, %v1280_v41  ;;  %v644_v61 = vadd.f32 %v1045_v59, %v1280_v41  ;;  %v507_v62 = vpop.f32.mrb[5].mxu0  ;;  %v635_v63 = vpop.f32.mrb[5].mxu1 }
  0xfe   : > { %v508_v0 = vadd.f32 %v1280_v41, %v507_v62  ;;  %v636_v1 = vadd.f32 %v1280_v41, %v635_v63  ;;  %v1014_v2 = vpop.f32.mrb[6].mxu0  ;;  %v1046_v3 = vpop.f32.mrb[6].mxu1 }
  0xff   : > { %753 = vst.msk [vmem:[%s1287_s29 + $0x30] sm:$0xff] %vm746_vm2, %v516_v60  ;;  %785 = vst.msk [vmem:[%s1287_s29 + $0x130] sm:$0xff] %vm746_vm2, %v644_v61  ;;  %v519_v4 = vadd.f32 %v1014_v2, %v1280_v41  ;;  %v647_v5 = vadd.f32 %v1046_v3, %v1280_v41  ;;  %v510_v6 = vpop.f32.mrb[7].mxu0  ;;  %v638_v7 = vpop.f32.mrb[7].mxu1 }
 0x100   : > { %751 = vst.msk [vmem:[%s1287_s29 + $0x20] sm:$0xff] %vm746_vm2, %v508_v0  ;;  %783 = vst.msk [vmem:[%s1287_s29 + $0x120] sm:$0xff] %vm746_vm2, %v636_v1  ;;  %v511_v8 = vadd.f32 %v1280_v41, %v510_v6  ;;  %v639_v9 = vadd.f32 %v1280_v41, %v638_v7 }
 0x101   : > { %754 = vst.msk [vmem:[%s1287_s29 + $0x38] sm:$0xff] %vm746_vm2, %v519_v4  ;;  %786 = vst.msk [vmem:[%s1287_s29 + $0x138] sm:$0xff] %vm746_vm2, %v647_v5 }
 0x102   : > { %752 = vst.msk [vmem:[%s1287_s29 + $0x28] sm:$0xff] %vm746_vm2, %v511_v8  ;;  %784 = vst.msk [vmem:[%s1287_s29 + $0x128] sm:$0xff] %vm746_vm2, %v639_v9 }
 0x104   : > { %v1017_v10 = vpop.f32.mrb[8].mxu0  ;;  %v1049_v11 = vpop.f32.mrb[8].mxu1 }
 0x105   : > { %v532_v12 = vadd.f32 %v1017_v10, %v1280_v41  ;;  %v660_v13 = vadd.f32 %v1049_v11, %v1280_v41  ;;  %v523_v14 = vpop.f32.mrb[9].mxu0  ;;  %v651_v15 = vpop.f32.mrb[9].mxu1 }
 0x106   : > { %v524_v16 = vadd.f32 %v1280_v41, %v523_v14  ;;  %v652_v17 = vadd.f32 %v1280_v41, %v651_v15  ;;  %v1018_v18 = vpop.f32.mrb[10].mxu0  ;;  %v1050_v19 = vpop.f32.mrb[10].mxu1 }
 0x107   : > { %757 = vst.msk [vmem:[%s1287_s29 + $0x50] sm:$0xff] %vm746_vm2, %v532_v12  ;;  %789 = vst.msk [vmem:[%s1287_s29 + $0x150] sm:$0xff] %vm746_vm2, %v660_v13  ;;  %v535_v20 = vadd.f32 %v1018_v18, %v1280_v41  ;;  %v663_v21 = vadd.f32 %v1050_v19, %v1280_v41  ;;  %v526_v22 = vpop.f32.mrb[11].mxu0  ;;  %v654_v23 = vpop.f32.mrb[11].mxu1 }
 0x108   : > { %755 = vst.msk [vmem:[%s1287_s29 + $0x40] sm:$0xff] %vm746_vm2, %v524_v16  ;;  %787 = vst.msk [vmem:[%s1287_s29 + $0x140] sm:$0xff] %vm746_vm2, %v652_v17  ;;  %v527_v24 = vadd.f32 %v1280_v41, %v526_v22  ;;  %v655_v25 = vadd.f32 %v1280_v41, %v654_v23 }
 0x109   : > { %758 = vst.msk [vmem:[%s1287_s29 + $0x58] sm:$0xff] %vm746_vm2, %v535_v20  ;;  %790 = vst.msk [vmem:[%s1287_s29 + $0x158] sm:$0xff] %vm746_vm2, %v663_v21 }
 0x10a   : > { %756 = vst.msk [vmem:[%s1287_s29 + $0x48] sm:$0xff] %vm746_vm2, %v527_v24  ;;  %788 = vst.msk [vmem:[%s1287_s29 + $0x148] sm:$0xff] %vm746_vm2, %v655_v25 }
 0x10c   : > { %v1021_v26 = vpop.f32.mrb[12].mxu0  ;;  %v1053_v27 = vpop.f32.mrb[12].mxu1 }
 0x10d   : > { %v548_v28 = vadd.f32 %v1021_v26, %v1280_v41  ;;  %v676_v29 = vadd.f32 %v1053_v27, %v1280_v41  ;;  %v539_v30 = vpop.f32.mrb[13].mxu0  ;;  %v667_v31 = vpop.f32.mrb[13].mxu1 }
 0x10e   : > { %v540_v32 = vadd.f32 %v1280_v41, %v539_v30  ;;  %v668_v33 = vadd.f32 %v1280_v41, %v667_v31  ;;  %v1022_v34 = vpop.f32.mrb[14].mxu0  ;;  %v1054_v35 = vpop.f32.mrb[14].mxu1 }
 0x10f   : > { %761 = vst.msk [vmem:[%s1287_s29 + $0x70] sm:$0xff] %vm746_vm2, %v548_v28  ;;  %793 = vst.msk [vmem:[%s1287_s29 + $0x170] sm:$0xff] %vm746_vm2, %v676_v29  ;;  %v551_v36 = vadd.f32 %v1022_v34, %v1280_v41  ;;  %v679_v37 = vadd.f32 %v1054_v35, %v1280_v41  ;;  %v542_v38 = vpop.f32.mrb[15].mxu0  ;;  %v670_v39 = vpop.f32.mrb[15].mxu1 }
 0x110   : > { %759 = vst.msk [vmem:[%s1287_s29 + $0x60] sm:$0xff] %vm746_vm2, %v540_v32  ;;  %791 = vst.msk [vmem:[%s1287_s29 + $0x160] sm:$0xff] %vm746_vm2, %v668_v33  ;;  %v543_v40 = vadd.f32 %v1280_v41, %v542_v38  ;;  %v671_v42 = vadd.f32 %v1280_v41, %v670_v39 }
 0x111   : > { %762 = vst.msk [vmem:[%s1287_s29 + $0x78] sm:$0xff] %vm746_vm2, %v551_v36  ;;  %794 = vst.msk [vmem:[%s1287_s29 + $0x178] sm:$0xff] %vm746_vm2, %v679_v37 }
 0x112   : > { %760 = vst.msk [vmem:[%s1287_s29 + $0x68] sm:$0xff] %vm746_vm2, %v543_v40  ;;  %792 = vst.msk [vmem:[%s1287_s29 + $0x168] sm:$0xff] %vm746_vm2, %v671_v42 }
 0x114   : > { %v1025_v43 = vpop.f32.mrb[16].mxu0  ;;  %v1057_v44 = vpop.f32.mrb[16].mxu1 }
 0x115   : > { %v564_v45 = vadd.f32 %v1025_v43, %v1280_v41  ;;  %v692_v46 = vadd.f32 %v1057_v44, %v1280_v41  ;;  %v555_v47 = vpop.f32.mrb[17].mxu0  ;;  %v683_v48 = vpop.f32.mrb[17].mxu1 }
 0x116   : > { %v556_v49 = vadd.f32 %v1280_v41, %v555_v47  ;;  %v684_v50 = vadd.f32 %v1280_v41, %v683_v48  ;;  %v1026_v51 = vpop.f32.mrb[18].mxu0  ;;  %v1058_v52 = vpop.f32.mrb[18].mxu1 }
 0x117   : > { %765 = vst.msk [vmem:[%s1287_s29 + $0x90] sm:$0xff] %vm746_vm2, %v564_v45  ;;  %797 = vst.msk [vmem:[%s1287_s29 + $0x190] sm:$0xff] %vm746_vm2, %v692_v46  ;;  %v567_v53 = vadd.f32 %v1026_v51, %v1280_v41  ;;  %v695_v54 = vadd.f32 %v1058_v52, %v1280_v41  ;;  %v558_v55 = vpop.f32.mrb[19].mxu0  ;;  %v686_v56 = vpop.f32.mrb[19].mxu1 }
 0x118   : > { %763 = vst.msk [vmem:[%s1287_s29 + $0x80] sm:$0xff] %vm746_vm2, %v556_v49  ;;  %795 = vst.msk [vmem:[%s1287_s29 + $0x180] sm:$0xff] %vm746_vm2, %v684_v50  ;;  %v559_v57 = vadd.f32 %v1280_v41, %v558_v55  ;;  %v687_v58 = vadd.f32 %v1280_v41, %v686_v56 }
 0x119   : > { %766 = vst.msk [vmem:[%s1287_s29 + $0x98] sm:$0xff] %vm746_vm2, %v567_v53  ;;  %798 = vst.msk [vmem:[%s1287_s29 + $0x198] sm:$0xff] %vm746_vm2, %v695_v54 }
 0x11a   : > { %764 = vst.msk [vmem:[%s1287_s29 + $0x88] sm:$0xff] %vm746_vm2, %v559_v57  ;;  %796 = vst.msk [vmem:[%s1287_s29 + $0x188] sm:$0xff] %vm746_vm2, %v687_v58 }
 0x11c   : > { %v1029_v59 = vpop.f32.mrb[20].mxu0  ;;  %v1061_v60 = vpop.f32.mrb[20].mxu1 }
 0x11d   : > { %v580_v61 = vadd.f32 %v1029_v59, %v1280_v41  ;;  %v708_v62 = vadd.f32 %v1061_v60, %v1280_v41  ;;  %v571_v63 = vpop.f32.mrb[21].mxu0  ;;  %v699_v0 = vpop.f32.mrb[21].mxu1 }
 0x11e   : > { %v572_v1 = vadd.f32 %v1280_v41, %v571_v63  ;;  %v700_v2 = vadd.f32 %v1280_v41, %v699_v0  ;;  %v1030_v3 = vpop.f32.mrb[22].mxu0  ;;  %v1062_v4 = vpop.f32.mrb[22].mxu1 }
 0x11f   : > { %769 = vst.msk [vmem:[%s1287_s29 + $0xb0] sm:$0xff] %vm746_vm2, %v580_v61  ;;  %801 = vst.msk [vmem:[%s1287_s29 + $0x1b0] sm:$0xff] %vm746_vm2, %v708_v62  ;;  %v583_v5 = vadd.f32 %v1030_v3, %v1280_v41  ;;  %v711_v6 = vadd.f32 %v1062_v4, %v1280_v41  ;;  %v574_v7 = vpop.f32.mrb[23].mxu0  ;;  %v702_v8 = vpop.f32.mrb[23].mxu1 }
 0x120   : > { %767 = vst.msk [vmem:[%s1287_s29 + $0xa0] sm:$0xff] %vm746_vm2, %v572_v1  ;;  %799 = vst.msk [vmem:[%s1287_s29 + $0x1a0] sm:$0xff] %vm746_vm2, %v700_v2  ;;  %v575_v9 = vadd.f32 %v1280_v41, %v574_v7  ;;  %v703_v10 = vadd.f32 %v1280_v41, %v702_v8 }
 0x121   : > { %770 = vst.msk [vmem:[%s1287_s29 + $0xb8] sm:$0xff] %vm746_vm2, %v583_v5  ;;  %802 = vst.msk [vmem:[%s1287_s29 + $0x1b8] sm:$0xff] %vm746_vm2, %v711_v6 }
 0x122   : > { %768 = vst.msk [vmem:[%s1287_s29 + $0xa8] sm:$0xff] %vm746_vm2, %v575_v9  ;;  %800 = vst.msk [vmem:[%s1287_s29 + $0x1a8] sm:$0xff] %vm746_vm2, %v703_v10 }
 0x124   : > { %v1033_v11 = vpop.f32.mrb[24].mxu0  ;;  %v1065_v12 = vpop.f32.mrb[24].mxu1 }
 0x125   : > { %v596_v13 = vadd.f32 %v1033_v11, %v1280_v41  ;;  %v724_v14 = vadd.f32 %v1065_v12, %v1280_v41  ;;  %v587_v15 = vpop.f32.mrb[25].mxu0  ;;  %v715_v16 = vpop.f32.mrb[25].mxu1 }
 0x126   : > { %v588_v17 = vadd.f32 %v1280_v41, %v587_v15  ;;  %v716_v18 = vadd.f32 %v1280_v41, %v715_v16  ;;  %v1034_v19 = vpop.f32.mrb[26].mxu0  ;;  %v1066_v20 = vpop.f32.mrb[26].mxu1 }
 0x127   : > { %773 = vst.msk [vmem:[%s1287_s29 + $0xd0] sm:$0xff] %vm746_vm2, %v596_v13  ;;  %805 = vst.msk [vmem:[%s1287_s29 + $0x1d0] sm:$0xff] %vm746_vm2, %v724_v14  ;;  %v599_v21 = vadd.f32 %v1034_v19, %v1280_v41  ;;  %v727_v22 = vadd.f32 %v1066_v20, %v1280_v41  ;;  %v590_v23 = vpop.f32.mrb[27].mxu0  ;;  %v718_v24 = vpop.f32.mrb[27].mxu1 }
 0x128   : > { %771 = vst.msk [vmem:[%s1287_s29 + $0xc0] sm:$0xff] %vm746_vm2, %v588_v17  ;;  %803 = vst.msk [vmem:[%s1287_s29 + $0x1c0] sm:$0xff] %vm746_vm2, %v716_v18  ;;  %v591_v25 = vadd.f32 %v1280_v41, %v590_v23  ;;  %v719_v26 = vadd.f32 %v1280_v41, %v718_v24 }
 0x129   : > { %774 = vst.msk [vmem:[%s1287_s29 + $0xd8] sm:$0xff] %vm746_vm2, %v599_v21  ;;  %806 = vst.msk [vmem:[%s1287_s29 + $0x1d8] sm:$0xff] %vm746_vm2, %v727_v22 }
 0x12a   : > { %772 = vst.msk [vmem:[%s1287_s29 + $0xc8] sm:$0xff] %vm746_vm2, %v591_v25  ;;  %804 = vst.msk [vmem:[%s1287_s29 + $0x1c8] sm:$0xff] %vm746_vm2, %v719_v26 }
 0x12c   : > { %v1037_v27 = vpop.f32.mrb[28].mxu0  ;;  %v1069_v28 = vpop.f32.mrb[28].mxu1 }
 0x12d   : > { %v612_v29 = vadd.f32 %v1037_v27, %v1280_v41  ;;  %v740_v30 = vadd.f32 %v1069_v28, %v1280_v41  ;;  %v603_v31 = vpop.f32.mrb[29].mxu0  ;;  %v731_v32 = vpop.f32.mrb[29].mxu1 }
 0x12e   : > { %v604_v33 = vadd.f32 %v1280_v41, %v603_v31  ;;  %v732_v34 = vadd.f32 %v1280_v41, %v731_v32  ;;  %v1038_v35 = vpop.f32.mrb[30].mxu0  ;;  %v1070_v36 = vpop.f32.mrb[30].mxu1 }
 0x12f   : > { %777 = vst.msk [vmem:[%s1287_s29 + $0xf0] sm:$0xff] %vm746_vm2, %v612_v29  ;;  %809 = vst.msk [vmem:[%s1287_s29 + $0x1f0] sm:$0xff] %vm746_vm2, %v740_v30  ;;  %v615_v37 = vadd.f32 %v1038_v35, %v1280_v41  ;;  %v743_v38 = vadd.f32 %v1070_v36, %v1280_v41  ;;  %v606_v39 = vpop.f32.mrb[31].mxu0  ;;  %v734_v40 = vpop.f32.mrb[31].mxu1 }
 0x130   : > { %775 = vst.msk [vmem:[%s1287_s29 + $0xe0] sm:$0xff] %vm746_vm2, %v604_v33  ;;  %807 = vst.msk [vmem:[%s1287_s29 + $0x1e0] sm:$0xff] %vm746_vm2, %v732_v34  ;;  %v607_v42 = vadd.f32 %v1280_v41, %v606_v39  ;;  %v735_v43 = vadd.f32 %v1280_v41, %v734_v40 }
 0x131   : > { %778 = vst.msk [vmem:[%s1287_s29 + $0xf8] sm:$0xff] %vm746_vm2, %v615_v37  ;;  %810 = vst.msk [vmem:[%s1287_s29 + $0x1f8] sm:$0xff] %vm746_vm2, %v743_v38 }
 0x132   : > { %776 = vst.msk [vmem:[%s1287_s29 + $0xe8] sm:$0xff] %vm746_vm2, %v607_v42  ;;  %808 = vst.msk [vmem:[%s1287_s29 + $0x1e8] sm:$0xff] %vm746_vm2, %v735_v43 }
 0x133 PF: > { %s13_s14 = sadd.s32 1, %s1126_s14   ;;  %s1494_s12 = smov %s1122_s13 }
 0x134   : > { %p10_p5 = scmp.ge.s32.totalorder %s13_s14, 4   ;;  %s1495_s13 = smov %s1497_s15 }
 0x136   :  { %12 = sbr.rel (!%p10_p5) target bundleno = 2 (0x2), region = 68 }

</bundles_post_ra>
